<compile_context>
chip_gen: v7x
topology: tpu7x:2x2x1
jax: 0.10.0
libtpu: 0.0.40
codegen_flags: <defaults>
</compile_context>

<pallas_src>
import jax
import jax.numpy as jnp
from jax.experimental import pallas as pl
from jax.experimental.pallas import tpu as pltpu


def _make_kernel(H, W, Cin, Cout, stride, has_shortcut, fuse1, fuse2):
    Ho = (H - 1) // stride + 1
    Wo = (W - 1) // stride + 1

    def conv3x3(pad_ref, C, s, Hout, Wout, fuse, w_ref, b_ref):
        """3x3 conv over the zero-padded bf16 activation in pad_ref ((Hin+2, Win+2, C)).

        Stride `s` is folded along both H and W via reshape phase-selects.
        Taps are bf16 MXU matmuls accumulated in f32.  Returns (Hout*Wout, Cout) f32."""
        p = pad_ref[...]

        def tap(kh, kw):
            if s == 1:
                blk = jax.lax.slice(p, (kh, kw, 0), (kh + Hout, kw + Wout, C))
                return blk.reshape(Hout * Wout, C)
            # rows kh, kh+s, ... and cols kw, kw+s, ... via leading-dim / merged-dim
            # reshape phase-selects (no strided loads needed).
            blk = jax.lax.slice(p, (kh, kw, 0), (kh + s * Hout, kw + s * Wout, C))
            blk = blk.reshape(Hout, s, s * Wout, C)[:, 0]        # H phase-select
            return blk.reshape(Hout * Wout, s, C)[:, 0, :]       # W phase-select

        acc = jnp.zeros((Hout * Wout, Cout), jnp.float32)
        if fuse:
            # kw-direction im2col: one K = 3*C matmul per kh (fills the 256-deep
            # MXU contraction on v6e/v7x; lane-aligned because C % 128 == 0).
            for kh in range(3):
                patch = jnp.concatenate([tap(kh, 0), tap(kh, 1), tap(kh, 2)], axis=-1)
                acc = acc + jnp.dot(patch, w_ref[kh],
                                    preferred_element_type=jnp.float32)
        else:
            for kh in range(3):
                for kw in range(3):
                    acc = acc + jnp.dot(tap(kh, kw), w_ref[kh * 3 + kw],
                                        preferred_element_type=jnp.float32)
        return acc + b_ref[...]

    def body(x_ref, s1_ref, t1_ref, w1_ref, b1_ref,
             s2_ref, t2_ref, w2_ref, b2_ref, ws_ref, bs_ref,
             o_ref, pad1, pad2):
        # Zero only the 1-pixel border strips every step (O((H+W)*C) work) so the
        # batch axis has no persistent-scratch dependence and can be
        # megacore-parallel on v7x.
        zr1 = jnp.zeros((1, W + 2, Cin), jnp.bfloat16)
        zc1 = jnp.zeros((H + 2, 1, Cin), jnp.bfloat16)
        pad1[0:1, :, :] = zr1
        pad1[H + 1:H + 2, :, :] = zr1
        pad1[:, 0:1, :] = zc1
        pad1[:, W + 1:W + 2, :] = zc1
        zr2 = jnp.zeros((1, W + 2, Cout), jnp.bfloat16)
        zc2 = jnp.zeros((H + 2, 1, Cout), jnp.bfloat16)
        pad2[0:1, :, :] = zr2
        pad2[H + 1:H + 2, :, :] = zr2
        pad2[:, 0:1, :] = zc2
        pad2[:, W + 1:W + 2, :] = zc2

        x = x_ref[0]                                              # (H, W, Cin) f32

        # ---- BN1 (folded, f32) + ReLU; cast once to bf16 into the padded scratch ----
        a1 = jnp.maximum(x * s1_ref[...] + t1_ref[...], 0.0)
        pad1[1:H + 1, 1:W + 1, :] = a1.astype(jnp.bfloat16)

        # ---- conv1: 3x3, stride 1, pad 1, bias ----
        out1 = conv3x3(pad1, Cin, 1, H, W, fuse1, w1_ref, b1_ref)     # (H*W, Cout) f32

        # ---- BN2 (folded) + ReLU ; dropout = identity in eval mode ----
        a2 = jnp.maximum(out1.reshape(H, W, Cout) * s2_ref[...] + t2_ref[...], 0.0)
        pad2[1:H + 1, 1:W + 1, :] = a2.astype(jnp.bfloat16)

        # ---- conv2: 3x3, stride folded along H and W, pad 1, bias ----
        out2 = conv3x3(pad2, Cout, stride, Ho, Wo, fuse2, w2_ref, b2_ref)  # (Ho*Wo, Cout)

        # ---- shortcut (same H/W subsample as conv2) ----
        if stride == 1:
            xs = x.reshape(H * W, Cin)
        else:
            xs = x.reshape(Ho, stride, W, Cin)[:, 0]                    # H phase-select
            xs = xs.reshape(Ho * Wo, stride, Cin)[:, 0, :]              # W phase-select
        if has_shortcut:
            sc = jnp.dot(xs.astype(jnp.bfloat16), ws_ref[...],
                         preferred_element_type=jnp.float32) + bs_ref[...]
        else:
            sc = xs                            # identity: Cin == Cout, stride == 1

        o_ref[0] = (out2 + sc).reshape(Ho, Wo, Cout)

    if has_shortcut:
        return body

    def body_identity(x_ref, s1_ref, t1_ref, w1_ref, b1_ref,
                      s2_ref, t2_ref, w2_ref, b2_ref, o_ref, pad1, pad2):
        return body(x_ref, s1_ref, t1_ref, w1_ref, b1_ref,
                    s2_ref, t2_ref, w2_ref, b2_ref, None, None, o_ref, pad1, pad2)

    return body_identity


def _fold_bn(gamma, beta, mean, var, eps=1e-5):
    scale = gamma / jnp.sqrt(var + eps)
    shift = beta - mean * scale
    return scale, shift


def wide_basic_forward(x_nchw, params, stride=1):
    """Forward pass of wide_basic. (N, Cin, H, W) f32 -> (N, Cout, Ho, Wo)."""
    x = jnp.transpose(x_nchw, (0, 2, 3, 1)).astype(jnp.float32)   # NCHW -> NHWC
    N, H, W, Cin = x.shape
    Cout = params["w1"].shape[-1]
    assert H % stride == 0 and W % stride == 0, \
        "in-kernel stride folding assumes H % stride == 0 and W % stride == 0"
    Ho, Wo = H // stride, W // stride
    has_shortcut = params.get("ws") is not None

    # kw-direction im2col fusion only when the channel (lane) dim is 128-aligned.
    fuse1 = (Cin % 128 == 0)
    fuse2 = (Cout % 128 == 0)

    s1, t1 = _fold_bn(params["bn1_gamma"], params["bn1_beta"],
                      params["bn1_mean"], params["bn1_var"])
    s2, t2 = _fold_bn(params["bn2_gamma"], params["bn2_beta"],
                      params["bn2_mean"], params["bn2_var"])

    # bf16 weights (f32 accumulation happens inside the kernel).
    w1_full = params["w1"].astype(jnp.bfloat16)                   # (3,3,Cin,Cout)
    w2_full = params["w2"].astype(jnp.bfloat16)                   # (3,3,Cout,Cout)
    w1 = (w1_full.reshape(3, 3 * Cin, Cout) if fuse1
          else w1_full.reshape(9, Cin, Cout))
    w2 = (w2_full.reshape(3, 3 * Cout, Cout) if fuse2
          else w2_full.reshape(9, Cout, Cout))
    b1 = params["b1"].reshape(1, Cout).astype(jnp.float32)
    b2 = params["b2"].reshape(1, Cout).astype(jnp.float32)
    s1 = s1.reshape(1, 1, Cin).astype(jnp.float32)
    t1 = t1.reshape(1, 1, Cin).astype(jnp.float32)
    s2 = s2.reshape(1, 1, Cout).astype(jnp.float32)
    t2 = t2.reshape(1, 1, Cout).astype(jnp.float32)

    def full(shape):
        return pl.BlockSpec(shape, lambda b, _n=len(shape): (0,) * _n)

    inputs = [x, s1, t1, w1, b1, s2, t2, w2, b2]
    in_specs = [
        pl.BlockSpec((1, H, W, Cin), lambda b: (b, 0, 0, 0)),      # one image per step
        full(s1.shape), full(t1.shape),                             # bn1 scale / shift
        full(w1.shape), full(b1.shape),                             # conv1 weight / bias
        full(s2.shape), full(t2.shape),                             # bn2 scale / shift
        full(w2.shape), full(b2.shape),                             # conv2 weight / bias
    ]

    flops_per_img = (2 * H * W * 9 * Cin * Cout +                   # conv1
                     2 * Ho * Wo * 9 * Cout * Cout)                 # conv2 (W folded)
    weight_bytes = int(w1.size + w2.size) * 2
    const_bytes = int(b1.size + b2.size + s1.size + t1.size + s2.size + t2.size) * 4

    if has_shortcut:
        ws = params["ws"].astype(jnp.bfloat16)                      # (Cin, Cout)
        bs = params["bs"].reshape(1, Cout).astype(jnp.float32)
        inputs += [ws, bs]
        in_specs += [full(ws.shape), full(bs.shape)]
        flops_per_img += 2 * Ho * Wo * Cin * Cout
        weight_bytes += int(ws.size) * 2
        const_bytes += int(bs.size) * 4

    # VMEM budget: bf16 padded scratches + double-buffered x/out blocks +
    # (default double-buffered) constants, plus headroom.  Avoid hard-coding the
    # whole of v7x's 64 MiB.
    pad_bytes = (H + 2) * (W + 2) * (Cin + Cout) * 2
    io_bytes = 2 * (H * W * Cin * 4 + Ho * Wo * Cout * 4)
    vmem_need = pad_bytes + io_bytes + 2 * (weight_bytes + const_bytes)
    vmem_limit = int(min(112 * 1024 * 1024, max(vmem_need + (8 << 20), 32 << 20)))

    bytes_accessed = (N * (H * W * Cin * 4 + Ho * Wo * Cout * 4)
                      + weight_bytes + const_bytes)

    kernel = _make_kernel(H, W, Cin, Cout, stride, has_shortcut, fuse1, fuse2)

    out = pl.pallas_call(
        kernel,
        out_shape=jax.ShapeDtypeStruct((N, Ho, Wo, Cout), jnp.float32),
        grid=(N,),
        in_specs=in_specs,
        out_specs=pl.BlockSpec((1, Ho, Wo, Cout), lambda b: (b, 0, 0, 0)),
        scratch_shapes=[
            pltpu.VMEM((H + 2, W + 2, Cin), jnp.bfloat16),           # padded relu(bn1(x))
            pltpu.VMEM((H + 2, W + 2, Cout), jnp.bfloat16),          # padded relu(bn2(conv1))
        ],
        compiler_params=pltpu.CompilerParams(
            # Per-step border zeroing -> no cross-step scratch dependence, so the
            # batch axis can be split across v7x's two TensorCores.
            dimension_semantics=("parallel",),
            vmem_limit_bytes=vmem_limit,
        ),
        cost_estimate=pl.CostEstimate(
            flops=int(N * flops_per_img),
            transcendentals=0,
            bytes_accessed=int(bytes_accessed),
        ),
    )(*inputs)

    return jnp.transpose(out, (0, 3, 1, 2))                          # NHWC -> NCHW


# ----------------------- pure-JAX reference (for verification) -----------------------
def reference(x_nchw, params, stride=1):
    x = jnp.transpose(x_nchw, (0, 2, 3, 1)).astype(jnp.float32)
    dn = ("NHWC", "HWIO", "NHWC")
    hi = jax.lax.Precision.HIGHEST

    def bn_relu(v, g, b, m, var, eps=1e-5):
        return jnp.maximum((v - m) / jnp.sqrt(var + eps) * g + b, 0.0)

    a1 = bn_relu(x, params["bn1_gamma"], params["bn1_beta"],
                 params["bn1_mean"], params["bn1_var"])
    o1 = jax.lax.conv_general_dilated(a1, params["w1"], (1, 1), ((1, 1), (1, 1)),
                                      dimension_numbers=dn, precision=hi) + params["b1"]
    a2 = bn_relu(o1, params["bn2_gamma"], params["bn2_beta"],
                 params["bn2_mean"], params["bn2_var"])
    o2 = jax.lax.conv_general_dilated(a2, params["w2"], (stride, stride), ((1, 1), (1, 1)),
                                      dimension_numbers=dn, precision=hi) + params["b2"]
    if params.get("ws") is not None:
        Cin, Cout = params["ws"].shape
        w = params["ws"].reshape(1, 1, Cin, Cout)
        sc = jax.lax.conv_general_dilated(x, w, (stride, stride), ((0, 0), (0, 0)),
                                          dimension_numbers=dn, precision=hi) + params["bs"]
    else:
        sc = x[:, ::stride, ::stride, :]
    return jnp.transpose(o2 + sc, (0, 3, 1, 2))


def make_params(key, in_planes, planes, shortcut):
    ks = jax.random.split(key, 14)
    p = {
        "bn1_gamma": jax.random.uniform(ks[0], (in_planes,), minval=0.8, maxval=1.2),
        "bn1_beta": 0.1 * jax.random.normal(ks[1], (in_planes,)),
        "bn1_mean": 0.1 * jax.random.normal(ks[2], (in_planes,)),
        "bn1_var": jax.random.uniform(ks[3], (in_planes,), minval=0.5, maxval=1.5),
        "w1": 0.1 * jax.random.normal(ks[4], (3, 3, in_planes, planes)),
        "b1": 0.05 * jax.random.normal(ks[5], (planes,)),
        "bn2_gamma": jax.random.uniform(ks[6], (planes,), minval=0.8, maxval=1.2),
        "bn2_beta": 0.1 * jax.random.normal(ks[7], (planes,)),
        "bn2_mean": 0.1 * jax.random.normal(ks[8], (planes,)),
        "bn2_var": jax.random.uniform(ks[9], (planes,), minval=0.5, maxval=1.5),
        "w2": 0.1 * jax.random.normal(ks[10], (3, 3, planes, planes)),
        "b2": 0.05 * jax.random.normal(ks[11], (planes,)),
        "ws": None,
        "bs": None,
    }
    if shortcut:
        p["ws"] = 0.1 * jax.random.normal(ks[12], (in_planes, planes))
        p["bs"] = 0.05 * jax.random.normal(ks[13], (planes,))
    return p


if __name__ == "__main__":
    key = jax.random.PRNGKey(0)
    k_x1, k_p1, k_x2, k_p2, k_x3, k_p3 = jax.random.split(key, 6)

    # Case 1: in_planes != planes, stride = 2  -> 1x1 strided conv shortcut
    # (exercises the in-kernel H+W stride folding).
    N, Cin, H, W, planes, stride = 2, 4, 16, 16, 8, 2
    x = jax.random.normal(k_x1, (N, Cin, H, W), jnp.float32)
    params = make_params(k_p1, Cin, planes, shortcut=True)
    out = jax.block_until_ready(wide_basic_forward(x, params, stride=stride))
    assert out.shape == (N, planes, H // stride, W // stride)
    ref = reference(x, params, stride=stride)
    assert bool(jnp.allclose(out, ref, atol=3e-2, rtol=3e-2)), "mismatch (shortcut conv case)"

    # Case 2: in_planes == planes, stride = 1  -> identity shortcut
    x2 = jax.random.normal(k_x2, (N, planes, H, W), jnp.float32)
    params_id = make_params(k_p2, planes, planes, shortcut=False)
    out2 = jax.block_until_ready(wide_basic_forward(x2, params_id, stride=1))
    assert out2.shape == (N, planes, H, W)
    ref2 = reference(x2, params_id, stride=1)
    assert bool(jnp.allclose(out2, ref2, atol=3e-2, rtol=3e-2)), "mismatch (identity shortcut case)"

    # Case 3: lane-aligned width (C = 128) -> exercises the kw-fused im2col path.
    C3, H3 = 128, 8
    x3 = jax.random.normal(k_x3, (1, C3, H3, H3), jnp.float32)
    params3 = make_params(k_p3, C3, C3, shortcut=False)
    out3 = jax.block_until_ready(wide_basic_forward(x3, params3, stride=1))
    assert out3.shape == (1, C3, H3, H3)
    ref3 = reference(x3, params3, stride=1)
    rel = jnp.sqrt(jnp.sum((out3 - ref3) ** 2)) / jnp.sqrt(jnp.sum(ref3 ** 2))
    assert bool(rel < 3e-2), f"mismatch (fused-kw case), rel={rel}"

    print("KERNEL_OK")
</pallas_src>

<mosaic_0001>
module attributes {stable_mosaic.version = 11 : i64} {
  func.func @body(%arg0: i32, %arg1: memref<1x16x16x4xf32, #tpu.memory_space<vmem>>, %arg2: memref<1x1x4xf32, #tpu.memory_space<vmem>>, %arg3: memref<1x1x4xf32, #tpu.memory_space<vmem>>, %arg4: memref<9x4x8xbf16, #tpu.memory_space<vmem>>, %arg5: memref<1x8xf32, #tpu.memory_space<vmem>>, %arg6: memref<1x1x8xf32, #tpu.memory_space<vmem>>, %arg7: memref<1x1x8xf32, #tpu.memory_space<vmem>>, %arg8: memref<9x8x8xbf16, #tpu.memory_space<vmem>>, %arg9: memref<1x8xf32, #tpu.memory_space<vmem>>, %arg10: memref<4x8xbf16, #tpu.memory_space<vmem>>, %arg11: memref<1x8xf32, #tpu.memory_space<vmem>>, %arg12: memref<1x8x8x8xf32, #tpu.memory_space<vmem>>, %arg13: memref<18x18x4xbf16, #tpu.memory_space<vmem>>, %arg14: memref<18x18x8xbf16, #tpu.memory_space<vmem>>) attributes {dimension_semantics = [#tpu.dimension_semantics<parallel>], iteration_bounds = array<i64: 2>, scalar_prefetch = 0 : i64, scratch_operands = 2 : i64, tpu.core_type = #tpu.core_type<tc>, window_params = [{transform_indices = @transform_0, window_bounds = array<i64: 1, 16, 16, 4>}, {pipeline_mode = #tpu.pipeline_mode<synchronous>, transform_indices = @transform_1, window_bounds = array<i64: 1, 1, 4>}, {pipeline_mode = #tpu.pipeline_mode<synchronous>, transform_indices = @transform_2, window_bounds = array<i64: 1, 1, 4>}, {pipeline_mode = #tpu.pipeline_mode<synchronous>, transform_indices = @transform_3, window_bounds = array<i64: 9, 4, 8>}, {pipeline_mode = #tpu.pipeline_mode<synchronous>, transform_indices = @transform_4, window_bounds = array<i64: 1, 8>}, {pipeline_mode = #tpu.pipeline_mode<synchronous>, transform_indices = @transform_5, window_bounds = array<i64: 1, 1, 8>}, {pipeline_mode = #tpu.pipeline_mode<synchronous>, transform_indices = @transform_6, window_bounds = array<i64: 1, 1, 8>}, {pipeline_mode = #tpu.pipeline_mode<synchronous>, transform_indices = @transform_7, window_bounds = array<i64: 9, 8, 8>}, {pipeline_mode = #tpu.pipeline_mode<synchronous>, transform_indices = @transform_8, window_bounds = array<i64: 1, 8>}, {pipeline_mode = #tpu.pipeline_mode<synchronous>, transform_indices = @transform_9, window_bounds = array<i64: 4, 8>}, {pipeline_mode = #tpu.pipeline_mode<synchronous>, transform_indices = @transform_10, window_bounds = array<i64: 1, 8>}, {transform_indices = @transform_11, window_bounds = array<i64: 1, 8, 8, 8>}]} {
    %cst = arith.constant 0.000000e+00 : bf16
    %0 = vector.broadcast %cst : bf16 to vector<1x18x4xbf16>
    %cst_0 = arith.constant 0.000000e+00 : bf16
    %1 = vector.broadcast %cst_0 : bf16 to vector<18x1x4xbf16>
    %c0 = arith.constant 0 : index
    %c0_1 = arith.constant 0 : index
    %c0_2 = arith.constant 0 : index
    %2 = vector.load %arg13[%c0, %c0_1, %c0_2] : memref<18x18x4xbf16, #tpu.memory_space<vmem>>, vector<1x18x4xbf16>
    tpu.vector_store %arg13[%c0, %c0_1, %c0_2], %0 {strides = array<i32>} : memref<18x18x4xbf16, #tpu.memory_space<vmem>>, vector<1x18x4xbf16>,
    %c17 = arith.constant 17 : index
    %c0_3 = arith.constant 0 : index
    %c0_4 = arith.constant 0 : index
    %3 = vector.load %arg13[%c17, %c0_3, %c0_4] : memref<18x18x4xbf16, #tpu.memory_space<vmem>>, vector<1x18x4xbf16>
    tpu.vector_store %arg13[%c17, %c0_3, %c0_4], %0 {strides = array<i32>} : memref<18x18x4xbf16, #tpu.memory_space<vmem>>, vector<1x18x4xbf16>,
    %c0_5 = arith.constant 0 : index
    %c0_6 = arith.constant 0 : index
    %c0_7 = arith.constant 0 : index
    %4 = vector.load %arg13[%c0_5, %c0_6, %c0_7] : memref<18x18x4xbf16, #tpu.memory_space<vmem>>, vector<18x1x4xbf16>
    tpu.vector_store %arg13[%c0_5, %c0_6, %c0_7], %1 {strides = array<i32>} : memref<18x18x4xbf16, #tpu.memory_space<vmem>>, vector<18x1x4xbf16>,
    %c0_8 = arith.constant 0 : index
    %c17_9 = arith.constant 17 : index
    %c0_10 = arith.constant 0 : index
    %5 = vector.load %arg13[%c0_8, %c17_9, %c0_10] : memref<18x18x4xbf16, #tpu.memory_space<vmem>>, vector<18x1x4xbf16>
    tpu.vector_store %arg13[%c0_8, %c17_9, %c0_10], %1 {strides = array<i32>} : memref<18x18x4xbf16, #tpu.memory_space<vmem>>, vector<18x1x4xbf16>,
    %cst_11 = arith.constant 0.000000e+00 : bf16
    %6 = vector.broadcast %cst_11 : bf16 to vector<1x18x8xbf16>
    %cst_12 = arith.constant 0.000000e+00 : bf16
    %7 = vector.broadcast %cst_12 : bf16 to vector<18x1x8xbf16>
    %c0_13 = arith.constant 0 : index
    %c0_14 = arith.constant 0 : index
    %c0_15 = arith.constant 0 : index
    %8 = vector.load %arg14[%c0_13, %c0_14, %c0_15] : memref<18x18x8xbf16, #tpu.memory_space<vmem>>, vector<1x18x8xbf16>
    tpu.vector_store %arg14[%c0_13, %c0_14, %c0_15], %6 {strides = array<i32>} : memref<18x18x8xbf16, #tpu.memory_space<vmem>>, vector<1x18x8xbf16>,
    %c17_16 = arith.constant 17 : index
    %c0_17 = arith.constant 0 : index
    %c0_18 = arith.constant 0 : index
    %9 = vector.load %arg14[%c17_16, %c0_17, %c0_18] : memref<18x18x8xbf16, #tpu.memory_space<vmem>>, vector<1x18x8xbf16>
    tpu.vector_store %arg14[%c17_16, %c0_17, %c0_18], %6 {strides = array<i32>} : memref<18x18x8xbf16, #tpu.memory_space<vmem>>, vector<1x18x8xbf16>,
    %c0_19 = arith.constant 0 : index
    %c0_20 = arith.constant 0 : index
    %c0_21 = arith.constant 0 : index
    %10 = vector.load %arg14[%c0_19, %c0_20, %c0_21] : memref<18x18x8xbf16, #tpu.memory_space<vmem>>, vector<18x1x8xbf16>
    tpu.vector_store %arg14[%c0_19, %c0_20, %c0_21], %7 {strides = array<i32>} : memref<18x18x8xbf16, #tpu.memory_space<vmem>>, vector<18x1x8xbf16>,
    %c0_22 = arith.constant 0 : index
    %c17_23 = arith.constant 17 : index
    %c0_24 = arith.constant 0 : index
    %11 = vector.load %arg14[%c0_22, %c17_23, %c0_24] : memref<18x18x8xbf16, #tpu.memory_space<vmem>>, vector<18x1x8xbf16>
    tpu.vector_store %arg14[%c0_22, %c17_23, %c0_24], %7 {strides = array<i32>} : memref<18x18x8xbf16, #tpu.memory_space<vmem>>, vector<18x1x8xbf16>,
    %c0_25 = arith.constant 0 : index
    %c0_26 = arith.constant 0 : index
    %c0_27 = arith.constant 0 : index
    %c0_28 = arith.constant 0 : index
    %12 = vector.load %arg1[%c0_25, %c0_26, %c0_27, %c0_28] : memref<1x16x16x4xf32, #tpu.memory_space<vmem>>, vector<1x16x16x4xf32>
    %13 = vector.shape_cast %12 : vector<1x16x16x4xf32> to vector<16x16x4xf32>
    %c0_29 = arith.constant 0 : index
    %c0_30 = arith.constant 0 : index
    %c0_31 = arith.constant 0 : index
    %14 = vector.load %arg2[%c0_29, %c0_30, %c0_31] : memref<1x1x4xf32, #tpu.memory_space<vmem>>, vector<1x1x4xf32>
    %15 = vector.broadcast %14 : vector<1x1x4xf32> to vector<16x16x4xf32>
    %16 = arith.mulf %13, %15 : vector<16x16x4xf32>
    %c0_32 = arith.constant 0 : index
    %c0_33 = arith.constant 0 : index
    %c0_34 = arith.constant 0 : index
    %17 = vector.load %arg3[%c0_32, %c0_33, %c0_34] : memref<1x1x4xf32, #tpu.memory_space<vmem>>, vector<1x1x4xf32>
    %18 = vector.broadcast %17 : vector<1x1x4xf32> to vector<16x16x4xf32>
    %19 = arith.addf %16, %18 : vector<16x16x4xf32>
    %cst_35 = arith.constant 0.000000e+00 : f32
    %20 = vector.broadcast %cst_35 : f32 to vector<16x16x4xf32>
    %21 = arith.maximumf %19, %20 : vector<16x16x4xf32>
    %22 = arith.truncf %21 : vector<16x16x4xf32> to vector<16x16x4xbf16>
    %c1 = arith.constant 1 : index
    %c1_36 = arith.constant 1 : index
    %c0_37 = arith.constant 0 : index
    %23 = vector.load %arg13[%c1, %c1_36, %c0_37] : memref<18x18x4xbf16, #tpu.memory_space<vmem>>, vector<16x16x4xbf16>
    tpu.vector_store %arg13[%c1, %c1_36, %c0_37], %22 {strides = array<i32>} : memref<18x18x4xbf16, #tpu.memory_space<vmem>>, vector<16x16x4xbf16>,
    %c0_38 = arith.constant 0 : index
    %c0_39 = arith.constant 0 : index
    %c0_40 = arith.constant 0 : index
    %24 = vector.load %arg13[%c0_38, %c0_39, %c0_40] : memref<18x18x4xbf16, #tpu.memory_space<vmem>>, vector<18x18x4xbf16>
    %cst_41 = arith.constant 0.000000e+00 : f32
    %25 = vector.broadcast %cst_41 : f32 to vector<256x8xf32>
    %26 = vector.extract_strided_slice %24 {offsets = [0, 0, 0], sizes = [16, 16, 4], strides = [1, 1, 1]} : vector<18x18x4xbf16> to vector<16x16x4xbf16>
    %27 = vector.shape_cast %26 : vector<16x16x4xbf16> to vector<256x4xbf16>
    %c0_42 = arith.constant 0 : index
    %c0_43 = arith.constant 0 : index
    %c0_44 = arith.constant 0 : index
    %28 = vector.load %arg4[%c0_42, %c0_43, %c0_44] : memref<9x4x8xbf16, #tpu.memory_space<vmem>>, vector<1x4x8xbf16>
    %29 = vector.shape_cast %28 : vector<1x4x8xbf16> to vector<4x8xbf16>
    %cst_45 = arith.constant dense<0.000000e+00> : vector<256x8xf32>
    %30 = tpu.matmul %27, %29, %cst_45 {dimension_numbers = #tpu.dot_dimension_numbers<[1], [0], [0], [1], [0, 0, 1, 1], [], []>} : vector<256x4xbf16>, vector<4x8xbf16>, vector<256x8xf32> -> vector<256x8xf32>
    %31 = arith.addf %25, %30 : vector<256x8xf32>
    %32 = vector.extract_strided_slice %24 {offsets = [0, 1, 0], sizes = [16, 16, 4], strides = [1, 1, 1]} : vector<18x18x4xbf16> to vector<16x16x4xbf16>
    %33 = vector.shape_cast %32 : vector<16x16x4xbf16> to vector<256x4xbf16>
    %c1_46 = arith.constant 1 : index
    %c0_47 = arith.constant 0 : index
    %c0_48 = arith.constant 0 : index
    %34 = vector.load %arg4[%c1_46, %c0_47, %c0_48] : memref<9x4x8xbf16, #tpu.memory_space<vmem>>, vector<1x4x8xbf16>
    %35 = vector.shape_cast %34 : vector<1x4x8xbf16> to vector<4x8xbf16>
    %cst_49 = arith.constant dense<0.000000e+00> : vector<256x8xf32>
    %36 = tpu.matmul %33, %35, %cst_49 {dimension_numbers = #tpu.dot_dimension_numbers<[1], [0], [0], [1], [0, 0, 1, 1], [], []>} : vector<256x4xbf16>, vector<4x8xbf16>, vector<256x8xf32> -> vector<256x8xf32>
    %37 = arith.addf %31, %36 : vector<256x8xf32>
    %38 = vector.extract_strided_slice %24 {offsets = [0, 2, 0], sizes = [16, 16, 4], strides = [1, 1, 1]} : vector<18x18x4xbf16> to vector<16x16x4xbf16>
    %39 = vector.shape_cast %38 : vector<16x16x4xbf16> to vector<256x4xbf16>
    %c2 = arith.constant 2 : index
    %c0_50 = arith.constant 0 : index
    %c0_51 = arith.constant 0 : index
    %40 = vector.load %arg4[%c2, %c0_50, %c0_51] : memref<9x4x8xbf16, #tpu.memory_space<vmem>>, vector<1x4x8xbf16>
    %41 = vector.shape_cast %40 : vector<1x4x8xbf16> to vector<4x8xbf16>
    %cst_52 = arith.constant dense<0.000000e+00> : vector<256x8xf32>
    %42 = tpu.matmul %39, %41, %cst_52 {dimension_numbers = #tpu.dot_dimension_numbers<[1], [0], [0], [1], [0, 0, 1, 1], [], []>} : vector<256x4xbf16>, vector<4x8xbf16>, vector<256x8xf32> -> vector<256x8xf32>
    %43 = arith.addf %37, %42 : vector<256x8xf32>
    %44 = vector.extract_strided_slice %24 {offsets = [1, 0, 0], sizes = [16, 16, 4], strides = [1, 1, 1]} : vector<18x18x4xbf16> to vector<16x16x4xbf16>
    %45 = vector.shape_cast %44 : vector<16x16x4xbf16> to vector<256x4xbf16>
    %c3 = arith.constant 3 : index
    %c0_53 = arith.constant 0 : index
    %c0_54 = arith.constant 0 : index
    %46 = vector.load %arg4[%c3, %c0_53, %c0_54] : memref<9x4x8xbf16, #tpu.memory_space<vmem>>, vector<1x4x8xbf16>
    %47 = vector.shape_cast %46 : vector<1x4x8xbf16> to vector<4x8xbf16>
    %cst_55 = arith.constant dense<0.000000e+00> : vector<256x8xf32>
    %48 = tpu.matmul %45, %47, %cst_55 {dimension_numbers = #tpu.dot_dimension_numbers<[1], [0], [0], [1], [0, 0, 1, 1], [], []>} : vector<256x4xbf16>, vector<4x8xbf16>, vector<256x8xf32> -> vector<256x8xf32>
    %49 = arith.addf %43, %48 : vector<256x8xf32>
    %50 = vector.extract_strided_slice %24 {offsets = [1, 1, 0], sizes = [16, 16, 4], strides = [1, 1, 1]} : vector<18x18x4xbf16> to vector<16x16x4xbf16>
    %51 = vector.shape_cast %50 : vector<16x16x4xbf16> to vector<256x4xbf16>
    %c4 = arith.constant 4 : index
    %c0_56 = arith.constant 0 : index
    %c0_57 = arith.constant 0 : index
    %52 = vector.load %arg4[%c4, %c0_56, %c0_57] : memref<9x4x8xbf16, #tpu.memory_space<vmem>>, vector<1x4x8xbf16>
    %53 = vector.shape_cast %52 : vector<1x4x8xbf16> to vector<4x8xbf16>
    %cst_58 = arith.constant dense<0.000000e+00> : vector<256x8xf32>
    %54 = tpu.matmul %51, %53, %cst_58 {dimension_numbers = #tpu.dot_dimension_numbers<[1], [0], [0], [1], [0, 0, 1, 1], [], []>} : vector<256x4xbf16>, vector<4x8xbf16>, vector<256x8xf32> -> vector<256x8xf32>
    %55 = arith.addf %49, %54 : vector<256x8xf32>
    %56 = vector.extract_strided_slice %24 {offsets = [1, 2, 0], sizes = [16, 16, 4], strides = [1, 1, 1]} : vector<18x18x4xbf16> to vector<16x16x4xbf16>
    %57 = vector.shape_cast %56 : vector<16x16x4xbf16> to vector<256x4xbf16>
    %c5 = arith.constant 5 : index
    %c0_59 = arith.constant 0 : index
    %c0_60 = arith.constant 0 : index
    %58 = vector.load %arg4[%c5, %c0_59, %c0_60] : memref<9x4x8xbf16, #tpu.memory_space<vmem>>, vector<1x4x8xbf16>
    %59 = vector.shape_cast %58 : vector<1x4x8xbf16> to vector<4x8xbf16>
    %cst_61 = arith.constant dense<0.000000e+00> : vector<256x8xf32>
    %60 = tpu.matmul %57, %59, %cst_61 {dimension_numbers = #tpu.dot_dimension_numbers<[1], [0], [0], [1], [0, 0, 1, 1], [], []>} : vector<256x4xbf16>, vector<4x8xbf16>, vector<256x8xf32> -> vector<256x8xf32>
    %61 = arith.addf %55, %60 : vector<256x8xf32>
    %62 = vector.extract_strided_slice %24 {offsets = [2, 0, 0], sizes = [16, 16, 4], strides = [1, 1, 1]} : vector<18x18x4xbf16> to vector<16x16x4xbf16>
    %63 = vector.shape_cast %62 : vector<16x16x4xbf16> to vector<256x4xbf16>
    %c6 = arith.constant 6 : index
    %c0_62 = arith.constant 0 : index
    %c0_63 = arith.constant 0 : index
    %64 = vector.load %arg4[%c6, %c0_62, %c0_63] : memref<9x4x8xbf16, #tpu.memory_space<vmem>>, vector<1x4x8xbf16>
    %65 = vector.shape_cast %64 : vector<1x4x8xbf16> to vector<4x8xbf16>
    %cst_64 = arith.constant dense<0.000000e+00> : vector<256x8xf32>
    %66 = tpu.matmul %63, %65, %cst_64 {dimension_numbers = #tpu.dot_dimension_numbers<[1], [0], [0], [1], [0, 0, 1, 1], [], []>} : vector<256x4xbf16>, vector<4x8xbf16>, vector<256x8xf32> -> vector<256x8xf32>
    %67 = arith.addf %61, %66 : vector<256x8xf32>
    %68 = vector.extract_strided_slice %24 {offsets = [2, 1, 0], sizes = [16, 16, 4], strides = [1, 1, 1]} : vector<18x18x4xbf16> to vector<16x16x4xbf16>
    %69 = vector.shape_cast %68 : vector<16x16x4xbf16> to vector<256x4xbf16>
    %c7 = arith.constant 7 : index
    %c0_65 = arith.constant 0 : index
    %c0_66 = arith.constant 0 : index
    %70 = vector.load %arg4[%c7, %c0_65, %c0_66] : memref<9x4x8xbf16, #tpu.memory_space<vmem>>, vector<1x4x8xbf16>
    %71 = vector.shape_cast %70 : vector<1x4x8xbf16> to vector<4x8xbf16>
    %cst_67 = arith.constant dense<0.000000e+00> : vector<256x8xf32>
    %72 = tpu.matmul %69, %71, %cst_67 {dimension_numbers = #tpu.dot_dimension_numbers<[1], [0], [0], [1], [0, 0, 1, 1], [], []>} : vector<256x4xbf16>, vector<4x8xbf16>, vector<256x8xf32> -> vector<256x8xf32>
    %73 = arith.addf %67, %72 : vector<256x8xf32>
    %74 = vector.extract_strided_slice %24 {offsets = [2, 2, 0], sizes = [16, 16, 4], strides = [1, 1, 1]} : vector<18x18x4xbf16> to vector<16x16x4xbf16>
    %75 = vector.shape_cast %74 : vector<16x16x4xbf16> to vector<256x4xbf16>
    %c8 = arith.constant 8 : index
    %c0_68 = arith.constant 0 : index
    %c0_69 = arith.constant 0 : index
    %76 = vector.load %arg4[%c8, %c0_68, %c0_69] : memref<9x4x8xbf16, #tpu.memory_space<vmem>>, vector<1x4x8xbf16>
    %77 = vector.shape_cast %76 : vector<1x4x8xbf16> to vector<4x8xbf16>
    %cst_70 = arith.constant dense<0.000000e+00> : vector<256x8xf32>
    %78 = tpu.matmul %75, %77, %cst_70 {dimension_numbers = #tpu.dot_dimension_numbers<[1], [0], [0], [1], [0, 0, 1, 1], [], []>} : vector<256x4xbf16>, vector<4x8xbf16>, vector<256x8xf32> -> vector<256x8xf32>
    %79 = arith.addf %73, %78 : vector<256x8xf32>
    %c0_71 = arith.constant 0 : index
    %c0_72 = arith.constant 0 : index
    %80 = vector.load %arg5[%c0_71, %c0_72] : memref<1x8xf32, #tpu.memory_space<vmem>>, vector<1x8xf32>
    %81 = vector.broadcast %80 : vector<1x8xf32> to vector<256x8xf32>
    %82 = arith.addf %79, %81 : vector<256x8xf32>
    %83 = vector.shape_cast %82 : vector<256x8xf32> to vector<16x16x8xf32>
    %c0_73 = arith.constant 0 : index
    %c0_74 = arith.constant 0 : index
    %c0_75 = arith.constant 0 : index
    %84 = vector.load %arg6[%c0_73, %c0_74, %c0_75] : memref<1x1x8xf32, #tpu.memory_space<vmem>>, vector<1x1x8xf32>
    %85 = vector.broadcast %84 : vector<1x1x8xf32> to vector<16x16x8xf32>
    %86 = arith.mulf %83, %85 : vector<16x16x8xf32>
    %c0_76 = arith.constant 0 : index
    %c0_77 = arith.constant 0 : index
    %c0_78 = arith.constant 0 : index
    %87 = vector.load %arg7[%c0_76, %c0_77, %c0_78] : memref<1x1x8xf32, #tpu.memory_space<vmem>>, vector<1x1x8xf32>
    %88 = vector.broadcast %87 : vector<1x1x8xf32> to vector<16x16x8xf32>
    %89 = arith.addf %86, %88 : vector<16x16x8xf32>
    %cst_79 = arith.constant 0.000000e+00 : f32
    %90 = vector.broadcast %cst_79 : f32 to vector<16x16x8xf32>
    %91 = arith.maximumf %89, %90 : vector<16x16x8xf32>
    %92 = arith.truncf %91 : vector<16x16x8xf32> to vector<16x16x8xbf16>
    %c1_80 = arith.constant 1 : index
    %c1_81 = arith.constant 1 : index
    %c0_82 = arith.constant 0 : index
    %93 = vector.load %arg14[%c1_80, %c1_81, %c0_82] : memref<18x18x8xbf16, #tpu.memory_space<vmem>>, vector<16x16x8xbf16>
    tpu.vector_store %arg14[%c1_80, %c1_81, %c0_82], %92 {strides = array<i32>} : memref<18x18x8xbf16, #tpu.memory_space<vmem>>, vector<16x16x8xbf16>,
    %c0_83 = arith.constant 0 : index
    %c0_84 = arith.constant 0 : index
    %c0_85 = arith.constant 0 : index
    %94 = vector.load %arg14[%c0_83, %c0_84, %c0_85] : memref<18x18x8xbf16, #tpu.memory_space<vmem>>, vector<18x18x8xbf16>
    %cst_86 = arith.constant 0.000000e+00 : f32
    %95 = vector.broadcast %cst_86 : f32 to vector<64x8xf32>
    %96 = vector.extract_strided_slice %94 {offsets = [0, 0, 0], sizes = [16, 16, 8], strides = [1, 1, 1]} : vector<18x18x8xbf16> to vector<16x16x8xbf16>
    %97 = vector.shape_cast %96 : vector<16x16x8xbf16> to vector<8x2x16x8xbf16>
    %98 = vector.extract_strided_slice %97 {offsets = [0, 0, 0, 0], sizes = [8, 1, 16, 8], strides = [1, 1, 1, 1]} : vector<8x2x16x8xbf16> to vector<8x1x16x8xbf16>
    %99 = vector.shape_cast %98 : vector<8x1x16x8xbf16> to vector<8x16x8xbf16>
    %100 = vector.shape_cast %99 : vector<8x16x8xbf16> to vector<64x2x8xbf16>
    %101 = vector.extract_strided_slice %100 {offsets = [0, 0, 0], sizes = [64, 1, 8], strides = [1, 1, 1]} : vector<64x2x8xbf16> to vector<64x1x8xbf16>
    %102 = vector.shape_cast %101 : vector<64x1x8xbf16> to vector<64x8xbf16>
    %c0_87 = arith.constant 0 : index
    %c0_88 = arith.constant 0 : index
    %c0_89 = arith.constant 0 : index
    %103 = vector.load %arg8[%c0_87, %c0_88, %c0_89] : memref<9x8x8xbf16, #tpu.memory_space<vmem>>, vector<1x8x8xbf16>
    %104 = vector.shape_cast %103 : vector<1x8x8xbf16> to vector<8x8xbf16>
    %cst_90 = arith.constant dense<0.000000e+00> : vector<64x8xf32>
    %105 = tpu.matmul %102, %104, %cst_90 {dimension_numbers = #tpu.dot_dimension_numbers<[1], [0], [0], [1], [0, 0, 1, 1], [], []>} : vector<64x8xbf16>, vector<8x8xbf16>, vector<64x8xf32> -> vector<64x8xf32>
    %106 = arith.addf %95, %105 : vector<64x8xf32>
    %107 = vector.extract_strided_slice %94 {offsets = [0, 1, 0], sizes = [16, 16, 8], strides = [1, 1, 1]} : vector<18x18x8xbf16> to vector<16x16x8xbf16>
    %108 = vector.shape_cast %107 : vector<16x16x8xbf16> to vector<8x2x16x8xbf16>
    %109 = vector.extract_strided_slice %108 {offsets = [0, 0, 0, 0], sizes = [8, 1, 16, 8], strides = [1, 1, 1, 1]} : vector<8x2x16x8xbf16> to vector<8x1x16x8xbf16>
    %110 = vector.shape_cast %109 : vector<8x1x16x8xbf16> to vector<8x16x8xbf16>
    %111 = vector.shape_cast %110 : vector<8x16x8xbf16> to vector<64x2x8xbf16>
    %112 = vector.extract_strided_slice %111 {offsets = [0, 0, 0], sizes = [64, 1, 8], strides = [1, 1, 1]} : vector<64x2x8xbf16> to vector<64x1x8xbf16>
    %113 = vector.shape_cast %112 : vector<64x1x8xbf16> to vector<64x8xbf16>
    %c1_91 = arith.constant 1 : index
    %c0_92 = arith.constant 0 : index
    %c0_93 = arith.constant 0 : index
    %114 = vector.load %arg8[%c1_91, %c0_92, %c0_93] : memref<9x8x8xbf16, #tpu.memory_space<vmem>>, vector<1x8x8xbf16>
    %115 = vector.shape_cast %114 : vector<1x8x8xbf16> to vector<8x8xbf16>
    %cst_94 = arith.constant dense<0.000000e+00> : vector<64x8xf32>
    %116 = tpu.matmul %113, %115, %cst_94 {dimension_numbers = #tpu.dot_dimension_numbers<[1], [0], [0], [1], [0, 0, 1, 1], [], []>} : vector<64x8xbf16>, vector<8x8xbf16>, vector<64x8xf32> -> vector<64x8xf32>
    %117 = arith.addf %106, %116 : vector<64x8xf32>
    %118 = vector.extract_strided_slice %94 {offsets = [0, 2, 0], sizes = [16, 16, 8], strides = [1, 1, 1]} : vector<18x18x8xbf16> to vector<16x16x8xbf16>
    %119 = vector.shape_cast %118 : vector<16x16x8xbf16> to vector<8x2x16x8xbf16>
    %120 = vector.extract_strided_slice %119 {offsets = [0, 0, 0, 0], sizes = [8, 1, 16, 8], strides = [1, 1, 1, 1]} : vector<8x2x16x8xbf16> to vector<8x1x16x8xbf16>
    %121 = vector.shape_cast %120 : vector<8x1x16x8xbf16> to vector<8x16x8xbf16>
    %122 = vector.shape_cast %121 : vector<8x16x8xbf16> to vector<64x2x8xbf16>
    %123 = vector.extract_strided_slice %122 {offsets = [0, 0, 0], sizes = [64, 1, 8], strides = [1, 1, 1]} : vector<64x2x8xbf16> to vector<64x1x8xbf16>
    %124 = vector.shape_cast %123 : vector<64x1x8xbf16> to vector<64x8xbf16>
    %c2_95 = arith.constant 2 : index
    %c0_96 = arith.constant 0 : index
    %c0_97 = arith.constant 0 : index
    %125 = vector.load %arg8[%c2_95, %c0_96, %c0_97] : memref<9x8x8xbf16, #tpu.memory_space<vmem>>, vector<1x8x8xbf16>
    %126 = vector.shape_cast %125 : vector<1x8x8xbf16> to vector<8x8xbf16>
    %cst_98 = arith.constant dense<0.000000e+00> : vector<64x8xf32>
    %127 = tpu.matmul %124, %126, %cst_98 {dimension_numbers = #tpu.dot_dimension_numbers<[1], [0], [0], [1], [0, 0, 1, 1], [], []>} : vector<64x8xbf16>, vector<8x8xbf16>, vector<64x8xf32> -> vector<64x8xf32>
    %128 = arith.addf %117, %127 : vector<64x8xf32>
    %129 = vector.extract_strided_slice %94 {offsets = [1, 0, 0], sizes = [16, 16, 8], strides = [1, 1, 1]} : vector<18x18x8xbf16> to vector<16x16x8xbf16>
    %130 = vector.shape_cast %129 : vector<16x16x8xbf16> to vector<8x2x16x8xbf16>
    %131 = vector.extract_strided_slice %130 {offsets = [0, 0, 0, 0], sizes = [8, 1, 16, 8], strides = [1, 1, 1, 1]} : vector<8x2x16x8xbf16> to vector<8x1x16x8xbf16>
    %132 = vector.shape_cast %131 : vector<8x1x16x8xbf16> to vector<8x16x8xbf16>
    %133 = vector.shape_cast %132 : vector<8x16x8xbf16> to vector<64x2x8xbf16>
    %134 = vector.extract_strided_slice %133 {offsets = [0, 0, 0], sizes = [64, 1, 8], strides = [1, 1, 1]} : vector<64x2x8xbf16> to vector<64x1x8xbf16>
    %135 = vector.shape_cast %134 : vector<64x1x8xbf16> to vector<64x8xbf16>
    %c3_99 = arith.constant 3 : index
    %c0_100 = arith.constant 0 : index
    %c0_101 = arith.constant 0 : index
    %136 = vector.load %arg8[%c3_99, %c0_100, %c0_101] : memref<9x8x8xbf16, #tpu.memory_space<vmem>>, vector<1x8x8xbf16>
    %137 = vector.shape_cast %136 : vector<1x8x8xbf16> to vector<8x8xbf16>
    %cst_102 = arith.constant dense<0.000000e+00> : vector<64x8xf32>
    %138 = tpu.matmul %135, %137, %cst_102 {dimension_numbers = #tpu.dot_dimension_numbers<[1], [0], [0], [1], [0, 0, 1, 1], [], []>} : vector<64x8xbf16>, vector<8x8xbf16>, vector<64x8xf32> -> vector<64x8xf32>
    %139 = arith.addf %128, %138 : vector<64x8xf32>
    %140 = vector.extract_strided_slice %94 {offsets = [1, 1, 0], sizes = [16, 16, 8], strides = [1, 1, 1]} : vector<18x18x8xbf16> to vector<16x16x8xbf16>
    %141 = vector.shape_cast %140 : vector<16x16x8xbf16> to vector<8x2x16x8xbf16>
    %142 = vector.extract_strided_slice %141 {offsets = [0, 0, 0, 0], sizes = [8, 1, 16, 8], strides = [1, 1, 1, 1]} : vector<8x2x16x8xbf16> to vector<8x1x16x8xbf16>
    %143 = vector.shape_cast %142 : vector<8x1x16x8xbf16> to vector<8x16x8xbf16>
    %144 = vector.shape_cast %143 : vector<8x16x8xbf16> to vector<64x2x8xbf16>
    %145 = vector.extract_strided_slice %144 {offsets = [0, 0, 0], sizes = [64, 1, 8], strides = [1, 1, 1]} : vector<64x2x8xbf16> to vector<64x1x8xbf16>
    %146 = vector.shape_cast %145 : vector<64x1x8xbf16> to vector<64x8xbf16>
    %c4_103 = arith.constant 4 : index
    %c0_104 = arith.constant 0 : index
    %c0_105 = arith.constant 0 : index
    %147 = vector.load %arg8[%c4_103, %c0_104, %c0_105] : memref<9x8x8xbf16, #tpu.memory_space<vmem>>, vector<1x8x8xbf16>
    %148 = vector.shape_cast %147 : vector<1x8x8xbf16> to vector<8x8xbf16>
    %cst_106 = arith.constant dense<0.000000e+00> : vector<64x8xf32>
    %149 = tpu.matmul %146, %148, %cst_106 {dimension_numbers = #tpu.dot_dimension_numbers<[1], [0], [0], [1], [0, 0, 1, 1], [], []>} : vector<64x8xbf16>, vector<8x8xbf16>, vector<64x8xf32> -> vector<64x8xf32>
    %150 = arith.addf %139, %149 : vector<64x8xf32>
    %151 = vector.extract_strided_slice %94 {offsets = [1, 2, 0], sizes = [16, 16, 8], strides = [1, 1, 1]} : vector<18x18x8xbf16> to vector<16x16x8xbf16>
    %152 = vector.shape_cast %151 : vector<16x16x8xbf16> to vector<8x2x16x8xbf16>
    %153 = vector.extract_strided_slice %152 {offsets = [0, 0, 0, 0], sizes = [8, 1, 16, 8], strides = [1, 1, 1, 1]} : vector<8x2x16x8xbf16> to vector<8x1x16x8xbf16>
    %154 = vector.shape_cast %153 : vector<8x1x16x8xbf16> to vector<8x16x8xbf16>
    %155 = vector.shape_cast %154 : vector<8x16x8xbf16> to vector<64x2x8xbf16>
    %156 = vector.extract_strided_slice %155 {offsets = [0, 0, 0], sizes = [64, 1, 8], strides = [1, 1, 1]} : vector<64x2x8xbf16> to vector<64x1x8xbf16>
    %157 = vector.shape_cast %156 : vector<64x1x8xbf16> to vector<64x8xbf16>
    %c5_107 = arith.constant 5 : index
    %c0_108 = arith.constant 0 : index
    %c0_109 = arith.constant 0 : index
    %158 = vector.load %arg8[%c5_107, %c0_108, %c0_109] : memref<9x8x8xbf16, #tpu.memory_space<vmem>>, vector<1x8x8xbf16>
    %159 = vector.shape_cast %158 : vector<1x8x8xbf16> to vector<8x8xbf16>
    %cst_110 = arith.constant dense<0.000000e+00> : vector<64x8xf32>
    %160 = tpu.matmul %157, %159, %cst_110 {dimension_numbers = #tpu.dot_dimension_numbers<[1], [0], [0], [1], [0, 0, 1, 1], [], []>} : vector<64x8xbf16>, vector<8x8xbf16>, vector<64x8xf32> -> vector<64x8xf32>
    %161 = arith.addf %150, %160 : vector<64x8xf32>
    %162 = vector.extract_strided_slice %94 {offsets = [2, 0, 0], sizes = [16, 16, 8], strides = [1, 1, 1]} : vector<18x18x8xbf16> to vector<16x16x8xbf16>
    %163 = vector.shape_cast %162 : vector<16x16x8xbf16> to vector<8x2x16x8xbf16>
    %164 = vector.extract_strided_slice %163 {offsets = [0, 0, 0, 0], sizes = [8, 1, 16, 8], strides = [1, 1, 1, 1]} : vector<8x2x16x8xbf16> to vector<8x1x16x8xbf16>
    %165 = vector.shape_cast %164 : vector<8x1x16x8xbf16> to vector<8x16x8xbf16>
    %166 = vector.shape_cast %165 : vector<8x16x8xbf16> to vector<64x2x8xbf16>
    %167 = vector.extract_strided_slice %166 {offsets = [0, 0, 0], sizes = [64, 1, 8], strides = [1, 1, 1]} : vector<64x2x8xbf16> to vector<64x1x8xbf16>
    %168 = vector.shape_cast %167 : vector<64x1x8xbf16> to vector<64x8xbf16>
    %c6_111 = arith.constant 6 : index
    %c0_112 = arith.constant 0 : index
    %c0_113 = arith.constant 0 : index
    %169 = vector.load %arg8[%c6_111, %c0_112, %c0_113] : memref<9x8x8xbf16, #tpu.memory_space<vmem>>, vector<1x8x8xbf16>
    %170 = vector.shape_cast %169 : vector<1x8x8xbf16> to vector<8x8xbf16>
    %cst_114 = arith.constant dense<0.000000e+00> : vector<64x8xf32>
    %171 = tpu.matmul %168, %170, %cst_114 {dimension_numbers = #tpu.dot_dimension_numbers<[1], [0], [0], [1], [0, 0, 1, 1], [], []>} : vector<64x8xbf16>, vector<8x8xbf16>, vector<64x8xf32> -> vector<64x8xf32>
    %172 = arith.addf %161, %171 : vector<64x8xf32>
    %173 = vector.extract_strided_slice %94 {offsets = [2, 1, 0], sizes = [16, 16, 8], strides = [1, 1, 1]} : vector<18x18x8xbf16> to vector<16x16x8xbf16>
    %174 = vector.shape_cast %173 : vector<16x16x8xbf16> to vector<8x2x16x8xbf16>
    %175 = vector.extract_strided_slice %174 {offsets = [0, 0, 0, 0], sizes = [8, 1, 16, 8], strides = [1, 1, 1, 1]} : vector<8x2x16x8xbf16> to vector<8x1x16x8xbf16>
    %176 = vector.shape_cast %175 : vector<8x1x16x8xbf16> to vector<8x16x8xbf16>
    %177 = vector.shape_cast %176 : vector<8x16x8xbf16> to vector<64x2x8xbf16>
    %178 = vector.extract_strided_slice %177 {offsets = [0, 0, 0], sizes = [64, 1, 8], strides = [1, 1, 1]} : vector<64x2x8xbf16> to vector<64x1x8xbf16>
    %179 = vector.shape_cast %178 : vector<64x1x8xbf16> to vector<64x8xbf16>
    %c7_115 = arith.constant 7 : index
    %c0_116 = arith.constant 0 : index
    %c0_117 = arith.constant 0 : index
    %180 = vector.load %arg8[%c7_115, %c0_116, %c0_117] : memref<9x8x8xbf16, #tpu.memory_space<vmem>>, vector<1x8x8xbf16>
    %181 = vector.shape_cast %180 : vector<1x8x8xbf16> to vector<8x8xbf16>
    %cst_118 = arith.constant dense<0.000000e+00> : vector<64x8xf32>
    %182 = tpu.matmul %179, %181, %cst_118 {dimension_numbers = #tpu.dot_dimension_numbers<[1], [0], [0], [1], [0, 0, 1, 1], [], []>} : vector<64x8xbf16>, vector<8x8xbf16>, vector<64x8xf32> -> vector<64x8xf32>
    %183 = arith.addf %172, %182 : vector<64x8xf32>
    %184 = vector.extract_strided_slice %94 {offsets = [2, 2, 0], sizes = [16, 16, 8], strides = [1, 1, 1]} : vector<18x18x8xbf16> to vector<16x16x8xbf16>
    %185 = vector.shape_cast %184 : vector<16x16x8xbf16> to vector<8x2x16x8xbf16>
    %186 = vector.extract_strided_slice %185 {offsets = [0, 0, 0, 0], sizes = [8, 1, 16, 8], strides = [1, 1, 1, 1]} : vector<8x2x16x8xbf16> to vector<8x1x16x8xbf16>
    %187 = vector.shape_cast %186 : vector<8x1x16x8xbf16> to vector<8x16x8xbf16>
    %188 = vector.shape_cast %187 : vector<8x16x8xbf16> to vector<64x2x8xbf16>
    %189 = vector.extract_strided_slice %188 {offsets = [0, 0, 0], sizes = [64, 1, 8], strides = [1, 1, 1]} : vector<64x2x8xbf16> to vector<64x1x8xbf16>
    %190 = vector.shape_cast %189 : vector<64x1x8xbf16> to vector<64x8xbf16>
    %c8_119 = arith.constant 8 : index
    %c0_120 = arith.constant 0 : index
    %c0_121 = arith.constant 0 : index
    %191 = vector.load %arg8[%c8_119, %c0_120, %c0_121] : memref<9x8x8xbf16, #tpu.memory_space<vmem>>, vector<1x8x8xbf16>
    %192 = vector.shape_cast %191 : vector<1x8x8xbf16> to vector<8x8xbf16>
    %cst_122 = arith.constant dense<0.000000e+00> : vector<64x8xf32>
    %193 = tpu.matmul %190, %192, %cst_122 {dimension_numbers = #tpu.dot_dimension_numbers<[1], [0], [0], [1], [0, 0, 1, 1], [], []>} : vector<64x8xbf16>, vector<8x8xbf16>, vector<64x8xf32> -> vector<64x8xf32>
    %194 = arith.addf %183, %193 : vector<64x8xf32>
    %c0_123 = arith.constant 0 : index
    %c0_124 = arith.constant 0 : index
    %195 = vector.load %arg9[%c0_123, %c0_124] : memref<1x8xf32, #tpu.memory_space<vmem>>, vector<1x8xf32>
    %196 = vector.broadcast %195 : vector<1x8xf32> to vector<64x8xf32>
    %197 = arith.addf %194, %196 : vector<64x8xf32>
    %198 = vector.shape_cast %13 : vector<16x16x4xf32> to vector<8x2x16x4xf32>
    %199 = vector.extract_strided_slice %198 {offsets = [0, 0, 0, 0], sizes = [8, 1, 16, 4], strides = [1, 1, 1, 1]} : vector<8x2x16x4xf32> to vector<8x1x16x4xf32>
    %200 = vector.shape_cast %199 : vector<8x1x16x4xf32> to vector<8x16x4xf32>
    %201 = vector.shape_cast %200 : vector<8x16x4xf32> to vector<64x2x4xf32>
    %202 = vector.extract_strided_slice %201 {offsets = [0, 0, 0], sizes = [64, 1, 4], strides = [1, 1, 1]} : vector<64x2x4xf32> to vector<64x1x4xf32>
    %203 = vector.shape_cast %202 : vector<64x1x4xf32> to vector<64x4xf32>
    %204 = arith.truncf %203 : vector<64x4xf32> to vector<64x4xbf16>
    %c0_125 = arith.constant 0 : index
    %c0_126 = arith.constant 0 : index
    %205 = vector.load %arg10[%c0_125, %c0_126] : memref<4x8xbf16, #tpu.memory_space<vmem>>, vector<4x8xbf16>
    %cst_127 = arith.constant dense<0.000000e+00> : vector<64x8xf32>
    %206 = tpu.matmul %204, %205, %cst_127 {dimension_numbers = #tpu.dot_dimension_numbers<[1], [0], [0], [1], [0, 0, 1, 1], [], []>} : vector<64x4xbf16>, vector<4x8xbf16>, vector<64x8xf32> -> vector<64x8xf32>
    %c0_128 = arith.constant 0 : index
    %c0_129 = arith.constant 0 : index
    %207 = vector.load %arg11[%c0_128, %c0_129] : memref<1x8xf32, #tpu.memory_space<vmem>>, vector<1x8xf32>
    %208 = vector.broadcast %207 : vector<1x8xf32> to vector<64x8xf32>
    %209 = arith.addf %206, %208 : vector<64x8xf32>
    %210 = arith.addf %197, %209 : vector<64x8xf32>
    %211 = vector.shape_cast %210 : vector<64x8xf32> to vector<8x8x8xf32>
    %c0_130 = arith.constant 0 : index
    %c0_131 = arith.constant 0 : index
    %c0_132 = arith.constant 0 : index
    %c0_133 = arith.constant 0 : index
    %212 = vector.load %arg12[%c0_130, %c0_131, %c0_132, %c0_133] : memref<1x8x8x8xf32, #tpu.memory_space<vmem>>, vector<1x8x8x8xf32>
    %213 = vector.shape_cast %212 : vector<1x8x8x8xf32> to vector<8x8x8xf32>
    %214 = vector.shape_cast %211 : vector<8x8x8xf32> to vector<1x8x8x8xf32>
    tpu.vector_store %arg12[%c0_130, %c0_131, %c0_132, %c0_133], %214 {strides = array<i32>} : memref<1x8x8x8xf32, #tpu.memory_space<vmem>>, vector<1x8x8x8xf32>,
    return
  }
  func.func @transform_0(%arg0: i32) -> (i32, i32, i32, i32) {
    %c0_i32 = arith.constant 0 : i32
    %c0_i32_0 = arith.constant 0 : i32
    %c0_i32_1 = arith.constant 0 : i32
    %c0_i32_2 = arith.constant 0 : i32
    return %arg0, %c0_i32, %c0_i32_0, %c0_i32_1 : i32, i32, i32, i32
  }
  func.func @transform_1(%arg0: i32) -> (i32, i32, i32) {
    %c0_i32 = arith.constant 0 : i32
    %c0_i32_0 = arith.constant 0 : i32
    %c0_i32_1 = arith.constant 0 : i32
    %c0_i32_2 = arith.constant 0 : i32
    return %c0_i32, %c0_i32_0, %c0_i32_1 : i32, i32, i32
  }
  func.func @transform_2(%arg0: i32) -> (i32, i32, i32) {
    %c0_i32 = arith.constant 0 : i32
    %c0_i32_0 = arith.constant 0 : i32
    %c0_i32_1 = arith.constant 0 : i32
    %c0_i32_2 = arith.constant 0 : i32
    return %c0_i32, %c0_i32_0, %c0_i32_1 : i32, i32, i32
  }
  func.func @transform_3(%arg0: i32) -> (i32, i32, i32) {
    %c0_i32 = arith.constant 0 : i32
    %c0_i32_0 = arith.constant 0 : i32
    %c0_i32_1 = arith.constant 0 : i32
    %c0_i32_2 = arith.constant 0 : i32
    return %c0_i32, %c0_i32_0, %c0_i32_1 : i32, i32, i32
  }
  func.func @transform_4(%arg0: i32) -> (i32, i32) {
    %c0_i32 = arith.constant 0 : i32
    %c0_i32_0 = arith.constant 0 : i32
    %c0_i32_1 = arith.constant 0 : i32
    return %c0_i32, %c0_i32_0 : i32, i32
  }
  func.func @transform_5(%arg0: i32) -> (i32, i32, i32) {
    %c0_i32 = arith.constant 0 : i32
    %c0_i32_0 = arith.constant 0 : i32
    %c0_i32_1 = arith.constant 0 : i32
    %c0_i32_2 = arith.constant 0 : i32
    return %c0_i32, %c0_i32_0, %c0_i32_1 : i32, i32, i32
  }
  func.func @transform_6(%arg0: i32) -> (i32, i32, i32) {
    %c0_i32 = arith.constant 0 : i32
    %c0_i32_0 = arith.constant 0 : i32
    %c0_i32_1 = arith.constant 0 : i32
    %c0_i32_2 = arith.constant 0 : i32
    return %c0_i32, %c0_i32_0, %c0_i32_1 : i32, i32, i32
  }
  func.func @transform_7(%arg0: i32) -> (i32, i32, i32) {
    %c0_i32 = arith.constant 0 : i32
    %c0_i32_0 = arith.constant 0 : i32
    %c0_i32_1 = arith.constant 0 : i32
    %c0_i32_2 = arith.constant 0 : i32
    return %c0_i32, %c0_i32_0, %c0_i32_1 : i32, i32, i32
  }
  func.func @transform_8(%arg0: i32) -> (i32, i32) {
    %c0_i32 = arith.constant 0 : i32
    %c0_i32_0 = arith.constant 0 : i32
    %c0_i32_1 = arith.constant 0 : i32
    return %c0_i32, %c0_i32_0 : i32, i32
  }
  func.func @transform_9(%arg0: i32) -> (i32, i32) {
    %c0_i32 = arith.constant 0 : i32
    %c0_i32_0 = arith.constant 0 : i32
    %c0_i32_1 = arith.constant 0 : i32
    return %c0_i32, %c0_i32_0 : i32, i32
  }
  func.func @transform_10(%arg0: i32) -> (i32, i32) {
    %c0_i32 = arith.constant 0 : i32
    %c0_i32_0 = arith.constant 0 : i32
    %c0_i32_1 = arith.constant 0 : i32
    return %c0_i32, %c0_i32_0 : i32, i32
  }
  func.func @transform_11(%arg0: i32) -> (i32, i32, i32, i32) {
    %c0_i32 = arith.constant 0 : i32
    %c0_i32_0 = arith.constant 0 : i32
    %c0_i32_1 = arith.constant 0 : i32
    %c0_i32_2 = arith.constant 0 : i32
    return %arg0, %c0_i32, %c0_i32_0, %c0_i32_1 : i32, i32, i32, i32
  }
}

</mosaic_0001>

<bundles_post_ra>
// kernel: tpu_custom_call.1
= control target key start
LH: loop header
LB: loop body
LE: loop exit
PB: predicated region body
PF: predicated region fallthrough
CT: control target
= control target key end

     0   :  { %16 = vsyncpa [#allocation5], 0  ;;  %s21103_s0 = inlined_call_operand.vmem [shape: f32[2,16,16,4], index: 0, kind: input, shape index: {}]   ;;  %s21104_s1 = inlined_call_operand.vmem [shape: f32[1,1,4], index: 1, kind: input, shape index: {}]   ;;  %s21105_s2 = inlined_call_operand.vmem [shape: f32[1,1,4], index: 2, kind: input, shape index: {}]   ;;  %s21106_s3 = inlined_call_operand.vmem [shape: bf16[9,4,8], index: 3, kind: input, shape index: {}]   ;;  %s21107_s4 = inlined_call_operand.vmem [shape: f32[1,8], index: 4, kind: input, shape index: {}]   ;;  %s21108_s5 = inlined_call_operand.vmem [shape: f32[1,1,8], index: 5, kind: input, shape index: {}]   ;;  %s21109_s6 = inlined_call_operand.vmem [shape: f32[1,1,8], index: 6, kind: input, shape index: {}]   ;;  %s21110_s7 = inlined_call_operand.vmem [shape: bf16[9,8,8], index: 7, kind: input, shape index: {}]   ;;  %s21111_s8 = inlined_call_operand.vmem [shape: f32[1,8], index: 8, kind: input, shape index: {}]   ;;  %s21112_s9 = inlined_call_operand.vmem [shape: bf16[4,8], index: 9, kind: input, shape index: {}]   ;;  %s21113_s10 = inlined_call_operand.vmem [shape: f32[1,8], index: 10, kind: input, shape index: {}]   ;;  %s21114_s11 = inlined_call_operand.hbm [shape: f32[2,8,8,8], index: 11, kind: output, shape index: {}]  }
   0x1   :  { %18 = vsyncpa [#allocation5 + $0x1], 0  ;;  %s15533_s17 = smov 0   ;;  %s15535_s18 = smov 0  }
   0x2   :  { %s15537_s19 = smov 0   ;;  %s15539_s20 = smov 0  }
   0x3 LB: > { %s15554_s21 = sadd.s32 4294967295, %s15465_s20   ;;  %s13714_s22 = sadd.s32 4294967294, %s15465_s20   ;;  %s15465_s20 = sphi %s15539_s20, %s22036_s20   ;;  %s15461_s19 = sphi %s15537_s19, %s22035_s19   ;;  %s15457_s18 = sphi %s15535_s18, %s22034_s18   ;;  %s15453_s17 = sphi %s15533_s17, %s22033_s17  }
   0x4   : > { %s15558_s23 = sadd.s32 1, %s15465_s20   ;;  %s267_s24 = sadd.s32 1, %s15461_s19 }
   0x5   : > { %s264_s25 = ssub.s32 %s15465_s20, %s15558_s23  ;;  %p277_p0 = scmp.ne.s32.totalorder %s15461_s19, %s15457_s18 }
   0x6   : > { %p265_p1 = scmp.eq.s32.totalorder %s264_s25, 0  ;;  %p278_p2 = scmp.eq.s32.totalorder %s15554_s21, 1 }
   0x7   : > { %p283_p3 = scmp.ne.s32.totalorder %s15457_s18, %s15453_s17  ;;  %p284_p4 = scmp.eq.s32.totalorder %s13714_s22, 1 }
   0x8   : > { %s15569_s26 = scalar_select %p265_p1, %s15461_s19, %s267_s24  }
   0x9   : > { %p15571_p5 = por %p278_p2, %p277_p0  ;;  %p15575_p6 = por %p284_p4, %p283_p3 }
   0xa   : > { %p13717_p7 = scmp.ge.s32.totalorder %s15465_s20, 1  ;;  %p340_p8 = scmp.lt.s32.totalorder %s15465_s20, 3 }
   0xc   : > { %p341_p9 = pnand %p13717_p7, %p340_p8 }
   0xe   : > { %344 = sbr.rel (%p341_p9) target bundleno = 1632 (0x660), region = 64 }
  0x15   : > { %vm1844_vm0 = vcmask 1041408   ;;  %v13869_v0 = vld [vmem:[%s21106_s3 + $0x6] sm:$0x3]  ;;  %p380_p10 = scmp.lt.s32.totalorder %s15554_s21, 1  ;;  %vm386_vm1 = vcmask 27648   ;;  %vm389_vm2 = vcmask 24576  }
  0x16   : > { %15280 = vmatprep.subr.msk.bf16.mxu0 %vm1844_vm0, %v13869_v0  ;;  %v15587_v1 = vsel %vm1844_vm0, %v13869_v0, 0  ;;  %vm396_vm3 = vsmask.f32 256  ;;  %v401_v2 = vld [vmem:[#allocation2 + $0xc] sm:$0x1]  ;;  %v15467_v6 = vmov 0  }
  0x17   : > { %21401 = vst [vmem:[#allocation7_spill] sm:$0xff] %v15587_v1  ;;  %14628 = vmatpush3.bf16.msra.mxu0 %v15587_v1  ;;  %s381_s12 = scalar_select %p380_p10, %s15554_s21, 1  ;;  %vm15593_vm4 = vmand %vm389_vm2, %vm396_vm3  ;;  %v15602_v5 = vld [vmem:[%s21104_s1] ss:$0 sm:$0xff]  ;;  %vm508_vm5 = vcmask 60416   ;;  %vm511_vm8 = vcmask 57344  }
  0x18   : > { %v402_v4 = vsel %vm15593_vm4, 0, %v401_v2  ;;  %387 = vst.msk [vmem:[#allocation2] sm:$0xf] %vm386_vm1, %v15467_v6  ;;  %388 = vst.msk [vmem:[#allocation2 + $0x4] sm:$0xf] %vm386_vm1, %v15467_v6  ;;  %v21404_v19 = vmov 0 }
  0x19   : > { %390 = vst.msk [vmem:[#allocation2 + $0x8] sm:$0x1] %vm389_vm2, %v15467_v6  ;;  %394 = vst.msk [vmem:[#allocation2 + $0xd4] sm:$0x1] %vm389_vm2, %v15467_v6  ;;  %s14256_s15 = sshll.u32 %s381_s12, 8  ;;  %v21407_v55 = vmov 0 }
  0x1a   : > { %392 = vst.msk [vmem:[#allocation2 + $0xcc] sm:$0xf] %vm386_vm1, %v15467_v6  ;;  %393 = vst.msk [vmem:[#allocation2 + $0xd0] sm:$0xf] %vm386_vm1, %v15467_v6  ;;  %vm5270_vm6 = vsmask.f32 1284  ;;  %s15616_s24 = scalar_lea.vmem %s21103_s0, %s14256_s15 }
  0x1b   : > { %403 = vst [vmem:[#allocation2 + $0xc] sm:$0x1] %v402_v4  ;;  %vm5272_vm7 = vsmask.f32 2312  ;;  %514 = vst.msk [vmem:[#allocation3 + $0xcc] sm:$0xf] %vm508_vm5, %v15467_v6 }
  0x1c   : > { %509 = vst.msk [vmem:[#allocation3] sm:$0xf] %vm508_vm5, %v15467_v6  ;;  %510 = vst.msk [vmem:[#allocation3 + $0x4] sm:$0xf] %vm508_vm5, %v15467_v6  ;;  %v15621_v7 = vld [vmem:[%s21105_s2] ss:$0 sm:$0xff] }
  0x1d   : > { %vm5274_vm9 = vsmask.f32 3340  ;;  %512 = vst.msk [vmem:[#allocation3 + $0x8] sm:$0x1] %vm511_vm8, %v15467_v6  ;;  %516 = vst.msk [vmem:[#allocation3 + $0xd4] sm:$0x1] %vm511_vm8, %v15467_v6 }
  0x1e   : > { %v628_v8 = vld [vmem:[%s15616_s24] sm:$0xff]  ;;  %v629_v9 = vld [vmem:[%s15616_s24 + $0x8] sm:$0xff]  ;;  %vm5271_vm10 = vmor %vm396_vm3, %vm5270_vm6  ;;  %vm866_vm12 = vsmask.f32 4368  ;;  %vm452_vm15 = vsmask.f32 7938 }
  0x1f   : > { %v667_v10 = vmul.f32 %v15602_v5, %v628_v8  ;;  %v668_v11 = vmul.f32 %v15602_v5, %v629_v9  ;;  %vm5273_vm11 = vmor %vm5271_vm10, %vm5272_vm7  ;;  %v15634_v12 = vld [vmem:[%s21106_s3 + $0x8] sm:$0x3]  ;;  %v404_v13 = vld [vmem:[#allocation2 + $0x18] sm:$0x1]  ;;  %s14321_s12 = sshll.u32 %s15554_s21, 10  ;;  %s15470_s25 = smov [#allocation4]  }
  0x20   : > { %vm5275_vm13 = vmor %vm5273_vm11, %vm5274_vm9  ;;  %15282 = vmatprep.subr.msk.bf16.mxu0 %vm1844_vm0, %v15634_v12  ;;  %v405_v14 = vsel %vm15593_vm4, 0, %v404_v13  ;;  %v630_v15 = vld [vmem:[%s15616_s24 + $0x10] sm:$0xff]  ;;  %v631_v16 = vld [vmem:[%s15616_s24 + $0x18] sm:$0xff]  ;;  %vm1795_vm9 = vcmask 31744   ;;  %vm1359_vm11 = vsmask.f32 7440  ;;  %s21053_s16 = scalar_lea.hbm %s21114_s11, %s14321_s12 }
  0x21   : > { %v706_v17 = vadd.f32 %v15621_v7, %v667_v10  ;;  %v707_v18 = vadd.f32 %v15621_v7, %v668_v11  ;;  %vm15645_vm14 = vmor %vm5275_vm13, %vm866_vm12  ;;  %406 = vst [vmem:[#allocation2 + $0x18] sm:$0x1] %v405_v14  ;;  %v669_v20 = vmul.f32 %v15602_v5, %v630_v15  ;;  %v670_v21 = vmul.f32 %v15602_v5, %v631_v16  ;;  %v407_v22 = vld [vmem:[#allocation2 + $0x24] sm:$0x1]  ;;  %v633_v25 = vld [vmem:[%s15616_s24 + $0x28] sm:$0xff] }
  0x22   : > { %v21405_v19 = vsel %vm15645_vm14, 4294967295, %v21404_v19  ;;  %v632_v23 = vld [vmem:[%s15616_s24 + $0x20] sm:$0xff]  ;;  %v408_v24 = vsel %vm15593_vm4, 0, %v407_v22  ;;  %v410_v27 = vld [vmem:[#allocation2 + $0x30] sm:$0x1]  ;;  %v672_v33 = vmul.f32 %v15602_v5, %v633_v25  ;;  %v635_v36 = vld [vmem:[%s15616_s24 + $0x38] sm:$0xff] }
  0x23   : > { %21406 = vst [vmem:[#allocation8_spill] sm:$0xff] %v21405_v19  ;;  %v671_v26 = vmul.f32 %v15602_v5, %v632_v23  ;;  %v738_v28 = vmax.f32 %v706_v17, 0.0  ;;  %v739_v29 = vmax.f32 %v707_v18, 0.0  ;;  %v708_v30 = vadd.f32 %v15621_v7, %v669_v20  ;;  %409 = vst [vmem:[#allocation2 + $0x24] sm:$0x1] %v408_v24  ;;  %v634_v32 = vld [vmem:[%s15616_s24 + $0x30] sm:$0xff] }
  0x24   : > { %v709_v31 = vadd.f32 %v15621_v7, %v670_v21  ;;  %v411_v35 = vsel %vm15593_vm4, 0, %v410_v27  ;;  %v673_v37 = vmul.f32 %v15602_v5, %v634_v32  ;;  %v13755_v38 = vld [vmem:[%s21106_s3 + $0x2] sm:$0x3]  ;;  %v711_v43 = vadd.f32 %v15621_v7, %v672_v33  ;;  %vm15674_vm6 = vmor %vm396_vm3, %vm866_vm12  ;;  %v1191_v60 = vld [vmem:[#allocation2 + $0xc] sm:$0xf] }
  0x25   : > { %v710_v34 = vadd.f32 %v15621_v7, %v671_v26  ;;  %v14257_v39 = vpack.c.bf16 %v738_v28, %v738_v28  ;;  %v14258_v40 = vpack.c.bf16 %v739_v29, %v739_v29  ;;  %v740_v41 = vmax.f32 %v708_v30, 0.0  ;;  %412 = vst [vmem:[#allocation2 + $0x30] sm:$0x1] %v411_v35  ;;  %15277 = vmatprep.subr.msk.bf16.mxu1 %vm1844_vm0, %v13755_v38  ;;  %vm15683_vm7 = vmand %vm386_vm1, %vm452_vm15  ;;  %v398_v28 = vld [vmem:[#allocation2] sm:$0x1] }
  0x26   : > { %v741_v42 = vmax.f32 %v709_v31, 0.0  ;;  %v674_v45 = vmul.f32 %v15602_v5, %v635_v36  ;;  %v712_v46 = vadd.f32 %v15621_v7, %v673_v37  ;;  %v743_v53 = vmax.f32 %v711_v43, 0.0  ;;  %vm15710_vm10 = vmand %vm389_vm2, %vm452_vm15 }
  0x27   : > { %v742_v44 = vmax.f32 %v710_v34, 0.0  ;;  %v869_v47 = vshrl.u32 %v14257_v39, 16  ;;  %v872_v48 = vshll.u32 %v14257_v39, 16  ;;  %v877_v49 = vshrl.u32 %v14258_v40, 16  ;;  %v454_v34 = vld [vmem:[#allocation2 + $0x8] sm:$0x1]  ;;  %vm15724_vm2 = vmand %vm511_vm8, %vm396_vm3 }
  0x28   : > { %v880_v50 = vshll.u32 %v14258_v40, 16  ;;  %v14259_v51 = vpack.c.bf16 %v740_v41, %v740_v41  ;;  %v14260_v52 = vpack.c.bf16 %v741_v42, %v741_v42  ;;  %v21408_v55 = vsel %vm15674_vm6, 4294967295, %v21407_v55  ;;  %v1198_v16 = vld [vmem:[#allocation2 + $0x18] sm:$0xf]  ;;  %v570_v39 = vld [vmem:[#allocation3 + $0xcc] sm:$0x1] }
  0x29   : > { %v14261_v54 = vpack.c.bf16 %v742_v44, %v742_v44  ;;  %21409 = vst [vmem:[#allocation9_spill] sm:$0xff] %v21408_v55  ;;  %v871_v56 = vrot.slane %v869_v47, 7  ;;  %v15678_v57 = vrot.slane %v877_v49, 7  ;;  %v713_v58 = vadd.f32 %v15621_v7, %v674_v45  ;;  %v15717_v44 = vld [vmem:[#allocation2 + $0x4] sm:$0xf] }
  0x2a   : > { %v886_v61 = vshrl.u32 %v14259_v51, 16  ;;  %v889_v62 = vshll.u32 %v14259_v51, 16  ;;  %v894_v63 = vshrl.u32 %v14260_v52, 16  ;;  %v897_v0 = vshll.u32 %v14260_v52, 16  ;;  %v1205_v31 = vld [vmem:[#allocation2 + $0x24] sm:$0xf] }
  0x2b   : > { %v874_v2 = vor.u32 %v872_v48, %v871_v56  ;;  %v875_v4 = vrot.slane %v871_v56, 4  ;;  %v882_v6 = vor.u32 %v880_v50, %v15678_v57  ;;  %v744_v8 = vmax.f32 %v712_v46, 0.0 }
  0x2c   : > { %v888_v9 = vrot.slane %v886_v61, 7  ;;  %v15688_v10 = vrot.slane %v894_v63, 7  ;;  %v14262_v11 = vpack.c.bf16 %v743_v53, %v743_v53  ;;  %v903_v13 = vshrl.u32 %v14261_v54, 16 }
  0x2d   : > { %v883_v14 = vsel %vm15674_vm6, %v875_v4, %v882_v6  ;;  %v1192_v15 = vsel %vm15683_vm7, %v874_v2, %v1191_v60  ;;  %v906_v17 = vshll.u32 %v14261_v54, 16  ;;  %v745_v18 = vmax.f32 %v713_v58, 0.0 }
  0x2e   : > { %1193 = vst [vmem:[#allocation2 + $0xc] sm:$0xf] %v1192_v15  ;;  %1194 = vst.msk [vmem:[#allocation2 + $0x10] sm:$0xf] %vm386_vm1, %v883_v14  ;;  %v891_v20 = vor.u32 %v889_v62, %v888_v9  ;;  %v892_v21 = vrot.slane %v888_v9, 4  ;;  %v899_v22 = vor.u32 %v897_v0, %v15688_v10  ;;  %v15698_v23 = vsel %vm1844_vm0, %v15634_v12, 0 }
  0x2f   : > { %v905_v24 = vrot.slane %v903_v13, 7  ;;  %v911_v25 = vshrl.u32 %v14262_v11, 16  ;;  %v914_v26 = vshll.u32 %v14262_v11, 16  ;;  %v14263_v27 = vpack.c.bf16 %v744_v8, %v744_v8  ;;  %v1212_v13 = vld [vmem:[#allocation2 + $0x30] sm:$0xf] }
  0x30   : > { %v900_v29 = vsel %vm15674_vm6, %v892_v21, %v899_v22  ;;  %v1199_v30 = vsel %vm15683_vm7, %v891_v20, %v1198_v16  ;;  %v14264_v32 = vpack.c.bf16 %v745_v18, %v745_v18  ;;  %v1846_v33 = vsel %vm1844_vm0, %v13755_v38, 0 }
  0x31   : > { %1200 = vst [vmem:[#allocation2 + $0x18] sm:$0xf] %v1199_v30  ;;  %1201 = vst.msk [vmem:[#allocation2 + $0x1c] sm:$0xf] %vm386_vm1, %v900_v29  ;;  %v908_v12 = vor.u32 %v906_v17, %v905_v24  ;;  %v909_v35 = vrot.slane %v905_v24, 4  ;;  %v15706_v36 = vrot.slane %v911_v25, 7  ;;  %14526 = vmatpush3.bf16.msra.mxu1 %v1846_v33 }
  0x32   : > { %v920_v37 = vshrl.u32 %v14263_v27, 16  ;;  %v884_v41 = vrot.slane %v15678_v57, 4  ;;  %v923_v38 = vshll.u32 %v14263_v27, 16  ;;  %v928_v42 = vshrl.u32 %v14264_v32, 16 }
  0x33   : > { %v399_v43 = vsel %vm15593_vm4, 0, %v398_v28  ;;  %v916_v45 = vor.u32 %v914_v26, %v15706_v36  ;;  %v1206_v46 = vsel %vm15683_vm7, %v908_v12, %v1205_v31  ;;  %v931_v48 = vshll.u32 %v14264_v32, 16  ;;  %v457_v31 = vld [vmem:[#allocation2 + $0x14] sm:$0x1] }
  0x34   : > { %v922_v47 = vrot.slane %v920_v37, 7  ;;  %400 = vst [vmem:[#allocation2] sm:$0x1] %v399_v43  ;;  %v21414_v49 = vmov 0  ;;  %v901_v50 = vrot.slane %v15688_v10, 4  ;;  %v15729_v51 = vrot.slane %v928_v42, 7 }
  0x35   : > { %v21415_v49 = vsel %vm15724_vm2, 4294967295, %v21414_v49  ;;  %1207 = vst [vmem:[#allocation2 + $0x24] sm:$0xf] %v1206_v46  ;;  %v455_v52 = vsel %vm15710_vm10, 0, %v454_v34  ;;  %v571_v53 = vsel %vm15724_vm2, 0, %v570_v39  ;;  %v917_v58 = vsel %vm15674_vm6, %v909_v35, %v916_v45  ;;  %v636_v45 = vld [vmem:[%s15616_s24 + $0x40] sm:$0xff] }
  0x36   : > { %21416 = vst [vmem:[#allocation10_spill] sm:$0xff] %v21415_v49  ;;  %v15735_v54 = vld [vmem:[#allocation2 + $0xc] sm:$0xf]  ;;  %v15737_v56 = vld [vmem:[#allocation2 + $0x10] sm:$0xf]  ;;  %v918_v60 = vrot.slane %v15706_v36, 4  ;;  %v925_v61 = vor.u32 %v923_v38, %v922_v47  ;;  %v933_v11 = vor.u32 %v931_v48, %v15729_v51 }
  0x37   : > { %456 = vst [vmem:[#allocation2 + $0x8] sm:$0x1] %v455_v52  ;;  %572 = vst [vmem:[#allocation3 + $0xcc] sm:$0x1] %v571_v53  ;;  %vm1358_vm3 = vsmask.f32 3328  ;;  %v15750_v6 = vcombine.low %v15735_v54, %v15737_v56 }
  0x38   : > { %v1371_v62 = vshll.u32 %v15717_v44, 16  ;;  %v1386_v63 = vshrl.u32 %v15735_v54, 16  ;;  %v1389_v0 = vshll.u32 %v15735_v54, 16  ;;  %v1395_v2 = vshll.u32 %v15737_v56, 16  ;;  %1208 = vst.msk [vmem:[#allocation2 + $0x28] sm:$0xf] %vm386_vm1, %v917_v58  ;;  %vm15823_vm12 = vmor %vm1358_vm3, %vm1359_vm11 }
  0x39   : > { %v1399_v4 = vshrl.u32 %v15737_v56, 16  ;;  %v21116_v8 = vrot.slane %v15737_v56, 5  ;;  %v926_v9 = vrot.slane %v922_v47, 4  ;;  %v15756_v18 = vld [vmem:[#allocation2 + $0x18] sm:$0xf]  ;;  %14629 = vmatprep.mubr.msk.bf16.mxu0 %vm1795_vm9, %v15750_v6  ;;  %v1375_v25 = vshrl.u32 %v15717_v44, 16 }
  0x3a   : > { %v1388_v14 = vrot.slane %v1386_v63, 4  ;;  %v1391_v15 = vrot.slane %v1389_v0, 5  ;;  %v15754_v16 = vrot.slane %v1395_v2, 5  ;;  %v15765_v22 = vld [vmem:[#allocation2 + $0x1c] sm:$0xf]  ;;  %v1410_v24 = vshrl.u32 %v15756_v18, 16 }
  0x3b   : > { %v1401_v17 = vrot.slane %v1399_v4, 4  ;;  %v15761_v21 = vrot.slane %v21116_v8, 4  ;;  %v1413_v28 = vshll.u32 %v15756_v18, 16  ;;  %v15773_v29 = vcombine.low %v15756_v18, %v15765_v22  ;;  %v1303_v30 = vld [vmem:[#allocation2] sm:$0xf]  ;;  %v637_v46 = vld [vmem:[%s15616_s24 + $0x48] sm:$0xff] }
  0x3c   : > { %v1392_v26 = vor.u32 %v1391_v15, %v1388_v14  ;;  %v21115_v33 = vrot.slane %v15765_v22, 5  ;;  %v15777_v34 = vld [vmem:[#allocation2 + $0x24] sm:$0xf]  ;;  %v934_v12 = vsel %vm15674_vm6, %v926_v9, %v933_v11  ;;  %v1213_v35 = vsel %vm15683_vm7, %v925_v61, %v1212_v13  ;;  %v413_v37 = vld [vmem:[#allocation2 + $0x3c] sm:$0x1]  ;;  %v638_v63 = vld [vmem:[%s15616_s24 + $0x50] sm:$0xff] }
  0x3d   : > { %v1402_v27 = vor.u32 %v1401_v17, %v15754_v16  ;;  %v1423_v42 = vshrl.u32 %v15765_v22, 16  ;;  %14630 = vmatmul.mubr.msk.bf16.vlgmr.msra.gmra.mrb[0].mxu0 %vm1795_vm9, %v15773_v29  ;;  %1214 = vst [vmem:[#allocation2 + $0x30] sm:$0xf] %v1213_v35  ;;  %1215 = vst.msk [vmem:[#allocation2 + $0x34] sm:$0xf] %vm386_vm1, %v934_v12  ;;  %v1434_v52 = vshrl.u32 %v15777_v34, 16  ;;  %v675_v35 = vmul.f32 %v15602_v5, %v636_v45 }
  0x3e   : > { %v15783_v39 = vrot.slane %v1392_v26, 4  ;;  %v1305_v44 = vld [vmem:[#allocation2 + $0x8] sm:$0x1]  ;;  %14662 = vmatpush3.bf16.msra.mxu0 %v15698_v23  ;;  %v1362_v53 = vshrl.u32 %v1303_v30, 16  ;;  %v1365_v58 = vshll.u32 %v1303_v30, 16  ;;  %v1373_v61 = vrot.slane %v1371_v62, 5 }
  0x3f   : > { %v15785_v38 = vrot.slane %v1402_v27, 4  ;;  %v416_v47 = vld [vmem:[#allocation2 + $0x48] sm:$0x1]  ;;  %v1437_v0 = vshll.u32 %v15777_v34, 16  ;;  %v1377_v4 = vrot.slane %v1375_v25, 4  ;;  %v1381_v9 = vshll.u32 %v1305_v44, 16 }
  0x40   : > { %v15795_v48 = vld [vmem:[#allocation2 + $0x28] sm:$0xf]  ;;  %v639_v11 = vld [vmem:[%s15616_s24 + $0x58] sm:$0xff]  ;;  %v15812_v13 = vrot.slane %v21115_v33, 4  ;;  %v1364_v62 = vrot.slane %v1362_v53, 4  ;;  %v1367_v14 = vrot.slane %v1365_v58, 5  ;;  %v676_v44 = vmul.f32 %v15602_v5, %v637_v46 }
  0x41   : > { %v15802_v2 = vcombine.low %v15777_v34, %v15795_v48  ;;  %v15808_v23 = vld [vmem:[%s21106_s3 + $0xa] sm:$0x3]  ;;  %v458_v15 = vsel %vm15710_vm10, 0, %v457_v31  ;;  %v460_v17 = vld [vmem:[#allocation2 + $0x20] sm:$0x1]  ;;  %v1447_v25 = vshrl.u32 %v15795_v48, 16  ;;  %v1378_v27 = vor.u32 %v1377_v4, %v1373_v61 }
  0x42   : > { %15283 = vmatprep.subr.msk.bf16.mxu0 %vm1844_vm0, %v15808_v23  ;;  %v21417_v26 = vmov 0  ;;  %v1383_v30 = vrot.slane %v1381_v9, 5  ;;  %459 = vst [vmem:[#allocation2 + $0x14] sm:$0x1] %v458_v15  ;;  %v414_v31 = vsel %vm15593_vm4, 0, %v413_v37  ;;  %v1368_v12 = vor.u32 %v1367_v14, %v1364_v62 }
  0x43   : > { %14633 = vmatprep.mubr.msk.bf16.mxu0 %vm1795_vm9, %v15802_v2  ;;  %v21418_v26 = vsel %vm15823_vm12, 4294967295, %v21417_v26  ;;  %415 = vst [vmem:[#allocation2 + $0x3c] sm:$0x1] %v414_v31  ;;  %v417_v53 = vsel %vm15593_vm4, 0, %v416_v47  ;;  %v1379_v58 = vrot.slane %v1378_v27, 4  ;;  %v677_v32 = vmul.f32 %v15602_v5, %v638_v63 }
  0x44   : > { %21419 = vst [vmem:[#allocation11_spill] sm:$0xff] %v21418_v26  ;;  %418 = vst [vmem:[#allocation2 + $0x48] sm:$0x1] %v417_v53  ;;  %v678_v4 = vmul.f32 %v15602_v5, %v639_v11  ;;  %v461_v9 = vsel %vm15710_vm10, 0, %v460_v17  ;;  %v15837_v15 = vld [vmem:[#allocation2 + $0x30] sm:$0xf]  ;;  %v1398_v45 = vsel %vm15823_vm12, %v15783_v39, %v15754_v16  ;;  %v714_v46 = vadd.f32 %v15621_v7, %v675_v35 }
  0x45   : > { %v15839_v37 = vld [vmem:[#allocation2 + $0x34] sm:$0xf]  ;;  %v1369_v62 = vrot.slane %v1368_v12, 4  ;;  %v715_v47 = vadd.f32 %v15621_v7, %v676_v44  ;;  %462 = vst [vmem:[#allocation2 + $0x20] sm:$0x1] %v461_v9  ;;  %v1458_v63 = vshrl.u32 %v15837_v15, 16  ;;  %v1384_v31 = vsel %vm15823_vm12, %v1379_v58, %v1383_v30 }
  0x46   : > { %v15851_v14 = vcombine.low %v15837_v15, %v15839_v37  ;;  %v1412_v17 = vrot.slane %v1410_v24, 4  ;;  %v746_v12 = vmax.f32 %v714_v46, 0.0  ;;  %v716_v53 = vadd.f32 %v15621_v7, %v677_v32 }
  0x47   : > { %v1374_v27 = vsel %vm15823_vm12, %v1369_v62, %v1373_v61  ;;  %v747_v35 = vmax.f32 %v715_v47, 0.0  ;;  %v717_v9 = vadd.f32 %v15621_v7, %v678_v4  ;;  %v1415_v33 = vrot.slane %v1413_v28, 5  ;;  %v463_v28 = vld [vmem:[#allocation2 + $0x2c] sm:$0x1] }
  0x48   : > { %14634 = vmatmul.mubr.msk.bf16.gmra.mrb[4].mxu0 %vm1795_vm9, %v15851_v14  ;;  %v13756_v44 = vcombine.low %v1374_v27, %v1384_v31  ;;  %v14265_v20 = vpack.c.bf16 %v746_v12, %v746_v12  ;;  %v1419_v61 = vshll.u32 %v15765_v22, 16  ;;  %v15868_v30 = vrot.slane %v1423_v42, 4 }
  0x49   : > { %v1195_v24 = vld [vmem:[#allocation2 + $0x14] sm:$0x1]  ;;  %v14266_v8 = vpack.c.bf16 %v747_v35, %v747_v35  ;;  %v748_v58 = vmax.f32 %v716_v53, 0.0  ;;  %v749_v4 = vmax.f32 %v717_v9, 0.0  ;;  %v1416_v62 = vor.u32 %v1415_v33, %v1412_v17 }
  0x4a   : > { %14527 = vmatprep.mubr.msk.bf16.mxu1 %vm1795_vm9, %v13756_v44  ;;  %v1196_v32 = vsel %vm15593_vm4, %v884_v41, %v1195_v24  ;;  %v937_v46 = vshrl.u32 %v14265_v20, 16  ;;  %v940_v47 = vshll.u32 %v14265_v20, 16  ;;  %v15877_v44 = vrot.slane %v1419_v61, 5  ;;  %v1219_v33 = vld [vmem:[#allocation2 + $0x3c] sm:$0xf] }
  0x4b   : > { %1197 = vst [vmem:[#allocation2 + $0x14] sm:$0x1] %v1196_v32  ;;  %v945_v27 = vshrl.u32 %v14266_v8, 16  ;;  %v948_v31 = vshll.u32 %v14266_v8, 16  ;;  %v14267_v12 = vpack.c.bf16 %v748_v58, %v748_v58  ;;  %v14268_v35 = vpack.c.bf16 %v749_v4, %v749_v4 }
  0x4c   : > { %v1202_v42 = vld [vmem:[#allocation2 + $0x20] sm:$0x1]  ;;  %v15875_v43 = vrot.slane %v1416_v62, 4  ;;  %v939_v57 = vrot.slane %v937_v46, 7  ;;  %v464_v20 = vsel %vm15710_vm10, 0, %v463_v28  ;;  %v1471_v24 = vshrl.u32 %v15839_v37, 16 }
  0x4d   : > { %v15879_v11 = vrot.slane %v945_v27, 7  ;;  %v1203_v41 = vsel %vm15593_vm4, %v901_v50, %v1202_v42  ;;  %v954_v8 = vshrl.u32 %v14267_v12, 16  ;;  %v957_v17 = vshll.u32 %v14267_v12, 16  ;;  %465 = vst [vmem:[#allocation2 + $0x2c] sm:$0x1] %v464_v20 }
  0x4e   : > { %v962_v53 = vshrl.u32 %v14268_v35, 16  ;;  %v965_v9 = vshll.u32 %v14268_v35, 16  ;;  %1204 = vst [vmem:[#allocation2 + $0x20] sm:$0x1] %v1203_v41  ;;  %v942_v61 = vor.u32 %v940_v47, %v939_v57  ;;  %v943_v32 = vrot.slane %v939_v57, 4 }
  0x4f   : > { %v950_v58 = vor.u32 %v948_v31, %v15879_v11  ;;  %v956_v4 = vrot.slane %v954_v8, 7  ;;  %v1422_v62 = vsel %vm15823_vm12, %v15875_v43, %v15877_v44  ;;  %v1357_v28 = vld [vmem:[%s21106_s3] sm:$0x3]  ;;  %v1226_v27 = vld [vmem:[#allocation2 + $0x48] sm:$0xf]  ;;  %v1436_v31 = vrot.slane %v1434_v52, 4 }
  0x50   : > { %v15890_v50 = vrot.slane %v962_v53, 7  ;;  %v1220_v47 = vsel %vm15683_vm7, %v942_v61, %v1219_v33  ;;  %v1439_v12 = vrot.slane %v1437_v0, 5  ;;  %v419_v35 = vld [vmem:[#allocation2 + $0x54] sm:$0x1]  ;;  %15278 = vmatprep.subr.msk.bf16.mxu1 %vm1844_vm0, %v1357_v28  ;;  %v1426_v33 = vor.u32 %v15868_v30, %v15877_v44  ;;  %v640_v8 = vld [vmem:[%s15616_s24 + $0x60] sm:$0xff]  ;;  %v641_v53 = vld [vmem:[%s15616_s24 + $0x68] sm:$0xff] }
  0x51   : > { %v951_v46 = vsel %vm15674_vm6, %v943_v32, %v950_v58  ;;  %1221 = vst [vmem:[#allocation2 + $0x3c] sm:$0xf] %v1220_v47  ;;  %v959_v57 = vor.u32 %v957_v17, %v956_v4  ;;  %v960_v41 = vrot.slane %v956_v4, 4  ;;  %v1443_v61 = vshll.u32 %v15795_v48, 16  ;;  %v422_v58 = vld [vmem:[#allocation2 + $0x60] sm:$0x1] }
  0x52   : > { %v1308_v42 = vld [vmem:[#allocation2 + $0x14] sm:$0x1]  ;;  %1222 = vst.msk [vmem:[#allocation2 + $0x40] sm:$0xf] %vm386_vm1, %v951_v46  ;;  %v967_v20 = vor.u32 %v965_v9, %v15890_v50  ;;  %v1440_v0 = vor.u32 %v1439_v12, %v1436_v31  ;;  %v1449_v9 = vrot.slane %v1447_v25, 4  ;;  %v420_v30 = vsel %vm15593_vm4, 0, %v419_v35 }
  0x53   : > { %v1405_v52 = vshll.u32 %v1308_v42, 16  ;;  %v1227_v17 = vsel %vm15683_vm7, %v959_v57, %v1226_v27  ;;  %421 = vst [vmem:[#allocation2 + $0x54] sm:$0x1] %v420_v30  ;;  %v679_v27 = vmul.f32 %v15602_v5, %v640_v8  ;;  %v680_v48 = vmul.f32 %v15602_v5, %v641_v53  ;;  %v642_v42 = vld [vmem:[%s15616_s24 + $0x70] sm:$0xff]  ;;  %v643_v57 = vld [vmem:[%s15616_s24 + $0x78] sm:$0xff] }
  0x54   : > { %v968_v32 = vsel %vm15674_vm6, %v960_v41, %v967_v20  ;;  %1228 = vst [vmem:[#allocation2 + $0x48] sm:$0xf] %v1227_v17  ;;  %v1209_v46 = vld [vmem:[#allocation2 + $0x2c] sm:$0x1]  ;;  %v15925_v47 = vrot.slane %v1440_v0, 4  ;;  %v1427_v25 = vrot.slane %v1426_v33, 4  ;;  %v681_v16 = vmul.f32 %v15602_v5, %v642_v42 }
  0x55   : > { %v1407_v4 = vrot.slane %v1405_v52, 5  ;;  %1229 = vst.msk [vmem:[#allocation2 + $0x4c] sm:$0xf] %vm386_vm1, %v968_v32  ;;  %v1311_v28 = vld [vmem:[#allocation2 + $0x20] sm:$0x1]  ;;  %v1210_v12 = vsel %vm15593_vm4, %v918_v60, %v1209_v46  ;;  %v15933_v35 = vrot.slane %v1443_v61, 5  ;;  %v718_v20 = vadd.f32 %v15621_v7, %v679_v27 }
  0x56   : > { %v1429_v31 = vshll.u32 %v1311_v28, 16  ;;  %1211 = vst [vmem:[#allocation2 + $0x2c] sm:$0x1] %v1210_v12  ;;  %v719_v33 = vadd.f32 %v15621_v7, %v680_v48  ;;  %v423_v8 = vsel %vm15593_vm4, 0, %v422_v58  ;;  %v644_v52 = vld [vmem:[%s15616_s24 + $0x80] sm:$0xff]  ;;  %v682_v39 = vmul.f32 %v15602_v5, %v643_v57 }
  0x57   : > { %v1408_v41 = vsel %vm15823_vm12, %v15785_v38, %v1407_v4  ;;  %v1446_v38 = vsel %vm15823_vm12, %v15925_v47, %v15933_v35  ;;  %v1450_v53 = vor.u32 %v1449_v9, %v15933_v35  ;;  %424 = vst [vmem:[#allocation2 + $0x60] sm:$0x1] %v423_v8  ;;  %v750_v32 = vmax.f32 %v718_v20, 0.0  ;;  %v466_v35 = vld [vmem:[#allocation2 + $0x38] sm:$0x1] }
  0x58   : > { %v15949_v36 = vcombine.low %v1398_v45, %v1408_v41  ;;  %v1431_v60 = vrot.slane %v1429_v31, 5  ;;  %v15957_v0 = vld [vmem:[#allocation2 + $0x3c] sm:$0xf]  ;;  %v751_v17 = vmax.f32 %v719_v33, 0.0  ;;  %v720_v12 = vadd.f32 %v15621_v7, %v681_v16  ;;  %v15359_v59 = vld [vmem:[#allocation2 + $0x14] sm:$0x1] }
  0x59   : > { %v15959_v61 = vld [vmem:[#allocation2 + $0x40] sm:$0xf]  ;;  %v1482_v45 = vshrl.u32 %v15957_v0, 16  ;;  %v1485_v30 = vshll.u32 %v15957_v0, 16  ;;  %v1451_v28 = vrot.slane %v1450_v53, 4  ;;  %v14269_v46 = vpack.c.bf16 %v750_v32, %v750_v32 }
  0x5a   : > { %14528 = vmatmul.mubr.msk.bf16.vlgmr.msra.gmra.mrb[0].mxu1 %vm1795_vm9, %v15949_v36  ;;  %v1495_v9 = vshrl.u32 %v15959_v61, 16  ;;  %v15970_v58 = vcombine.low %v15957_v0, %v15959_v61  ;;  %v1432_v4 = vsel %vm15823_vm12, %v1427_v25, %v1431_v60  ;;  %v14270_v47 = vpack.c.bf16 %v751_v17, %v751_v17  ;;  %v1233_v34 = vld [vmem:[#allocation2 + $0x54] sm:$0xf] }
  0x5b   : > { %v15976_v27 = vld [vmem:[#allocation2 + $0x48] sm:$0xf]  ;;  %v15985_v31 = vcombine.low %v1422_v62, %v1432_v4  ;;  %v721_v25 = vadd.f32 %v15621_v7, %v682_v39  ;;  %v15990_v42 = vmul.f32 %v15602_v5, %v644_v52  ;;  %v971_v44 = vshrl.u32 %v14269_v46, 16 }
  0x5c   : > { %14637 = vmatprep.mubr.msk.bf16.mxu0 %vm1795_vm9, %v15970_v58  ;;  %v15978_v48 = vld [vmem:[#allocation2 + $0x4c] sm:$0xf]  ;;  %v974_v62 = vshll.u32 %v14269_v46, 16  ;;  %v979_v8 = vshrl.u32 %v14270_v47, 16  ;;  %v982_v60 = vshll.u32 %v14270_v47, 16  ;;  %v752_v52 = vmax.f32 %v720_v12, 0.0 }
  0x5d   : > { %21420 = vst [vmem:[#allocation12_spill] sm:$0xff] %v15985_v31  ;;  %v15997_v33 = vcombine.low %v15976_v27, %v15978_v48  ;;  %14531 = vmatprep.mubr.msk.bf16.mxu1 %vm1795_vm9, %v15985_v31  ;;  %v1314_v43 = vld [vmem:[#allocation2 + $0x2c] sm:$0x1]  ;;  %v753_v32 = vmax.f32 %v721_v25, 0.0  ;;  %v467_v17 = vsel %vm15710_vm10, 0, %v466_v35  ;;  %v973_v16 = vrot.slane %v971_v44, 7 }
  0x5e   : > { %v1453_v53 = vshll.u32 %v1314_v43, 16  ;;  %v16005_v39 = vrot.slane %v979_v8, 7  ;;  %468 = vst [vmem:[#allocation2 + $0x38] sm:$0x1] %v467_v17  ;;  %v1460_v4 = vrot.slane %v1458_v63, 4  ;;  %v21421_v46 = vshll.u32 %v15837_v15, 16 }
  0x5f   : > { %14638 = vmatmul.mubr.msk.bf16.gmra.mrb[8].mxu0 %vm1795_vm9, %v15997_v33  ;;  %v14271_v41 = vpack.c.bf16 %v752_v52, %v752_v52  ;;  %v14272_v10 = vpack.c.bf16 %v753_v32, %v753_v32  ;;  %v1467_v12 = vshll.u32 %v15839_v37, 16  ;;  %v976_v25 = vor.u32 %v974_v62, %v973_v16  ;;  %v469_v15 = vld [vmem:[#allocation2 + $0x44] sm:$0x1] }
  0x60   : > { %v1463_v20 = vrot.slane %v21421_v46, 5  ;;  %v1455_v47 = vrot.slane %v1453_v53, 5  ;;  %v977_v43 = vrot.slane %v973_v16, 4  ;;  %v984_v35 = vor.u32 %v982_v60, %v16005_v39 }
  0x61   : > { %v988_v17 = vshrl.u32 %v14271_v41, 16  ;;  %v991_v63 = vshll.u32 %v14271_v41, 16  ;;  %v996_v57 = vshrl.u32 %v14272_v10, 16  ;;  %v1234_v62 = vsel %vm15683_vm7, %v976_v25, %v1233_v34 }
  0x62   : > { %v1456_v8 = vsel %vm15823_vm12, %v1451_v28, %v1455_v47  ;;  %v985_v53 = vsel %vm15674_vm6, %v977_v43, %v984_v35  ;;  %v999_v52 = vshll.u32 %v14272_v10, 16  ;;  %1235 = vst [vmem:[#allocation2 + $0x54] sm:$0xf] %v1234_v62  ;;  %v1464_v28 = vor.u32 %v1463_v20, %v1460_v4  ;;  %v645_v35 = vld [vmem:[%s15616_s24 + $0x88] sm:$0xff]  ;;  %v647_v62 = vld [vmem:[%s15616_s24 + $0x98] sm:$0xff] }
  0x63   : > { %v16016_v46 = vcombine.low %v1446_v38, %v1456_v8  ;;  %1236 = vst.msk [vmem:[#allocation2 + $0x58] sm:$0xf] %vm386_vm1, %v985_v53  ;;  %v990_v60 = vrot.slane %v988_v17, 7  ;;  %v16023_v32 = vrot.slane %v996_v57, 7  ;;  %v16025_v16 = vrot.slane %v1467_v12, 5  ;;  %v646_v53 = vld [vmem:[%s15616_s24 + $0x90] sm:$0xff] }
  0x64   : > { %v1240_v38 = vld [vmem:[#allocation2 + $0x60] sm:$0xf]  ;;  %v1473_v41 = vrot.slane %v1471_v24, 4  ;;  %v470_v10 = vsel %vm15710_vm10, 0, %v469_v15  ;;  %v1484_v34 = vrot.slane %v1482_v45, 4  ;;  %v1487_v57 = vrot.slane %v1485_v30, 5 }
  0x65   : > { %21422 = vst [vmem:[#allocation13_spill] sm:$0xff] %v16016_v46  ;;  %14532 = vmatmul.mubr.msk.bf16.gmra.mrb[4].mxu1 %vm1795_vm9, %v16016_v46  ;;  %v993_v20 = vor.u32 %v991_v63, %v990_v60  ;;  %v994_v4 = vrot.slane %v990_v60, 4  ;;  %v1001_v47 = vor.u32 %v999_v52, %v16023_v32  ;;  %v1216_v37 = vld [vmem:[#allocation2 + $0x38] sm:$0x1]  ;;  %471 = vst [vmem:[#allocation2 + $0x44] sm:$0x1] %v470_v10 }
  0x66   : > { %v425_v24 = vld [vmem:[#allocation2 + $0x6c] sm:$0x1]  ;;  %v21423_v25 = vrot.slane %v15729_v51, 4  ;;  %v16043_v45 = vrot.slane %v1464_v28, 4  ;;  %v1474_v0 = vor.u32 %v1473_v41, %v16025_v16  ;;  %v1488_v30 = vor.u32 %v1487_v57, %v1484_v34  ;;  %v428_v8 = vld [vmem:[#allocation2 + $0x78] sm:$0x1] }
  0x67   : > { %v1002_v17 = vsel %vm15674_vm6, %v994_v4, %v1001_v47  ;;  %v1241_v63 = vsel %vm15683_vm7, %v993_v20, %v1240_v38  ;;  %v1491_v15 = vshll.u32 %v15959_v61, 16  ;;  %v1497_v51 = vrot.slane %v1495_v9, 4  ;;  %v472_v52 = vld [vmem:[#allocation2 + $0x50] sm:$0x1] }
  0x68   : > { %v1217_v43 = vsel %vm15593_vm4, %v21423_v25, %v1216_v37  ;;  %1242 = vst [vmem:[#allocation2 + $0x60] sm:$0xf] %v1241_v63  ;;  %1243 = vst.msk [vmem:[#allocation2 + $0x64] sm:$0xf] %vm386_vm1, %v1002_v17  ;;  %v1470_v60 = vsel %vm15823_vm12, %v16043_v45, %v16025_v16  ;;  %v1475_v28 = vrot.slane %v1474_v0, 4  ;;  %v16061_v41 = vrot.slane %v1488_v30, 4 }
  0x69   : > { %1218 = vst [vmem:[#allocation2 + $0x38] sm:$0x1] %v1217_v43  ;;  %v426_v38 = vsel %vm15593_vm4, 0, %v425_v24  ;;  %v16065_v10 = vrot.slane %v1491_v15, 5  ;;  %v684_v61 = vmul.f32 %v15602_v5, %v645_v35  ;;  %v722_v9 = vadd.f32 %v15621_v7, %v15990_v42  ;;  %v16072_v57 = vld [vmem:[#allocation2 + $0x54] sm:$0xf] }
  0x6a   : > { %427 = vst [vmem:[#allocation2 + $0x6c] sm:$0x1] %v426_v38  ;;  %v429_v34 = vsel %vm15593_vm4, 0, %v428_v8  ;;  %v16074_v16 = vld [vmem:[#allocation2 + $0x58] sm:$0xf]  ;;  %v685_v20 = vmul.f32 %v15602_v5, %v646_v53  ;;  %v686_v4 = vmul.f32 %v15602_v5, %v647_v62  ;;  %v473_v47 = vsel %vm15710_vm10, 0, %v472_v52 }
  0x6b   : > { %430 = vst [vmem:[#allocation2 + $0x78] sm:$0x1] %v429_v34  ;;  %v21424_v37 = vshrl.u32 %v15976_v27, 16  ;;  %v16087_v45 = vcombine.low %v16072_v57, %v16074_v16  ;;  %474 = vst [vmem:[#allocation2 + $0x50] sm:$0x1] %v473_v47  ;;  %v1498_v35 = vor.u32 %v1497_v51, %v16065_v10  ;;  %v723_v8 = vadd.f32 %v15621_v7, %v684_v61  ;;  %v648_v63 = vld [vmem:[%s15616_s24 + $0xa0] sm:$0xff] }
  0x6c   : > { %v1223_v0 = vld [vmem:[#allocation2 + $0x44] sm:$0x1]  ;;  %v754_v17 = vmax.f32 %v722_v9, 0.0  ;;  %v21425_v15 = vrot.slane %v15879_v11, 4  ;;  %v724_v62 = vadd.f32 %v15621_v7, %v685_v20  ;;  %v725_v52 = vadd.f32 %v15621_v7, %v686_v4 }
  0x6d   : > { %v1508_v24 = vrot.slane %v21424_v37, 4  ;;  %14641 = vmatprep.mubr.msk.bf16.mxu0 %vm1795_vm9, %v16087_v45  ;;  %v21426_v38 = vshll.u32 %v15976_v27, 16  ;;  %v16106_v61 = vrot.slane %v1498_v35, 4  ;;  %v755_v9 = vmax.f32 %v723_v8, 0.0 }
  0x6e   : > { %v1224_v53 = vsel %vm15593_vm4, %v21425_v15, %v1223_v0  ;;  %v14273_v47 = vpack.c.bf16 %v754_v17, %v754_v17  ;;  %v1515_v37 = vshll.u32 %v15978_v48, 16  ;;  %v756_v15 = vmax.f32 %v724_v62, 0.0 }
  0x6f   : > { %v1511_v34 = vrot.slane %v21426_v38, 5  ;;  %1225 = vst [vmem:[#allocation2 + $0x44] sm:$0x1] %v1224_v53  ;;  %v16109_v12 = vld [vmem:[#allocation2 + $0x60] sm:$0xf]  ;;  %v16114_v7 = vmul.f32 %v15602_v5, %v648_v63  ;;  %v14274_v53 = vpack.c.bf16 %v755_v9, %v755_v9  ;;  %vm2317_vm13 = vcmask 1042432  }
  0x70   : > { %v1317_v51 = vld [vmem:[#allocation2 + $0x38] sm:$0x1]  ;;  %v16111_v11 = vld [vmem:[#allocation2 + $0x64] sm:$0xf]  ;;  %v1005_v38 = vshrl.u32 %v14273_v47, 16  ;;  %v1008_v44 = vshll.u32 %v14273_v47, 16  ;;  %v14275_v5 = vpack.c.bf16 %v756_v15, %v756_v15 }
  0x71   : > { %v1477_v0 = vshll.u32 %v1317_v51, 16  ;;  %v1512_v20 = vor.u32 %v1511_v34, %v1508_v24  ;;  %v16121_v8 = vcombine.low %v16109_v12, %v16111_v11  ;;  %v757_v24 = vmax.f32 %v725_v52, 0.0  ;;  %v1247_v9 = vld [vmem:[#allocation2 + $0x6c] sm:$0xf] }
  0x72   : > { %v1230_v63 = vld [vmem:[#allocation2 + $0x50] sm:$0x1]  ;;  %v16127_v34 = vrot.slane %v1515_v37, 5  ;;  %v1007_v35 = vrot.slane %v1005_v38, 7  ;;  %v1013_v4 = vshrl.u32 %v14274_v53, 16  ;;  %v1016_v27 = vshll.u32 %v14274_v53, 16 }
  0x73   : > { %21427 = vst [vmem:[#allocation14_spill] sm:$0xff] %v16121_v8  ;;  %v1479_v17 = vrot.slane %v1477_v0, 5  ;;  %14642 = vmatmul.mubr.msk.bf16.gmra.mrb[12].mxu0 %vm1795_vm9, %v16121_v8  ;;  %v16125_v62 = vrot.slane %v1512_v20, 4  ;;  %v14276_v47 = vpack.c.bf16 %v757_v24, %v757_v24  ;;  %v1022_v43 = vshrl.u32 %v14275_v5, 16  ;;  %v475_v38 = vld [vmem:[#allocation2 + $0x5c] sm:$0x1] }
  0x74   : > { %v1025_v25 = vshll.u32 %v14275_v5, 16  ;;  %v1010_v52 = vor.u32 %v1008_v44, %v1007_v35  ;;  %v1011_v15 = vrot.slane %v1007_v35, 4  ;;  %v16133_v42 = vrot.slane %v1013_v4, 7  ;;  %v1254_v35 = vld [vmem:[#allocation2 + $0x78] sm:$0xf] }
  0x75   : > { %v1480_v51 = vsel %vm15823_vm12, %v1475_v28, %v1479_v17  ;;  %v21428_v37 = vrot.slane %v15890_v50, 4  ;;  %v1030_v17 = vshrl.u32 %v14276_v47, 16  ;;  %v1033_v53 = vshll.u32 %v14276_v47, 16 }
  0x76   : > { %v16131_v0 = vcombine.low %v1470_v60, %v1480_v51  ;;  %v1320_v30 = vld [vmem:[#allocation2 + $0x44] sm:$0x1]  ;;  %v1024_v60 = vrot.slane %v1022_v43, 7  ;;  %v1018_v44 = vor.u32 %v1016_v27, %v16133_v42  ;;  %v1248_v50 = vsel %vm15683_vm7, %v1010_v52, %v1247_v9 }
  0x77   : > { %v1231_v20 = vsel %vm15593_vm4, %v21428_v37, %v1230_v63  ;;  %v1501_v28 = vshll.u32 %v1320_v30, 16  ;;  %v1518_v24 = vsel %vm15823_vm12, %v16125_v62, %v16127_v34  ;;  %1249 = vst [vmem:[#allocation2 + $0x6c] sm:$0xf] %v1248_v50  ;;  %v16149_v63 = vrot.slane %v1030_v17, 7 }
  0x78   : > { %14535 = vmatprep.mubr.msk.bf16.mxu1 %vm1795_vm9, %v16131_v0  ;;  %1232 = vst [vmem:[#allocation2 + $0x50] sm:$0x1] %v1231_v20  ;;  %v1027_v43 = vor.u32 %v1025_v25, %v1024_v60  ;;  %v1028_v5 = vrot.slane %v1024_v60, 4  ;;  %v1019_v27 = vsel %vm15674_vm6, %v1011_v15, %v1018_v44  ;;  %v21429_v51 = vshrl.u32 %v15978_v48, 16  ;;  %v431_v20 = vld [vmem:[#allocation2 + $0x84] sm:$0x1] }
  0x79   : > { %v1503_v30 = vrot.slane %v1501_v28, 5  ;;  %v476_v9 = vsel %vm15710_vm10, 0, %v475_v38  ;;  %v21430_v52 = vshrl.u32 %v16072_v57, 16  ;;  %v649_v28 = vld [vmem:[%s15616_s24 + $0xa8] sm:$0xff]  ;;  %1250 = vst.msk [vmem:[#allocation2 + $0x70] sm:$0xf] %vm386_vm1, %v1019_v27  ;;  %v1035_v15 = vor.u32 %v1033_v53, %v16149_v63 }
  0x7a   : > { %v1521_v47 = vrot.slane %v21429_v51, 4  ;;  %v1255_v60 = vsel %vm15683_vm7, %v1027_v43, %v1254_v35  ;;  %477 = vst [vmem:[#allocation2 + $0x5c] sm:$0x1] %v476_v9  ;;  %v21431_v17 = vsel %vm15823_vm12, %v16061_v41, %v16065_v10  ;;  %v21433_v44 = vshll.u32 %v16072_v57, 16  ;;  %v650_v27 = vld [vmem:[%s15616_s24 + $0xb0] sm:$0xff] }
  0x7b   : > { %v1532_v37 = vrot.slane %v21430_v52, 4  ;;  %v1504_v25 = vsel %vm15823_vm12, %v16106_v61, %v1503_v30  ;;  %1256 = vst [vmem:[#allocation2 + $0x78] sm:$0xf] %v1255_v60  ;;  %v1539_v50 = vshll.u32 %v16074_v16, 16  ;;  %v434_v30 = vld [vmem:[#allocation2 + $0x90] sm:$0x1]  ;;  %v1036_v35 = vsel %vm15674_vm6, %v1028_v5, %v1035_v15 }
  0x7c   : > { %v16173_v38 = vcombine.low %v21431_v17, %v1504_v25  ;;  %v1522_v61 = vor.u32 %v1521_v47, %v16127_v34  ;;  %v1535_v53 = vrot.slane %v21433_v44, 5  ;;  %v21434_v43 = vshrl.u32 %v16074_v16, 16  ;;  %v16189_v10 = vld [vmem:[%s21104_s1] ss:$0 sm:$0xff]  ;;  %v651_v47 = vld [vmem:[%s15616_s24 + $0xb8] sm:$0xff] }
  0x7d   : > { %v432_v41 = vsel %vm15593_vm4, 0, %v431_v20  ;;  %v688_v57 = vmul.f32 %v16189_v10, %v649_v28  ;;  %1257 = vst.msk [vmem:[#allocation2 + $0x7c] sm:$0xf] %vm386_vm1, %v1036_v35  ;;  %v16198_v52 = vrot.slane %v1539_v50, 5  ;;  %v16203_v20 = vld [vmem:[%s21105_s2] ss:$0 sm:$0xff] }
  0x7e   : > { %21432 = vst [vmem:[#allocation15_spill] sm:$0xff] %v16173_v38  ;;  %v1545_v51 = vrot.slane %v21434_v43, 4  ;;  %14536 = vmatmul.mubr.msk.bf16.gmra.mrb[8].mxu1 %vm1795_vm9, %v16173_v38  ;;  %v1523_v16 = vrot.slane %v1522_v61, 4  ;;  %v1536_v9 = vor.u32 %v1535_v53, %v1532_v37  ;;  %433 = vst [vmem:[#allocation2 + $0x84] sm:$0x1] %v432_v41  ;;  %v726_v28 = vadd.f32 %v16203_v20, %v16114_v7 }
  0x7f   : > { %v16196_v5 = vld [vmem:[#allocation2 + $0x50] sm:$0x1]  ;;  %v727_v15 = vadd.f32 %v16203_v20, %v688_v57  ;;  %v435_v60 = vsel %vm15593_vm4, 0, %v434_v30  ;;  %v689_v37 = vmul.f32 %v16189_v10, %v650_v27  ;;  %v16212_v17 = vld [vmem:[#allocation2 + $0x6c] sm:$0xf]  ;;  %v690_v7 = vmul.f32 %v16189_v10, %v651_v47  ;;  %v652_v47 = vld [vmem:[%s15616_s24 + $0xc0] sm:$0xff] }
  0x80   : > { %v1525_v25 = vshll.u32 %v16196_v5, 16  ;;  %v16214_v61 = vrot.slane %v1536_v9, 4  ;;  %v1546_v44 = vor.u32 %v1545_v51, %v16198_v52  ;;  %v758_v53 = vmax.f32 %v726_v28, 0.0  ;;  %436 = vst [vmem:[#allocation2 + $0x90] sm:$0x1] %v435_v60 }
  0x81   : > { %v759_v41 = vmax.f32 %v727_v15, 0.0  ;;  %v16220_v30 = vld [vmem:[#allocation2 + $0x70] sm:$0xf]  ;;  %v1237_v27 = vld [vmem:[#allocation2 + $0x5c] sm:$0x1]  ;;  %v728_v28 = vadd.f32 %v16203_v20, %v689_v37  ;;  %v21436_v4 = vrot.slane %v16005_v39, 4 }
  0x82   : > { %v1527_v43 = vrot.slane %v1525_v25, 5  ;;  %v16226_v9 = vrot.slane %v1546_v44, 4  ;;  %v14277_v51 = vpack.c.bf16 %v758_v53, %v758_v53  ;;  %v16233_v25 = vcombine.low %v16212_v17, %v16220_v30  ;;  %v16235_v15 = vld [vmem:[#allocation2 + $0x78] sm:$0xf]  ;;  %v478_v35 = vld [vmem:[#allocation2 + $0x68] sm:$0x1] }
  0x83   : > { %v1238_v44 = vsel %vm15593_vm4, %v21436_v4, %v1237_v27  ;;  %v14278_v57 = vpack.c.bf16 %v759_v41, %v759_v41  ;;  %v16258_v27 = vmul.f32 %v16189_v10, %v652_v47  ;;  %v760_v41 = vmax.f32 %v728_v28, 0.0 }
  0x84   : > { %21435 = vst [vmem:[#allocation16_spill] sm:$0xff] %v16233_v25  ;;  %v1528_v48 = vsel %vm15823_vm12, %v1523_v16, %v1527_v43  ;;  %1239 = vst [vmem:[#allocation2 + $0x5c] sm:$0x1] %v1238_v44  ;;  %14645 = vmatprep.mubr.msk.bf16.mxu0 %vm1795_vm9, %v16233_v25  ;;  %v16254_v39 = vld [vmem:[#allocation2 + $0x7c] sm:$0xf]  ;;  %v1039_v4 = vshrl.u32 %v14277_v51, 16  ;;  %v729_v43 = vadd.f32 %v16203_v20, %v690_v7 }
  0x85   : > { %v16250_v60 = vcombine.low %v1518_v24, %v1528_v48  ;;  %v1042_v16 = vshll.u32 %v14277_v51, 16  ;;  %v16263_v62 = vcombine.low %v16235_v15, %v16254_v39  ;;  %v1047_v34 = vshrl.u32 %v14278_v57, 16  ;;  %v1261_v47 = vld [vmem:[#allocation2 + $0x84] sm:$0xf] }
  0x86   : > { %v1050_v24 = vshll.u32 %v14278_v57, 16  ;;  %v1041_v48 = vrot.slane %v1039_v4, 7  ;;  %v761_v44 = vmax.f32 %v729_v43, 0.0  ;;  %v479_v7 = vsel %vm15710_vm10, 0, %v478_v35 }
  0x87   : > { %21437 = vst [vmem:[#allocation17_spill] sm:$0xff] %v16250_v60  ;;  %21438 = vst [vmem:[#allocation18_spill] sm:$0xff] %v16263_v62  ;;  %14539 = vmatprep.mubr.msk.bf16.mxu1 %vm1795_vm9, %v16250_v60  ;;  %14646 = vmatmul.mubr.msk.bf16.gmra.mrb[16].mxu0 %vm1795_vm9, %v16263_v62  ;;  %v16271_v51 = vrot.slane %v1047_v34, 7  ;;  %v21439_v37 = vshrl.u32 %v16109_v12, 16  ;;  %v21440_v50 = vshll.u32 %v16109_v12, 16  ;;  %v1563_v57 = vshll.u32 %v16111_v11, 16 }
  0x88   : > { %480 = vst [vmem:[#allocation2 + $0x68] sm:$0x1] %v479_v7  ;;  %v1044_v28 = vor.u32 %v1042_v16, %v1041_v48  ;;  %v1045_v4 = vrot.slane %v1041_v48, 4  ;;  %v14279_v43 = vpack.c.bf16 %v760_v41, %v760_v41  ;;  %v14280_v49 = vpack.c.bf16 %v761_v44, %v761_v44  ;;  %v481_v7 = vld [vmem:[#allocation2 + $0x74] sm:$0x1] }
  0x89   : > { %v1556_v53 = vrot.slane %v21439_v37, 4  ;;  %v1559_v19 = vrot.slane %v21440_v50, 5  ;;  %v1052_v35 = vor.u32 %v1050_v24, %v16271_v51  ;;  %v16280_v62 = vrot.slane %v1563_v57, 5 }
  0x8a   : > { %v1262_v12 = vsel %vm15683_vm7, %v1044_v28, %v1261_v47  ;;  %v1056_v50 = vshrl.u32 %v14279_v43, 16  ;;  %v1059_v37 = vshll.u32 %v14279_v43, 16  ;;  %v1064_v8 = vshrl.u32 %v14280_v49, 16  ;;  %v1268_v43 = vld [vmem:[#allocation2 + $0x90] sm:$0xf] }
  0x8b   : > { %v1560_v34 = vor.u32 %v1559_v19, %v1556_v53  ;;  %v16282_v25 = vld [vmem:[#allocation2 + $0x5c] sm:$0x1]  ;;  %v1053_v48 = vsel %vm15674_vm6, %v1045_v4, %v1052_v35  ;;  %1263 = vst [vmem:[#allocation2 + $0x84] sm:$0xf] %v1262_v12  ;;  %v1067_v24 = vshll.u32 %v14280_v49, 16  ;;  %v21441_v44 = vshrl.u32 %v16111_v11, 16 }
  0x8c   : > { %v1549_v16 = vshll.u32 %v16282_v25, 16  ;;  %1264 = vst.msk [vmem:[#allocation2 + $0x88] sm:$0xf] %vm386_vm1, %v1053_v48  ;;  %v1058_v19 = vrot.slane %v1056_v50, 7  ;;  %v16292_v53 = vrot.slane %v1064_v8, 7  ;;  %v482_v57 = vsel %vm15710_vm10, 0, %v481_v7 }
  0x8d   : > { %v16289_v41 = vrot.slane %v1560_v34, 4  ;;  %v1569_v47 = vrot.slane %v21441_v44, 4  ;;  %483 = vst [vmem:[#allocation2 + $0x74] sm:$0x1] %v482_v57  ;;  %v21442_v4 = vshrl.u32 %v16212_v17, 16  ;;  %v21443_v8 = vshll.u32 %v16212_v17, 16 }
  0x8e   : > { %v1551_v28 = vrot.slane %v1549_v16, 5  ;;  %v1061_v12 = vor.u32 %v1059_v37, %v1058_v19  ;;  %v1062_v11 = vrot.slane %v1058_v19, 4  ;;  %v1069_v50 = vor.u32 %v1067_v24, %v16292_v53  ;;  %v653_v7 = vld [vmem:[%s15616_s24 + $0xc8] sm:$0xff] }
  0x8f   : > { %v1580_v35 = vrot.slane %v21442_v4, 4  ;;  %v1583_v34 = vrot.slane %v21443_v8, 5  ;;  %v1244_v16 = vld [vmem:[#allocation2 + $0x68] sm:$0x1]  ;;  %v21444_v44 = vrot.slane %v16023_v32, 4  ;;  %v1570_v4 = vor.u32 %v1569_v47, %v16280_v62 }
  0x90   : > { %v1552_v48 = vsel %vm15823_vm12, %v16226_v9, %v1551_v28  ;;  %v484_v8 = vld [vmem:[#allocation2 + $0x80] sm:$0x1]  ;;  %v21445_v37 = vsel %vm15823_vm12, %v16214_v61, %v16198_v52  ;;  %v1070_v19 = vsel %vm15674_vm6, %v1062_v11, %v1069_v50  ;;  %v1269_v32 = vsel %vm15683_vm7, %v1061_v12, %v1268_v43 }
  0x91   : > { %v1245_v57 = vsel %vm15593_vm4, %v21444_v44, %v1244_v16  ;;  %v1584_v17 = vor.u32 %v1583_v34, %v1580_v35  ;;  %v16321_v24 = vcombine.low %v21445_v37, %v1552_v48  ;;  %v1587_v9 = vshll.u32 %v16220_v30, 16  ;;  %1270 = vst [vmem:[#allocation2 + $0x90] sm:$0xf] %v1269_v32  ;;  %1271 = vst.msk [vmem:[#allocation2 + $0x94] sm:$0xf] %vm386_vm1, %v1070_v19 }
  0x92   : > { %1246 = vst [vmem:[#allocation2 + $0x68] sm:$0x1] %v1245_v57  ;;  %v16329_v47 = vrot.slane %v1570_v4, 4  ;;  %v21447_v52 = vshrl.u32 %v16220_v30, 16  ;;  %v16337_v35 = vsel %vm1844_vm0, %v15808_v23, 0  ;;  %v485_v11 = vsel %vm15710_vm10, 0, %v484_v8 }
  0x93   : > { %21446 = vst [vmem:[#allocation19_spill] sm:$0xff] %v16321_v24  ;;  %v16331_v28 = vrot.slane %v1584_v17, 4  ;;  %v487_v34 = vld [vmem:[#allocation2 + $0x8c] sm:$0x1]  ;;  %14540 = vmatmul.mubr.msk.bf16.gmra.mrb[12].mxu1 %vm1795_vm9, %v16321_v24  ;;  %v16341_v43 = vld [vmem:[#allocation2 + $0x84] sm:$0xf] }
  0x94   : > { %v1593_v61 = vrot.slane %v21447_v52, 4  ;;  %21448 = vst [vmem:[#allocation20_spill] sm:$0xff] %v16341_v43  ;;  %v16343_v12 = vrot.slane %v1587_v9, 5  ;;  %v21449_v50 = vshrl.u32 %v16235_v15, 16  ;;  %v21450_v30 = vshll.u32 %v16235_v15, 16 }
  0x95   : > { %v16351_v44 = vld [vmem:[#allocation2 + $0x88] sm:$0xf]  ;;  %v1626_v23 = vshrl.u32 %v16341_v43, 16  ;;  %v1629_v57 = vshll.u32 %v16341_v43, 16  ;;  %486 = vst [vmem:[#allocation2 + $0x80] sm:$0x1] %v485_v11 }
  0x96   : > { %v1604_v16 = vrot.slane %v21449_v50, 4  ;;  %v1607_v48 = vrot.slane %v21450_v30, 5  ;;  %21451 = vst [vmem:[#allocation21_spill] sm:$0xff] %v16351_v44  ;;  %v1611_v4 = vshll.u32 %v16254_v39, 16  ;;  %v21452_v17 = vshrl.u32 %v16254_v39, 16 }
  0x97   : > { %v1639_v8 = vshrl.u32 %v16351_v44, 16  ;;  %v16361_v19 = vcombine.low %v16341_v43, %v16351_v44  ;;  %v1251_v15 = vld [vmem:[#allocation2 + $0x74] sm:$0x1]  ;;  %v1594_v9 = vor.u32 %v1593_v61, %v16343_v12  ;;  %v490_v52 = vld [vmem:[#allocation2 + $0x98] sm:$0x1]  ;;  %v21454_v11 = vrot.slane %v16133_v42, 4 }
  0x98   : > { %v1617_v37 = vrot.slane %v21452_v17, 4  ;;  %v1608_v50 = vor.u32 %v1607_v48, %v1604_v16  ;;  %v16372_v30 = vrot.slane %v1611_v4, 5  ;;  %v488_v17 = vsel %vm15710_vm10, 0, %v487_v34 }
  0x99   : > { %21453 = vst [vmem:[#allocation22_spill] sm:$0xff] %v16361_v19  ;;  %v1252_v39 = vsel %vm15593_vm4, %v21454_v11, %v1251_v15  ;;  %14649 = vmatprep.mubr.msk.bf16.mxu0 %vm1795_vm9, %v16361_v19  ;;  %v16379_v32 = vrot.slane %v1594_v9, 4  ;;  %489 = vst [vmem:[#allocation2 + $0x8c] sm:$0x1] %v488_v17  ;;  %v1628_v61 = vrot.slane %v1626_v23, 4  ;;  %v1631_v1 = vrot.slane %v1629_v57, 5 }
  0x9a   : > { %1253 = vst [vmem:[#allocation2 + $0x74] sm:$0x1] %v1252_v39  ;;  %v1635_v42 = vshll.u32 %v16351_v44, 16  ;;  %v16382_v49 = vld [vmem:[#allocation2 + $0x68] sm:$0x1]  ;;  %v16384_v16 = vrot.slane %v1608_v50, 4  ;;  %v1618_v48 = vor.u32 %v1617_v37, %v16372_v30  ;;  %v692_v39 = vmul.f32 %v16189_v10, %v653_v7 }
  0x9b   : > { %21455 = vst [vmem:[#allocation23_spill] sm:$0xff] %v16382_v49  ;;  %v1641_v4 = vrot.slane %v1639_v8, 4  ;;  %v491_v34 = vsel %vm15710_vm10, 0, %v490_v52  ;;  %v16389_v15 = vld [vmem:[#allocation2 + $0x90] sm:$0xf]  ;;  %v1573_v9 = vshll.u32 %v16382_v49, 16  ;;  %v1632_v23 = vor.u32 %v1631_v1, %v1628_v61 }
  0x9c   : > { %21456 = vst [vmem:[#allocation24_spill] sm:$0xff] %v16389_v15  ;;  %v16391_v11 = vld [vmem:[#allocation2 + $0x94] sm:$0xf]  ;;  %v16394_v57 = vrot.slane %v1635_v42, 5  ;;  %492 = vst [vmem:[#allocation2 + $0x98] sm:$0x1] %v491_v34 }
  0x9d   : > { %21457 = vst [vmem:[#allocation25_spill] sm:$0xff] %v16391_v11  ;;  %v1650_v50 = vshrl.u32 %v16389_v15, 16  ;;  %v1653_v37 = vshll.u32 %v16389_v15, 16  ;;  %v1663_v8 = vshrl.u32 %v16391_v11, 16  ;;  %v16402_v52 = vcombine.low %v16389_v15, %v16391_v11  ;;  %v437_v17 = vld [vmem:[#allocation2 + $0x9c] sm:$0x1] }
  0x9e   : > { %v1575_v19 = vrot.slane %v1573_v9, 5  ;;  %v1258_v43 = vld [vmem:[#allocation2 + $0x80] sm:$0x1]  ;;  %v16408_v61 = vrot.slane %v1618_v48, 4  ;;  %v16410_v7 = vrot.slane %v1632_v23, 4  ;;  %v21459_v42 = vrot.slane %v16149_v63, 4 }
  0x9f   : > { %21458 = vst [vmem:[#allocation26_spill] sm:$0xff] %v16402_v52  ;;  %14650 = vmatmul.mubr.msk.bf16.gmra.mrb[20].mxu0 %vm1795_vm9, %v16402_v52  ;;  %v1642_v9 = vor.u32 %v1641_v4, %v16394_v57  ;;  %v1652_v15 = vrot.slane %v1650_v50, 4  ;;  %v1655_v44 = vrot.slane %v1653_v37, 5  ;;  %v493_v49 = vld [vmem:[#allocation2 + $0xa4] sm:$0x1]  ;;  %v1665_v4 = vrot.slane %v1663_v8, 4 }
  0xa0   : > { %v1259_v34 = vsel %vm15593_vm4, %v21459_v42, %v1258_v43  ;;  %v1576_v48 = vsel %vm15823_vm12, %v16329_v47, %v1575_v19  ;;  %14663 = vmatprep.mubr.msk.bf16.mxu0 %vm1795_vm9, %v15949_v36  ;;  %v1659_v43 = vshll.u32 %v16391_v11, 16  ;;  %v440_v23 = vld [vmem:[#allocation2 + $0xa8] sm:$0x1]  ;;  %v496_v50 = vld [vmem:[#allocation2 + $0xb0] sm:$0x1]  ;;  %v21460_v47 = vsel %vm15823_vm12, %v16289_v41, %v16280_v62 }
  0xa1   : > { %1260 = vst [vmem:[#allocation2 + $0x80] sm:$0x1] %v1259_v34  ;;  %v16434_v19 = vcombine.low %v21460_v47, %v1576_v48  ;;  %v16436_v36 = vld [vmem:[#allocation2 + $0x74] sm:$0x1]  ;;  %v1265_v37 = vld [vmem:[#allocation2 + $0x8c] sm:$0x1]  ;;  %v1656_v34 = vor.u32 %v1655_v44, %v1652_v15 }
  0xa2   : > { %v16438_v42 = vrot.slane %v1642_v9, 4  ;;  %v438_v63 = vsel %vm15593_vm4, 0, %v437_v17  ;;  %v1597_v8 = vshll.u32 %v16436_v36, 16  ;;  %v21461_v1 = vrot.slane %v16271_v51, 4  ;;  %v654_v41 = vld [vmem:[%s15616_s24 + $0xd0] sm:$0xff]  ;;  %v655_v9 = vld [vmem:[%s15616_s24 + $0xd8] sm:$0xff] }
  0xa3   : > { %v16447_v11 = vrot.slane %v1659_v43, 5  ;;  %439 = vst [vmem:[#allocation2 + $0x9c] sm:$0x1] %v438_v63  ;;  %v494_v62 = vsel %vm15710_vm10, 0, %v493_v49  ;;  %14543 = vmatprep.mubr.msk.bf16.mxu1 %vm1795_vm9, %v16434_v19  ;;  %v1272_v44 = vld [vmem:[#allocation2 + $0x98] sm:$0x1]  ;;  %v730_v51 = vadd.f32 %v16203_v20, %v16258_v27  ;;  %v731_v17 = vadd.f32 %v16203_v20, %v692_v39 }
  0xa4   : > { %v1266_v52 = vsel %vm15593_vm4, %v21461_v1, %v1265_v37  ;;  %v16455_v15 = vrot.slane %v1656_v34, 4  ;;  %495 = vst [vmem:[#allocation2 + $0xa4] sm:$0x1] %v494_v62  ;;  %v441_v1 = vsel %vm15593_vm4, 0, %v440_v23  ;;  %v443_v49 = vld [vmem:[#allocation2 + $0xb4] sm:$0x1] }
  0xa5   : > { %1267 = vst [vmem:[#allocation2 + $0x8c] sm:$0x1] %v1266_v52  ;;  %v1599_v48 = vrot.slane %v1597_v8, 5  ;;  %v21462_v63 = vrot.slane %v16292_v53, 4  ;;  %v1666_v43 = vor.u32 %v1665_v4, %v16447_v11  ;;  %442 = vst [vmem:[#allocation2 + $0xa8] sm:$0x1] %v441_v1  ;;  %v693_v53 = vmul.f32 %v16189_v10, %v654_v41 }
  0xa6   : > { %v497_v47 = vsel %vm15710_vm10, 0, %v496_v50  ;;  %v762_v39 = vmax.f32 %v730_v51, 0.0  ;;  %v763_v23 = vmax.f32 %v731_v17, 0.0  ;;  %v499_v37 = vld [vmem:[#allocation2 + $0xbc] sm:$0x1]  ;;  %v656_v34 = vld [vmem:[%s15616_s24 + $0xe0] sm:$0xff]  ;;  %v694_v50 = vmul.f32 %v16189_v10, %v655_v9 }
  0xa7   : > { %v1273_v52 = vsel %vm15593_vm4, %v21462_v63, %v1272_v44  ;;  %498 = vst [vmem:[#allocation2 + $0xb0] sm:$0x1] %v497_v47  ;;  %v1600_v4 = vsel %vm15823_vm12, %v16379_v32, %v1599_v48  ;;  %v16478_v8 = vrot.slane %v1666_v43, 4  ;;  %v444_v62 = vsel %vm15593_vm4, 0, %v443_v49  ;;  %v16486_v44 = vld [vmem:[%s21106_s3 + $0xc] sm:$0x3]  ;;  %14664 = vmatmul.mubr.msk.bf16.vlgmr.msra.gmra.mrb[0].mxu0 %vm1795_vm9, %v15985_v31 }
  0xa8   : > { %1274 = vst [vmem:[#allocation2 + $0x98] sm:$0x1] %v1273_v52  ;;  %v21463_v41 = vsel %vm15823_vm12, %v16331_v28, %v16343_v12  ;;  %v16497_v32 = vld [vmem:[#allocation2 + $0x80] sm:$0x1]  ;;  %v14281_v9 = vpack.c.bf16 %v762_v39, %v762_v39  ;;  %v14282_v17 = vpack.c.bf16 %v763_v23, %v763_v23  ;;  %v732_v1 = vadd.f32 %v16203_v20, %v693_v53  ;;  %v657_v49 = vld [vmem:[%s15616_s24 + $0xe8] sm:$0xff] }
  0xa9   : > { %v16493_v51 = vcombine.low %v21463_v41, %v1600_v4  ;;  %445 = vst [vmem:[#allocation2 + $0xb4] sm:$0x1] %v444_v62  ;;  %14696 = vmatpush3.bf16.msra.mxu0 %v16337_v35  ;;  %v1621_v48 = vshll.u32 %v16497_v32, 16  ;;  %14667 = vmatprep.mubr.msk.bf16.mxu0 %vm1795_vm9, %v16016_v46  ;;  %v733_v28 = vadd.f32 %v16203_v20, %v694_v50  ;;  %v500_v12 = vsel %vm15710_vm10, 0, %v499_v37 }
  0xaa   : > { %v695_v63 = vmul.f32 %v16189_v10, %v656_v34  ;;  %v1073_v52 = vshrl.u32 %v14281_v9, 16  ;;  %v1076_v43 = vshll.u32 %v14281_v9, 16  ;;  %v1081_v47 = vshrl.u32 %v14282_v17, 16  ;;  %501 = vst [vmem:[#allocation2 + $0xbc] sm:$0x1] %v500_v12  ;;  %15284 = vmatprep.subr.msk.bf16.mxu0 %vm1844_vm0, %v16486_v44 }
  0xab   : > { %21464 = vst [vmem:[#allocation27_spill] sm:$0xff] %v16493_v51  ;;  %14544 = vmatmul.mubr.msk.bf16.gmra.mrb[16].mxu1 %vm1795_vm9, %v16493_v51  ;;  %v1084_v39 = vshll.u32 %v14282_v17, 16  ;;  %v1623_v35 = vrot.slane %v1621_v48, 5  ;;  %v764_v53 = vmax.f32 %v732_v1, 0.0  ;;  %v696_v4 = vmul.f32 %v16189_v10, %v657_v49  ;;  %v1275_v12 = vld [vmem:[#allocation2 + $0x9c] sm:$0xf] }
  0xac   : > { %v16513_v23 = vld [vmem:[#allocation2 + $0x8c] sm:$0x1]  ;;  %v734_v37 = vadd.f32 %v16203_v20, %v695_v63  ;;  %v1075_v50 = vrot.slane %v1073_v52, 7  ;;  %v1083_v62 = vrot.slane %v1081_v47, 7  ;;  %v765_v41 = vmax.f32 %v733_v28, 0.0 }
  0xad   : > { %21465 = vst [vmem:[#allocation28_spill] sm:$0xff] %v16513_v23  ;;  %v1645_v34 = vshll.u32 %v16513_v23, 16  ;;  %v1624_v9 = vsel %vm15823_vm12, %v16408_v61, %v1623_v35  ;;  %v14283_v48 = vpack.c.bf16 %v764_v53, %v764_v53  ;;  %v735_v27 = vadd.f32 %v16203_v20, %v696_v4  ;;  %v1279_v46 = vld [vmem:[#allocation2 + $0xa4] sm:$0x1] }
  0xae   : > { %v766_v1 = vmax.f32 %v734_v37, 0.0  ;;  %v21466_v49 = vsel %vm15823_vm12, %v16384_v16, %v16372_v30  ;;  %v1078_v47 = vor.u32 %v1076_v43, %v1075_v50  ;;  %v1079_v61 = vrot.slane %v1075_v50, 4  ;;  %v446_v50 = vld [vmem:[#allocation2 + $0xc0] sm:$0x1] }
  0xaf   : > { %v16521_v17 = vld [vmem:[#allocation2 + $0x98] sm:$0x1]  ;;  %v16529_v63 = vcombine.low %v21466_v49, %v1624_v9  ;;  %v1647_v52 = vrot.slane %v1645_v34, 5  ;;  %v1086_v35 = vor.u32 %v1084_v39, %v1083_v62  ;;  %v1088_v31 = vrot.slane %v1083_v62, 4  ;;  %14668 = vmatmul.mubr.msk.bf16.gmra.mrb[4].mxu0 %vm1795_vm9, %v16131_v0  ;;  %v1282_v9 = vld [vmem:[#allocation2 + $0xa8] sm:$0xf] }
  0xb0   : > { %v1669_v28 = vshll.u32 %v16521_v17, 16  ;;  %v14284_v23 = vpack.c.bf16 %v765_v41, %v765_v41  ;;  %v1276_v16 = vsel %vm15683_vm7, %v1078_v47, %v1275_v12  ;;  %v1090_v43 = vshrl.u32 %v14283_v48, 16  ;;  %14671 = vmatprep.mubr.msk.bf16.mxu0 %vm1795_vm9, %v16173_v38 }
  0xb1   : > { %14547 = vmatprep.mubr.msk.bf16.mxu1 %vm1795_vm9, %v16529_v63  ;;  %v1648_v53 = vsel %vm15823_vm12, %v16438_v42, %v1647_v52  ;;  %v21467_v39 = vsel %vm15823_vm12, %v16410_v7, %v16394_v57  ;;  %v1087_v37 = vsel %vm15674_vm6, %v1079_v61, %v1086_v35  ;;  %1277 = vst [vmem:[#allocation2 + $0x9c] sm:$0xf] %v1276_v16  ;;  %v1093_v34 = vshll.u32 %v14283_v48, 16  ;;  %v502_v52 = vld [vmem:[#allocation2 + $0xc8] sm:$0x1] }
  0xb2   : > { %v1671_v30 = vrot.slane %v1669_v28, 5  ;;  %v16546_v4 = vcombine.low %v21467_v39, %v1648_v53  ;;  %v1280_v42 = vsel %vm15593_vm4, %v1088_v31, %v1279_v46  ;;  %1278 = vst.msk [vmem:[#allocation2 + $0xa0] sm:$0xf] %vm386_vm1, %v1087_v37  ;;  %v1092_v57 = vrot.slane %v1090_v43, 7  ;;  %v16561_v31 = vld [vmem:[%s21106_s3 + $0x4] sm:$0x3] }
  0xb3   : > { %1281 = vst [vmem:[#allocation2 + $0xa4] sm:$0x1] %v1280_v42  ;;  %v1098_v7 = vshrl.u32 %v14284_v23, 16  ;;  %v1101_v41 = vshll.u32 %v14284_v23, 16  ;;  %v21469_v46 = vsel %vm15823_vm12, %v16455_v15, %v16447_v11  ;;  %v767_v12 = vmax.f32 %v735_v27, 0.0  ;;  %v658_v15 = vld [vmem:[%s15616_s24 + $0xf0] sm:$0xff] }
  0xb4   : > { %21468 = vst [vmem:[#allocation29_spill] sm:$0xff] %v16546_v4  ;;  %v1672_v62 = vsel %vm15823_vm12, %v16478_v8, %v1671_v30  ;;  %14548 = vmatmul.mubr.msk.bf16.gmra.mrb[20].mxu1 %vm1795_vm9, %v16546_v4  ;;  %v14285_v48 = vpack.c.bf16 %v766_v1, %v766_v1  ;;  %v15357_v23 = vld [vmem:[%s21106_s3] sm:$0x3]  ;;  %v1095_v61 = vor.u32 %v1093_v34, %v1092_v57  ;;  %v1096_v35 = vrot.slane %v1092_v57, 4  ;;  %v1286_v27 = vld [vmem:[#allocation2 + $0xb0] sm:$0x1] }
  0xb5   : > { %v16570_v8 = vcombine.low %v21469_v46, %v1672_v62  ;;  %v2138_v49 = vsel %vm1844_vm0, %v15357_v23, 0  ;;  %v16576_v28 = vld [vmem:[#allocation2 + $0x20] sm:$0x1]  ;;  %v1100_v11 = vrot.slane %v1098_v7, 7  ;;  %v14286_v1 = vpack.c.bf16 %v767_v12, %v767_v12  ;;  %v659_v43 = vld [vmem:[%s15616_s24 + $0xf8] sm:$0xff] }
  0xb6   : > { %14560 = vmatpush3.bf16.msra.mxu1 %v2138_v49  ;;  %v1107_v53 = vshrl.u32 %v14285_v48, 16  ;;  %v1110_v30 = vshll.u32 %v14285_v48, 16  ;;  %v447_v16 = vsel %vm15593_vm4, 0, %v446_v50  ;;  %v1283_v42 = vsel %vm15683_vm7, %v1095_v61, %v1282_v9  ;;  %v1289_v12 = vld [vmem:[#allocation2 + $0xb4] sm:$0xf] }
  0xb7   : > { %14551 = vmatprep.mubr.msk.bf16.mxu1 %vm1795_vm9, %v16570_v8  ;;  %15279 = vmatprep.subr.msk.bf16.mxu1 %vm1844_vm0, %v16561_v31  ;;  %v1103_v39 = vor.u32 %v1101_v41, %v1100_v11  ;;  %v1105_v37 = vrot.slane %v1100_v11, 4  ;;  %448 = vst [vmem:[#allocation2 + $0xc0] sm:$0x1] %v447_v16  ;;  %v503_v34 = vsel %vm15710_vm10, 0, %v502_v52  ;;  %1284 = vst [vmem:[#allocation2 + $0xa8] sm:$0xf] %v1283_v42 }
  0xb8   : > { %v1109_v62 = vrot.slane %v1107_v53, 7  ;;  %v1115_v57 = vshrl.u32 %v14286_v1, 16  ;;  %v1118_v7 = vshll.u32 %v14286_v1, 16  ;;  %504 = vst [vmem:[#allocation2 + $0xc8] sm:$0x1] %v503_v34  ;;  %v697_v50 = vmul.f32 %v16189_v10, %v658_v15  ;;  %14672 = vmatmul.mubr.msk.bf16.gmra.mrb[8].mxu0 %vm1795_vm9, %v16250_v60 }
  0xb9   : > { %v16592_v46 = vld [vmem:[#allocation2 + $0x9c] sm:$0xf]  ;;  %v1104_v41 = vsel %vm15674_vm6, %v1096_v35, %v1103_v39  ;;  %v1287_v9 = vsel %vm15593_vm4, %v1105_v37, %v1286_v27  ;;  %v698_v48 = vmul.f32 %v16189_v10, %v659_v43  ;;  %v16601_v23 = vld [vmem:[#allocation2 + $0xa0] sm:$0xf]  ;;  %14675 = vmatprep.mubr.msk.bf16.mxu0 %vm1795_vm9, %v16321_v24  ;;  %vm2318_vm3 = vcmask 1046532  }
  0xba   : > { %v16603_v49 = vld [vmem:[#allocation2 + $0xa4] sm:$0x1]  ;;  %v1674_v52 = vshrl.u32 %v16592_v46, 16  ;;  %v1677_v61 = vshll.u32 %v16592_v46, 16  ;;  %1285 = vst.msk [vmem:[#allocation2 + $0xac] sm:$0xf] %vm386_vm1, %v1104_v41  ;;  %v1112_v11 = vor.u32 %v1110_v30, %v1109_v62  ;;  %v736_v35 = vadd.f32 %v16203_v20, %v697_v50  ;;  %vm16651_vm11 = vmor %vm2317_vm13, %vm2318_vm3 }
  0xbb   : > { %1288 = vst [vmem:[#allocation2 + $0xb0] sm:$0x1] %v1287_v9  ;;  %v1683_v10 = vshll.u32 %v16601_v23, 16  ;;  %v1687_v15 = vshrl.u32 %v16601_v23, 16  ;;  %v1693_v27 = vshll.u32 %v16603_v49, 16  ;;  %v1113_v1 = vrot.slane %v1109_v62, 4 }
  0xbc   : > { %v1676_v53 = vrot.slane %v1674_v52, 4  ;;  %v1679_v16 = vrot.slane %v1677_v61, 5  ;;  %v1117_v43 = vrot.slane %v1115_v57, 7  ;;  %v1290_v39 = vsel %vm15683_vm7, %v1112_v11, %v1289_v12  ;;  %v1293_v47 = vld [vmem:[#allocation2 + $0xbc] sm:$0x1] }
  0xbd   : > { %v1685_v37 = vrot.slane %v1683_v10, 5  ;;  %v1689_v30 = vrot.slane %v1687_v15, 4  ;;  %v1695_v42 = vrot.slane %v1693_v27, 5  ;;  %1291 = vst [vmem:[#allocation2 + $0xb4] sm:$0xf] %v1290_v39  ;;  %v737_v34 = vadd.f32 %v16203_v20, %v698_v48 }
  0xbe   : > { %v1680_v50 = vor.u32 %v1679_v16, %v1676_v53  ;;  %v1120_v41 = vor.u32 %v1118_v7, %v1117_v43  ;;  %v1122_v9 = vrot.slane %v1117_v43, 4  ;;  %v768_v24 = vmax.f32 %v736_v35, 0.0  ;;  %v16617_v38 = vld [vmem:[#allocation2 + $0xa8] sm:$0xf] }
  0xbf   : > { %v1690_v60 = vor.u32 %v1689_v30, %v1685_v37  ;;  %v769_v62 = vmax.f32 %v737_v34, 0.0  ;;  %v16621_v57 = vcombine.low %v16592_v46, %v16601_v23  ;;  %v1698_v52 = vshrl.u32 %v16617_v38, 16 }
  0xc0   : > { %v1681_v12 = vrot.slane %v1680_v50, 4  ;;  %v1701_v61 = vshll.u32 %v16617_v38, 16  ;;  %v1121_v20 = vsel %vm15674_vm6, %v1113_v1, %v1120_v41  ;;  %v1294_v35 = vsel %vm15593_vm4, %v1122_v9, %v1293_v47  ;;  %14676 = vmatmul.mubr.msk.bf16.gmra.mrb[12].mxu0 %vm1795_vm9, %v16434_v19 }
  0xc1   : > { %v1691_v7 = vrot.slane %v1690_v60, 4  ;;  %v16627_v48 = vld [vmem:[#allocation2 + $0xac] sm:$0xf]  ;;  %1292 = vst.msk [vmem:[#allocation2 + $0xb8] sm:$0xf] %vm386_vm1, %v1121_v20  ;;  %v14287_v10 = vpack.c.bf16 %v768_v24, %v768_v24  ;;  %v14288_v15 = vpack.c.bf16 %v769_v62, %v769_v62  ;;  %v1700_v53 = vrot.slane %v1698_v52, 4  ;;  %14679 = vmatprep.mubr.msk.bf16.mxu0 %vm1795_vm9, %v16493_v51 }
  0xc2   : > { %v16629_v11 = vld [vmem:[#allocation2 + $0xb0] sm:$0x1]  ;;  %v1686_v27 = vsel %vm15823_vm12, %v1681_v12, %v1685_v37  ;;  %v1703_v1 = vrot.slane %v1701_v61, 5  ;;  %v1707_v60 = vshll.u32 %v16627_v48, 16  ;;  %1295 = vst [vmem:[#allocation2 + $0xbc] sm:$0x1] %v1294_v35 }
  0xc3   : > { %v1696_v16 = vsel %vm15823_vm12, %v1691_v7, %v1695_v42  ;;  %v1711_v47 = vshrl.u32 %v16627_v48, 16  ;;  %v1717_v43 = vshll.u32 %v16629_v11, 16  ;;  %v1124_v24 = vshrl.u32 %v14287_v10, 16 }
  0xc4   : > { %v16645_v39 = vcombine.low %v1686_v27, %v1696_v16  ;;  %v1704_v30 = vor.u32 %v1703_v1, %v1700_v53  ;;  %v1709_v37 = vrot.slane %v1707_v60, 5  ;;  %v16647_v34 = vld [vmem:[#allocation2 + $0xb4] sm:$0xf]  ;;  %v1127_v50 = vshll.u32 %v14287_v10, 16  ;;  %v1296_v53 = vld [vmem:[#allocation2 + $0xc0] sm:$0xf] }
  0xc5   : > { %v1713_v9 = vrot.slane %v1711_v47, 4  ;;  %v1719_v42 = vrot.slane %v1717_v43, 5  ;;  %v1722_v62 = vshrl.u32 %v16647_v34, 16  ;;  %v1725_v12 = vshll.u32 %v16647_v34, 16 }
  0xc6   : > { %14552 = vmatmul.mubr.msk.bf16.gmra.mrb[24].mxu1 %vm1795_vm9, %v16645_v39  ;;  %v1705_v52 = vrot.slane %v1704_v30, 4  ;;  %v1126_v61 = vrot.slane %v1124_v24, 7  ;;  %v1132_v20 = vshrl.u32 %v14288_v15, 16  ;;  %v1135_v7 = vshll.u32 %v14288_v15, 16  ;;  %v1300_v15 = vld [vmem:[#allocation2 + $0xc8] sm:$0x1] }
  0xc7   : > { %v1714_v35 = vor.u32 %v1713_v9, %v1709_v37  ;;  %v1724_v10 = vrot.slane %v1722_v62, 4  ;;  %v1727_v27 = vrot.slane %v1725_v12, 5  ;;  %v21472_v1 = vrot.slane %v15737_v56, 5 }
  0xc8   : > { %v21473_v60 = vrot.slane %v15735_v54, 9  ;;  %v1710_v47 = vsel %vm15823_vm12, %v1705_v52, %v1709_v37  ;;  %v16667_v43 = vld [vmem:[#allocation2 + $0xb8] sm:$0xf]  ;;  %v1129_v30 = vor.u32 %v1127_v50, %v1126_v61  ;;  %v1130_v24 = vrot.slane %v1126_v61, 4  ;;  %14680 = vmatmul.mubr.msk.bf16.gmra.mrb[16].mxu0 %vm1795_vm9, %v16529_v63 }
  0xc9   : > { %v1134_v51 = vrot.slane %v1132_v20, 7  ;;  %v1715_v9 = vrot.slane %v1714_v35, 4  ;;  %v16669_v62 = vld [vmem:[#allocation2 + $0xbc] sm:$0x1]  ;;  %v1728_v12 = vor.u32 %v1727_v27, %v1724_v10  ;;  %v1731_v56 = vshll.u32 %v16667_v43, 16  ;;  %14683 = vmatprep.mubr.msk.bf16.mxu0 %vm1795_vm9, %v16546_v4 }
  0xca   : > { %v2330_v16 = vsel %vm16651_vm11, %v21473_v60, %v21472_v1  ;;  %v1735_v54 = vshrl.u32 %v16667_v43, 16  ;;  %v1741_v1 = vshll.u32 %v16669_v62, 16  ;;  %v1297_v52 = vsel %vm15683_vm7, %v1129_v30, %v1296_v53 }
  0xcb   : > { %v1137_v37 = vor.u32 %v1135_v7, %v1134_v51  ;;  %v1139_v50 = vrot.slane %v1134_v51, 4  ;;  %v1720_v61 = vsel %vm15823_vm12, %v1715_v9, %v1719_v42  ;;  %v1729_v20 = vrot.slane %v1728_v12, 4  ;;  %1298 = vst [vmem:[#allocation2 + $0xc0] sm:$0xf] %v1297_v52 }
  0xcc   : > { %v1733_v35 = vrot.slane %v1731_v56, 5  ;;  %v1737_v10 = vrot.slane %v1735_v54, 4  ;;  %v16682_v27 = vcombine.low %v1710_v47, %v1720_v61  ;;  %v1743_v51 = vrot.slane %v1741_v1, 5  ;;  %v16715_v54 = vld [vmem:[#allocation2] sm:$0xf] }
  0xcd   : > { %v1138_v60 = vsel %vm15674_vm6, %v1130_v24, %v1137_v37  ;;  %v1301_v4 = vsel %vm15593_vm4, %v1139_v50, %v1300_v15  ;;  %v2332_v53 = vrot.slane %v15359_v59, 5  ;;  %v21474_v42 = vrot.slane %v15765_v22, 5 }
  0xce   : > { %v1738_v7 = vor.u32 %v1737_v10, %v1733_v35  ;;  %1299 = vst.msk [vmem:[#allocation2 + $0xc4] sm:$0xf] %vm386_vm1, %v1138_v60  ;;  %1302 = vst [vmem:[#allocation2 + $0xc8] sm:$0x1] %v1301_v4  ;;  %v21475_v30 = vrot.slane %v15756_v18, 9  ;;  %14555 = vmatprep.mubr.msk.bf16.mxu1 %vm1795_vm9, %v16682_v27  ;;  %v21476_v24 = vrot.slane %v16576_v28, 5  ;;  %v1734_v4 = vsel %vm15823_vm12, %v1729_v20, %v1733_v35 }
  0xcf   : > { %v2333_v18 = vsel %vm16651_vm11, %v15761_v21, %v2332_v53  ;;  %v16713_v28 = vld [vmem:[#allocation2 + $0x4] sm:$0xf]  ;;  %v16737_v61 = vcombine.low %v16617_v38, %v16627_v48  ;;  %vm17161_vm1 = vmand %vm511_vm8, %vm452_vm15  ;;  %vm5279_vm7 = vsmask.f32 6424  ;;  %vm6766_vm13 = vcmask 1041409  }
  0xd0   : > { %v2337_v47 = vsel %vm16651_vm11, %v21475_v30, %v21474_v42  ;;  %v2340_v15 = vsel %vm16651_vm11, %v15812_v13, %v21476_v24  ;;  %v1739_v9 = vrot.slane %v1738_v7, 4  ;;  %v16709_v12 = vcombine.low %v2330_v16, %v2333_v18  ;;  %14684 = vmatmul.mubr.msk.bf16.gmra.mrb[20].mxu0 %vm1795_vm9, %v16570_v8 }
  0xd1   : > { %v16707_v22 = vcombine.low %v2337_v47, %v2340_v15  ;;  %v13788_v13 = vcombine.low %v16715_v54, %v16713_v28  ;;  %14687 = vmatprep.mubr.msk.bf16.mxu0 %vm1795_vm9, %v16645_v39  ;;  %v16747_v24 = vcombine.low %v16647_v34, %v16667_v43  ;;  %vm6769_vm3 = vcmask 1042434  }
  0xd2   : > { %v1744_v56 = vsel %vm15823_vm12, %v1739_v9, %v1743_v51  ;;  %v16725_v21 = vld [vmem:[#allocation2 + $0xc0] sm:$0xf]  ;;  %v15362_v9 = vld [vmem:[#allocation2 + $0x28] sm:$0xf] }
  0xd3   : > { %v16721_v1 = vcombine.low %v1734_v4, %v1744_v56  ;;  %v2933_v16 = vshrl.u32 %v16725_v21, 16  ;;  %v2936_v37 = vshll.u32 %v16725_v21, 16  ;;  %v2343_v18 = vrot.slane %v15362_v9, 5  ;;  %v15363_v56 = vld [vmem:[#allocation2 + $0x34] sm:$0xf] }
  0xd4   : > { %v15368_v9 = vld [vmem:[#allocation2 + $0x38] sm:$0x1] }
  0xd5   : > { %14556 = vmatmul.mubr.msk.bf16.gmra.mrb[28].mxu1 %vm1795_vm9, %v16721_v1  ;;  %v16731_v50 = vld [vmem:[#allocation2 + $0xc4] sm:$0xf]  ;;  %v16733_v52 = vld [vmem:[#allocation2 + $0xc8] sm:$0x1]  ;;  %v2935_v20 = vrot.slane %v2933_v16, 4  ;;  %v2938_v35 = vrot.slane %v2936_v37, 5 }
  0xd6   : > { %14561 = vmatprep.mubr.msk.bf16.mxu1 %vm1795_vm9, %v13788_v13  ;;  %v2942_v10 = vshll.u32 %v16731_v50, 16  ;;  %v2946_v60 = vshrl.u32 %v16731_v50, 16  ;;  %v2952_v7 = vshll.u32 %v16733_v52, 16  ;;  %v2350_v13 = vrot.slane %v15363_v56, 5  ;;  %v15364_v16 = vld [vmem:[#allocation2 + $0x40] sm:$0xf] }
  0xd7   : > { %v2939_v51 = vor.u32 %v2938_v35, %v2935_v20  ;;  %v2357_v37 = vrot.slane %v15364_v16, 5  ;;  %v2353_v56 = vrot.slane %v15368_v9, 5  ;;  %v15369_v16 = vld [vmem:[#allocation2 + $0x3c] sm:$0xf]  ;;  %v2413_v9 = vrot.slane %v16601_v23, 5 }
  0xd8   : > { %v2944_v59 = vrot.slane %v2942_v10, 5  ;;  %v2948_v53 = vrot.slane %v2946_v60, 4  ;;  %14688 = vmatmul.mubr.msk.bf16.gmra.mrb[24].mxu0 %vm1795_vm9, %v16682_v27  ;;  %v2954_v47 = vrot.slane %v2952_v7, 5  ;;  %v15365_v10 = vld [vmem:[#allocation2 + $0x24] sm:$0xf]  ;;  %v13825_v55 = vrot.slane %v15369_v16, 9 }
  0xd9   : > { %v2940_v42 = vrot.slane %v2939_v51, 4  ;;  %14691 = vmatprep.mubr.msk.bf16.mxu0 %vm1795_vm9, %v16721_v1  ;;  %v13823_v60 = vrot.slane %v15365_v10, 9  ;;  %v15366_v7 = vld [vmem:[#allocation2 + $0x2c] sm:$0x1]  ;;  %v2359_v26 = vrot.slane %v2357_v37, 4  ;;  %v2420_v16 = vrot.slane %v16627_v48, 5 }
  0xda   : > { %v2949_v30 = vor.u32 %v2948_v53, %v2944_v59  ;;  %v2346_v51 = vrot.slane %v15366_v7, 5  ;;  %v2345_v53 = vrot.slane %v2343_v18, 4  ;;  %v15375_v48 = vld [vmem:[#allocation2 + $0x58] sm:$0xf] }
  0xdb   : > { %v2945_v15 = vsel %vm15823_vm12, %v2940_v42, %v2944_v59  ;;  %v2531_v59 = vsel %vm1844_vm0, %v16561_v31, 0  ;;  %v15367_v42 = vld [vmem:[#allocation2 + $0x30] sm:$0xf]  ;;  %v2344_v31 = vsel %vm16651_vm11, %v13823_v60, %v2343_v18  ;;  %v3383_v18 = vsel %vm1844_vm0, %v16486_v44, 0 }
  0xdc   : > { %v2950_v4 = vrot.slane %v2949_v30, 4  ;;  %v2352_v30 = vrot.slane %v2350_v13, 4  ;;  %v13834_v44 = vrot.slane %v16617_v38, 9  ;;  %v13835_v38 = vrot.slane %v16647_v34, 9 }
  0xdd   : > { %14562 = vmatmul.mubr.msk.bf16.vlgmr.msra.gmra.mrb[0].mxu1 %vm1795_vm9, %v15750_v6  ;;  %v13824_v6 = vrot.slane %v15367_v42, 9  ;;  %v3163_v34 = vrot.slane %v16731_v50, 5 }
  0xde   : > { %14565 = vmatprep.mubr.msk.bf16.mxu1 %vm1795_vm9, %v15773_v29  ;;  %v2955_v20 = vsel %vm15823_vm12, %v2950_v4, %v2954_v47  ;;  %14594 = vmatpush3.bf16.msra.mxu1 %v2531_v59  ;;  %v15370_v47 = vld [vmem:[#allocation2 + $0x44] sm:$0x1]  ;;  %v15371_v4 = vld [vmem:[%s21106_s3 + $0x6] sm:$0x3]  ;;  %v2354_v7 = vsel %vm16651_vm11, %v2352_v30, %v2353_v56  ;;  %v2358_v59 = vsel %vm16651_vm11, %v13825_v55, %v2357_v37  ;;  %v15373_v55 = vld [vmem:[#allocation2 + $0x4c] sm:$0xf] }
  0xdf   : > { %v16759_v35 = vcombine.low %v2945_v15, %v2955_v20  ;;  %v2360_v15 = vrot.slane %v15370_v47, 5  ;;  %15281 = vmatprep.subr.msk.bf16.mxu1 %vm1844_vm0, %v15371_v4  ;;  %v2347_v20 = vsel %vm16651_vm11, %v2345_v53, %v2346_v51  ;;  %v2351_v10 = vsel %vm16651_vm11, %v13824_v6, %v2350_v13  ;;  %v15372_v51 = vld [vmem:[#allocation2 + $0x48] sm:$0xf] }
  0xe0   : > { %v16789_v60 = vcombine.low %v2344_v31, %v2347_v20  ;;  %v16791_v13 = vcombine.low %v2351_v10, %v2354_v7  ;;  %v13826_v53 = vrot.slane %v15372_v51, 9  ;;  %v13833_v6 = vrot.slane %v16592_v46, 9  ;;  %v16805_v46 = vld [vmem:[%s21106_s3 + $0xe] sm:$0x3] }
  0xe1   : > { %14692 = vmatmul.mubr.msk.bf16.gmra.mrb[28].mxu0 %vm1795_vm9, %v16759_v35  ;;  %v2361_v42 = vsel %vm16651_vm11, %v2359_v26, %v2360_v15  ;;  %v2364_v37 = vrot.slane %v15373_v55, 5  ;;  %v2367_v26 = vrot.slane %v16196_v5, 5  ;;  %v2416_v56 = vrot.slane %v16603_v49, 5  ;;  %v15374_v15 = vld [vmem:[#allocation2 + $0x54] sm:$0xf] }
  0xe2   : > { %14697 = vmatprep.mubr.msk.bf16.mxu0 %vm1795_vm9, %v16709_v12  ;;  %v16794_v30 = vcombine.low %v2358_v59, %v2361_v42  ;;  %v2423_v47 = vrot.slane %v16629_v11, 5  ;;  %v13827_v5 = vrot.slane %v15374_v15, 9  ;;  %v2414_v23 = vsel %vm16651_vm11, %v13833_v6, %v2413_v9  ;;  %v449_v42 = vld [vmem:[#allocation2 + $0xcc] sm:$0x1] }
  0xe3   : > { %v2415_v49 = vrot.slane %v2413_v9, 4  ;;  %v2371_v11 = vrot.slane %v15375_v48, 5  ;;  %v2421_v4 = vsel %vm16651_vm11, %v13834_v44, %v2420_v16  ;;  %v2422_v31 = vrot.slane %v2420_v16, 4 }
  0xe4   : > { %v2427_v20 = vrot.slane %v16667_v43, 5  ;;  %v2430_v7 = vrot.slane %v16669_v62, 5  ;;  %v13905_v59 = vrot.slane %v16725_v21, 9  ;;  %v3165_v9 = vrot.slane %v3163_v34, 4 }
  0xe5   : > { %14566 = vmatmul.mubr.msk.bf16.gmra.mrb[4].mxu1 %vm1795_vm9, %v15802_v2  ;;  %v2417_v10 = vsel %vm16651_vm11, %v2415_v49, %v2416_v56  ;;  %v2424_v43 = vsel %vm16651_vm11, %v2422_v31, %v2423_v47  ;;  %v3166_v56 = vrot.slane %v16733_v52, 5  ;;  %v2366_v44 = vrot.slane %v2364_v37, 4 }
  0xe6   : > { %14569 = vmatprep.mubr.msk.bf16.mxu1 %vm1795_vm9, %v15851_v14  ;;  %v2428_v51 = vsel %vm16651_vm11, %v13835_v38, %v2427_v20  ;;  %v2429_v62 = vrot.slane %v2427_v20, 4  ;;  %v16834_v6 = vcombine.low %v2421_v4, %v2424_v43  ;;  %v3164_v55 = vsel %vm16651_vm11, %v13905_v59, %v3163_v34  ;;  %v15377_v20 = vld [vmem:[#allocation2 + $0x70] sm:$0xf] }
  0xe7   : > { %v16843_v47 = vcombine.low %v16725_v21, %v16731_v50  ;;  %v450_v15 = vsel %vm15593_vm4, 0, %v449_v42  ;;  %v2374_v49 = vrot.slane %v16282_v25, 5  ;;  %v3167_v48 = vsel %vm16651_vm11, %v3165_v9, %v3166_v56  ;;  %v15376_v21 = vld [vmem:[#allocation2 + $0x64] sm:$0xf]  ;;  %v21478_v42 = vld [vmem:[#allocation23_spill] sm:$0xff] }
  0xe8   : > { %v2431_v16 = vsel %vm16651_vm11, %v2429_v62, %v2430_v7  ;;  %451 = vst [vmem:[#allocation2 + $0xcc] sm:$0x1] %v450_v15  ;;  %v16852_v52 = vcombine.low %v3164_v55, %v3167_v48  ;;  %v2365_v3 = vsel %vm16651_vm11, %v13826_v53, %v2364_v37  ;;  %v2368_v25 = vsel %vm16651_vm11, %v2366_v44, %v2367_v26  ;;  %v21477_v7 = vld [vmem:[#allocation14_spill] sm:$0xff]  ;;  %v15378_v26 = vld [vmem:[#allocation2 + $0x60] sm:$0xf] }
  0xe9   : > { %14698 = vmatmul.mubr.msk.bf16.vlgmr.msra.gmra.mrb[0].mxu0 %vm1795_vm9, %v16707_v22  ;;  %v16848_v38 = vcombine.low %v2428_v51, %v2431_v16  ;;  %v2378_v50 = vrot.slane %v15376_v21, 5  ;;  %v2372_v4 = vsel %vm16651_vm11, %v13827_v5, %v2371_v11  ;;  %v16870_v53 = vcombine.low %v2365_v3, %v2368_v25  ;;  %v15380_v56 = vld [vmem:[#allocation2 + $0x7c] sm:$0xf]  ;;  %v21479_v15 = vld [vmem:[#allocation21_spill] sm:$0xff]  ;;  %v21481_v48 = vld [vmem:[#allocation18_spill] sm:$0xff] }
  0xea   : > { %14730 = vmatpush3.bf16.msra.mxu0 %v3383_v18  ;;  %14701 = vmatprep.mubr.msk.bf16.mxu0 %vm1795_vm9, %v16789_v60  ;;  %v16826_v18 = vcombine.low %v2414_v23, %v2417_v10  ;;  %v2373_v23 = vrot.slane %v2371_v11, 4  ;;  %v2385_v10 = vrot.slane %v15377_v20, 5  ;;  %v13828_v59 = vrot.slane %v15378_v26, 9  ;;  %v15379_v11 = vld [vmem:[#allocation2 + $0x6c] sm:$0xf]  ;;  %v21482_v20 = vld [vmem:[#allocation20_spill] sm:$0xff] }
  0xeb   : > { %15285 = vmatprep.subr.msk.bf16.mxu0 %vm1844_vm0, %v16805_v46  ;;  %v2380_v34 = vrot.slane %v2378_v50, 4  ;;  %v2381_v5 = vrot.slane %v21478_v42, 5  ;;  %v13829_v43 = vrot.slane %v15379_v11, 9  ;;  %v2388_v62 = vrot.slane %v16436_v36, 5  ;;  %v15381_v21 = vld [vmem:[#allocation2 + $0x78] sm:$0xf] }
  0xec   : > { %v2375_v31 = vsel %vm16651_vm11, %v2373_v23, %v2374_v49  ;;  %v2387_v51 = vrot.slane %v2385_v10, 4  ;;  %v2379_v55 = vsel %vm16651_vm11, %v13828_v59, %v2378_v50  ;;  %v2392_v44 = vrot.slane %v15380_v56, 5  ;;  %v21480_v49 = vld [vmem:[#allocation16_spill] sm:$0xff]  ;;  %v21484_v11 = vld [vmem:[#allocation25_spill] sm:$0xff] }
  0xed   : > { %14570 = vmatmul.mubr.msk.bf16.gmra.mrb[8].mxu1 %vm1795_vm9, %v15970_v58  ;;  %v16872_v37 = vcombine.low %v2372_v4, %v2375_v31  ;;  %v2382_v9 = vsel %vm16651_vm11, %v2380_v34, %v2381_v5  ;;  %v2386_v16 = vsel %vm16651_vm11, %v13829_v43, %v2385_v10  ;;  %v2399_v23 = vrot.slane %v21479_v15, 5  ;;  %v21483_v59 = vld [vmem:[#allocation28_spill] sm:$0xff] }
  0xee   : > { %14573 = vmatprep.mubr.msk.bf16.mxu1 %vm1795_vm9, %v15997_v33  ;;  %v2389_v36 = vsel %vm16651_vm11, %v2387_v51, %v2388_v62  ;;  %v16893_v3 = vcombine.low %v2379_v55, %v2382_v9  ;;  %v13830_v50 = vrot.slane %v15381_v21, 9  ;;  %v2394_v4 = vrot.slane %v2392_v44, 4  ;;  %v21485_v62 = vld [vmem:[#allocation22_spill] sm:$0xff] }
  0xef   : > { %v16895_v25 = vcombine.low %v2386_v16, %v2389_v36  ;;  %v2395_v31 = vrot.slane %v16497_v32, 5  ;;  %v13831_v10 = vrot.slane %v21482_v20, 9  ;;  %v2401_v26 = vrot.slane %v2399_v23, 4  ;;  %v21486_v55 = vld [vmem:[#allocation26_spill] sm:$0xff]  ;;  %v21487_v16 = vld [vmem:[#allocation24_spill] sm:$0xff] }
  0xf0   : > { %v2402_v34 = vrot.slane %v21483_v59, 5  ;;  %v2393_v42 = vsel %vm16651_vm11, %v13830_v50, %v2392_v44  ;;  %v2406_v43 = vrot.slane %v21484_v11, 5  ;;  %v2322_v9 = vrot.slane %v16713_v28, 5  ;;  %v15382_v21 = vld [vmem:[#allocation2 + $0x8] sm:$0x1] }
  0xf1   : > { %14702 = vmatmul.mubr.msk.bf16.gmra.mrb[4].mxu0 %vm1795_vm9, %v16791_v13  ;;  %v2396_v5 = vsel %vm16651_vm11, %v2394_v4, %v2395_v31  ;;  %v2400_v32 = vsel %vm16651_vm11, %v13831_v10, %v2399_v23  ;;  %v13832_v36 = vrot.slane %v21487_v16, 9  ;;  %v2409_v23 = vrot.slane %v16521_v17, 5  ;;  %v505_v59 = vld [vmem:[#allocation2 + $0xd4] sm:$0x1] }
  0xf2   : > { %14705 = vmatprep.mubr.msk.bf16.mxu0 %vm1795_vm9, %v16794_v30  ;;  %v2403_v51 = vsel %vm16651_vm11, %v2401_v26, %v2402_v34  ;;  %v16918_v56 = vcombine.low %v2393_v42, %v2396_v5  ;;  %v2408_v15 = vrot.slane %v2406_v43, 4  ;;  %v2325_v50 = vrot.slane %v15382_v21, 5  ;;  %v21488_v42 = vld [vmem:[#allocation7_spill] sm:$0xff] }
  0xf3   : > { %v16920_v44 = vcombine.low %v2400_v32, %v2403_v51  ;;  %v13820_v4 = vrot.slane %v16715_v54, 9  ;;  %v2324_v31 = vrot.slane %v2322_v9, 4  ;;  %v2407_v28 = vsel %vm16651_vm11, %v13832_v36, %v2406_v43 }
  0xf4   : > { %v2410_v20 = vsel %vm16651_vm11, %v2408_v15, %v2409_v23  ;;  %v506_v34 = vsel %vm15710_vm10, 0, %v505_v59  ;;  %v3611_v40 = vsel %vm1844_vm0, %v16805_v46, 0  ;;  %v21494_v46 = vld [vmem:[#allocation27_spill] sm:$0xff]  ;;  %vm5277_vm4 = vsmask.f32 5396 }
  0xf5   : > { %14574 = vmatmul.mubr.msk.bf16.gmra.mrb[12].mxu1 %vm1795_vm9, %v16087_v45  ;;  %v16937_v17 = vcombine.low %v2407_v28, %v2410_v20  ;;  %v2323_v54 = vsel %vm16651_vm11, %v13820_v4, %v2322_v9  ;;  %v2326_v10 = vsel %vm16651_vm11, %v2324_v31, %v2325_v50  ;;  %507 = vst [vmem:[#allocation2 + $0xd4] sm:$0x1] %v506_v34  ;;  %vm5278_vm8 = vmor %vm15645_vm14, %vm5277_vm4  ;;  %vm6775_vm4 = vcmask 1044484  }
  0xf6   : > { %14577 = vmatprep.mubr.msk.bf16.mxu1 %vm1795_vm9, %v21477_v7  ;;  %v13837_v26 = vcombine.low %v2323_v54, %v2326_v10  ;;  %vm5280_vm10 = vmor %vm5278_vm8, %vm5279_vm7  ;;  %vm6778_vm8 = vcmask 1045509   ;;  %vm6901_vm7 = vcmask 1043456  }
  0xf9   : > { %14706 = vmatmul.mubr.msk.bf16.gmra.mrb[8].mxu0 %vm1795_vm9, %v16870_v53 }
  0xfa   : > { %14709 = vmatprep.mubr.msk.bf16.mxu0 %vm1795_vm9, %v16872_v37 }
  0xfc   : > { %v1356_v32 = vld [vmem:[#allocation2 + $0xd4] sm:$0x1] }
  0xfd   : > { %14578 = vmatmul.mubr.msk.bf16.gmra.mrb[16].mxu1 %vm1795_vm9, %v21480_v49 }
  0xfe   : > { %14581 = vmatprep.mubr.msk.bf16.mxu1 %vm1795_vm9, %v21481_v48 }
 0x101   : > { %14710 = vmatmul.mubr.msk.bf16.gmra.mrb[12].mxu0 %vm1795_vm9, %v16893_v3 }
 0x102   : > { %14713 = vmatprep.mubr.msk.bf16.mxu0 %vm1795_vm9, %v16895_v25 }
 0x105   : > { %14582 = vmatmul.mubr.msk.bf16.gmra.mrb[20].mxu1 %vm1795_vm9, %v21485_v62 }
 0x106   : > { %14585 = vmatprep.mubr.msk.bf16.mxu1 %vm1795_vm9, %v21486_v55 }
 0x109   : > { %14714 = vmatmul.mubr.msk.bf16.gmra.mrb[16].mxu0 %vm1795_vm9, %v16918_v56 }
 0x10a   : > { %14717 = vmatprep.mubr.msk.bf16.mxu0 %vm1795_vm9, %v16920_v44 }
 0x10d   : > { %14586 = vmatmul.mubr.msk.bf16.gmra.mrb[24].mxu1 %vm1795_vm9, %v16621_v57 }
 0x10e   : > { %14589 = vmatprep.mubr.msk.bf16.mxu1 %vm1795_vm9, %v16737_v61 }
 0x111   : > { %14718 = vmatmul.mubr.msk.bf16.gmra.mrb[20].mxu0 %vm1795_vm9, %v16937_v17 }
 0x112   : > { %14721 = vmatprep.mubr.msk.bf16.mxu0 %vm1795_vm9, %v16826_v18 }
 0x115   : > { %14590 = vmatmul.mubr.msk.bf16.gmra.mrb[28].mxu1 %vm1795_vm9, %v16747_v24 }
 0x116   : > { %14595 = vmatprep.mubr.msk.bf16.mxu1 %vm1795_vm9, %v13837_v26  ;;  %v522_v26 = vld [vmem:[#allocation3 + $0xc] sm:$0x1] }
 0x117   : > { %v523_v34 = vsel %vm15724_vm2, 0, %v522_v26 }
 0x118   : > { %524 = vst [vmem:[#allocation3 + $0xc] sm:$0x1] %v523_v34 }
 0x119   : > { %14722 = vmatmul.mubr.msk.bf16.gmra.mrb[24].mxu0 %vm1795_vm9, %v16834_v6 }
 0x11a   : > { %14725 = vmatprep.mubr.msk.bf16.mxu0 %vm1795_vm9, %v16848_v38 }
 0x11d   : > { %14596 = vmatmul.mubr.msk.bf16.vlgmr.msra.gmra.mrb[0].mxu1 %vm1795_vm9, %v16709_v12  ;;  %v13961_v12 = vld [vmem:[%s21106_s3 + $0x10] sm:$0x3] }
 0x11e   : > { %14599 = vmatprep.mubr.msk.bf16.mxu1 %vm1795_vm9, %v16707_v22  ;;  %14932 = vmatpush3.bf16.msra.mxu1 %v21488_v42 }
 0x121   : > { %14726 = vmatmul.mubr.msk.bf16.gmra.mrb[28].mxu0 %vm1795_vm9, %v16852_v52 }
 0x122   : > { %14731 = vmatprep.mubr.msk.bf16.mxu0 %vm1795_vm9, %v15773_v29  ;;  %v17027_v29 = vld [vmem:[#allocation2 + $0xcc] sm:$0xf] }
 0x125   : > { %14600 = vmatmul.mubr.msk.bf16.gmra.mrb[4].mxu1 %vm1795_vm9, %v16789_v60 }
 0x126   : > { %14603 = vmatprep.mubr.msk.bf16.mxu1 %vm1795_vm9, %v16791_v13 }
 0x129   : > { %14732 = vmatmul.mubr.msk.bf16.vlgmr.msra.gmra.mrb[0].mxu0 %vm1795_vm9, %v15802_v2  ;;  %v17029_v2 = vld [vmem:[#allocation2 + $0xd0] sm:$0xf] }
 0x12a   : > { %14764 = vmatpush3.bf16.msra.mxu0 %v3611_v40  ;;  %14735 = vmatprep.mubr.msk.bf16.mxu0 %vm1795_vm9, %v15851_v14  ;;  %v13925_v14 = vcombine.low %v17027_v29, %v17029_v2  ;;  %v580_v40 = vld [vmem:[#allocation3 + $0x20] sm:$0x1] }
 0x12b   : > { %15286 = vmatprep.subr.msk.bf16.mxu0 %vm1844_vm0, %v13961_v12 }
 0x12d   : > { %14604 = vmatmul.mubr.msk.bf16.gmra.mrb[8].mxu1 %vm1795_vm9, %v16794_v30 }
 0x12e   : > { %14607 = vmatprep.mubr.msk.bf16.mxu1 %vm1795_vm9, %v16870_v53 }
 0x131   : > { %14736 = vmatmul.mubr.msk.bf16.gmra.mrb[4].mxu0 %vm1795_vm9, %v15970_v58  ;;  %v21489_v58 = vld [vmem:[#allocation12_spill] sm:$0xff] }
 0x132   : > { %14739 = vmatprep.mubr.msk.bf16.mxu0 %vm1795_vm9, %v15997_v33  ;;  %v3823_v33 = vsel %vm1844_vm0, %v13961_v12, 0  ;;  %v625_v12 = vld [vmem:[#allocation3 + $0xd4] sm:$0x1] }
 0x135   : > { %14608 = vmatmul.mubr.msk.bf16.gmra.mrb[12].mxu1 %vm1795_vm9, %v16872_v37 }
 0x136   : > { %14611 = vmatprep.mubr.msk.bf16.mxu1 %vm1795_vm9, %v16893_v3 }
 0x139   : > { %14740 = vmatmul.mubr.msk.bf16.gmra.mrb[8].mxu0 %vm1795_vm9, %v16087_v45  ;;  %v21490_v45 = vld [vmem:[#allocation13_spill] sm:$0xff] }
 0x13a   : > { %14743 = vmatprep.mubr.msk.bf16.mxu0 %vm1795_vm9, %v21477_v7  ;;  %v3582_v7 = vshll.u32 %v17027_v29, 16 }
 0x13c   : > { %v3584_v5 = vrot.slane %v3582_v7, 5  ;;  %v586_v7 = vld [vmem:[#allocation3 + $0x38] sm:$0x1] }
 0x13d   : > { %14612 = vmatmul.mubr.msk.bf16.gmra.mrb[16].mxu1 %vm1795_vm9, %v16895_v25 }
 0x13e   : > { %14615 = vmatprep.mubr.msk.bf16.mxu1 %vm1795_vm9, %v16918_v56 }
 0x141   : > { %14744 = vmatmul.mubr.msk.bf16.gmra.mrb[12].mxu0 %vm1795_vm9, %v21480_v49  ;;  %v3592_v49 = vshrl.u32 %v17029_v2, 16 }
 0x142   : > { %14747 = vmatprep.mubr.msk.bf16.mxu0 %vm1795_vm9, %v21481_v48 }
 0x143   : > { %v3594_v43 = vrot.slane %v3592_v49, 4 }
 0x145   : > { %14616 = vmatmul.mubr.msk.bf16.gmra.mrb[20].mxu1 %vm1795_vm9, %v16920_v44 }
 0x146   : > { %14619 = vmatprep.mubr.msk.bf16.mxu1 %vm1795_vm9, %v16937_v17 }
 0x149   : > { %14748 = vmatmul.mubr.msk.bf16.gmra.mrb[16].mxu0 %vm1795_vm9, %v21485_v62  ;;  %v3598_v62 = vshll.u32 %v1356_v32, 16 }
 0x14a   : > { %14751 = vmatprep.mubr.msk.bf16.mxu0 %vm1795_vm9, %v21486_v55 }
 0x14b   : > { %v3600_v16 = vrot.slane %v3598_v62, 5 }
 0x14d   : > { %14620 = vmatmul.mubr.msk.bf16.gmra.mrb[24].mxu1 %vm1795_vm9, %v16826_v18 }
 0x14e   : > { %14623 = vmatprep.mubr.msk.bf16.mxu1 %vm1795_vm9, %v16834_v6 }
 0x151   : > { %14752 = vmatmul.mubr.msk.bf16.gmra.mrb[20].mxu0 %vm1795_vm9, %v16621_v57 }
 0x152   : > { %14755 = vmatprep.mubr.msk.bf16.mxu0 %vm1795_vm9, %v16737_v61 }
 0x155   : > { %14624 = vmatmul.mubr.msk.bf16.gmra.mrb[28].mxu1 %vm1795_vm9, %v16848_v38 }
 0x156   : > { %14653 = vmatprep.mubr.msk.bf16.mxu1 %vm1795_vm9, %v16621_v57  ;;  %v21491_v57 = vld [vmem:[#allocation15_spill] sm:$0xff] }
 0x159   : > { %14756 = vmatmul.mubr.msk.bf16.gmra.mrb[24].mxu0 %vm1795_vm9, %v16747_v24 }
 0x15a   : > { %14759 = vmatprep.mubr.msk.bf16.mxu0 %vm1795_vm9, %v16843_v47 }
 0x15d   : > { %14654 = vmatmul.mubr.msk.bf16.vlgmr.msra.gmra.mrb[24].mxu1 %vm1795_vm9, %v16737_v61  ;;  %v21492_v61 = vld [vmem:[#allocation17_spill] sm:$0xff] }
 0x15e   : > { %14657 = vmatprep.mubr.msk.bf16.mxu1 %vm1795_vm9, %v16747_v24  ;;  %v21493_v24 = vld [vmem:[#allocation19_spill] sm:$0xff] }
 0x161   : > { %14760 = vmatmul.mubr.msk.bf16.gmra.mrb[28].mxu0 %vm1795_vm9, %v13925_v14  ;;  %v626_v14 = vsel %vm17161_vm1, 0, %v625_v12 }
 0x162   : > { %14765 = vmatprep.mubr.msk.bf16.mxu0 %vm1795_vm9, %v21489_v58  ;;  %v577_v58 = vld [vmem:[#allocation3 + $0x14] sm:$0x1]  ;;  %627 = vst [vmem:[#allocation3 + $0xd4] sm:$0x1] %v626_v14 }
 0x165   : > { %14658 = vmatmul.mubr.msk.bf16.gmra.mrb[28].mxu1 %vm1795_vm9, %v16843_v47  ;;  %v21495_v47 = vld [vmem:[#allocation29_spill] sm:$0xff] }
 0x169   : > { %14766 = vmatmul.mubr.msk.bf16.vlgmr.msra.gmra.mrb[0].mxu0 %vm1795_vm9, %v21490_v45  ;;  %v531_v45 = vld [vmem:[#allocation3 + $0x30] sm:$0x1] }
 0x16a   : > { %14798 = vmatpush3.bf16.msra.mxu0 %v3823_v33  ;;  %14769 = vmatprep.mubr.msk.bf16.mxu0 %vm1795_vm9, %v16131_v0  ;;  %v3579_v0 = vshrl.u32 %v17027_v29, 16  ;;  %v578_v33 = vsel %vm17161_vm1, 0, %v577_v58  ;;  %v549_v58 = vld [vmem:[#allocation3 + $0x78] sm:$0x1] }
 0x16b   : > { %579 = vst [vmem:[#allocation3 + $0x14] sm:$0x1] %v578_v33  ;;  %v550_v33 = vsel %vm15724_vm2, 0, %v549_v58 }
 0x16c   : > { %v3581_v48 = vrot.slane %v3579_v0, 4  ;;  %551 = vst [vmem:[#allocation3 + $0x78] sm:$0x1] %v550_v33  ;;  %v613_v33 = vld [vmem:[#allocation3 + $0xa4] sm:$0x1] }
 0x171   : > { %14770 = vmatmul.mubr.msk.bf16.gmra.mrb[4].mxu0 %vm1795_vm9, %v21491_v57  ;;  %v532_v57 = vsel %vm15724_vm2, 0, %v531_v45  ;;  %v546_v45 = vld [vmem:[#allocation3 + $0x6c] sm:$0x1] }
 0x172   : > { %14773 = vmatprep.mubr.msk.bf16.mxu0 %vm1795_vm9, %v21492_v61  ;;  %533 = vst [vmem:[#allocation3 + $0x30] sm:$0x1] %v532_v57  ;;  %v604_v57 = vld [vmem:[#allocation3 + $0x80] sm:$0x1] }
 0x179   : > { %14774 = vmatmul.mubr.msk.bf16.gmra.mrb[8].mxu0 %vm1795_vm9, %v21493_v24 }
 0x17a   : > { %14777 = vmatprep.mubr.msk.bf16.mxu0 %vm1795_vm9, %v16434_v19  ;;  %v3588_v19 = vshll.u32 %v17029_v2, 16 }
 0x17c   : > { %v3590_v11 = vrot.slane %v3588_v19, 5  ;;  %v587_v19 = vsel %vm17161_vm1, 0, %v586_v7  ;;  %v601_v7 = vld [vmem:[#allocation3 + $0x74] sm:$0x1] }
 0x17d   : > { %588 = vst [vmem:[#allocation3 + $0x38] sm:$0x1] %v587_v19  ;;  %v602_v19 = vsel %vm17161_vm1, 0, %v601_v7 }
 0x17e   : > { %v3595_v51 = vor.u32 %v3594_v43, %v3590_v11  ;;  %603 = vst [vmem:[#allocation3 + $0x74] sm:$0x1] %v602_v19  ;;  %v14015_v7 = vld.sshfl [vmem:[#allocation3 + $0x4] sm:$0x33 pattern:$0x75316420] }
 0x180   : > { %v3596_v9 = vrot.slane %v3595_v51, 4 }
 0x181   : > { %14778 = vmatmul.mubr.msk.bf16.gmra.mrb[12].mxu0 %vm1795_vm9, %v21494_v46  ;;  %v528_v46 = vld [vmem:[#allocation3 + $0x24] sm:$0x1] }
 0x182   : > { %14781 = vmatprep.mubr.msk.bf16.mxu0 %vm1795_vm9, %v16529_v63  ;;  %v3585_v63 = vor.u32 %v3584_v5, %v3581_v48  ;;  %v529_v0 = vsel %vm15724_vm2, 0, %v528_v46  ;;  %v583_v48 = vld [vmem:[#allocation3 + $0x2c] sm:$0x1]  ;;  %v537_v5 = vld [vmem:[#allocation3 + $0x48] sm:$0x1]  ;;  %v547_v46 = vsel %vm15724_vm2, 0, %v546_v45 }
 0x183   : > { %530 = vst [vmem:[#allocation3 + $0x24] sm:$0x1] %v529_v0  ;;  %v538_v43 = vsel %vm15724_vm2, 0, %v537_v5  ;;  %v605_v0 = vsel %vm17161_vm1, 0, %v604_v57  ;;  %548 = vst [vmem:[#allocation3 + $0x6c] sm:$0x1] %v547_v46 }
 0x184   : > { %v3586_v55 = vrot.slane %v3585_v63, 4  ;;  %539 = vst [vmem:[#allocation3 + $0x48] sm:$0x1] %v538_v43  ;;  %v592_v63 = vld [vmem:[#allocation3 + $0x50] sm:$0x1]  ;;  %v614_v45 = vsel %vm17161_vm1, 0, %v613_v33 }
 0x185   : > { %v593_v62 = vsel %vm17161_vm1, 0, %v592_v63  ;;  %606 = vst [vmem:[#allocation3 + $0x80] sm:$0x1] %v605_v0  ;;  %615 = vst [vmem:[#allocation3 + $0xa4] sm:$0x1] %v614_v45 }
 0x186   : > { %v3591_v36 = vsel %vm15823_vm12, %v3586_v55, %v3590_v11  ;;  %v584_v11 = vsel %vm17161_vm1, 0, %v583_v48  ;;  %594 = vst [vmem:[#allocation3 + $0x50] sm:$0x1] %v593_v62  ;;  %v589_v55 = vld [vmem:[#allocation3 + $0x44] sm:$0x1] }
 0x187   : > { %585 = vst [vmem:[#allocation3 + $0x2c] sm:$0x1] %v584_v11  ;;  %v555_v48 = vld [vmem:[#allocation3 + $0x90] sm:$0x1]  ;;  %v552_v11 = vld [vmem:[#allocation3 + $0x84] sm:$0x1] }
 0x188   : > { %v556_v5 = vsel %vm15724_vm2, 0, %v555_v48  ;;  %v553_v43 = vsel %vm15724_vm2, 0, %v552_v11  ;;  %v21506_v11 = vmov 0 }
 0x189   : > { %14782 = vmatmul.mubr.msk.bf16.gmra.mrb[16].mxu0 %vm1795_vm9, %v21495_v47  ;;  %557 = vst [vmem:[#allocation3 + $0x90] sm:$0x1] %v556_v5  ;;  %554 = vst [vmem:[#allocation3 + $0x84] sm:$0x1] %v553_v43  ;;  %v4796_v43 = vcombine.high %v14015_v7, %v14015_v7 }
 0x18a   : > { %14785 = vmatprep.mubr.msk.bf16.mxu0 %vm1795_vm9, %v16570_v8  ;;  %v590_v8 = vsel %vm17161_vm1, 0, %v589_v55  ;;  %v15468_v55 = vmov 1966171168  }
 0x18b   : > { %591 = vst [vmem:[#allocation3 + $0x44] sm:$0x1] %v590_v8  ;;  %v561_v8 = vld [vmem:[#allocation3 + $0xa8] sm:$0x1] }
 0x191   : > { %14786 = vmatmul.mubr.msk.bf16.gmra.mrb[20].mxu0 %vm1795_vm9, %v16645_v39  ;;  %v3601_v39 = vsel %vm15823_vm12, %v3596_v9, %v3600_v16  ;;  %v543_v9 = vld [vmem:[#allocation3 + $0x60] sm:$0x1]  ;;  %vm5281_vm12 = vsmask.f32 7452 }
 0x192   : > { %14789 = vmatprep.mubr.msk.bf16.mxu0 %vm1795_vm9, %v16682_v27  ;;  %v13943_v15 = vcombine.low %v3591_v36, %v3601_v39  ;;  %v525_v27 = vld [vmem:[#allocation3 + $0x18] sm:$0x1]  ;;  %v519_v16 = vld [vmem:[#allocation3] sm:$0x1]  ;;  %v544_v36 = vsel %vm15724_vm2, 0, %v543_v9  ;;  %v4774_v9 = vunpack.c.l.s4 %v15468_v55  ;;  %vm17272_vm14 = vmor %vm5280_vm10, %vm5281_vm12  ;;  %vm6784_vm10 = vcmask 1047559  }
 0x193   : > { %545 = vst [vmem:[#allocation3 + $0x60] sm:$0x1] %v544_v36  ;;  %v520_v39 = vsel %vm15724_vm2, 0, %v519_v16  ;;  %v4776_v16 = vlaneseq  ;;  %v21507_v11 = vsel %vm17272_vm14, 4294967295, %v21506_v11  ;;  %vm17403_vm12 = vmand %vm508_vm5, %vm452_vm15  ;;  %vm6888_vm15 = vcmask 64512  }
 0x194   : > { %521 = vst [vmem:[#allocation3] sm:$0x1] %v520_v39  ;;  %v4775_v36 = vunpack.c.0.s8 %v4774_v9  ;;  %21508 = vst [vmem:[#allocation20_spill] sm:$0xff] %v21507_v11 }
 0x195   : > { %v17241_v39 = vshrl.u32 %v4776_v16, 7 }
 0x197   : > { %21500 = vst [vmem:[#allocation14_spill] sm:$0xff] %v17241_v39 }
 0x199   : > { %14790 = vmatmul.mubr.msk.bf16.gmra.mrb[24].mxu0 %vm1795_vm9, %v16721_v1  ;;  %v526_v1 = vsel %vm15724_vm2, 0, %v525_v27 }
 0x19a   : > { %14793 = vmatprep.mubr.msk.bf16.mxu0 %vm1795_vm9, %v16759_v35  ;;  %527 = vst [vmem:[#allocation3 + $0x18] sm:$0x1] %v526_v1  ;;  %v3809_v35 = vrot.slane %v17029_v2, 5  ;;  %v581_v2 = vsel %vm17161_vm1, 0, %v580_v40 }
 0x19b   : > { %582 = vst [vmem:[#allocation3 + $0x20] sm:$0x1] %v581_v2 }
 0x1a1   : > { %14794 = vmatmul.mubr.msk.bf16.gmra.mrb[28].mxu0 %vm1795_vm9, %v13943_v15 }
 0x1a2   : > { %14799 = vmatprep.mubr.msk.bf16.mxu0 %vm1795_vm9, %v16707_v22 }
 0x1a9   : > { %14800 = vmatmul.mubr.msk.bf16.vlgmr.msra.gmra.mrb[0].mxu0 %vm1795_vm9, %v16789_v60  ;;  %v13960_v60 = vrot.slane %v17027_v29, 9 }
 0x1aa   : > { %14803 = vmatprep.mubr.msk.bf16.mxu0 %vm1795_vm9, %v16791_v13  ;;  %v3811_v13 = vrot.slane %v3809_v35, 4 }
 0x1b1   : > { %14804 = vmatmul.mubr.msk.bf16.gmra.mrb[4].mxu0 %vm1795_vm9, %v16794_v30  ;;  %v3812_v30 = vrot.slane %v1356_v32, 5  ;;  %v534_v32 = vld [vmem:[#allocation3 + $0x3c] sm:$0x1] }
 0x1b2   : > { %14807 = vmatprep.mubr.msk.bf16.mxu0 %vm1795_vm9, %v16870_v53  ;;  %v3810_v53 = vsel %vm16651_vm11, %v13960_v60, %v3809_v35  ;;  %v535_v51 = vsel %vm15724_vm2, 0, %v534_v32  ;;  %v540_v60 = vld [vmem:[#allocation3 + $0x54] sm:$0x1]  ;;  %v610_v32 = vld [vmem:[#allocation3 + $0x98] sm:$0x1] }
 0x1b3   : > { %536 = vst [vmem:[#allocation3 + $0x3c] sm:$0x1] %v535_v51  ;;  %v611_v63 = vsel %vm17161_vm1, 0, %v610_v32  ;;  %v607_v51 = vld [vmem:[#allocation3 + $0x8c] sm:$0x1] }
 0x1b4   : > { %612 = vst [vmem:[#allocation3 + $0x98] sm:$0x1] %v611_v63  ;;  %v608_v62 = vsel %vm17161_vm1, 0, %v607_v51 }
 0x1b5   : > { %609 = vst [vmem:[#allocation3 + $0x8c] sm:$0x1] %v608_v62 }
 0x1b9   : > { %14808 = vmatmul.mubr.msk.bf16.gmra.mrb[8].mxu0 %vm1795_vm9, %v16872_v37 }
 0x1ba   : > { %14811 = vmatprep.mubr.msk.bf16.mxu0 %vm1795_vm9, %v16893_v3 }
 0x1c1   : > { %14812 = vmatmul.mubr.msk.bf16.gmra.mrb[12].mxu0 %vm1795_vm9, %v16895_v25 }
 0x1c2   : > { %14815 = vmatprep.mubr.msk.bf16.mxu0 %vm1795_vm9, %v16918_v56 }
 0x1c9   : > { %14816 = vmatmul.mubr.msk.bf16.gmra.mrb[16].mxu0 %vm1795_vm9, %v16920_v44 }
 0x1ca   : > { %14819 = vmatprep.mubr.msk.bf16.mxu0 %vm1795_vm9, %v16937_v17 }
 0x1d1   : > { %14820 = vmatmul.mubr.msk.bf16.gmra.mrb[20].mxu0 %vm1795_vm9, %v16826_v18  ;;  %v3813_v18 = vsel %vm16651_vm11, %v3811_v13, %v3812_v30  ;;  %v598_v13 = vld [vmem:[#allocation3 + $0x68] sm:$0x1]  ;;  %v541_v30 = vsel %vm15724_vm2, 0, %v540_v60  ;;  %v562_v60 = vsel %vm15724_vm2, 0, %v561_v8  ;;  %vm6772_vm11 = vcmask 1043459  }
 0x1d2   : > { %14823 = vmatprep.mubr.msk.bf16.mxu0 %vm1795_vm9, %v16834_v6  ;;  %v13962_v37 = vcombine.low %v3810_v53, %v3813_v18  ;;  %v599_v53 = vsel %vm17161_vm1, 0, %v598_v13  ;;  %542 = vst [vmem:[#allocation3 + $0x54] sm:$0x1] %v541_v30  ;;  %v574_v18 = vld [vmem:[#allocation3 + $0x8] sm:$0x1] }
 0x1d3   : > { %600 = vst [vmem:[#allocation3 + $0x68] sm:$0x1] %v599_v53  ;;  %v575_v26 = vsel %vm17161_vm1, 0, %v574_v18  ;;  %563 = vst [vmem:[#allocation3 + $0xa8] sm:$0x1] %v562_v60 }
 0x1d4   : > { %576 = vst [vmem:[#allocation3 + $0x8] sm:$0x1] %v575_v26  ;;  %v558_v13 = vld [vmem:[#allocation3 + $0x9c] sm:$0x1]  ;;  %v616_v53 = vld [vmem:[#allocation3 + $0xb0] sm:$0x1]  ;;  %v17250_v26 = vsub.s32 %v4775_v36, %v17241_v39 }
 0x1d5   : > { %v559_v30 = vsel %vm15724_vm2, 0, %v558_v13  ;;  %v617_v18 = vsel %vm17161_vm1, 0, %v616_v53 }
 0x1d6   : > { %560 = vst [vmem:[#allocation3 + $0x9c] sm:$0x1] %v559_v30  ;;  %618 = vst [vmem:[#allocation3 + $0xb0] sm:$0x1] %v617_v18  ;;  %v17277_v32 = vrot.slane %v14015_v7, %v17250_v26  ;;  %v17286_v16 = vrot.slane %v4796_v43, %v17250_v26 }
 0x1d8   : > { %21509 = vst [vmem:[#allocation28_spill] sm:$0xff] %v17277_v32  ;;  %21510 = vst [vmem:[#allocation25_spill] sm:$0xff] %v17286_v16  ;;  %v5313_v36 = vshll.u32 %v17277_v32, 16  ;;  %v17295_v30 = vcombine.high %v17277_v32, %v17277_v32  ;;  %v5316_v18 = vshrl.u32 %v17277_v32, 16  ;;  %v17303_v33 = vcombine.high %v17286_v16, %v17286_v16 }
 0x1d9   : > { %14824 = vmatmul.mubr.msk.bf16.gmra.mrb[24].mxu0 %vm1795_vm9, %v16848_v38 }
 0x1da   : > { %14827 = vmatprep.mubr.msk.bf16.mxu0 %vm1795_vm9, %v16852_v52  ;;  %21511 = vst [vmem:[#allocation22_spill] sm:$0xff] %v17295_v30  ;;  %21512 = vst [vmem:[#allocation26_spill] sm:$0xff] %v17303_v33  ;;  %v5329_v43 = vshll.u32 %v17295_v30, 16 }
 0x1e1   : > { %14828 = vmatmul.mubr.msk.bf16.gmra.mrb[28].mxu0 %vm1795_vm9, %v13962_v37  ;;  %v595_v37 = vld [vmem:[#allocation3 + $0x5c] sm:$0x1] }
 0x1e2   : > { %v596_v40 = vsel %vm17161_vm1, 0, %v595_v37  ;;  %v14014_v37 = vld.sshfl [vmem:[#allocation3] sm:$0x33 pattern:$0x75316420] }
 0x1e3   : > { %597 = vst [vmem:[#allocation3 + $0x5c] sm:$0x1] %v596_v40  ;;  %v4772_v40 = vcombine.high %v14014_v37, %v14014_v37  ;;  %v17253_v58 = vrot.slane %v14014_v37, %v17250_v26  ;;  %v5321_v37 = vshll.u32 %v17286_v16, 16 }
 0x1e5   : > { %21501 = vst [vmem:[#allocation23_spill] sm:$0xff] %v17253_v58  ;;  %v17260_v46 = vrot.slane %v4772_v40, %v17250_v26  ;;  %v17264_v0 = vcombine.high %v17253_v58, %v17253_v58  ;;  %v5284_v62 = vshrl.u32 %v17253_v58, 16  ;;  %v14030_v40 = vld.sshfl [vmem:[#allocation3 + $0x8] sm:$0x1 pattern:$0x75316420] }
 0x1e7   : > { %21503 = vst [vmem:[#allocation21_spill] sm:$0xff] %v17260_v46  ;;  %21504 = vst [vmem:[#allocation16_spill] sm:$0xff] %v17264_v0  ;;  %v17268_v19 = vcombine.high %v17260_v46, %v17260_v46  ;;  %v5292_v48 = vshrl.u32 %v17260_v46, 16  ;;  %v5297_v5 = vshll.u32 %v17264_v0, 16  ;;  %v5300_v63 = vshrl.u32 %v17264_v0, 16 }
 0x1e8   : > { %v5289_v55 = vshll.u32 %v17260_v46, 16  ;;  %v4590_v46 = vld [vmem:[#allocation3 + $0x14] sm:$0x1] }
 0x1e9   : > { %21505 = vst [vmem:[#allocation18_spill] sm:$0xff] %v17268_v19  ;;  %v5305_v51 = vshll.u32 %v17268_v19, 16  ;;  %v5299_v9 = vsel %vm17272_vm14, %v5292_v48, %v5297_v5  ;;  %v5308_v8 = vshrl.u32 %v17268_v19, 16  ;;  %v5324_v5 = vshrl.u32 %v17286_v16, 16 }
 0x1ea   : > { %v5825_v13 = vrot.slane %v5299_v9, %v17250_v26  ;;  %v5291_v53 = vsel %vm17272_vm14, %v5284_v62, %v5289_v55  ;;  %v5332_v55 = vshrl.u32 %v17295_v30, 16  ;;  %v5337_v9 = vshll.u32 %v17303_v33, 16 }
 0x1eb   : > { %v5307_v60 = vsel %vm17272_vm14, %v5300_v63, %v5305_v51  ;;  %v5315_v45 = vsel %vm17272_vm14, %v5308_v8, %v5313_v36  ;;  %v5811_v7 = vrot.slane %v5291_v53, %v17250_v26  ;;  %v17313_v63 = vrot.slane %v14030_v40, %v17250_v26 }
 0x1ec   : > { %v5839_v57 = vrot.slane %v5307_v60, %v17250_v26  ;;  %v5832_v48 = vrot.slane %v5825_v13, %v17250_v26  ;;  %v5323_v51 = vsel %vm17272_vm14, %v5316_v18, %v5321_v37  ;;  %v5853_v62 = vrot.slane %v5315_v45, %v17250_v26 }
 0x1ed   : > { %21513 = vst [vmem:[#allocation24_spill] sm:$0xff] %v17313_v63  ;;  %v5818_v36 = vrot.slane %v5811_v7, %v17250_v26  ;;  %v5331_v13 = vsel %vm17272_vm14, %v5324_v5, %v5329_v43  ;;  %v5867_v53 = vrot.slane %v5323_v51, %v17250_v26  ;;  %v5340_v40 = vshrl.u32 %v17303_v33, 16  ;;  %v567_v33 = vld [vmem:[#allocation3 + $0xc0] sm:$0x1] }
 0x1ee   : > { %v5846_v8 = vrot.slane %v5839_v57, %v17250_v26  ;;  %v6702_v60 = vunpack.c.l.b16 %v5832_v48  ;;  %v5345_v18 = vshll.u32 %v17313_v63, 16  ;;  %v5860_v37 = vrot.slane %v5853_v62, %v17250_v26 }
 0x1ef   : > { %v5339_v45 = vsel %vm17272_vm14, %v5332_v55, %v5337_v9  ;;  %v5881_v57 = vrot.slane %v5331_v13, %v17250_v26  ;;  %v6701_v30 = vunpack.c.l.b16 %v5818_v36  ;;  %v5874_v48 = vrot.slane %v5867_v53, %v17250_v26 }
 0x1f0   : > { %v17119_v6 = vpop.f32.mrb[0].mxu1  ;;  %v6703_v39 = vunpack.c.l.b16 %v5846_v8  ;;  %v6765_v7 = vrot.slane %v6702_v60, 7  ;;  %v5347_v5 = vsel %vm17272_vm14, %v5340_v40, %v5345_v18  ;;  %v5895_v43 = vrot.slane %v5339_v45, %v17250_v26  ;;  %v564_v45 = vld [vmem:[#allocation3 + $0xb4] sm:$0x1] }
 0x1f1   : > { %v17121_v3 = vpop.f32.mrb[1].mxu1  ;;  %v6704_v51 = vunpack.c.l.b16 %v5860_v37  ;;  %v568_v62 = vsel %vm15724_vm2, 0, %v567_v33  ;;  %v5888_v55 = vrot.slane %v5881_v57, %v17250_v26  ;;  %v5909_v8 = vrot.slane %v5347_v5, %v17250_v26  ;;  %v17355_v5 = vld [vmem:[%s21108_s5] ss:$0 sm:$0xff] }
 0x1f2   : > { %v17123_v25 = vpop.f32.mrb[2].mxu1  ;;  %v6768_v63 = vrot.slane %v6703_v39, 6  ;;  %v6767_v9 = vsel %vm6766_vm13, %v6765_v7, %v6701_v30  ;;  %569 = vst [vmem:[#allocation3 + $0xc0] sm:$0x1] %v568_v62  ;;  %v6705_v36 = vunpack.c.l.b16 %v5874_v48  ;;  %v5902_v60 = vrot.slane %v5895_v43, %v17250_v26  ;;  %v17349_v7 = vld [vmem:[%s21107_s4] ss:$0 sm:$0xff] }
 0x1f3   : > { %v17125_v56 = vpop.f32.mrb[3].mxu1  ;;  %v6771_v13 = vrot.slane %v6704_v51, 5  ;;  %v6706_v40 = vunpack.c.l.b16 %v5888_v55  ;;  %v5916_v39 = vrot.slane %v5909_v8, %v17250_v26  ;;  %v565_v30 = vsel %vm15724_vm2, 0, %v564_v45  ;;  %v622_v55 = vld [vmem:[#allocation3 + $0xc8] sm:$0x1] }
 0x1f4   : > { %v6770_v53 = vsel %vm6769_vm3, %v6768_v63, %v6767_v9  ;;  %v6774_v18 = vrot.slane %v6705_v36, 4  ;;  %v6707_v33 = vunpack.c.l.b16 %v5902_v60  ;;  %566 = vst [vmem:[#allocation3 + $0xb4] sm:$0x1] %v565_v30  ;;  %v623_v60 = vsel %vm17161_vm1, 0, %v622_v55 }
 0x1f5   : > { %v6773_v37 = vsel %vm6772_vm11, %v6771_v13, %v6770_v53  ;;  %v6777_v63 = vrot.slane %v6706_v40, 3  ;;  %v6708_v51 = vunpack.c.l.b16 %v5916_v39  ;;  %v619_v13 = vld [vmem:[#allocation3 + $0xbc] sm:$0x1]  ;;  %624 = vst [vmem:[#allocation3 + $0xc8] sm:$0x1] %v623_v60 }
 0x1f6   : > { %v6776_v62 = vsel %vm6775_vm4, %v6774_v18, %v6773_v37  ;;  %v6780_v36 = vrot.slane %v6707_v33, 2  ;;  %v620_v39 = vsel %vm17161_vm1, 0, %v619_v13  ;;  %v17371_v18 = vld [vmem:[%s21109_s6] ss:$0 sm:$0xff]  ;;  %vm6781_vm1 = vcmask 1046534  }
 0x1f7   : > { %621 = vst [vmem:[#allocation3 + $0xbc] sm:$0x1] %v620_v39 }
 0x1f8   : > { %v17127_v38 = vpop.f32.mrb[4].mxu1 }
 0x1f9   : > { %v17129_v52 = vpop.f32.mrb[5].mxu1 }
 0x1fa   : > { %v17131_v44 = vpop.f32.mrb[6].mxu1 }
 0x1fb   : > { %v17133_v23 = vpop.f32.mrb[7].mxu1 }
 0x200   : > { %v17135_v41 = vpop.f32.mrb[8].mxu1 }
 0x201   : > { %v17137_v21 = vpop.f32.mrb[9].mxu1 }
 0x202   : > { %v17139_v50 = vpop.f32.mrb[10].mxu1 }
 0x203   : > { %v17141_v4 = vpop.f32.mrb[11].mxu1 }
 0x208   : > { %v17143_v31 = vpop.f32.mrb[12].mxu1 }
 0x209   : > { %v17145_v28 = vpop.f32.mrb[13].mxu1 }
 0x20a   : > { %v17147_v20 = vpop.f32.mrb[14].mxu1 }
 0x20b   : > { %v17149_v17 = vpop.f32.mrb[15].mxu1 }
 0x210   : > { %v17151_v54 = vpop.f32.mrb[16].mxu1 }
 0x211   : > { %v17153_v10 = vpop.f32.mrb[17].mxu1 }
 0x212   : > { %v17155_v59 = vpop.f32.mrb[18].mxu1 }
 0x213   : > { %v17165_v29 = vpop.f32.mrb[19].mxu1 }
 0x218   : > { %v17175_v61 = vpop.f32.mrb[20].mxu1 }
 0x219   : > { %v17177_v24 = vpop.f32.mrb[21].mxu1 }
 0x21a   : > { %v17179_v47 = vpop.f32.mrb[22].mxu1 }
 0x21b   : > { %v17183_v49 = vpop.f32.mrb[23].mxu1 }
 0x230   : > { %v17201_v15 = vpop.f32.mrb[24].mxu1 }
 0x231   : > { %v17203_v27 = vpop.f32.mrb[25].mxu1 }
 0x232   : > { %v17205_v1 = vpop.f32.mrb[26].mxu1 }
 0x233   : > { %v17207_v35 = vpop.f32.mrb[27].mxu1 }
 0x238   : > { %v17215_v34 = vpop.f32.mrb[28].mxu1 }
 0x239   : > { %v17219_v12 = vpop.f32.mrb[29].mxu1 }
 0x23a   : > { %v17221_v2 = vpop.f32.mrb[30].mxu1 }
 0x23b   : > { %v17223_v14 = vpop.f32.mrb[31].mxu1 }
 0x27c   : > { %v14801_v57 = vpop.f32.mrb[0].mxu0 }
 0x27d   : > { %v14933_v48 = vadd.f32 %v14801_v57, %v17119_v6  ;;  %v3859_v43 = vpop.f32.mrb[1].mxu0 }
 0x27e   : > { %v14934_v9 = vadd.f32 %v3859_v43, %v17121_v3  ;;  %v14802_v8 = vpop.f32.mrb[2].mxu0  ;;  %v14102_v3 = vld [vmem:[%s21110_s7 + $0x4] sm:$0xf]  ;;  %v6783_v43 = vrot.slane %v6708_v51, 1 }
 0x27f   : > { %v4027_v6 = vadd.f32 %v14933_v48, %v17349_v7  ;;  %v14935_v53 = vadd.f32 %v14802_v8, %v17123_v25  ;;  %v3862_v40 = vpop.f32.mrb[3].mxu0  ;;  %v6779_v25 = vsel %vm6778_vm8, %v6777_v63, %v6776_v62  ;;  %15287 = vmatprep.subr.msk.bf16.mxu1 %vm6901_vm7, %v14102_v3  ;;  %v6903_v42 = vsel %vm6901_vm7, %v14102_v3, 0 }
 0x280   : > { %v4025_v33 = vadd.f32 %v14934_v9, %v17349_v7  ;;  %v14936_v37 = vadd.f32 %v3862_v40, %v17125_v56  ;;  %14832 = vmatpush3.bf16.msra.mxu1 %v6903_v42  ;;  %v6782_v62 = vsel %vm6781_vm1, %v6780_v36, %v6779_v25 }
 0x281   : > { %v4066_v45 = vmul.f32 %v17355_v5, %v4027_v6  ;;  %v4028_v30 = vadd.f32 %v14935_v53, %v17349_v7  ;;  %v17392_v36 = vsel %vm6784_vm10, %v6783_v43, %v6782_v62 }
 0x282   : > { %v4064_v57 = vmul.f32 %v17355_v5, %v4025_v33  ;;  %v4026_v48 = vadd.f32 %v14936_v37, %v17349_v7 }
 0x283   : > { %v4105_v56 = vadd.f32 %v17371_v18, %v4066_v45  ;;  %v4067_v63 = vmul.f32 %v17355_v5, %v4028_v30 }
 0x284   : > { %v4103_v55 = vadd.f32 %v17371_v18, %v4064_v57  ;;  %v4065_v9 = vmul.f32 %v17355_v5, %v4026_v48  ;;  %v14805_v8 = vpop.f32.mrb[4].mxu0 }
 0x285   : > { %v4137_v60 = vmax.f32 %v4105_v56, 0.0  ;;  %v4106_v13 = vadd.f32 %v17371_v18, %v4067_v63  ;;  %v14937_v6 = vadd.f32 %v14805_v8, %v17127_v38  ;;  %v3875_v53 = vpop.f32.mrb[5].mxu0 }
 0x286   : > { %v4135_v40 = vmax.f32 %v4103_v55, 0.0  ;;  %v4104_v51 = vadd.f32 %v17371_v18, %v4065_v9  ;;  %v14938_v39 = vadd.f32 %v3875_v53, %v17129_v52  ;;  %v14806_v3 = vpop.f32.mrb[6].mxu0 }
 0x287   : > { %v14291_v33 = vpack.c.bf16 %v4137_v60, %v4137_v60  ;;  %v4138_v37 = vmax.f32 %v4106_v13, 0.0  ;;  %v4031_v25 = vadd.f32 %v14937_v6, %v17349_v7  ;;  %v14939_v42 = vadd.f32 %v14806_v3, %v17131_v44  ;;  %v3878_v45 = vpop.f32.mrb[7].mxu0 }
 0x288   : > { %v14289_v30 = vpack.c.bf16 %v4135_v40, %v4135_v40  ;;  %v4136_v38 = vmax.f32 %v4104_v51, 0.0  ;;  %v4029_v57 = vadd.f32 %v14938_v39, %v17349_v7  ;;  %v14940_v48 = vadd.f32 %v3878_v45, %v17133_v23  ;;  %v4593_v23 = vld [vmem:[#allocation3 + $0x18] sm:$0xf]  ;;  %v4586_v45 = vld [vmem:[#allocation3 + $0xc] sm:$0xf] }
 0x289   : > { %v4281_v56 = vshrl.u32 %v14291_v33, 16  ;;  %v4284_v63 = vshll.u32 %v14291_v33, 16  ;;  %v14292_v52 = vpack.c.bf16 %v4138_v37, %v4138_v37  ;;  %v4070_v55 = vmul.f32 %v17355_v5, %v4031_v25 }
 0x28a   : > { %v4264_v43 = vshrl.u32 %v14289_v30, 16  ;;  %v4267_v62 = vshll.u32 %v14289_v30, 16  ;;  %v14290_v9 = vpack.c.bf16 %v4136_v38, %v4136_v38  ;;  %v4068_v8 = vmul.f32 %v17355_v5, %v4029_v57 }
 0x28b   : > { %v4283_v60 = vrot.slane %v4281_v56, 7  ;;  %v4289_v13 = vshrl.u32 %v14292_v52, 16  ;;  %v4292_v44 = vshll.u32 %v14292_v52, 16  ;;  %v4109_v6 = vadd.f32 %v17371_v18, %v4070_v55  ;;  %v4597_v55 = vld [vmem:[#allocation3 + $0x20] sm:$0x1] }
 0x28c   : > { %v4266_v40 = vrot.slane %v4264_v43, 7  ;;  %v4272_v51 = vshrl.u32 %v14290_v9, 16  ;;  %v4275_v39 = vshll.u32 %v14290_v9, 16  ;;  %v4107_v3 = vadd.f32 %v17371_v18, %v4068_v8  ;;  %v14809_v33 = vpop.f32.mrb[8].mxu0 }
 0x28d   : > { %v4286_v37 = vor.u32 %v4284_v63, %v4283_v60  ;;  %v4287_v25 = vrot.slane %v4283_v60, 4  ;;  %v4291_v30 = vrot.slane %v4289_v13, 7  ;;  %v4141_v38 = vmax.f32 %v4109_v6, 0.0  ;;  %v3891_v57 = vpop.f32.mrb[9].mxu0 }
 0x28e   : > { %v4269_v56 = vor.u32 %v4267_v62, %v4266_v40  ;;  %v4270_v52 = vrot.slane %v4266_v40, 4  ;;  %v4274_v16 = vrot.slane %v4272_v51, 7  ;;  %v4139_v32 = vmax.f32 %v4107_v3, 0.0  ;;  %v14810_v19 = vpop.f32.mrb[10].mxu0 }
 0x28f   : > { %v4594_v43 = vsel %vm17403_vm12, %v4286_v37, %v4593_v23  ;;  %v4294_v0 = vor.u32 %v4292_v44, %v4291_v30  ;;  %v4296_v9 = vrot.slane %v4291_v30, 4  ;;  %v14295_v8 = vpack.c.bf16 %v4141_v38, %v4141_v38  ;;  %v3894_v58 = vpop.f32.mrb[11].mxu0  ;;  %v4607_v30 = vld [vmem:[#allocation3 + $0x30] sm:$0xf] }
 0x290   : > { %4595 = vst [vmem:[#allocation3 + $0x18] sm:$0xf] %v4594_v43  ;;  %v4587_v63 = vsel %vm17403_vm12, %v4269_v56, %v4586_v45  ;;  %v4277_v60 = vor.u32 %v4275_v39, %v4274_v16  ;;  %v4279_v13 = vrot.slane %v4274_v16, 4  ;;  %v14293_v62 = vpack.c.bf16 %v4139_v32, %v4139_v32 }
 0x291   : > { %4588 = vst [vmem:[#allocation3 + $0xc] sm:$0xf] %v4587_v63  ;;  %v4295_v40 = vsel %vm15674_vm6, %v4287_v25, %v4294_v0  ;;  %v4598_v51 = vsel %vm15724_vm2, %v4296_v9, %v4597_v55  ;;  %v4315_v23 = vshrl.u32 %v14295_v8, 16  ;;  %v4318_v44 = vshll.u32 %v14295_v8, 16  ;;  %v4600_v8 = vld [vmem:[#allocation3 + $0x24] sm:$0xf] }
 0x292   : > { %4596 = vst.msk [vmem:[#allocation3 + $0x1c] sm:$0xf] %vm508_vm5, %v4295_v40  ;;  %4599 = vst [vmem:[#allocation3 + $0x20] sm:$0x1] %v4598_v51  ;;  %v4278_v3 = vsel %vm15674_vm6, %v4270_v52, %v4277_v60  ;;  %v4591_v39 = vsel %vm15724_vm2, %v4279_v13, %v4590_v46  ;;  %v4298_v16 = vshrl.u32 %v14293_v62, 16  ;;  %v4301_v32 = vshll.u32 %v14293_v62, 16 }
 0x293   : > { %4589 = vst.msk [vmem:[#allocation3 + $0x10] sm:$0xf] %vm508_vm5, %v4278_v3  ;;  %4592 = vst [vmem:[#allocation3 + $0x14] sm:$0x1] %v4591_v39  ;;  %v17422_v0 = vrot.slane %v4315_v23, 7  ;;  %v4032_v37 = vadd.f32 %v14939_v42, %v17349_v7  ;;  %v4030_v25 = vadd.f32 %v14940_v48, %v17349_v7  ;;  %v14941_v45 = vadd.f32 %v14809_v33, %v17135_v41 }
 0x294   : > { %v17427_v38 = vrot.slane %v4298_v16, 7  ;;  %v14942_v56 = vadd.f32 %v3891_v57, %v17137_v21  ;;  %v14943_v46 = vadd.f32 %v14810_v19, %v17139_v50  ;;  %v14944_v52 = vadd.f32 %v3894_v58, %v17141_v4  ;;  %v14813_v55 = vpop.f32.mrb[12].mxu0 }
 0x295   : > { %v4320_v43 = vor.u32 %v4318_v44, %v17422_v0  ;;  %v4321_v9 = vrot.slane %v17422_v0, 4  ;;  %v4071_v42 = vmul.f32 %v17355_v5, %v4032_v37  ;;  %v4069_v48 = vmul.f32 %v17355_v5, %v4030_v25  ;;  %v3907_v41 = vpop.f32.mrb[13].mxu0 }
 0x296   : > { %v4303_v33 = vor.u32 %v4301_v32, %v17427_v38  ;;  %v4304_v63 = vrot.slane %v17427_v38, 4  ;;  %v4035_v21 = vadd.f32 %v14941_v45, %v17349_v7  ;;  %v4033_v50 = vadd.f32 %v14942_v56, %v17349_v7  ;;  %v17440_v4 = vpop.f32.mrb[14].mxu0 }
 0x297   : > { %v4608_v58 = vsel %vm17403_vm12, %v4320_v43, %v4607_v30  ;;  %v4110_v19 = vadd.f32 %v17371_v18, %v4071_v42  ;;  %v4108_v57 = vadd.f32 %v17371_v18, %v4069_v48  ;;  %v4036_v60 = vadd.f32 %v14943_v46, %v17349_v7  ;;  %v17447_v13 = vpop.f32.mrb[15].mxu0 }
 0x298   : > { %4609 = vst [vmem:[#allocation3 + $0x30] sm:$0xf] %v4608_v58  ;;  %v4601_v62 = vsel %vm17403_vm12, %v4303_v33, %v4600_v8  ;;  %v4074_v40 = vmul.f32 %v17355_v5, %v4035_v21  ;;  %v4072_v51 = vmul.f32 %v17355_v5, %v4033_v50  ;;  %v4034_v23 = vadd.f32 %v14944_v52, %v17349_v7 }
 0x299   : > { %4602 = vst [vmem:[#allocation3 + $0x24] sm:$0xf] %v4601_v62  ;;  %v4142_v44 = vmax.f32 %v4110_v19, 0.0  ;;  %v4140_v3 = vmax.f32 %v4108_v57, 0.0  ;;  %v4075_v39 = vmul.f32 %v17355_v5, %v4036_v60  ;;  %v14945_v16 = vadd.f32 %v14813_v55, %v17143_v31 }
 0x29a   : > { %v4113_v32 = vadd.f32 %v17371_v18, %v4074_v40  ;;  %v4111_v37 = vadd.f32 %v17371_v18, %v4072_v51  ;;  %v4073_v25 = vmul.f32 %v17355_v5, %v4034_v23  ;;  %v14946_v45 = vadd.f32 %v3907_v41, %v17145_v28  ;;  %v4611_v40 = vld [vmem:[#allocation3 + $0x38] sm:$0x1] }
 0x29b   : > { %v14296_v30 = vpack.c.bf16 %v4142_v44, %v4142_v44  ;;  %v14294_v56 = vpack.c.bf16 %v4140_v3, %v4140_v3  ;;  %v4114_v46 = vadd.f32 %v17371_v18, %v4075_v39  ;;  %v4039_v52 = vadd.f32 %v14945_v16, %v17349_v7  ;;  %v4604_v39 = vld [vmem:[#allocation3 + $0x2c] sm:$0x1] }
 0x29c   : > { %v4145_v43 = vmax.f32 %v4113_v32, 0.0  ;;  %v4143_v8 = vmax.f32 %v4111_v37, 0.0  ;;  %v4112_v42 = vadd.f32 %v17371_v18, %v4073_v25  ;;  %v4037_v31 = vadd.f32 %v14946_v45, %v17349_v7  ;;  %v17464_v55 = vpop.f32.mrb[16].mxu0 }
 0x29d   : > { %v4323_v48 = vshrl.u32 %v14296_v30, 16  ;;  %v4326_v33 = vshll.u32 %v14296_v30, 16  ;;  %v4306_v21 = vshrl.u32 %v14294_v56, 16  ;;  %v4309_v50 = vshll.u32 %v14294_v56, 16  ;;  %v3923_v58 = vpop.f32.mrb[17].mxu0 }
 0x29e   : > { %v14299_v28 = vpack.c.bf16 %v4145_v43, %v4145_v43  ;;  %v14297_v41 = vpack.c.bf16 %v4143_v8, %v4143_v8  ;;  %v4146_v19 = vmax.f32 %v4114_v46, 0.0  ;;  %v4144_v57 = vmax.f32 %v4112_v42, 0.0  ;;  %v17466_v60 = vpop.f32.mrb[18].mxu0 }
 0x29f   : > { %v4325_v62 = vrot.slane %v4323_v48, 7  ;;  %v4308_v51 = vrot.slane %v4306_v21, 7  ;;  %v4078_v23 = vmul.f32 %v17355_v5, %v4039_v52  ;;  %v4076_v44 = vmul.f32 %v17355_v5, %v4037_v31  ;;  %v17470_v3 = vpop.f32.mrb[19].mxu0 }
 0x2a0   : > { %v4349_v16 = vshrl.u32 %v14299_v28, 16  ;;  %v4352_v32 = vshll.u32 %v14299_v28, 16  ;;  %v4332_v37 = vshrl.u32 %v14297_v41, 16  ;;  %v4335_v25 = vshll.u32 %v14297_v41, 16  ;;  %v4614_v28 = vld [vmem:[#allocation3 + $0x3c] sm:$0xf] }
 0x2a1   : > { %v4328_v45 = vor.u32 %v4326_v33, %v4325_v62  ;;  %v4330_v30 = vrot.slane %v4325_v62, 4  ;;  %v4311_v56 = vor.u32 %v4309_v50, %v4308_v51  ;;  %v4313_v46 = vrot.slane %v4308_v51, 4  ;;  %v4621_v50 = vld [vmem:[#allocation3 + $0x48] sm:$0xf] }
 0x2a2   : > { %v4351_v43 = vrot.slane %v4349_v16, 7  ;;  %v4334_v8 = vrot.slane %v4332_v37, 7  ;;  %v14300_v42 = vpack.c.bf16 %v4146_v19, %v4146_v19  ;;  %v14298_v48 = vpack.c.bf16 %v4144_v57, %v4144_v57 }
 0x2a3   : > { %v4329_v52 = vsel %vm15674_vm6, %v4321_v9, %v4328_v45  ;;  %v4612_v31 = vsel %vm15724_vm2, %v4330_v30, %v4611_v40  ;;  %v4312_v33 = vsel %vm15674_vm6, %v4304_v63, %v4311_v56  ;;  %v4605_v21 = vsel %vm15724_vm2, %v4313_v46, %v4604_v39 }
 0x2a4   : > { %4610 = vst.msk [vmem:[#allocation3 + $0x34] sm:$0xf] %vm508_vm5, %v4329_v52  ;;  %4613 = vst [vmem:[#allocation3 + $0x38] sm:$0x1] %v4612_v31  ;;  %v4354_v0 = vor.u32 %v4352_v32, %v4351_v43  ;;  %v4355_v9 = vrot.slane %v4351_v43, 4  ;;  %v4337_v41 = vor.u32 %v4335_v25, %v4334_v8  ;;  %v4338_v19 = vrot.slane %v4334_v8, 4 }
 0x2a5   : > { %4603 = vst.msk [vmem:[#allocation3 + $0x28] sm:$0xf] %vm508_vm5, %v4312_v33  ;;  %4606 = vst [vmem:[#allocation3 + $0x2c] sm:$0x1] %v4605_v21  ;;  %v17486_v57 = vpop.f32.mrb[20].mxu0  ;;  %v4357_v38 = vshrl.u32 %v14300_v42, 16  ;;  %v4117_v37 = vadd.f32 %v17371_v18, %v4078_v23  ;;  %v4115_v32 = vadd.f32 %v17371_v18, %v4076_v44  ;;  %v14947_v56 = vadd.f32 %v17440_v4, %v17147_v20 }
 0x2a6   : > { %v4360_v62 = vshll.u32 %v14300_v42, 16  ;;  %v4340_v63 = vshrl.u32 %v14298_v48, 16  ;;  %v4343_v40 = vshll.u32 %v14298_v48, 16  ;;  %v17488_v51 = vpop.f32.mrb[21].mxu0  ;;  %v4622_v39 = vsel %vm17403_vm12, %v4354_v0, %v4621_v50  ;;  %v4625_v8 = vld [vmem:[#allocation3 + $0x50] sm:$0x1] }
 0x2a7   : > { %v4615_v16 = vsel %vm17403_vm12, %v4337_v41, %v4614_v28  ;;  %v17496_v25 = vpop.f32.mrb[22].mxu0  ;;  %4623 = vst [vmem:[#allocation3 + $0x48] sm:$0xf] %v4622_v39  ;;  %v4359_v45 = vrot.slane %v4357_v38, 7  ;;  %v14948_v46 = vadd.f32 %v17447_v13, %v17149_v17  ;;  %v4618_v42 = vld [vmem:[#allocation3 + $0x44] sm:$0x1]  ;;  %v14949_v44 = vadd.f32 %v17464_v55, %v17151_v54 }
 0x2a8   : > { %4616 = vst [vmem:[#allocation3 + $0x3c] sm:$0xf] %v4615_v16  ;;  %v4342_v30 = vrot.slane %v4340_v63, 7  ;;  %v17502_v43 = vpop.f32.mrb[23].mxu0  ;;  %v4149_v48 = vmax.f32 %v4117_v37, 0.0  ;;  %v4147_v23 = vmax.f32 %v4115_v32, 0.0  ;;  %v14950_v52 = vadd.f32 %v3923_v58, %v17153_v10 }
 0x2a9   : > { %v4362_v31 = vor.u32 %v4360_v62, %v4359_v45  ;;  %v4364_v33 = vrot.slane %v4359_v45, 4  ;;  %v4040_v4 = vadd.f32 %v14947_v56, %v17349_v7  ;;  %v4038_v17 = vadd.f32 %v14948_v46, %v17349_v7  ;;  %v4635_v56 = vld [vmem:[#allocation3 + $0x60] sm:$0xf]  ;;  %v4628_v46 = vld [vmem:[#allocation3 + $0x54] sm:$0xf] }
 0x2aa   : > { %v4345_v21 = vor.u32 %v4343_v40, %v4342_v30  ;;  %v4347_v50 = vrot.slane %v4342_v30, 4  ;;  %v14303_v28 = vpack.c.bf16 %v4149_v48, %v4149_v48  ;;  %v14301_v20 = vpack.c.bf16 %v4147_v23, %v4147_v23 }
 0x2ab   : > { %v4363_v13 = vsel %vm15674_vm6, %v4355_v9, %v4362_v31  ;;  %v4626_v0 = vsel %vm15724_vm2, %v4364_v33, %v4625_v8  ;;  %v4079_v62 = vmul.f32 %v17355_v5, %v4040_v4  ;;  %v4077_v63 = vmul.f32 %v17355_v5, %v4038_v17 }
 0x2ac   : > { %v4346_v54 = vsel %vm15674_vm6, %v4338_v19, %v4345_v21  ;;  %v4619_v10 = vsel %vm15724_vm2, %v4347_v50, %v4618_v42  ;;  %4624 = vst.msk [vmem:[#allocation3 + $0x4c] sm:$0xf] %vm508_vm5, %v4363_v13  ;;  %4627 = vst [vmem:[#allocation3 + $0x50] sm:$0x1] %v4626_v0  ;;  %v4383_v55 = vshrl.u32 %v14303_v28, 16  ;;  %v4386_v58 = vshll.u32 %v14303_v28, 16 }
 0x2ad   : > { %4617 = vst.msk [vmem:[#allocation3 + $0x40] sm:$0xf] %vm508_vm5, %v4346_v54  ;;  %4620 = vst [vmem:[#allocation3 + $0x44] sm:$0x1] %v4619_v10  ;;  %v4366_v41 = vshrl.u32 %v14301_v20, 16  ;;  %v4369_v38 = vshll.u32 %v14301_v20, 16  ;;  %v4043_v19 = vadd.f32 %v14949_v44, %v17349_v7  ;;  %v4041_v40 = vadd.f32 %v14950_v52, %v17349_v7 }
 0x2ae   : > { %v17519_v9 = vpop.f32.mrb[24].mxu0  ;;  %v17527_v16 = vrot.slane %v4383_v55, 7  ;;  %v14951_v32 = vadd.f32 %v17466_v60, %v17155_v59  ;;  %v14952_v45 = vadd.f32 %v17470_v3, %v17165_v29  ;;  %v4118_v8 = vadd.f32 %v17371_v18, %v4079_v62 }
 0x2af   : > { %v17525_v39 = vpop.f32.mrb[25].mxu0  ;;  %v17529_v37 = vrot.slane %v4366_v41, 7  ;;  %v4116_v42 = vadd.f32 %v17371_v18, %v4077_v63  ;;  %v4082_v48 = vmul.f32 %v17355_v5, %v4043_v19  ;;  %v4080_v23 = vmul.f32 %v17355_v5, %v4041_v40 }
 0x2b0   : > { %v17535_v30 = vpop.f32.mrb[26].mxu0  ;;  %v4388_v52 = vor.u32 %v4386_v58, %v17527_v16  ;;  %v4389_v59 = vrot.slane %v17527_v16, 4  ;;  %v4150_v3 = vmax.f32 %v4118_v8, 0.0  ;;  %v4044_v20 = vadd.f32 %v14951_v32, %v17349_v7 }
 0x2b1   : > { %v17541_v44 = vpop.f32.mrb[27].mxu0  ;;  %v4371_v29 = vor.u32 %v4369_v38, %v17529_v37  ;;  %v4372_v60 = vrot.slane %v17529_v37, 4  ;;  %v4148_v31 = vmax.f32 %v4116_v42, 0.0  ;;  %v4121_v33 = vadd.f32 %v17371_v18, %v4082_v48  ;;  %v4632_v48 = vld [vmem:[#allocation3 + $0x5c] sm:$0x1] }
 0x2b2   : > { %v4119_v21 = vadd.f32 %v17371_v18, %v4080_v23  ;;  %v4636_v50 = vsel %vm17403_vm12, %v4388_v52, %v4635_v56  ;;  %v4042_v4 = vadd.f32 %v14952_v45, %v17349_v7  ;;  %v14304_v17 = vpack.c.bf16 %v4150_v3, %v4150_v3 }
 0x2b3   : > { %v4629_v28 = vsel %vm17403_vm12, %v4371_v29, %v4628_v46  ;;  %4637 = vst [vmem:[#allocation3 + $0x60] sm:$0xf] %v4636_v50  ;;  %v14302_v13 = vpack.c.bf16 %v4148_v31, %v4148_v31  ;;  %v4153_v0 = vmax.f32 %v4121_v33, 0.0  ;;  %v4083_v10 = vmul.f32 %v17355_v5, %v4044_v20 }
 0x2b4   : > { %4630 = vst [vmem:[#allocation3 + $0x54] sm:$0xf] %v4629_v28  ;;  %v4151_v54 = vmax.f32 %v4119_v21, 0.0  ;;  %v4081_v55 = vmul.f32 %v17355_v5, %v4042_v4  ;;  %v14953_v58 = vadd.f32 %v17486_v57, %v17175_v61  ;;  %v14954_v41 = vadd.f32 %v17488_v51, %v17177_v24  ;;  %v17561_v38 = vpop.f32.mrb[28].mxu0  ;;  %v4639_v57 = vld [vmem:[#allocation3 + $0x68] sm:$0x1] }
 0x2b5   : > { %v4391_v62 = vshrl.u32 %v14304_v17, 16  ;;  %v4394_v63 = vshll.u32 %v14304_v17, 16  ;;  %v4374_v19 = vshrl.u32 %v14302_v13, 16  ;;  %v4377_v40 = vshll.u32 %v14302_v13, 16  ;;  %v17563_v16 = vpop.f32.mrb[29].mxu0 }
 0x2b6   : > { %v14307_v37 = vpack.c.bf16 %v4153_v0, %v4153_v0  ;;  %v14305_v32 = vpack.c.bf16 %v4151_v54, %v4151_v54  ;;  %v4122_v45 = vadd.f32 %v17371_v18, %v4083_v10  ;;  %v4120_v56 = vadd.f32 %v17371_v18, %v4081_v55  ;;  %v17567_v46 = vpop.f32.mrb[30].mxu0  ;;  %v4649_v55 = vld [vmem:[#allocation3 + $0x78] sm:$0xf] }
 0x2b7   : > { %v4393_v61 = vrot.slane %v4391_v62, 7  ;;  %v4376_v8 = vrot.slane %v4374_v19, 7  ;;  %v4047_v24 = vadd.f32 %v14953_v58, %v17349_v7  ;;  %v4045_v51 = vadd.f32 %v14954_v41, %v17349_v7  ;;  %v17571_v42 = vpop.f32.mrb[31].mxu0  ;;  %v4642_v58 = vld [vmem:[#allocation3 + $0x6c] sm:$0xf] }
 0x2b8   : > { %v4417_v23 = vshrl.u32 %v14307_v37, 16  ;;  %v4420_v52 = vshll.u32 %v14307_v37, 16  ;;  %v4400_v29 = vshrl.u32 %v14305_v32, 16  ;;  %v4403_v3 = vshll.u32 %v14305_v32, 16 }
 0x2b9   : > { %v4396_v31 = vor.u32 %v4394_v63, %v4393_v61  ;;  %v4398_v33 = vrot.slane %v4393_v61, 4  ;;  %v4379_v21 = vor.u32 %v4377_v40, %v4376_v8  ;;  %v4381_v50 = vrot.slane %v4376_v8, 4 }
 0x2ba   : > { %v4419_v28 = vrot.slane %v4417_v23, 7  ;;  %v4402_v20 = vrot.slane %v4400_v29, 7  ;;  %v4154_v4 = vmax.f32 %v4122_v45, 0.0  ;;  %v4152_v17 = vmax.f32 %v4120_v56, 0.0 }
 0x2bb   : > { %v4397_v13 = vsel %vm15674_vm6, %v4389_v59, %v4396_v31  ;;  %v4640_v0 = vsel %vm15724_vm2, %v4398_v33, %v4639_v57  ;;  %v4380_v54 = vsel %vm15674_vm6, %v4372_v60, %v4379_v21  ;;  %v4633_v10 = vsel %vm15724_vm2, %v4381_v50, %v4632_v48 }
 0x2bc   : > { %4638 = vst.msk [vmem:[#allocation3 + $0x64] sm:$0xf] %vm508_vm5, %v4397_v13  ;;  %4641 = vst [vmem:[#allocation3 + $0x68] sm:$0x1] %v4640_v0  ;;  %v4422_v41 = vor.u32 %v4420_v52, %v4419_v28  ;;  %v4423_v62 = vrot.slane %v4419_v28, 4  ;;  %v4405_v59 = vor.u32 %v4403_v3, %v4402_v20  ;;  %v4406_v63 = vrot.slane %v4402_v20, 4 }
 0x2bd   : > { %4631 = vst.msk [vmem:[#allocation3 + $0x58] sm:$0xf] %vm508_vm5, %v4380_v54  ;;  %4634 = vst [vmem:[#allocation3 + $0x5c] sm:$0x1] %v4633_v10  ;;  %v14308_v19 = vpack.c.bf16 %v4154_v4, %v4154_v4  ;;  %v14306_v40 = vpack.c.bf16 %v4152_v17, %v4152_v17  ;;  %v4086_v37 = vmul.f32 %v17355_v5, %v4047_v24 }
 0x2be   : > { %v4084_v60 = vmul.f32 %v17355_v5, %v4045_v51  ;;  %v4650_v32 = vsel %vm17403_vm12, %v4422_v41, %v4649_v55  ;;  %v4643_v45 = vsel %vm17403_vm12, %v4405_v59, %v4642_v58  ;;  %v14955_v56 = vadd.f32 %v17496_v25, %v17179_v47  ;;  %v4653_v25 = vld [vmem:[#allocation3 + $0x80] sm:$0x1] }
 0x2bf   : > { %v14956_v61 = vadd.f32 %v17502_v43, %v17183_v49  ;;  %4651 = vst [vmem:[#allocation3 + $0x78] sm:$0xf] %v4650_v32  ;;  %4644 = vst [vmem:[#allocation3 + $0x6c] sm:$0xf] %v4643_v45  ;;  %v4425_v57 = vshrl.u32 %v14308_v19, 16  ;;  %v4428_v8 = vshll.u32 %v14308_v19, 16  ;;  %v4125_v51 = vadd.f32 %v17371_v18, %v4086_v37 }
 0x2c0   : > { %v4408_v48 = vshrl.u32 %v14306_v40, 16  ;;  %v4411_v24 = vshll.u32 %v14306_v40, 16  ;;  %v4123_v23 = vadd.f32 %v17371_v18, %v4084_v60  ;;  %v4048_v52 = vadd.f32 %v14955_v56, %v17349_v7  ;;  %v4646_v43 = vld [vmem:[#allocation3 + $0x74] sm:$0x1] }
 0x2c1   : > { %v4046_v29 = vadd.f32 %v14956_v61, %v17349_v7  ;;  %v4427_v3 = vrot.slane %v4425_v57, 7  ;;  %v14957_v47 = vadd.f32 %v17519_v9, %v17201_v15  ;;  %v14958_v49 = vadd.f32 %v17525_v39, %v17203_v27  ;;  %v5149_v61 = vld [vmem:[%s21110_s7] sm:$0xf]  ;;  %v4663_v57 = vld [vmem:[#allocation3 + $0x90] sm:$0xf] }
 0x2c2   : > { %v4410_v31 = vrot.slane %v4408_v48, 7  ;;  %v4157_v33 = vmax.f32 %v4125_v51, 0.0  ;;  %v4155_v21 = vmax.f32 %v4123_v23, 0.0  ;;  %v4087_v50 = vmul.f32 %v17355_v5, %v4048_v52  ;;  %15288 = vmatprep.subr.msk.bf16.mxu1 %vm6901_vm7, %v5149_v61 }
 0x2c3   : > { %v4085_v28 = vmul.f32 %v17355_v5, %v4046_v29  ;;  %v4430_v20 = vor.u32 %v4428_v8, %v4427_v3  ;;  %v4432_v4 = vrot.slane %v4427_v3, 4  ;;  %v4051_v37 = vadd.f32 %v14957_v47, %v17349_v7  ;;  %v4656_v8 = vld [vmem:[#allocation3 + $0x84] sm:$0xf] }
 0x2c4   : > { %v4413_v17 = vor.u32 %v4411_v24, %v4410_v31  ;;  %v4415_v13 = vrot.slane %v4410_v31, 4  ;;  %v14311_v0 = vpack.c.bf16 %v4157_v33, %v4157_v33  ;;  %v14309_v54 = vpack.c.bf16 %v4155_v21, %v4155_v21  ;;  %v14016_v3 = vld.sshfl [vmem:[#allocation3 + $0x18] sm:$0x33 pattern:$0x75316420] }
 0x2c5   : > { %v4126_v10 = vadd.f32 %v17371_v18, %v4087_v50  ;;  %v4124_v15 = vadd.f32 %v17371_v18, %v4085_v28  ;;  %v4431_v27 = vsel %vm15674_vm6, %v4423_v62, %v4430_v20  ;;  %v4654_v9 = vsel %vm15724_vm2, %v4432_v4, %v4653_v25  ;;  %v4667_v4 = vld [vmem:[#allocation3 + $0x98] sm:$0x1] }
 0x2c6   : > { %v4414_v39 = vsel %vm15674_vm6, %v4406_v63, %v4413_v17  ;;  %v4647_v55 = vsel %vm15724_vm2, %v4415_v13, %v4646_v43  ;;  %4652 = vst.msk [vmem:[#allocation3 + $0x7c] sm:$0xf] %vm508_vm5, %v4431_v27  ;;  %4655 = vst [vmem:[#allocation3 + $0x80] sm:$0x1] %v4654_v9  ;;  %v4451_v58 = vshrl.u32 %v14311_v0, 16  ;;  %v4454_v41 = vshll.u32 %v14311_v0, 16 }
 0x2c7   : > { %4645 = vst.msk [vmem:[#allocation3 + $0x70] sm:$0xf] %vm508_vm5, %v4414_v39  ;;  %4648 = vst [vmem:[#allocation3 + $0x74] sm:$0x1] %v4647_v55  ;;  %v4434_v59 = vshrl.u32 %v14309_v54, 16  ;;  %v4437_v19 = vshll.u32 %v14309_v54, 16  ;;  %v4049_v60 = vadd.f32 %v14958_v49, %v17349_v7  ;;  %v14959_v45 = vadd.f32 %v17535_v30, %v17205_v1 }
 0x2c8   : > { %v4158_v62 = vmax.f32 %v4126_v10, 0.0  ;;  %v4156_v40 = vmax.f32 %v4124_v15, 0.0  ;;  %v4453_v63 = vrot.slane %v4451_v58, 7  ;;  %v14960_v56 = vadd.f32 %v17541_v44, %v17207_v35  ;;  %v4660_v17 = vld [vmem:[#allocation3 + $0x8c] sm:$0x1] }
 0x2c9   : > { %v4436_v32 = vrot.slane %v4434_v59, 7  ;;  %v4090_v51 = vmul.f32 %v17355_v5, %v4051_v37  ;;  %v4088_v23 = vmul.f32 %v17355_v5, %v4049_v60  ;;  %v4052_v28 = vadd.f32 %v14959_v45, %v17349_v7  ;;  %v14031_v60 = vld.sshfl [vmem:[#allocation3 + $0x20] sm:$0x1 pattern:$0x75316420] }
 0x2ca   : > { %v14312_v48 = vpack.c.bf16 %v4158_v62, %v4158_v62  ;;  %v14310_v24 = vpack.c.bf16 %v4156_v40, %v4156_v40  ;;  %v4456_v52 = vor.u32 %v4454_v41, %v4453_v63  ;;  %v4457_v29 = vrot.slane %v4453_v63, 4 }
 0x2cb   : > { %v4439_v1 = vor.u32 %v4437_v19, %v4436_v32  ;;  %v4440_v30 = vrot.slane %v4436_v32, 4  ;;  %v4129_v43 = vadd.f32 %v17371_v18, %v4090_v51  ;;  %v4127_v33 = vadd.f32 %v17371_v18, %v4088_v23  ;;  %v14017_v19 = vld.sshfl [vmem:[#allocation3 + $0x1c] sm:$0x33 pattern:$0x75316420] }
 0x2cc   : > { %v4459_v35 = vshrl.u32 %v14312_v48, 16  ;;  %v4462_v44 = vshll.u32 %v14312_v48, 16  ;;  %v4442_v31 = vshrl.u32 %v14310_v24, 16  ;;  %v4445_v47 = vshll.u32 %v14310_v24, 16 }
 0x2cd   : > { %v4664_v49 = vsel %vm17403_vm12, %v4456_v52, %v4663_v57  ;;  %v4657_v25 = vsel %vm17403_vm12, %v4439_v1, %v4656_v8  ;;  %v4050_v20 = vadd.f32 %v14960_v56, %v17349_v7  ;;  %v4161_v13 = vmax.f32 %v4129_v43, 0.0  ;;  %v4677_v52 = vld [vmem:[#allocation3 + $0xa8] sm:$0xf] }
 0x2ce   : > { %4665 = vst [vmem:[#allocation3 + $0x90] sm:$0xf] %v4664_v49  ;;  %4658 = vst [vmem:[#allocation3 + $0x84] sm:$0xf] %v4657_v25  ;;  %v4461_v21 = vrot.slane %v4459_v35, 7  ;;  %v4444_v50 = vrot.slane %v4442_v31, 7  ;;  %v4820_v54 = vcombine.high %v14016_v3, %v14016_v3  ;;  %v17636_v10 = vrot.slane %v14016_v3, %v17250_v26 }
 0x2cf   : > { %v4159_v0 = vmax.f32 %v4127_v33, 0.0  ;;  %v14315_v55 = vpack.c.bf16 %v4161_v13, %v4161_v13  ;;  %v4091_v41 = vmul.f32 %v17355_v5, %v4052_v28  ;;  %v4089_v59 = vmul.f32 %v17355_v5, %v4050_v20 }
 0x2d0   : > { %v4464_v15 = vor.u32 %v4462_v44, %v4461_v21  ;;  %v4466_v27 = vrot.slane %v4461_v21, 4  ;;  %v4447_v9 = vor.u32 %v4445_v47, %v4444_v50  ;;  %v4449_v39 = vrot.slane %v4444_v50, 4 }
 0x2d1   : > { %v14313_v58 = vpack.c.bf16 %v4159_v0, %v4159_v0  ;;  %v4485_v5 = vshrl.u32 %v14315_v55, 16  ;;  %v4488_v63 = vshll.u32 %v14315_v55, 16  ;;  %v4130_v56 = vadd.f32 %v17371_v18, %v4091_v41  ;;  %v4681_v55 = vld [vmem:[#allocation3 + $0xb0] sm:$0x1] }
 0x2d2   : > { %v4465_v7 = vsel %vm15674_vm6, %v4457_v29, %v4464_v15  ;;  %v4668_v62 = vsel %vm15724_vm2, %v4466_v27, %v4667_v4  ;;  %v4448_v40 = vsel %vm15674_vm6, %v4440_v30, %v4447_v9  ;;  %v4661_v37 = vsel %vm15724_vm2, %v4449_v39, %v4660_v17  ;;  %v4670_v29 = vld [vmem:[#allocation3 + $0x9c] sm:$0xf] }
 0x2d3   : > { %4666 = vst.msk [vmem:[#allocation3 + $0x94] sm:$0xf] %vm508_vm5, %v4465_v7  ;;  %4669 = vst [vmem:[#allocation3 + $0x98] sm:$0x1] %v4668_v62  ;;  %v4468_v32 = vshrl.u32 %v14313_v58, 16  ;;  %v4471_v45 = vshll.u32 %v14313_v58, 16  ;;  %v4128_v61 = vadd.f32 %v17371_v18, %v4089_v59  ;;  %v17653_v57 = vrot.slane %v4820_v54, %v17250_v26 }
 0x2d4   : > { %4659 = vst.msk [vmem:[#allocation3 + $0x88] sm:$0xf] %vm508_vm5, %v4448_v40  ;;  %4662 = vst [vmem:[#allocation3 + $0x8c] sm:$0x1] %v4661_v37  ;;  %v17657_v8 = vcombine.high %v17636_v10, %v17636_v10  ;;  %v4487_v48 = vrot.slane %v4485_v5, 7  ;;  %v4844_v51 = vcombine.high %v14017_v19, %v14017_v19  ;;  %v17660_v23 = vrot.slane %v14017_v19, %v17250_v26 }
 0x2d5   : > { %v4470_v24 = vrot.slane %v4468_v32, 7  ;;  %v4162_v1 = vmax.f32 %v4130_v56, 0.0  ;;  %v4160_v30 = vmax.f32 %v4128_v61, 0.0  ;;  %v17664_v18 = vcombine.high %v17653_v57, %v17653_v57  ;;  %v4674_v19 = vld [vmem:[#allocation3 + $0xa4] sm:$0x1] }
 0x2d6   : > { %v17667_v3 = vrot.slane %v14031_v60, %v17250_v26  ;;  %v4490_v35 = vor.u32 %v4488_v63, %v4487_v48  ;;  %v4491_v44 = vrot.slane %v4487_v48, 4  ;;  %v17670_v43 = vrot.slane %v4844_v51, %v17250_v26 }
 0x2d7   : > { %v4473_v31 = vor.u32 %v4471_v45, %v4470_v24  ;;  %v4474_v47 = vrot.slane %v4470_v24, 4  ;;  %v14316_v49 = vpack.c.bf16 %v4162_v1, %v4162_v1  ;;  %v14314_v25 = vpack.c.bf16 %v4160_v30, %v4160_v30 }
 0x2d8   : > { %21517 = vst [vmem:[#allocation7_spill] sm:$0xff] %v17667_v3  ;;  %v17674_v33 = vcombine.high %v17660_v23, %v17660_v23  ;;  %v4678_v21 = vsel %vm17403_vm12, %v4490_v35, %v4677_v52  ;;  %v5349_v28 = vshrl.u32 %v17636_v10, 16  ;;  %v5354_v20 = vshll.u32 %v17653_v57, 16 }
 0x2d9   : > { %v4671_v50 = vsel %vm17403_vm12, %v4473_v31, %v4670_v29  ;;  %4679 = vst [vmem:[#allocation3 + $0xa8] sm:$0xf] %v4678_v21  ;;  %v4493_v4 = vshrl.u32 %v14316_v49, 16  ;;  %v4496_v17 = vshll.u32 %v14316_v49, 16  ;;  %v4476_v13 = vshrl.u32 %v14314_v25, 16 }
 0x2da   : > { %4672 = vst [vmem:[#allocation3 + $0x9c] sm:$0xf] %v4671_v50  ;;  %v4479_v0 = vshll.u32 %v14314_v25, 16  ;;  %v17684_v54 = vcombine.high %v17670_v43, %v17670_v43  ;;  %v5356_v15 = vsel %vm17272_vm14, %v5349_v28, %v5354_v20  ;;  %v5357_v27 = vshrl.u32 %v17653_v57, 16 }
 0x2db   : > { %v5362_v9 = vshll.u32 %v17657_v8, 16  ;;  %v4495_v39 = vrot.slane %v4493_v4, 7  ;;  %v4478_v58 = vrot.slane %v4476_v13, 7  ;;  %v5365_v41 = vshrl.u32 %v17657_v8, 16 }
 0x2dc   : > { %v5370_v59 = vshll.u32 %v17664_v18, 16  ;;  %v5373_v62 = vshrl.u32 %v17664_v18, 16  ;;  %v5378_v40 = vshll.u32 %v17660_v23, 16  ;;  %v5381_v37 = vshrl.u32 %v17660_v23, 16 }
 0x2dd   : > { %v5364_v7 = vsel %vm17272_vm14, %v5357_v27, %v5362_v9  ;;  %v4498_v60 = vor.u32 %v4496_v17, %v4495_v39  ;;  %v4500_v5 = vrot.slane %v4495_v39, 4  ;;  %v4481_v63 = vor.u32 %v4479_v0, %v4478_v58 }
 0x2de   : > { %v4483_v32 = vrot.slane %v4478_v58, 4  ;;  %v5372_v45 = vsel %vm17272_vm14, %v5365_v41, %v5370_v59  ;;  %v5380_v56 = vsel %vm17272_vm14, %v5373_v62, %v5378_v40  ;;  %v5386_v61 = vshll.u32 %v17670_v43, 16 }
 0x2df   : > { %v5389_v48 = vshrl.u32 %v17670_v43, 16  ;;  %v4499_v24 = vsel %vm15674_vm6, %v4491_v44, %v4498_v60  ;;  %v4682_v51 = vsel %vm15724_vm2, %v4500_v5, %v4681_v55  ;;  %v4482_v52 = vsel %vm15674_vm6, %v4474_v47, %v4481_v63 }
 0x2e0   : > { %v4675_v29 = vsel %vm15724_vm2, %v4483_v32, %v4674_v19  ;;  %4680 = vst.msk [vmem:[#allocation3 + $0xac] sm:$0xf] %vm508_vm5, %v4499_v24  ;;  %4683 = vst [vmem:[#allocation3 + $0xb0] sm:$0x1] %v4682_v51  ;;  %v5388_v1 = vsel %vm17272_vm14, %v5381_v37, %v5386_v61  ;;  %v5394_v30 = vshll.u32 %v17674_v33, 16  ;;  %v5397_v35 = vshrl.u32 %v17674_v33, 16 }
 0x2e1   : > { %4673 = vst.msk [vmem:[#allocation3 + $0xa0] sm:$0xf] %vm508_vm5, %v4482_v52  ;;  %4676 = vst [vmem:[#allocation3 + $0xa4] sm:$0x1] %v4675_v29  ;;  %v5402_v44 = vshll.u32 %v17684_v54, 16  ;;  %v5405_v31 = vshrl.u32 %v17684_v54, 16  ;;  %v5923_v49 = vrot.slane %v5356_v15, %v17250_v26  ;;  %v5937_v25 = vrot.slane %v5364_v7, %v17250_v26 }
 0x2e2   : > { %v5410_v47 = vshll.u32 %v17667_v3, 16  ;;  %v5396_v21 = vsel %vm17272_vm14, %v5389_v48, %v5394_v30  ;;  %v5951_v28 = vrot.slane %v5372_v45, %v17250_v26  ;;  %v5965_v20 = vrot.slane %v5380_v56, %v17250_v26  ;;  %v15383_v52 = vld [vmem:[%s21107_s4] ss:$0 sm:$0xff] }
 0x2e3   : > { %v5404_v50 = vsel %vm17272_vm14, %v5397_v35, %v5402_v44  ;;  %v5930_v17 = vrot.slane %v5923_v49, %v17250_v26  ;;  %v5944_v13 = vrot.slane %v5937_v25, %v17250_v26  ;;  %v5979_v0 = vrot.slane %v5388_v1, %v17250_v26  ;;  %v14018_v1 = vld.sshfl [vmem:[#allocation3 + $0x30] sm:$0x33 pattern:$0x75316420] }
 0x2e4   : > { %v5412_v4 = vsel %vm17272_vm14, %v5405_v31, %v5410_v47  ;;  %v5958_v15 = vrot.slane %v5951_v28, %v17250_v26  ;;  %v5972_v27 = vrot.slane %v5965_v20, %v17250_v26  ;;  %v5993_v9 = vrot.slane %v5396_v21, %v17250_v26  ;;  %v15384_v47 = vld [vmem:[%s21108_s5] ss:$0 sm:$0xff] }
 0x2e5   : > { %v6007_v39 = vrot.slane %v5404_v50, %v17250_v26  ;;  %v5986_v55 = vrot.slane %v5979_v0, %v17250_v26  ;;  %v6021_v58 = vrot.slane %v5412_v4, %v17250_v26  ;;  %v6709_v41 = vunpack.c.l.b16 %v5930_v17 }
 0x2e6   : > { %v6710_v59 = vunpack.c.l.b16 %v5944_v13  ;;  %v6000_v19 = vrot.slane %v5993_v9, %v17250_v26  ;;  %v6711_v62 = vunpack.c.l.b16 %v5958_v15  ;;  %v6712_v40 = vunpack.c.l.b16 %v5972_v27  ;;  %v14019_v15 = vld.sshfl [vmem:[#allocation3 + $0x34] sm:$0x33 pattern:$0x75316420] }
 0x2e7   : > { %v6014_v7 = vrot.slane %v6007_v39, %v17250_v26  ;;  %v6028_v37 = vrot.slane %v6021_v58, %v17250_v26  ;;  %v6713_v60 = vunpack.c.l.b16 %v5986_v55  ;;  %v14961_v63 = vadd.f32 %v17561_v38, %v17215_v34  ;;  %v14020_v39 = vld.sshfl [vmem:[#allocation3 + $0x48] sm:$0x33 pattern:$0x75316420] }
 0x2e8   : > { %v6786_v5 = vrot.slane %v6710_v59, 7  ;;  %v6714_v32 = vunpack.c.l.b16 %v6000_v19  ;;  %v6788_v56 = vrot.slane %v6711_v62, 6  ;;  %v6790_v61 = vrot.slane %v6712_v40, 5 }
 0x2e9   : > { %v6715_v45 = vunpack.c.l.b16 %v6014_v7  ;;  %v6716_v48 = vunpack.c.l.b16 %v6028_v37  ;;  %v6792_v51 = vrot.slane %v6713_v60, 4  ;;  %v4055_v29 = vadd.f32 %v15383_v52, %v14961_v63 }
 0x2ea   : > { %v6787_v24 = vsel %vm6766_vm13, %v6786_v5, %v6709_v41  ;;  %v6794_v35 = vrot.slane %v6714_v32, 3  ;;  %v14962_v34 = vadd.f32 %v17563_v16, %v17219_v12  ;;  %v14963_v25 = vadd.f32 %v17567_v46, %v17221_v2  ;;  %v15385_v16 = vld [vmem:[%s21109_s6] ss:$0 sm:$0xff] }
 0x2eb   : > { %v6789_v30 = vsel %vm6769_vm3, %v6788_v56, %v6787_v24  ;;  %v6796_v44 = vrot.slane %v6715_v45, 2  ;;  %v6798_v31 = vrot.slane %v6716_v48, 1  ;;  %v4094_v49 = vmul.f32 %v15384_v47, %v4055_v29  ;;  %v4691_v48 = vld [vmem:[#allocation3 + $0xc0] sm:$0xf] }
 0x2ec   : > { %v6791_v38 = vsel %vm6772_vm11, %v6790_v61, %v6789_v30  ;;  %v4053_v50 = vadd.f32 %v15383_v52, %v14962_v34  ;;  %v14964_v28 = vadd.f32 %v17571_v42, %v17223_v14  ;;  %v4868_v20 = vcombine.high %v14018_v1, %v14018_v1 }
 0x2ed   : > { %v6793_v21 = vsel %vm6775_vm4, %v6792_v51, %v6791_v38  ;;  %v4133_v4 = vadd.f32 %v15385_v16, %v4094_v49  ;;  %v4056_v17 = vadd.f32 %v15383_v52, %v14963_v25  ;;  %v17765_v13 = vrot.slane %v14018_v1, %v17250_v26  ;;  %v14033_v25 = vld.sshfl [vmem:[#allocation3 + $0x50] sm:$0x1 pattern:$0x75316420] }
 0x2ee   : > { %v6795_v12 = vsel %vm6778_vm8, %v6794_v35, %v6793_v21  ;;  %v4092_v46 = vmul.f32 %v15384_v47, %v4053_v50  ;;  %v4054_v0 = vadd.f32 %v15383_v52, %v14964_v28  ;;  %v17769_v27 = vrot.slane %v4868_v20, %v17250_v26  ;;  %v14032_v52 = vld.sshfl [vmem:[#allocation3 + $0x38] sm:$0x1 pattern:$0x75316420] }
 0x2ef   : > { %v6797_v2 = vsel %vm6781_vm1, %v6796_v44, %v6795_v12  ;;  %v4165_v42 = vmax.f32 %v4133_v4, 0.0  ;;  %v4095_v9 = vmul.f32 %v15384_v47, %v4056_v17  ;;  %v17776_v55 = vcombine.high %v17765_v13, %v17765_v13  ;;  %v14021_v44 = vld.sshfl [vmem:[#allocation3 + $0x4c] sm:$0x33 pattern:$0x75316420] }
 0x2f0   : > { %v17772_v14 = vsel %vm6784_vm10, %v6798_v31, %v6797_v2  ;;  %v4131_v41 = vadd.f32 %v15385_v16, %v4092_v46  ;;  %v4093_v59 = vmul.f32 %v15384_v47, %v4054_v0  ;;  %v17782_v19 = vcombine.high %v17769_v27, %v17769_v27  ;;  %v4684_v0 = vld [vmem:[#allocation3 + $0xb4] sm:$0xf] }
 0x2f1   : > { %21518 = vst [vmem:[#allocation12_spill] sm:$0xff] %v17772_v14  ;;  %v6884_v58 = vpack.c.b16 %v17772_v14, %v17392_v36  ;;  %v14319_v7 = vpack.c.bf16 %v4165_v42, %v4165_v42  ;;  %v4134_v62 = vadd.f32 %v15385_v16, %v4095_v9  ;;  %v4892_v40 = vcombine.high %v14019_v15, %v14019_v15 }
 0x2f2   : > { %v17785_v37 = vrot.slane %v14019_v15, %v17250_v26  ;;  %v4163_v60 = vmax.f32 %v4131_v41, 0.0  ;;  %v4132_v5 = vadd.f32 %v15385_v16, %v4093_v59  ;;  %v4916_v63 = vcombine.high %v14020_v39, %v14020_v39  ;;  %v4695_v41 = vld [vmem:[#allocation3 + $0xc8] sm:$0x1] }
 0x2f3   : > { %14833 = vmatprep.mubr.msk.bf16.mxu1 %vm6888_vm15, %v6884_v58  ;;  %v17789_v32 = vrot.slane %v14020_v39, %v17250_v26  ;;  %v4519_v36 = vshrl.u32 %v14319_v7, 16  ;;  %v4522_v45 = vshll.u32 %v14319_v7, 16  ;;  %v4166_v56 = vmax.f32 %v4134_v62, 0.0 }
 0x2f4   : > { %v17792_v61 = vrot.slane %v4892_v40, %v17250_v26  ;;  %v14317_v24 = vpack.c.bf16 %v4163_v60, %v4163_v60  ;;  %v4164_v51 = vmax.f32 %v4132_v5, 0.0  ;;  %v17796_v29 = vcombine.high %v17785_v37, %v17785_v37  ;;  %v4688_v60 = vld [vmem:[#allocation3 + $0xbc] sm:$0x1] }
 0x2f5   : > { %v17799_v1 = vrot.slane %v4916_v63, %v17250_v26  ;;  %v4521_v30 = vrot.slane %v4519_v36, 7  ;;  %v14320_v35 = vpack.c.bf16 %v4166_v56, %v4166_v56  ;;  %v17807_v38 = vcombine.high %v17789_v32, %v17789_v32 }
 0x2f6   : > { %v17803_v34 = vcombine.high %v17792_v61, %v17792_v61  ;;  %v4502_v31 = vshrl.u32 %v14317_v24, 16  ;;  %v4505_v47 = vshll.u32 %v14317_v24, 16  ;;  %v14318_v49 = vpack.c.bf16 %v4164_v51, %v4164_v51 }
 0x2f7   : > { %v17811_v21 = vcombine.high %v17799_v1, %v17799_v1  ;;  %v4524_v50 = vor.u32 %v4522_v45, %v4521_v30  ;;  %v4525_v28 = vrot.slane %v4521_v30, 4  ;;  %v4527_v20 = vshrl.u32 %v14320_v35, 16 }
 0x2f8   : > { %v4530_v12 = vshll.u32 %v14320_v35, 16  ;;  %v4504_v16 = vrot.slane %v4502_v31, 7  ;;  %v4510_v4 = vshrl.u32 %v14318_v49, 16  ;;  %v4513_v17 = vshll.u32 %v14318_v49, 16 }
 0x2f9   : > { %v4940_v2 = vcombine.high %v14021_v44, %v14021_v44  ;;  %v4692_v46 = vsel %vm17403_vm12, %v4524_v50, %v4691_v48  ;;  %v4529_v15 = vrot.slane %v4527_v20, 7  ;;  %v17816_v42 = vrot.slane %v14021_v44, %v17250_v26 }
 0x2fa   : > { %v17819_v9 = vrot.slane %v14032_v52, %v17250_v26  ;;  %4693 = vst [vmem:[#allocation3 + $0xc0] sm:$0xf] %v4692_v46  ;;  %v4507_v39 = vor.u32 %v4505_v47, %v4504_v16  ;;  %v4508_v58 = vrot.slane %v4504_v16, 4  ;;  %v4512_v59 = vrot.slane %v4510_v4, 7 }
 0x2fb   : > { %v17822_v7 = vrot.slane %v4940_v2, %v17250_v26  ;;  %v4532_v62 = vor.u32 %v4530_v12, %v4529_v15  ;;  %v4534_v40 = vrot.slane %v4529_v15, 4  ;;  %v17826_v5 = vcombine.high %v17816_v42, %v17816_v42 }
 0x2fc   : > { %21519 = vst [vmem:[#allocation13_spill] sm:$0xff] %v17819_v9  ;;  %v17829_v63 = vrot.slane %v14033_v25, %v17250_v26  ;;  %v4685_v36 = vsel %vm17403_vm12, %v4507_v39, %v4684_v0  ;;  %v4515_v45 = vor.u32 %v4513_v17, %v4512_v59  ;;  %v4517_v56 = vrot.slane %v4512_v59, 4 }
 0x2fd   : > { %v17835_v48 = vcombine.high %v17822_v7, %v17822_v7  ;;  %4686 = vst [vmem:[#allocation3 + $0xb4] sm:$0xf] %v4685_v36  ;;  %v4533_v24 = vsel %vm15674_vm6, %v4525_v28, %v4532_v62  ;;  %v4696_v51 = vsel %vm15724_vm2, %v4534_v40, %v4695_v41  ;;  %v5414_v52 = vshrl.u32 %v17765_v13, 16 }
 0x2fe   : > { %21520 = vst [vmem:[#allocation15_spill] sm:$0xff] %v17829_v63  ;;  %v5419_v30 = vshll.u32 %v17769_v27, 16  ;;  %4694 = vst.msk [vmem:[#allocation3 + $0xc4] sm:$0xf] %vm508_vm5, %v4533_v24  ;;  %v4516_v53 = vsel %vm15674_vm6, %v4508_v58, %v4515_v45  ;;  %v4689_v35 = vsel %vm15724_vm2, %v4517_v56, %v4688_v60  ;;  %v5422_v44 = vshrl.u32 %v17769_v27, 16 }
 0x2ff   : > { %4697 = vst [vmem:[#allocation3 + $0xc8] sm:$0x1] %v4696_v51  ;;  %v5427_v31 = vshll.u32 %v17776_v55, 16  ;;  %4687 = vst.msk [vmem:[#allocation3 + $0xb8] sm:$0xf] %vm508_vm5, %v4516_v53  ;;  %v5430_v49 = vshrl.u32 %v17776_v55, 16 }
 0x300   : > { %4690 = vst [vmem:[#allocation3 + $0xbc] sm:$0x1] %v4689_v35  ;;  %v5421_v47 = vsel %vm17272_vm14, %v5414_v52, %v5419_v30  ;;  %v5435_v25 = vshll.u32 %v17782_v19, 16  ;;  %v5438_v6 = vshrl.u32 %v17782_v19, 16  ;;  %v5443_v50 = vshll.u32 %v17785_v37, 16 }
 0x301   : > { %v5429_v22 = vsel %vm17272_vm14, %v5422_v44, %v5427_v31  ;;  %v5446_v28 = vshrl.u32 %v17785_v37, 16  ;;  %v5451_v20 = vshll.u32 %v17792_v61, 16  ;;  %v5454_v16 = vshrl.u32 %v17792_v61, 16 }
 0x302   : > { %v5437_v12 = vsel %vm17272_vm14, %v5430_v49, %v5435_v25  ;;  %v5459_v4 = vshll.u32 %v17796_v29, 16  ;;  %v5462_v17 = vshrl.u32 %v17796_v29, 16  ;;  %v5445_v2 = vsel %vm17272_vm14, %v5438_v6, %v5443_v50 }
 0x303   : > { %v5453_v46 = vsel %vm17272_vm14, %v5446_v28, %v5451_v20  ;;  %v5467_v0 = vshll.u32 %v17803_v34, 16  ;;  %v5470_v15 = vshrl.u32 %v17803_v34, 16  ;;  %v5475_v58 = vshll.u32 %v17819_v9, 16 }
 0x304   : > { %v5461_v39 = vsel %vm17272_vm14, %v5454_v16, %v5459_v4  ;;  %v5479_v41 = vshrl.u32 %v17789_v32, 16  ;;  %v5484_v59 = vshll.u32 %v17799_v1, 16  ;;  %v5487_v40 = vshrl.u32 %v17799_v1, 16 }
 0x305   : > { %v5469_v62 = vsel %vm17272_vm14, %v5462_v17, %v5467_v0  ;;  %v5492_v60 = vshll.u32 %v17807_v38, 16  ;;  %v5495_v36 = vshrl.u32 %v17807_v38, 16  ;;  %v5477_v45 = vsel %vm17272_vm14, %v5470_v15, %v5475_v58 }
 0x306   : > { %v5486_v56 = vsel %vm17272_vm14, %v5479_v41, %v5484_v59  ;;  %v5500_v24 = vshll.u32 %v17811_v21, 16  ;;  %v5503_v51 = vshrl.u32 %v17811_v21, 16  ;;  %v5508_v30 = vshll.u32 %v17816_v42, 16 }
 0x307   : > { %v5494_v52 = vsel %vm17272_vm14, %v5487_v40, %v5492_v60  ;;  %v5511_v53 = vshrl.u32 %v17816_v42, 16  ;;  %v5516_v35 = vshll.u32 %v17822_v7, 16  ;;  %v5519_v31 = vshrl.u32 %v17822_v7, 16 }
 0x308   : > { %v5502_v44 = vsel %vm17272_vm14, %v5495_v36, %v5500_v24  ;;  %v5524_v49 = vshll.u32 %v17826_v5, 16  ;;  %v5527_v25 = vshrl.u32 %v17826_v5, 16  ;;  %v5510_v6 = vsel %vm17272_vm14, %v5503_v51, %v5508_v30 }
 0x309   : > { %v5518_v50 = vsel %vm17272_vm14, %v5511_v53, %v5516_v35  ;;  %v5532_v28 = vshll.u32 %v17835_v48, 16  ;;  %v5535_v20 = vshrl.u32 %v17835_v48, 16  ;;  %v5540_v4 = vshll.u32 %v17829_v63, 16 }
 0x30a   : > { %v5526_v16 = vsel %vm17272_vm14, %v5519_v31, %v5524_v49  ;;  %v6035_v17 = vrot.slane %v5421_v47, %v17250_v26  ;;  %v6049_v0 = vrot.slane %v5429_v22, %v17250_v26  ;;  %v6063_v58 = vrot.slane %v5437_v12, %v17250_v26 }
 0x30b   : > { %v5534_v15 = vsel %vm17272_vm14, %v5527_v25, %v5532_v28  ;;  %v6077_v41 = vrot.slane %v5445_v2, %v17250_v26  ;;  %v6091_v59 = vrot.slane %v5453_v46, %v17250_v26  ;;  %v5542_v40 = vsel %vm17272_vm14, %v5535_v20, %v5540_v4 }
 0x30c   : > { %v6042_v60 = vrot.slane %v6035_v17, %v17250_v26  ;;  %v6056_v36 = vrot.slane %v6049_v0, %v17250_v26  ;;  %v6105_v47 = vrot.slane %v5461_v39, %v17250_v26  ;;  %v6070_v22 = vrot.slane %v6063_v58, %v17250_v26 }
 0x30d   : > { %v6084_v24 = vrot.slane %v6077_v41, %v17250_v26  ;;  %v6098_v51 = vrot.slane %v6091_v59, %v17250_v26  ;;  %v6119_v12 = vrot.slane %v5469_v62, %v17250_v26  ;;  %v6133_v46 = vrot.slane %v5477_v45, %v17250_v26 }
 0x30e   : > { %v6112_v2 = vrot.slane %v6105_v47, %v17250_v26  ;;  %v6147_v30 = vrot.slane %v5486_v56, %v17250_v26  ;;  %v6161_v53 = vrot.slane %v5494_v52, %v17250_v26  ;;  %v6175_v39 = vrot.slane %v5502_v44, %v17250_v26 }
 0x30f   : > { %v6126_v35 = vrot.slane %v6119_v12, %v17250_v26  ;;  %v6189_v31 = vrot.slane %v5510_v6, %v17250_v26  ;;  %v6203_v49 = vrot.slane %v5518_v50, %v17250_v26  ;;  %v6140_v25 = vrot.slane %v6133_v46, %v17250_v26 }
 0x310   : > { %v6154_v62 = vrot.slane %v6147_v30, %v17250_v26  ;;  %v6168_v28 = vrot.slane %v6161_v53, %v17250_v26  ;;  %v6217_v45 = vrot.slane %v5526_v16, %v17250_v26  ;;  %v6182_v56 = vrot.slane %v6175_v39, %v17250_v26 }
 0x311   : > { %v6196_v52 = vrot.slane %v6189_v31, %v17250_v26  ;;  %v6210_v20 = vrot.slane %v6203_v49, %v17250_v26  ;;  %v6231_v44 = vrot.slane %v5534_v15, %v17250_v26  ;;  %v6245_v50 = vrot.slane %v5542_v40, %v17250_v26 }
 0x312   : > { %v6224_v6 = vrot.slane %v6217_v45, %v17250_v26  ;;  %v6717_v4 = vunpack.c.l.b16 %v6042_v60  ;;  %v6718_v17 = vunpack.c.l.b16 %v6056_v36  ;;  %v6719_v58 = vunpack.c.l.b16 %v6070_v22  ;;  %v14022_v60 = vld.sshfl [vmem:[#allocation3 + $0x60] sm:$0x33 pattern:$0x75316420] }
 0x313   : > { %v6238_v0 = vrot.slane %v6231_v44, %v17250_v26  ;;  %v6720_v41 = vunpack.c.l.b16 %v6084_v24  ;;  %v6721_v59 = vunpack.c.l.b16 %v6098_v51  ;;  %v6252_v16 = vrot.slane %v6245_v50, %v17250_v26  ;;  %v14023_v24 = vld.sshfl [vmem:[#allocation3 + $0x64] sm:$0x33 pattern:$0x75316420] }
 0x314   : > { %v6722_v47 = vunpack.c.l.b16 %v6112_v2  ;;  %v6723_v12 = vunpack.c.l.b16 %v6126_v35  ;;  %v6724_v46 = vunpack.c.l.b16 %v6140_v25  ;;  %v6725_v30 = vunpack.c.l.b16 %v6154_v62 }
 0x315   : > { %v6726_v53 = vunpack.c.l.b16 %v6168_v28  ;;  %v6727_v39 = vunpack.c.l.b16 %v6182_v56  ;;  %v6728_v15 = vunpack.c.l.b16 %v6196_v52  ;;  %v6729_v31 = vunpack.c.l.b16 %v6210_v20 }
 0x316   : > { %v6730_v49 = vunpack.c.l.b16 %v6224_v6  ;;  %v6731_v45 = vunpack.c.l.b16 %v6238_v0  ;;  %v6732_v40 = vunpack.c.l.b16 %v6252_v16  ;;  %v6800_v36 = vrot.slane %v6718_v17, 7 }
 0x317   : > { %v6802_v14 = vrot.slane %v6719_v58, 6  ;;  %v6804_v44 = vrot.slane %v6720_v41, 5  ;;  %v6806_v22 = vrot.slane %v6721_v59, 4  ;;  %v6808_v51 = vrot.slane %v6722_v47, 3 }
 0x318   : > { %v6810_v63 = vrot.slane %v6723_v12, 2  ;;  %v6812_v50 = vrot.slane %v6724_v46, 1  ;;  %v6814_v2 = vrot.slane %v6726_v53, 7  ;;  %v6801_v35 = vsel %vm6766_vm13, %v6800_v36, %v6717_v4 }
 0x319   : > { %v6816_v25 = vrot.slane %v6727_v39, 6  ;;  %v6818_v62 = vrot.slane %v6728_v15, 5  ;;  %v6820_v28 = vrot.slane %v6729_v31, 4  ;;  %v6803_v56 = vsel %vm6769_vm3, %v6802_v14, %v6801_v35 }
 0x31a   : > { %v6815_v52 = vsel %vm6766_vm13, %v6814_v2, %v6725_v30  ;;  %v6822_v20 = vrot.slane %v6730_v49, 3  ;;  %v6824_v6 = vrot.slane %v6731_v45, 2  ;;  %v6805_v17 = vsel %vm6772_vm11, %v6804_v44, %v6803_v56  ;;  %v14034_v4 = vld.sshfl [vmem:[#allocation3 + $0x68] sm:$0x1 pattern:$0x75316420] }
 0x31b   : > { %v6817_v0 = vsel %vm6769_vm3, %v6816_v25, %v6815_v52  ;;  %v6826_v58 = vrot.slane %v6732_v40, 1  ;;  %v4964_v41 = vcombine.high %v14022_v60, %v14022_v60  ;;  %v6807_v59 = vsel %vm6775_vm4, %v6806_v22, %v6805_v17  ;;  %v14024_v30 = vld.sshfl [vmem:[#allocation3 + $0x78] sm:$0x33 pattern:$0x75316420] }
 0x31c   : > { %v6819_v16 = vsel %vm6772_vm11, %v6818_v62, %v6817_v0  ;;  %v17951_v47 = vrot.slane %v14022_v60, %v17250_v26  ;;  %v4988_v12 = vcombine.high %v14023_v24, %v14023_v24  ;;  %v6809_v14 = vsel %vm6778_vm8, %v6808_v51, %v6807_v59  ;;  %v14025_v49 = vld.sshfl [vmem:[#allocation3 + $0x7c] sm:$0x33 pattern:$0x75316420] }
 0x31d   : > { %v6821_v46 = vsel %vm6775_vm4, %v6820_v28, %v6819_v16  ;;  %v17956_v53 = vrot.slane %v4964_v41, %v17250_v26  ;;  %v17959_v39 = vrot.slane %v14023_v24, %v17250_v26  ;;  %v6811_v15 = vsel %vm6781_vm1, %v6810_v63, %v6809_v14  ;;  %v14035_v44 = vld.sshfl [vmem:[#allocation3 + $0x80] sm:$0x1 pattern:$0x75316420] }
 0x31e   : > { %v6823_v31 = vsel %vm6778_vm8, %v6822_v20, %v6821_v46  ;;  %v17965_v45 = vcombine.high %v17951_v47, %v17951_v47  ;;  %v17968_v40 = vrot.slane %v4988_v12, %v17250_v26  ;;  %v17971_v60 = vsel %vm6784_vm10, %v6812_v50, %v6811_v15 }
 0x31f   : > { %21521 = vst [vmem:[#allocation17_spill] sm:$0xff] %v17956_v53  ;;  %21522 = vst [vmem:[#allocation19_spill] sm:$0xff] %v17959_v39  ;;  %v6825_v36 = vsel %vm6781_vm1, %v6824_v6, %v6823_v31  ;;  %v17976_v22 = vcombine.high %v17956_v53, %v17956_v53  ;;  %v17980_v63 = vcombine.high %v17959_v39, %v17959_v39  ;;  %v5544_v6 = vshrl.u32 %v17951_v47, 16 }
 0x320   : > { %21523 = vst [vmem:[#allocation27_spill] sm:$0xff] %v17965_v45  ;;  %21524 = vst [vmem:[#allocation29_spill] sm:$0xff] %v17968_v40  ;;  %v17983_v24 = vsel %vm6784_vm10, %v6826_v58, %v6825_v36  ;;  %v17987_v51 = vcombine.high %v17968_v40, %v17968_v40  ;;  %v5012_v50 = vcombine.high %v14024_v30, %v14024_v30  ;;  %v5549_v58 = vshll.u32 %v17956_v53, 16 }
 0x321   : > { %21525 = vst [vmem:[#allocation11_spill] sm:$0xff] %v17971_v60  ;;  %21526 = vst [vmem:[#allocation10_spill] sm:$0xff] %v17976_v22  ;;  %v17990_v2 = vrot.slane %v14024_v30, %v17250_v26  ;;  %v6885_v35 = vpack.c.b16 %v17983_v24, %v17971_v60  ;;  %v5036_v25 = vcombine.high %v14025_v49, %v14025_v49  ;;  %v5552_v41 = vshrl.u32 %v17956_v53, 16 }
 0x322   : > { %21527 = vst [vmem:[#allocation8_spill] sm:$0xff] %v17980_v63  ;;  %21528 = vst [vmem:[#allocation9_spill] sm:$0xff] %v17983_v24  ;;  %v17995_v62 = vrot.slane %v14025_v49, %v17250_v26  ;;  %v17998_v28 = vrot.slane %v14034_v4, %v17250_v26  ;;  %v18001_v56 = vrot.slane %v5012_v50, %v17250_v26  ;;  %v5557_v16 = vshll.u32 %v17965_v45, 16 }
 0x323   : > { %21529 = vst [vmem:[#allocation30_spill] sm:$0xff] %v17987_v51  ;;  %21530 = vst [vmem:[#allocation31_spill] sm:$0xff] %v17990_v2  ;;  %v18005_v52 = vcombine.high %v17990_v2, %v17990_v2  ;;  %v18008_v20 = vrot.slane %v14035_v44, %v17250_v26  ;;  %14834 = vmatmul.mubr.msk.bf16.vlgmr.msra.gmra.mrb[32].mxu1 %vm6888_vm15, %v6885_v35  ;;  %v18013_v17 = vrot.slane %v5036_v25, %v17250_v26  ;;  %v14026_v53 = vld.sshfl [vmem:[#allocation3 + $0x90] sm:$0x33 pattern:$0x75316420] }
 0x324   : > { %21531 = vst [vmem:[#allocation32_spill] sm:$0xff] %v17995_v62  ;;  %21532 = vst [vmem:[#allocation33_spill] sm:$0xff] %v17998_v28  ;;  %v18017_v0 = vcombine.high %v17995_v62, %v17995_v62  ;;  %v18023_v59 = vcombine.high %v18001_v56, %v18001_v56  ;;  %v5560_v4 = vshrl.u32 %v17965_v45, 16  ;;  %v5565_v12 = vshll.u32 %v17976_v22, 16 }
 0x325   : > { %21533 = vst [vmem:[#allocation34_spill] sm:$0xff] %v18001_v56  ;;  %21534 = vst [vmem:[#allocation35_spill] sm:$0xff] %v18005_v52  ;;  %v18030_v14 = vcombine.high %v18013_v17, %v18013_v17  ;;  %v5551_v46 = vsel %vm17272_vm14, %v5544_v6, %v5549_v58  ;;  %v5568_v30 = vshrl.u32 %v17976_v22, 16  ;;  %v5573_v15 = vshll.u32 %v17959_v39, 16 }
 0x326   : > { %21535 = vst [vmem:[#allocation36_spill] sm:$0xff] %v18008_v20  ;;  %21536 = vst [vmem:[#allocation37_spill] sm:$0xff] %v18013_v17  ;;  %v5559_v31 = vsel %vm17272_vm14, %v5552_v41, %v5557_v16  ;;  %v5567_v49 = vsel %vm17272_vm14, %v5560_v4, %v5565_v12  ;;  %v5576_v36 = vshrl.u32 %v17959_v39, 16  ;;  %v5581_v44 = vshll.u32 %v17968_v40, 16 }
 0x327   : > { %21537 = vst [vmem:[#allocation38_spill] sm:$0xff] %v18017_v0  ;;  %21538 = vst [vmem:[#allocation39_spill] sm:$0xff] %v18023_v59  ;;  %v5575_v50 = vsel %vm17272_vm14, %v5568_v30, %v5573_v15  ;;  %v5584_v35 = vshrl.u32 %v17968_v40, 16  ;;  %v5589_v25 = vshll.u32 %v17980_v63, 16  ;;  %v5592_v6 = vshrl.u32 %v17980_v63, 16 }
 0x328   : > { %21539 = vst [vmem:[#allocation40_spill] sm:$0xff] %v18030_v14  ;;  %v5583_v58 = vsel %vm17272_vm14, %v5576_v36, %v5581_v44  ;;  %v5597_v41 = vshll.u32 %v17987_v51, 16  ;;  %v5600_v16 = vshrl.u32 %v17987_v51, 16  ;;  %v5605_v4 = vshll.u32 %v17998_v28, 16 }
 0x329   : > { %v5591_v12 = vsel %vm17272_vm14, %v5584_v35, %v5589_v25  ;;  %v5609_v30 = vshrl.u32 %v17990_v2, 16  ;;  %v5614_v15 = vshll.u32 %v18001_v56, 16  ;;  %v5617_v60 = vshrl.u32 %v18001_v56, 16 }
 0x32a   : > { %v5599_v9 = vsel %vm17272_vm14, %v5592_v6, %v5597_v41  ;;  %v5607_v36 = vsel %vm17272_vm14, %v5600_v16, %v5605_v4  ;;  %v5622_v44 = vshll.u32 %v18005_v52, 16  ;;  %v5625_v3 = vshrl.u32 %v18005_v52, 16 }
 0x32b   : > { %v5616_v28 = vsel %vm17272_vm14, %v5609_v30, %v5614_v15  ;;  %v5630_v35 = vshll.u32 %v18023_v59, 16  ;;  %v5633_v25 = vshrl.u32 %v18023_v59, 16  ;;  %v5638_v2 = vshll.u32 %v17995_v62, 16 }
 0x32c   : > { %v5624_v56 = vsel %vm17272_vm14, %v5617_v60, %v5622_v44  ;;  %v5641_v6 = vshrl.u32 %v17995_v62, 16  ;;  %v5646_v41 = vshll.u32 %v18013_v17, 16  ;;  %v5649_v16 = vshrl.u32 %v18013_v17, 16 }
 0x32d   : > { %v5632_v4 = vsel %vm17272_vm14, %v5625_v3, %v5630_v35  ;;  %v5640_v30 = vsel %vm17272_vm14, %v5633_v25, %v5638_v2  ;;  %v5654_v15 = vshll.u32 %v18017_v0, 16  ;;  %v5657_v59 = vshrl.u32 %v18017_v0, 16 }
 0x32e   : > { %v5648_v52 = vsel %vm17272_vm14, %v5641_v6, %v5646_v41  ;;  %v5662_v60 = vshll.u32 %v18030_v14, 16  ;;  %v5665_v44 = vshrl.u32 %v18030_v14, 16  ;;  %v5670_v62 = vshll.u32 %v18008_v20, 16 }
 0x32f   : > { %v5656_v17 = vsel %vm17272_vm14, %v5649_v16, %v5654_v15  ;;  %v6259_v3 = vrot.slane %v5551_v46, %v17250_v26  ;;  %v6273_v2 = vrot.slane %v5559_v31, %v17250_v26  ;;  %v6287_v35 = vrot.slane %v5567_v49, %v17250_v26 }
 0x330   : > { %v5664_v25 = vsel %vm17272_vm14, %v5657_v59, %v5662_v60  ;;  %v5672_v6 = vsel %vm17272_vm14, %v5665_v44, %v5670_v62  ;;  %v6301_v41 = vrot.slane %v5575_v50, %v17250_v26  ;;  %v6315_v14 = vrot.slane %v5583_v58, %v17250_v26 }
 0x331   : > { %v6266_v20 = vrot.slane %v6259_v3, %v17250_v26  ;;  %v6280_v16 = vrot.slane %v6273_v2, %v17250_v26  ;;  %v6294_v46 = vrot.slane %v6287_v35, %v17250_v26  ;;  %v6329_v31 = vrot.slane %v5591_v12, %v17250_v26 }
 0x332   : > { %v6308_v49 = vrot.slane %v6301_v41, %v17250_v26  ;;  %v6322_v15 = vrot.slane %v6315_v14, %v17250_v26  ;;  %v6343_v59 = vrot.slane %v5599_v9, %v17250_v26  ;;  %v6357_v62 = vrot.slane %v5607_v36, %v17250_v26 }
 0x333   : > { %v6336_v50 = vrot.slane %v6329_v31, %v17250_v26  ;;  %v6371_v58 = vrot.slane %v5616_v28, %v17250_v26  ;;  %v6385_v60 = vrot.slane %v5624_v56, %v17250_v26  ;;  %v6399_v44 = vrot.slane %v5632_v4, %v17250_v26 }
 0x334   : > { %v6350_v3 = vrot.slane %v6343_v59, %v17250_v26  ;;  %v6364_v12 = vrot.slane %v6357_v62, %v17250_v26  ;;  %v6413_v2 = vrot.slane %v5640_v30, %v17250_v26  ;;  %v6427_v14 = vrot.slane %v5648_v52, %v17250_v26 }
 0x335   : > { %v6378_v9 = vrot.slane %v6371_v58, %v17250_v26  ;;  %v6392_v36 = vrot.slane %v6385_v60, %v17250_v26  ;;  %v6406_v35 = vrot.slane %v6399_v44, %v17250_v26  ;;  %v6441_v28 = vrot.slane %v5656_v17, %v17250_v26 }
 0x336   : > { %v6420_v56 = vrot.slane %v6413_v2, %v17250_v26  ;;  %v6434_v4 = vrot.slane %v6427_v14, %v17250_v26  ;;  %v6455_v41 = vrot.slane %v5664_v25, %v17250_v26  ;;  %v6469_v31 = vrot.slane %v5672_v6, %v17250_v26 }
 0x337   : > { %v6448_v30 = vrot.slane %v6441_v28, %v17250_v26  ;;  %v6733_v59 = vunpack.c.l.b16 %v6266_v20  ;;  %v6734_v52 = vunpack.c.l.b16 %v6280_v16  ;;  %v6735_v62 = vunpack.c.l.b16 %v6294_v46 }
 0x338   : > { %v6462_v58 = vrot.slane %v6455_v41, %v17250_v26  ;;  %v6476_v60 = vrot.slane %v6469_v31, %v17250_v26  ;;  %v6736_v44 = vunpack.c.l.b16 %v6308_v49  ;;  %v6737_v0 = vunpack.c.l.b16 %v6322_v15 }
 0x339   : > { %v6738_v17 = vunpack.c.l.b16 %v6336_v50  ;;  %v6739_v51 = vunpack.c.l.b16 %v6350_v3  ;;  %v6740_v2 = vunpack.c.l.b16 %v6364_v12  ;;  %v6741_v63 = vunpack.c.l.b16 %v6378_v9  ;;  %v14027_v12 = vld.sshfl [vmem:[#allocation3 + $0x94] sm:$0x33 pattern:$0x75316420] }
 0x33a   : > { %v6742_v14 = vunpack.c.l.b16 %v6392_v36  ;;  %v6743_v40 = vunpack.c.l.b16 %v6406_v35  ;;  %v6744_v25 = vunpack.c.l.b16 %v6420_v56  ;;  %v6745_v39 = vunpack.c.l.b16 %v6434_v4 }
 0x33b   : > { %v6746_v6 = vunpack.c.l.b16 %v6448_v30  ;;  %v6747_v22 = vunpack.c.l.b16 %v6462_v58  ;;  %v6748_v28 = vunpack.c.l.b16 %v6476_v60  ;;  %v6828_v20 = vrot.slane %v6734_v52, 7 }
 0x33c   : > { %v6830_v16 = vrot.slane %v6735_v62, 6  ;;  %v6832_v46 = vrot.slane %v6736_v44, 5  ;;  %v6834_v45 = vrot.slane %v6737_v0, 4  ;;  %v6836_v41 = vrot.slane %v6738_v17, 3  ;;  %v18129_v0 = vld [vmem:[%s21110_s7 + $0x8] sm:$0xf] }
 0x33d   : > { %v6829_v49 = vsel %vm6766_vm13, %v6828_v20, %v6733_v59  ;;  %v6838_v15 = vrot.slane %v6739_v51, 2  ;;  %v6840_v50 = vrot.slane %v6740_v2, 1  ;;  %v6842_v3 = vrot.slane %v6742_v14, 7 }
 0x33e   : > { %v6831_v9 = vsel %vm6769_vm3, %v6830_v16, %v6829_v49  ;;  %v6844_v36 = vrot.slane %v6743_v40, 6  ;;  %v6846_v35 = vrot.slane %v6744_v25, 5  ;;  %v6848_v56 = vrot.slane %v6745_v39, 4  ;;  %v15386_v39 = vld [vmem:[%s21110_s7] sm:$0xf] }
 0x33f   : > { %v6833_v4 = vsel %vm6772_vm11, %v6832_v46, %v6831_v9  ;;  %v6843_v31 = vsel %vm6766_vm13, %v6842_v3, %v6741_v63  ;;  %v6850_v30 = vrot.slane %v6746_v6, 3  ;;  %v6852_v52 = vrot.slane %v6747_v22, 2  ;;  %v14036_v17 = vld.sshfl [vmem:[#allocation3 + $0x98] sm:$0x1 pattern:$0x75316420] }
 0x340   : > { %v6835_v51 = vsel %vm6775_vm4, %v6834_v45, %v6833_v4  ;;  %v6845_v59 = vsel %vm6769_vm3, %v6844_v36, %v6843_v31  ;;  %v6854_v62 = vrot.slane %v6748_v28, 1  ;;  %v8059_v40 = vsel %vm6901_vm7, %v15386_v39, 0  ;;  %v14028_v2 = vld.sshfl [vmem:[#allocation3 + $0xa8] sm:$0x33 pattern:$0x75316420] }
 0x341   : > { %v6837_v63 = vsel %vm6778_vm8, %v6836_v41, %v6835_v51  ;;  %v6847_v22 = vsel %vm6772_vm11, %v6846_v35, %v6845_v59  ;;  %14842 = vmatpush3.bf16.msra.mxu1 %v8059_v40  ;;  %v5060_v58 = vcombine.high %v14026_v53, %v14026_v53  ;;  %v18140_v60 = vrot.slane %v14026_v53, %v17250_v26  ;;  %v14029_v53 = vld.sshfl [vmem:[#allocation3 + $0xac] sm:$0x33 pattern:$0x75316420] }
 0x342   : > { %v6839_v45 = vsel %vm6781_vm1, %v6838_v15, %v6837_v63  ;;  %v6849_v44 = vsel %vm6775_vm4, %v6848_v56, %v6847_v22  ;;  %v5084_v14 = vcombine.high %v14027_v12, %v14027_v12  ;;  %v18145_v25 = vrot.slane %v14027_v12, %v17250_v26  ;;  %15289 = vmatprep.subr.msk.bf16.mxu1 %vm6901_vm7, %v18129_v0  ;;  %v14037_v49 = vld.sshfl [vmem:[#allocation3 + $0xb0] sm:$0x1 pattern:$0x75316420] }
 0x343   : > { %v18150_v6 = vsel %vm6784_vm10, %v6840_v50, %v6839_v45  ;;  %v6851_v28 = vsel %vm6778_vm8, %v6850_v30, %v6849_v44  ;;  %v18154_v20 = vrot.slane %v5060_v58, %v17250_v26  ;;  %v18158_v16 = vcombine.high %v18140_v60, %v18140_v60 }
 0x344   : > { %21540 = vst [vmem:[#allocation41_spill] sm:$0xff] %v18145_v25  ;;  %21541 = vst [vmem:[#allocation42_spill] sm:$0xff] %v18150_v6  ;;  %v6853_v46 = vsel %vm6781_vm1, %v6852_v52, %v6851_v28  ;;  %v18164_v15 = vrot.slane %v5084_v14, %v17250_v26  ;;  %v18168_v50 = vcombine.high %v18145_v25, %v18145_v25  ;;  %v5674_v40 = vshrl.u32 %v18140_v60, 16 }
 0x345   : > { %21542 = vst [vmem:[#allocation43_spill] sm:$0xff] %v18154_v20  ;;  %21543 = vst [vmem:[#allocation44_spill] sm:$0xff] %v18158_v16  ;;  %v18171_v3 = vsel %vm6784_vm10, %v6854_v62, %v6853_v46  ;;  %v18175_v12 = vcombine.high %v18154_v20, %v18154_v20  ;;  %v5108_v9 = vcombine.high %v14028_v2, %v14028_v2  ;;  %v5679_v63 = vshll.u32 %v18154_v20, 16 }
 0x346   : > { %21544 = vst [vmem:[#allocation45_spill] sm:$0xff] %v18164_v15  ;;  %21545 = vst [vmem:[#allocation46_spill] sm:$0xff] %v18168_v50  ;;  %v18178_v36 = vrot.slane %v14028_v2, %v17250_v26  ;;  %v6886_v35 = vpack.c.b16 %v18171_v3, %v18150_v6  ;;  %v18184_v56 = vcombine.high %v18164_v15, %v18164_v15  ;;  %v5682_v58 = vshrl.u32 %v18154_v20, 16 }
 0x347   : > { %21546 = vst [vmem:[#allocation47_spill] sm:$0xff] %v18171_v3  ;;  %21547 = vst [vmem:[#allocation48_spill] sm:$0xff] %v18175_v12  ;;  %v5132_v4 = vcombine.high %v14029_v53, %v14029_v53  ;;  %v18187_v31 = vrot.slane %v14029_v53, %v17250_v26  ;;  %v18190_v30 = vrot.slane %v5108_v9, %v17250_v26  ;;  %v5687_v45 = vshll.u32 %v18158_v16, 16 }
 0x348   : > { %21548 = vst [vmem:[#allocation49_spill] sm:$0xff] %v18178_v36  ;;  %21549 = vst [vmem:[#allocation50_spill] sm:$0xff] %v18184_v56  ;;  %v18194_v52 = vcombine.high %v18178_v36, %v18178_v36  ;;  %v18197_v51 = vrot.slane %v14036_v17, %v17250_v26  ;;  %v18200_v59 = vrot.slane %v14037_v49, %v17250_v26  ;;  %14837 = vmatprep.mubr.msk.bf16.mxu1 %vm6888_vm15, %v6886_v35 }
 0x349   : > { %21550 = vst [vmem:[#allocation51_spill] sm:$0xff] %v18187_v31  ;;  %21551 = vst [vmem:[#allocation52_spill] sm:$0xff] %v18190_v30  ;;  %v18204_v62 = vrot.slane %v5132_v4, %v17250_v26  ;;  %v18208_v39 = vcombine.high %v18187_v31, %v18187_v31  ;;  %v18214_v22 = vcombine.high %v18190_v30, %v18190_v30  ;;  %v5690_v44 = vshrl.u32 %v18158_v16, 16 }
 0x34a   : > { %21552 = vst [vmem:[#allocation53_spill] sm:$0xff] %v18194_v52  ;;  %21553 = vst [vmem:[#allocation54_spill] sm:$0xff] %v18197_v51  ;;  %v5681_v2 = vsel %vm17272_vm14, %v5674_v40, %v5679_v63  ;;  %v5695_v14 = vshll.u32 %v18175_v12, 16  ;;  %v5698_v28 = vshrl.u32 %v18175_v12, 16  ;;  %v5689_v53 = vsel %vm17272_vm14, %v5682_v58, %v5687_v45 }
 0x34b   : > { %21554 = vst [vmem:[#allocation55_spill] sm:$0xff] %v18200_v59  ;;  %21555 = vst [vmem:[#allocation56_spill] sm:$0xff] %v18204_v62  ;;  %v18221_v17 = vcombine.high %v18204_v62, %v18204_v62  ;;  %v5703_v46 = vshll.u32 %v18145_v25, 16  ;;  %v5706_v49 = vshrl.u32 %v18145_v25, 16  ;;  %v5711_v9 = vshll.u32 %v18164_v15, 16 }
 0x34c   : > { %21556 = vst [vmem:[#allocation57_spill] sm:$0xff] %v18208_v39  ;;  %21557 = vst [vmem:[#allocation58_spill] sm:$0xff] %v18214_v22  ;;  %v5697_v35 = vsel %vm17272_vm14, %v5690_v44, %v5695_v14  ;;  %v5714_v4 = vshrl.u32 %v18164_v15, 16  ;;  %v5719_v40 = vshll.u32 %v18168_v50, 16  ;;  %v5722_v63 = vshrl.u32 %v18168_v50, 16 }
 0x34d   : > { %21558 = vst [vmem:[#allocation59_spill] sm:$0xff] %v18221_v17  ;;  %v5705_v41 = vsel %vm17272_vm14, %v5698_v28, %v5703_v46  ;;  %v5713_v58 = vsel %vm17272_vm14, %v5706_v49, %v5711_v9  ;;  %v5727_v45 = vshll.u32 %v18184_v56, 16  ;;  %v5730_v24 = vshrl.u32 %v18184_v56, 16 }
 0x34e   : > { %v5721_v6 = vsel %vm17272_vm14, %v5714_v4, %v5719_v40  ;;  %v5735_v44 = vshll.u32 %v18197_v51, 16  ;;  %v5739_v14 = vshrl.u32 %v18178_v36, 16  ;;  %v5744_v3 = vshll.u32 %v18190_v30, 16 }
 0x34f   : > { %v5729_v50 = vsel %vm17272_vm14, %v5722_v63, %v5727_v45  ;;  %v5747_v28 = vshrl.u32 %v18190_v30, 16  ;;  %v5752_v46 = vshll.u32 %v18194_v52, 16  ;;  %v5755_v49 = vshrl.u32 %v18194_v52, 16 }
 0x350   : > { %v5737_v9 = vsel %vm17272_vm14, %v5730_v24, %v5735_v44  ;;  %v5746_v4 = vsel %vm17272_vm14, %v5739_v14, %v5744_v3  ;;  %v5760_v40 = vshll.u32 %v18214_v22, 16  ;;  %v5763_v51 = vshrl.u32 %v18214_v22, 16 }
 0x351   : > { %v5754_v36 = vsel %vm17272_vm14, %v5747_v28, %v5752_v46  ;;  %v5768_v63 = vshll.u32 %v18187_v31, 16  ;;  %v5771_v45 = vshrl.u32 %v18187_v31, 16  ;;  %v5776_v30 = vshll.u32 %v18204_v62, 16 }
 0x352   : > { %v5762_v52 = vsel %vm17272_vm14, %v5755_v49, %v5760_v40  ;;  %v5779_v24 = vshrl.u32 %v18204_v62, 16  ;;  %v5784_v3 = vshll.u32 %v18208_v39, 16  ;;  %v5787_v44 = vshrl.u32 %v18208_v39, 16 }
 0x353   : > { %v5770_v14 = vsel %vm17272_vm14, %v5763_v51, %v5768_v63  ;;  %v5778_v28 = vsel %vm17272_vm14, %v5771_v45, %v5776_v30  ;;  %v5792_v46 = vshll.u32 %v18221_v17, 16  ;;  %v5795_v31 = vshrl.u32 %v18221_v17, 16 }
 0x354   : > { %v5786_v22 = vsel %vm17272_vm14, %v5779_v24, %v5784_v3  ;;  %v5800_v49 = vshll.u32 %v18200_v59, 16  ;;  %v6483_v40 = vrot.slane %v5681_v2, %v17250_v26  ;;  %v6497_v62 = vrot.slane %v5689_v53, %v17250_v26 }
 0x355   : > { %v5794_v39 = vsel %vm17272_vm14, %v5787_v44, %v5792_v46  ;;  %v6511_v51 = vrot.slane %v5697_v35, %v17250_v26  ;;  %v6525_v30 = vrot.slane %v5705_v41, %v17250_v26  ;;  %v6539_v63 = vrot.slane %v5713_v58, %v17250_v26 }
 0x356   : > { %v5802_v45 = vsel %vm17272_vm14, %v5795_v31, %v5800_v49  ;;  %v6490_v24 = vrot.slane %v6483_v40, %v17250_v26  ;;  %v6504_v3 = vrot.slane %v6497_v62, %v17250_v26  ;;  %v6553_v2 = vrot.slane %v5721_v6, %v17250_v26 }
 0x357   : > { %v6518_v53 = vrot.slane %v6511_v51, %v17250_v26  ;;  %v6532_v59 = vrot.slane %v6525_v30, %v17250_v26  ;;  %v6546_v44 = vrot.slane %v6539_v63, %v17250_v26  ;;  %v6567_v35 = vrot.slane %v5729_v50, %v17250_v26 }
 0x358   : > { %v6560_v41 = vrot.slane %v6553_v2, %v17250_v26  ;;  %v6581_v58 = vrot.slane %v5737_v9, %v17250_v26  ;;  %v6595_v31 = vrot.slane %v5746_v4, %v17250_v26  ;;  %v6609_v46 = vrot.slane %v5754_v36, %v17250_v26 }
 0x359   : > { %v6574_v62 = vrot.slane %v6567_v35, %v17250_v26  ;;  %v6623_v6 = vrot.slane %v5762_v52, %v17250_v26  ;;  %v6637_v49 = vrot.slane %v5770_v14, %v17250_v26  ;;  %v6651_v40 = vrot.slane %v5778_v28, %v17250_v26 }
 0x35a   : > { %v6588_v51 = vrot.slane %v6581_v58, %v17250_v26  ;;  %v6602_v50 = vrot.slane %v6595_v31, %v17250_v26  ;;  %v6616_v30 = vrot.slane %v6609_v46, %v17250_v26  ;;  %v6665_v9 = vrot.slane %v5786_v22, %v17250_v26 }
 0x35b   : > { %v6630_v4 = vrot.slane %v6623_v6, %v17250_v26  ;;  %v6644_v36 = vrot.slane %v6637_v49, %v17250_v26  ;;  %v6658_v63 = vrot.slane %v6651_v40, %v17250_v26  ;;  %v6679_v52 = vrot.slane %v5794_v39, %v17250_v26 }
 0x35c   : > { %v6672_v14 = vrot.slane %v6665_v9, %v17250_v26  ;;  %v6693_v28 = vrot.slane %v5802_v45, %v17250_v26  ;;  %v6749_v2 = vunpack.c.l.b16 %v6490_v24  ;;  %v6750_v35 = vunpack.c.l.b16 %v6504_v3 }
 0x35d   : > { %v6686_v58 = vrot.slane %v6679_v52, %v17250_v26  ;;  %v6751_v31 = vunpack.c.l.b16 %v6518_v53  ;;  %v6752_v46 = vunpack.c.l.b16 %v6532_v59  ;;  %v6753_v11 = vunpack.c.l.b16 %v6546_v44 }
 0x35e   : > { %v6700_v22 = vrot.slane %v6693_v28, %v17250_v26  ;;  %v6754_v6 = vunpack.c.l.b16 %v6560_v41  ;;  %v6755_v17 = vunpack.c.l.b16 %v6574_v62  ;;  %v6756_v49 = vunpack.c.l.b16 %v6588_v51 }
 0x35f   : > { %v6757_v56 = vunpack.c.l.b16 %v6602_v50  ;;  %v6758_v40 = vunpack.c.l.b16 %v6616_v30  ;;  %v6759_v15 = vunpack.c.l.b16 %v6630_v4  ;;  %v6760_v39 = vunpack.c.l.b16 %v6644_v36 }
 0x360   : > { %v6761_v25 = vunpack.c.l.b16 %v6658_v63  ;;  %v6762_v9 = vunpack.c.l.b16 %v6672_v14  ;;  %v6763_v12 = vunpack.c.l.b16 %v6686_v58  ;;  %v6764_v45 = vunpack.c.l.b16 %v6700_v22 }
 0x361   : > { %v6856_v24 = vrot.slane %v6750_v35, 7  ;;  %v6858_v3 = vrot.slane %v6751_v31, 6  ;;  %v6860_v16 = vrot.slane %v6752_v46, 5  ;;  %v6862_v52 = vrot.slane %v6753_v11, 4  ;;  %v21561_v31 = vld [vmem:[#allocation16_spill] sm:$0xff]  ;;  %v21562_v46 = vld [vmem:[#allocation18_spill] sm:$0xff] }
 0x362   : > { %v6864_v53 = vrot.slane %v6754_v6, 3  ;;  %v6866_v59 = vrot.slane %v6755_v17, 2  ;;  %v6868_v44 = vrot.slane %v6756_v49, 1  ;;  %v6870_v20 = vrot.slane %v6758_v40, 7  ;;  %v21559_v17 = vld [vmem:[#allocation23_spill] sm:$0xff] }
 0x363   : > { %v6857_v41 = vsel %vm6766_vm13, %v6856_v24, %v6749_v2  ;;  %v6872_v62 = vrot.slane %v6759_v15, 6  ;;  %v6874_v51 = vrot.slane %v6760_v39, 5  ;;  %v6876_v50 = vrot.slane %v6761_v25, 4  ;;  %v21560_v25 = vld [vmem:[#allocation21_spill] sm:$0xff] }
 0x364   : > { %v6859_v30 = vsel %vm6769_vm3, %v6858_v3, %v6857_v41  ;;  %v6871_v4 = vsel %vm6766_vm13, %v6870_v20, %v6757_v56  ;;  %v6878_v36 = vrot.slane %v6762_v9, 3  ;;  %v6880_v63 = vrot.slane %v6763_v12, 2  ;;  %v21564_v3 = vld [vmem:[#allocation28_spill] sm:$0xff] }
 0x365   : > { %v6861_v14 = vsel %vm6772_vm11, %v6860_v16, %v6859_v30  ;;  %v6873_v28 = vsel %vm6769_vm3, %v6872_v62, %v6871_v4  ;;  %v6882_v11 = vrot.slane %v6764_v45, 1  ;;  %v6976_v35 = vrot.slane %v21559_v17, %v17250_v26  ;;  %v21567_v62 = vld [vmem:[#allocation22_spill] sm:$0xff] }
 0x366   : > { %v6863_v58 = vsel %vm6775_vm4, %v6862_v52, %v6861_v14  ;;  %v6875_v15 = vsel %vm6772_vm11, %v6874_v51, %v6873_v28  ;;  %v6990_v2 = vrot.slane %v21560_v25, %v17250_v26  ;;  %v7004_v20 = vrot.slane %v21561_v31, %v17250_v26 }
 0x367   : > { %v6865_v12 = vsel %vm6778_vm8, %v6864_v53, %v6863_v58  ;;  %v6877_v16 = vsel %vm6775_vm4, %v6876_v50, %v6875_v15  ;;  %v6983_v56 = vrot.slane %v6976_v35, %v17250_v26  ;;  %v7018_v22 = vrot.slane %v21562_v46, %v17250_v26 }
 0x368   : > { %v6867_v6 = vsel %vm6781_vm1, %v6866_v59, %v6865_v12  ;;  %v6879_v49 = vsel %vm6778_vm8, %v6878_v36, %v6877_v16  ;;  %v18335_v40 = vrot.slane %v6990_v2, %v17250_v26  ;;  %v18338_v39 = vrot.slane %v7004_v20, %v17250_v26  ;;  %v21566_v59 = vld [vmem:[#allocation25_spill] sm:$0xff] }
 0x369   : > { %v18341_v9 = vsel %vm6784_vm10, %v6868_v44, %v6867_v6  ;;  %v6881_v45 = vsel %vm6781_vm1, %v6880_v63, %v6879_v49  ;;  %v18345_v24 = vrot.slane %v7018_v22, %v17250_v26  ;;  %v7032_v52 = vrot.slane %v21564_v3, %v17250_v26  ;;  %v21568_v44 = vld [vmem:[#allocation26_spill] sm:$0xff] }
 0x36a   : > { %21563 = vst [vmem:[#allocation23_spill] sm:$0xff] %v18341_v9  ;;  %v18350_v53 = vsel %vm6784_vm10, %v6882_v11, %v6881_v45  ;;  %v7046_v41 = vrot.slane %v21566_v59, %v17250_v26  ;;  %v7060_v51 = vrot.slane %v21567_v62, %v17250_v26  ;;  %v7074_v50 = vrot.slane %v21568_v44, %v17250_v26 }
 0x36b   : > { %21565 = vst [vmem:[#allocation21_spill] sm:$0xff] %v18350_v53  ;;  %v6887_v30 = vpack.c.b16 %v18350_v53, %v18341_v9  ;;  %v18361_v4 = vrot.slane %v7032_v52, %v17250_v26  ;;  %v7088_v36 = vrot.slane %v17636_v10, %v17250_v26  ;;  %v7102_v63 = vrot.slane %v17653_v57, %v17250_v26 }
 0x36c   : > { %v18368_v14 = vrot.slane %v7046_v41, %v17250_v26  ;;  %v18371_v28 = vrot.slane %v7060_v51, %v17250_v26  ;;  %v18374_v11 = vrot.slane %v7074_v50, %v17250_v26  ;;  %v7116_v17 = vrot.slane %v17657_v8, %v17250_v26 }
 0x36d   : > { %14838 = vmatmul.mubr.msk.bf16.gmra.mrb[36].mxu1 %vm6888_vm15, %v6887_v30  ;;  %v7095_v35 = vrot.slane %v7088_v36, %v17250_v26  ;;  %v18381_v10 = vrot.slane %v7102_v63, %v17250_v26  ;;  %v7130_v57 = vrot.slane %v17664_v18, %v17250_v26  ;;  %v7144_v58 = vrot.slane %v17660_v23, %v17250_v26 }
 0x36e   : > { %v18388_v15 = vrot.slane %v7116_v17, %v17250_v26  ;;  %v7158_v25 = vrot.slane %v17670_v43, %v17250_v26  ;;  %v7172_v8 = vrot.slane %v17674_v33, %v17250_v26  ;;  %v7186_v2 = vrot.slane %v17684_v54, %v17250_v26 }
 0x36f   : > { %v18397_v31 = vrot.slane %v7130_v57, %v17250_v26  ;;  %v18400_v18 = vrot.slane %v7144_v58, %v17250_v26  ;;  %v7866_v20 = vunpack.c.l.b16 %v6983_v56  ;;  %v21230_v23 = vunpack.c.l.b16 %v18335_v40 }
 0x370   : > { %v18404_v12 = vrot.slane %v7158_v25, %v17250_v26  ;;  %v18407_v43 = vrot.slane %v7172_v8, %v17250_v26  ;;  %v18410_v33 = vrot.slane %v7186_v2, %v17250_v26  ;;  %v21232_v54 = vunpack.c.l.b16 %v18338_v39 }
 0x371   : > { %v21231_v16 = vunpack.c.l.b16 %v18345_v24  ;;  %v21229_v46 = vunpack.c.l.b16 %v18361_v4  ;;  %v21205_v22 = vunpack.c.l.b16 %v18368_v14  ;;  %v21206_v56 = vunpack.c.l.b16 %v18371_v28 }
 0x372   : > { %v21228_v6 = vunpack.c.l.b16 %v18374_v11  ;;  %v7874_v49 = vunpack.c.l.b16 %v7095_v35  ;;  %v21207_v45 = vunpack.c.l.b16 %v18381_v10  ;;  %v21208_v3 = vunpack.c.l.b16 %v18388_v15 }
 0x373   : > { %v21209_v52 = vunpack.c.l.b16 %v18397_v31  ;;  %v21216_v59 = vunpack.c.l.b16 %v18400_v18  ;;  %v21210_v41 = vunpack.c.l.b16 %v18404_v12  ;;  %v21211_v62 = vunpack.c.l.b16 %v18407_v43 }
 0x374   : > { %v21212_v51 = vunpack.c.l.b16 %v18410_v33  ;;  %v7930_v44 = vrot.slane %v21230_v23, 7  ;;  %v7932_v50 = vrot.slane %v21232_v54, 6  ;;  %v7934_v30 = vrot.slane %v21231_v16, 5 }
 0x375   : > { %v7936_v36 = vrot.slane %v21229_v46, 4  ;;  %v7938_v63 = vrot.slane %v21205_v22, 3  ;;  %v7940_v17 = vrot.slane %v21206_v56, 2  ;;  %v7942_v35 = vrot.slane %v21228_v6, 1 }
 0x376   : > { %v7931_v57 = vsel %vm6766_vm13, %v7930_v44, %v7866_v20  ;;  %v7944_v58 = vrot.slane %v21207_v45, 7  ;;  %v7946_v25 = vrot.slane %v21208_v3, 6  ;;  %v7948_v8 = vrot.slane %v21209_v52, 5 }
 0x377   : > { %v7933_v2 = vsel %vm6769_vm3, %v7932_v50, %v7931_v57  ;;  %v7950_v22 = vrot.slane %v21216_v59, 4  ;;  %v7952_v56 = vrot.slane %v21210_v41, 3  ;;  %v7954_v20 = vrot.slane %v21211_v62, 2 }
 0x378   : > { %v7935_v44 = vsel %vm6772_vm11, %v7934_v30, %v7933_v2  ;;  %v7945_v45 = vsel %vm6766_vm13, %v7944_v58, %v7874_v49  ;;  %v7956_v3 = vrot.slane %v21212_v51, 1  ;;  %v7200_v52 = vrot.slane %v17765_v13, %v17250_v26 }
 0x379   : > { %v7937_v50 = vsel %vm6775_vm4, %v7936_v36, %v7935_v44  ;;  %v7947_v57 = vsel %vm6769_vm3, %v7946_v25, %v7945_v45  ;;  %v7214_v41 = vrot.slane %v17769_v27, %v17250_v26  ;;  %v7228_v62 = vrot.slane %v17776_v55, %v17250_v26 }
 0x37a   : > { %v7939_v30 = vsel %vm6778_vm8, %v7938_v63, %v7937_v50  ;;  %v7949_v49 = vsel %vm6772_vm11, %v7948_v8, %v7947_v57  ;;  %v7207_v58 = vrot.slane %v7200_v52, %v17250_v26  ;;  %v7242_v2 = vrot.slane %v17782_v19, %v17250_v26 }
 0x37b   : > { %v7941_v13 = vsel %vm6781_vm1, %v7940_v17, %v7939_v30  ;;  %v7951_v36 = vsel %vm6775_vm4, %v7950_v22, %v7949_v49  ;;  %v18473_v45 = vrot.slane %v7214_v41, %v17250_v26  ;;  %v18476_v27 = vrot.slane %v7228_v62, %v17250_v26 }
 0x37c   : > { %v7943_v55 = vsel %vm6784_vm10, %v7942_v35, %v7941_v13  ;;  %v7953_v63 = vsel %vm6778_vm8, %v7952_v56, %v7951_v36  ;;  %v18481_v25 = vrot.slane %v7242_v2, %v17250_v26  ;;  %v7256_v19 = vrot.slane %v17785_v37, %v17250_v26 }
 0x37d   : > { %v7955_v52 = vsel %vm6781_vm1, %v7954_v20, %v7953_v63  ;;  %v7270_v22 = vrot.slane %v17792_v61, %v17250_v26  ;;  %v7284_v41 = vrot.slane %v17796_v29, %v17250_v26  ;;  %v7298_v62 = vrot.slane %v17803_v34, %v17250_v26 }
 0x37e   : > { %v18493_v17 = vsel %vm6784_vm10, %v7956_v3, %v7955_v52  ;;  %v18496_v56 = vrot.slane %v7256_v19, %v17250_v26  ;;  %v7312_v37 = vrot.slane %v17789_v32, %v17250_v26  ;;  %v7326_v35 = vrot.slane %v17799_v1, %v17250_v26 }
 0x37f   : > { %21569 = vst [vmem:[#allocation16_spill] sm:$0xff] %v18493_v17  ;;  %v8042_v61 = vpack.c.b16 %v18493_v17, %v7943_v55  ;;  %v18504_v8 = vrot.slane %v7270_v22, %v17250_v26  ;;  %v18507_v29 = vrot.slane %v7284_v41, %v17250_v26  ;;  %v18510_v34 = vrot.slane %v7298_v62, %v17250_v26 }
 0x380   : > { %v7319_v3 = vrot.slane %v7312_v37, %v17250_v26  ;;  %v18514_v20 = vrot.slane %v7326_v35, %v17250_v26  ;;  %v7340_v32 = vrot.slane %v17807_v38, %v17250_v26  ;;  %v7354_v1 = vrot.slane %v17811_v21, %v17250_v26 }
 0x381   : > { %14843 = vmatprep.mubr.msk.bf16.mxu1 %vm6888_vm15, %v8042_v61  ;;  %v7368_v44 = vrot.slane %v17816_v42, %v17250_v26  ;;  %v7382_v50 = vrot.slane %v17822_v7, %v17250_v26  ;;  %v7396_v57 = vrot.slane %v17826_v5, %v17250_v26  ;;  %v7410_v30 = vrot.slane %v17835_v48, %v17250_v26 }
 0x382   : > { %v18530_v49 = vrot.slane %v7340_v32, %v17250_v26  ;;  %v18533_v38 = vrot.slane %v7354_v1, %v17250_v26  ;;  %v7882_v21 = vunpack.c.l.b16 %v7207_v58  ;;  %v21213_v2 = vunpack.c.l.b16 %v18473_v45 }
 0x383   : > { %v18537_v42 = vrot.slane %v7368_v44, %v17250_v26  ;;  %v18540_v7 = vrot.slane %v7382_v50, %v17250_v26  ;;  %v18543_v5 = vrot.slane %v7396_v57, %v17250_v26  ;;  %v18546_v48 = vrot.slane %v7410_v30, %v17250_v26 }
 0x384   : > { %v21214_v13 = vunpack.c.l.b16 %v18476_v27  ;;  %v21215_v36 = vunpack.c.l.b16 %v18481_v25  ;;  %v21217_v58 = vunpack.c.l.b16 %v18496_v56  ;;  %v21218_v55 = vunpack.c.l.b16 %v18504_v8 }
 0x385   : > { %v21227_v63 = vunpack.c.l.b16 %v18507_v29  ;;  %v21219_v19 = vunpack.c.l.b16 %v18510_v34  ;;  %v7890_v52 = vunpack.c.l.b16 %v7319_v3  ;;  %v21220_v22 = vunpack.c.l.b16 %v18514_v20 }
 0x386   : > { %v21221_v41 = vunpack.c.l.b16 %v18530_v49  ;;  %v21226_v62 = vunpack.c.l.b16 %v18533_v38  ;;  %v21222_v37 = vunpack.c.l.b16 %v18537_v42  ;;  %v21223_v35 = vunpack.c.l.b16 %v18540_v7 }
 0x387   : > { %v21224_v61 = vunpack.c.l.b16 %v18543_v5  ;;  %v21225_v32 = vunpack.c.l.b16 %v18546_v48  ;;  %v7958_v1 = vrot.slane %v21213_v2, 7  ;;  %v7960_v3 = vrot.slane %v21214_v13, 6 }
 0x388   : > { %v7962_v44 = vrot.slane %v21215_v36, 5  ;;  %v7964_v50 = vrot.slane %v21217_v58, 4  ;;  %v7966_v57 = vrot.slane %v21218_v55, 3  ;;  %v7968_v30 = vrot.slane %v21227_v63, 2 }
 0x389   : > { %v7959_v51 = vsel %vm6766_vm13, %v7958_v1, %v7882_v21  ;;  %v7970_v2 = vrot.slane %v21219_v19, 1  ;;  %v7972_v13 = vrot.slane %v21220_v22, 7  ;;  %v7974_v36 = vrot.slane %v21221_v41, 6 }
 0x38a   : > { %v7961_v59 = vsel %vm6769_vm3, %v7960_v3, %v7959_v51  ;;  %v7976_v58 = vrot.slane %v21226_v62, 5  ;;  %v7978_v55 = vrot.slane %v21222_v37, 4  ;;  %v7980_v21 = vrot.slane %v21223_v35, 3  ;;  %v21590_v62 = vld [vmem:[#allocation38_spill] sm:$0xff] }
 0x38b   : > { %v7963_v1 = vsel %vm6772_vm11, %v7962_v44, %v7961_v59  ;;  %v7973_v19 = vsel %vm6766_vm13, %v7972_v13, %v7890_v52  ;;  %v7982_v22 = vrot.slane %v21224_v61, 2  ;;  %v7984_v41 = vrot.slane %v21225_v32, 1  ;;  %v21570_v52 = vld [vmem:[#allocation17_spill] sm:$0xff]  ;;  %v21571_v61 = vld [vmem:[#allocation27_spill] sm:$0xff] }
 0x38c   : > { %v7965_v51 = vsel %vm6775_vm4, %v7964_v50, %v7963_v1  ;;  %v7975_v3 = vsel %vm6769_vm3, %v7974_v36, %v7973_v19  ;;  %v8377_v37 = vsel %vm6901_vm7, %v18129_v0, 0  ;;  %v7424_v35 = vrot.slane %v17951_v47, %v17250_v26  ;;  %v21572_v0 = vld [vmem:[#allocation10_spill] sm:$0xff] }
 0x38d   : > { %v7967_v59 = vsel %vm6778_vm8, %v7966_v57, %v7965_v51  ;;  %v7977_v13 = vsel %vm6772_vm11, %v7976_v58, %v7975_v3  ;;  %v7438_v44 = vrot.slane %v21570_v52, %v17250_v26  ;;  %v7452_v32 = vrot.slane %v21571_v61, %v17250_v26  ;;  %v21576_v3 = vld [vmem:[#allocation29_spill] sm:$0xff] }
 0x38e   : > { %v7969_v50 = vsel %vm6781_vm1, %v7968_v30, %v7967_v59  ;;  %v7979_v36 = vsel %vm6775_vm4, %v7978_v55, %v7977_v13  ;;  %v18608_v19 = vrot.slane %v7424_v35, %v17250_v26  ;;  %v7466_v47 = vrot.slane %v21572_v0, %v17250_v26  ;;  %v21575_v35 = vld [vmem:[#allocation19_spill] sm:$0xff] }
 0x38f   : > { %v18613_v57 = vsel %vm6784_vm10, %v7970_v2, %v7969_v50  ;;  %v7981_v58 = vsel %vm6778_vm8, %v7980_v21, %v7979_v36  ;;  %v18617_v1 = vrot.slane %v7438_v44, %v17250_v26  ;;  %v18620_v61 = vrot.slane %v7452_v32, %v17250_v26  ;;  %v21578_v21 = vld [vmem:[#allocation8_spill] sm:$0xff]  ;;  %v21579_v32 = vld [vmem:[#allocation30_spill] sm:$0xff] }
 0x390   : > { %21573 = vst [vmem:[#allocation18_spill] sm:$0xff] %v18613_v57  ;;  %v7983_v30 = vsel %vm6781_vm1, %v7982_v22, %v7981_v58  ;;  %v18624_v55 = vrot.slane %v7466_v47, %v17250_v26  ;;  %v7480_v51 = vrot.slane %v21575_v35, %v17250_v26  ;;  %v7494_v2 = vrot.slane %v21576_v3, %v17250_v26  ;;  %v21580_v22 = vld [vmem:[#allocation31_spill] sm:$0xff] }
 0x391   : > { %21574 = vst [vmem:[#allocation28_spill] sm:$0xff] %v18617_v1  ;;  %v18631_v59 = vsel %vm6784_vm10, %v7984_v41, %v7983_v30  ;;  %v7508_v13 = vrot.slane %v21578_v21, %v17250_v26  ;;  %v7522_v52 = vrot.slane %v21579_v32, %v17250_v26  ;;  %v7536_v44 = vrot.slane %v21580_v22, %v17250_v26  ;;  %v21582_v41 = vld [vmem:[#allocation34_spill] sm:$0xff]  ;;  %v21585_v3 = vld [vmem:[#allocation35_spill] sm:$0xff] }
 0x392   : > { %21577 = vst [vmem:[#allocation25_spill] sm:$0xff] %v18631_v59  ;;  %v8043_v50 = vpack.c.b16 %v18631_v59, %v18613_v57  ;;  %v18642_v36 = vrot.slane %v7480_v51, %v17250_v26  ;;  %v18645_v0 = vrot.slane %v7494_v2, %v17250_v26  ;;  %v7550_v47 = vrot.slane %v21582_v41, %v17250_v26  ;;  %v18661_v51 = vld [vmem:[%s21110_s7 + $0xc] sm:$0xf] }
 0x393   : > { %v18650_v58 = vrot.slane %v7508_v13, %v17250_v26  ;;  %v18653_v30 = vrot.slane %v7522_v52, %v17250_v26  ;;  %v7543_v35 = vrot.slane %v7536_v44, %v17250_v26  ;;  %v7564_v21 = vrot.slane %v21585_v3, %v17250_v26  ;;  %v21587_v13 = vld [vmem:[#allocation39_spill] sm:$0xff]  ;;  %v21588_v52 = vld [vmem:[#allocation32_spill] sm:$0xff]  ;;  %v21589_v44 = vld [vmem:[#allocation37_spill] sm:$0xff] }
 0x394   : > { %21581 = vst [vmem:[#allocation22_spill] sm:$0xff] %v18645_v0  ;;  %14844 = vmatmul.mubr.msk.bf16.vlgmr.msra.gmra.mrb[32].mxu1 %vm6888_vm15, %v8043_v50  ;;  %v18665_v2 = vrot.slane %v7550_v47, %v17250_v26  ;;  %v7578_v32 = vrot.slane %v21587_v13, %v17250_v26  ;;  %v7592_v22 = vrot.slane %v21588_v52, %v17250_v26  ;;  %v21591_v50 = vld [vmem:[#allocation40_spill] sm:$0xff]  ;;  %v7898_v6 = vunpack.c.l.b16 %v18608_v19 }
 0x395   : > { %21583 = vst [vmem:[#allocation26_spill] sm:$0xff] %v18650_v58  ;;  %21584 = vst [vmem:[#allocation17_spill] sm:$0xff] %v18653_v30  ;;  %v7606_v41 = vrot.slane %v21589_v44, %v17250_v26  ;;  %14852 = vmatpush3.bf16.msra.mxu1 %v8377_v37  ;;  %v18674_v3 = vrot.slane %v7564_v21, %v17250_v26  ;;  %v7620_v63 = vrot.slane %v21590_v62, %v17250_v26 }
 0x396   : > { %21586 = vst [vmem:[#allocation27_spill] sm:$0xff] %v18665_v2  ;;  %v7634_v47 = vrot.slane %v21591_v50, %v17250_v26  ;;  %v18682_v13 = vrot.slane %v7578_v32, %v17250_v26  ;;  %v18685_v52 = vrot.slane %v7592_v22, %v17250_v26  ;;  %v21236_v37 = vunpack.c.l.b16 %v18617_v1  ;;  %15290 = vmatprep.subr.msk.bf16.mxu1 %vm6901_vm7, %v18661_v51 }
 0x397   : > { %v18688_v44 = vrot.slane %v7606_v41, %v17250_v26  ;;  %v18694_v62 = vrot.slane %v7620_v63, %v17250_v26  ;;  %v7906_v23 = vunpack.c.l.b16 %v7543_v35  ;;  %v21596_v46 = vunpack.c.l.b16 %v18620_v61 }
 0x398   : > { %21592 = vst [vmem:[#allocation10_spill] sm:$0xff] %v18685_v52  ;;  %v18697_v21 = vrot.slane %v7634_v47, %v17250_v26  ;;  %v7986_v50 = vrot.slane %v21236_v37, 7  ;;  %v21597_v16 = vunpack.c.l.b16 %v18624_v55  ;;  %v21598_v63 = vunpack.c.l.b16 %v18642_v36 }
 0x399   : > { %21593 = vst [vmem:[#allocation19_spill] sm:$0xff] %v18688_v44  ;;  %21594 = vst [vmem:[#allocation29_spill] sm:$0xff] %v18694_v62  ;;  %v7988_v35 = vrot.slane %v21596_v46, 6  ;;  %v21599_v54 = vunpack.c.l.b16 %v18645_v0  ;;  %v21600_v19 = vunpack.c.l.b16 %v18650_v58  ;;  %v21601_v22 = vunpack.c.l.b16 %v18653_v30 }
 0x39a   : > { %21595 = vst [vmem:[#allocation8_spill] sm:$0xff] %v18697_v21  ;;  %v7990_v41 = vrot.slane %v21597_v16, 5  ;;  %v7992_v47 = vrot.slane %v21598_v63, 4  ;;  %v21602_v37 = vunpack.c.l.b16 %v18665_v2  ;;  %v7987_v46 = vsel %vm6766_vm13, %v7986_v50, %v7898_v6 }
 0x39b   : > { %v7994_v53 = vrot.slane %v21599_v54, 3  ;;  %v7996_v32 = vrot.slane %v21600_v19, 2  ;;  %v7998_v9 = vrot.slane %v21601_v22, 1  ;;  %v21603_v17 = vunpack.c.l.b16 %v18674_v3 }
 0x39c   : > { %v8000_v57 = vrot.slane %v21602_v37, 7  ;;  %v21604_v1 = vunpack.c.l.b16 %v18682_v13  ;;  %v21605_v0 = vunpack.c.l.b16 %v18685_v52  ;;  %v7989_v58 = vsel %vm6769_vm3, %v7988_v35, %v7987_v46 }
 0x39d   : > { %v8002_v16 = vrot.slane %v21603_v17, 6  ;;  %v21606_v22 = vunpack.c.l.b16 %v18688_v44  ;;  %v21607_v37 = vunpack.c.l.b16 %v18694_v62  ;;  %v7991_v6 = vsel %vm6772_vm11, %v7990_v41, %v7989_v58 }
 0x39e   : > { %v8004_v63 = vrot.slane %v21604_v1, 5  ;;  %v8006_v54 = vrot.slane %v21605_v0, 4  ;;  %v8001_v19 = vsel %vm6766_vm13, %v8000_v57, %v7906_v23  ;;  %v21608_v50 = vunpack.c.l.b16 %v18697_v21  ;;  %v21609_v57 = vld [vmem:[#allocation43_spill] sm:$0xff] }
 0x39f   : > { %v8008_v30 = vrot.slane %v21606_v22, 3  ;;  %v8010_v2 = vrot.slane %v21607_v37, 2  ;;  %v8003_v17 = vsel %vm6769_vm3, %v8002_v16, %v8001_v19  ;;  %v7648_v0 = vrot.slane %v18140_v60, %v17250_v26  ;;  %v21610_v22 = vld [vmem:[#allocation44_spill] sm:$0xff] }
 0x3a0   : > { %v8012_v1 = vrot.slane %v21608_v50, 1  ;;  %v7993_v35 = vsel %vm6775_vm4, %v7992_v47, %v7991_v6  ;;  %v8005_v23 = vsel %vm6772_vm11, %v8004_v63, %v8003_v17  ;;  %v7662_v46 = vrot.slane %v21609_v57, %v17250_v26  ;;  %v21611_v19 = vld [vmem:[#allocation48_spill] sm:$0xff] }
 0x3a1   : > { %v7676_v37 = vrot.slane %v21610_v22, %v17250_v26  ;;  %v7995_v58 = vsel %vm6778_vm8, %v7994_v53, %v7993_v35  ;;  %v8007_v41 = vsel %vm6775_vm4, %v8006_v54, %v8005_v23  ;;  %v7655_v16 = vrot.slane %v7648_v0, %v17250_v26  ;;  %v21616_v0 = vld [vmem:[#allocation41_spill] sm:$0xff] }
 0x3a2   : > { %v7690_v50 = vrot.slane %v21611_v19, %v17250_v26  ;;  %v7997_v60 = vsel %vm6781_vm1, %v7996_v32, %v7995_v58  ;;  %v8009_v47 = vsel %vm6778_vm8, %v8008_v30, %v8007_v41  ;;  %v18761_v63 = vrot.slane %v7662_v46, %v17250_v26  ;;  %v21618_v23 = vld [vmem:[#allocation45_spill] sm:$0xff] }
 0x3a3   : > { %v18764_v6 = vrot.slane %v7676_v37, %v17250_v26  ;;  %v18767_v17 = vsel %vm6784_vm10, %v7998_v9, %v7997_v60  ;;  %v8011_v53 = vsel %vm6781_vm1, %v8010_v2, %v8009_v47  ;;  %v7704_v35 = vrot.slane %v21616_v0, %v17250_v26  ;;  %v21619_v9 = vld [vmem:[#allocation46_spill] sm:$0xff]  ;;  %v21625_v60 = vld [vmem:[#allocation52_spill] sm:$0xff] }
 0x3a4   : > { %21612 = vst [vmem:[#allocation30_spill] sm:$0xff] %v18761_v63  ;;  %21614 = vst [vmem:[#allocation34_spill] sm:$0xff] %v18767_v17  ;;  %v18771_v54 = vrot.slane %v7690_v50, %v17250_v26  ;;  %v18776_v32 = vsel %vm6784_vm10, %v8012_v1, %v8011_v53  ;;  %v7718_v57 = vrot.slane %v21618_v23, %v17250_v26  ;;  %v21621_v37 = vld [vmem:[#allocation50_spill] sm:$0xff]  ;;  %v21622_v1 = vld [vmem:[#allocation49_spill] sm:$0xff] }
 0x3a5   : > { %21613 = vst [vmem:[#allocation31_spill] sm:$0xff] %v18764_v6  ;;  %21617 = vst [vmem:[#allocation39_spill] sm:$0xff] %v18776_v32  ;;  %v7732_v46 = vrot.slane %v21619_v9, %v17250_v26  ;;  %v8044_v2 = vpack.c.b16 %v18776_v32, %v18767_v17  ;;  %v18787_v22 = vrot.slane %v7704_v35, %v17250_v26  ;;  %v21626_v53 = vld [vmem:[#allocation53_spill] sm:$0xff]  ;;  %v21627_v9 = vld [vmem:[#allocation58_spill] sm:$0xff] }
 0x3a6   : > { %21615 = vst [vmem:[#allocation35_spill] sm:$0xff] %v18771_v54  ;;  %v7746_v58 = vrot.slane %v21621_v37, %v17250_v26  ;;  %v7760_v41 = vrot.slane %v21622_v1, %v17250_v26  ;;  %v18794_v19 = vrot.slane %v7718_v57, %v17250_v26  ;;  %v7774_v47 = vrot.slane %v21625_v60, %v17250_v26  ;;  %v21628_v37 = vld [vmem:[#allocation51_spill] sm:$0xff] }
 0x3a7   : > { %21620 = vst [vmem:[#allocation32_spill] sm:$0xff] %v18787_v22  ;;  %v18797_v50 = vrot.slane %v7732_v46, %v17250_v26  ;;  %v7788_v0 = vrot.slane %v21626_v53, %v17250_v26  ;;  %14847 = vmatprep.mubr.msk.bf16.mxu1 %vm6888_vm15, %v8044_v2  ;;  %v7802_v57 = vrot.slane %v21627_v9, %v17250_v26  ;;  %v21631_v53 = vld [vmem:[#allocation56_spill] sm:$0xff] }
 0x3a8   : > { %21623 = vst [vmem:[#allocation37_spill] sm:$0xff] %v18794_v19  ;;  %v18805_v35 = vrot.slane %v7746_v58, %v17250_v26  ;;  %v7767_v23 = vrot.slane %v7760_v41, %v17250_v26  ;;  %v7816_v46 = vrot.slane %v21628_v37, %v17250_v26  ;;  %v18813_v1 = vrot.slane %v7774_v47, %v17250_v26  ;;  %v21632_v58 = vld [vmem:[#allocation57_spill] sm:$0xff]  ;;  %v21633_v37 = vld [vmem:[#allocation59_spill] sm:$0xff] }
 0x3a9   : > { %21624 = vst [vmem:[#allocation38_spill] sm:$0xff] %v18797_v50  ;;  %v18816_v60 = vrot.slane %v7788_v0, %v17250_v26  ;;  %v7830_v2 = vrot.slane %v21631_v53, %v17250_v26  ;;  %v7844_v30 = vrot.slane %v21632_v58, %v17250_v26  ;;  %v18823_v41 = vrot.slane %v7802_v57, %v17250_v26 }
 0x3aa   : > { %21629 = vst [vmem:[#allocation40_spill] sm:$0xff] %v18813_v1  ;;  %v18826_v9 = vrot.slane %v7816_v46, %v17250_v26  ;;  %v7858_v59 = vrot.slane %v21633_v37, %v17250_v26  ;;  %v7914_v47 = vunpack.c.l.b16 %v7655_v16  ;;  %v7922_v21 = vunpack.c.l.b16 %v7767_v23 }
 0x3ab   : > { %21630 = vst [vmem:[#allocation43_spill] sm:$0xff] %v18816_v60  ;;  %v18831_v17 = vrot.slane %v7830_v2, %v17250_v26  ;;  %v18834_v0 = vrot.slane %v7844_v30, %v17250_v26  ;;  %v21635_v37 = vunpack.c.l.b16 %v18761_v63  ;;  %v21636_v2 = vunpack.c.l.b16 %v18764_v6 }
 0x3ac   : > { %v18839_v57 = vrot.slane %v7858_v59, %v17250_v26  ;;  %v21637_v30 = vunpack.c.l.b16 %v18771_v54  ;;  %v21638_v53 = vunpack.c.l.b16 %v18787_v22  ;;  %v21639_v59 = vunpack.c.l.b16 %v18794_v19 }
 0x3ad   : > { %21634 = vst [vmem:[#allocation44_spill] sm:$0xff] %v18831_v17  ;;  %v8014_v16 = vrot.slane %v21635_v37, 7  ;;  %v8016_v23 = vrot.slane %v21636_v2, 6  ;;  %v21640_v62 = vunpack.c.l.b16 %v18797_v50  ;;  %v21641_v63 = vunpack.c.l.b16 %v18805_v35 }
 0x3ae   : > { %v8018_v44 = vrot.slane %v21637_v30, 5  ;;  %v8020_v58 = vrot.slane %v21638_v53, 4  ;;  %v8022_v52 = vrot.slane %v21639_v59, 3  ;;  %v21642_v6 = vunpack.c.l.b16 %v18813_v1 }
 0x3af   : > { %v8024_v46 = vrot.slane %v21640_v62, 2  ;;  %v8015_v32 = vsel %vm6766_vm13, %v8014_v16, %v7914_v47  ;;  %v8026_v37 = vrot.slane %v21641_v63, 1  ;;  %v21643_v54 = vunpack.c.l.b16 %v18816_v60 }
 0x3b0   : > { %v8028_v2 = vrot.slane %v21642_v6, 7  ;;  %v8017_v22 = vsel %vm6769_vm3, %v8016_v23, %v8015_v32  ;;  %v21644_v53 = vunpack.c.l.b16 %v18823_v41  ;;  %v21645_v59 = vunpack.c.l.b16 %v18826_v9 }
 0x3b1   : > { %v8030_v30 = vrot.slane %v21643_v54, 6  ;;  %v21646_v62 = vunpack.c.l.b16 %v18831_v17  ;;  %v8019_v16 = vsel %vm6772_vm11, %v8018_v44, %v8017_v22  ;;  %v21647_v6 = vunpack.c.l.b16 %v18834_v0  ;;  %v21650_v17 = vld [vmem:[#allocation7_spill] sm:$0xff] }
 0x3b2   : > { %v8032_v19 = vrot.slane %v21644_v53, 5  ;;  %v8034_v50 = vrot.slane %v21645_v59, 4  ;;  %v8029_v63 = vsel %vm6766_vm13, %v8028_v2, %v7922_v21  ;;  %v21648_v54 = vunpack.c.l.b16 %v18839_v57  ;;  %v21649_v53 = vld [vmem:[#allocation24_spill] sm:$0xff] }
 0x3b3   : > { %v8036_v47 = vrot.slane %v21646_v62, 3  ;;  %v8038_v1 = vrot.slane %v21647_v6, 2  ;;  %v8021_v32 = vsel %vm6775_vm4, %v8020_v58, %v8019_v16  ;;  %v8031_v23 = vsel %vm6769_vm3, %v8030_v30, %v8029_v63 }
 0x3b4   : > { %v8040_v60 = vrot.slane %v21648_v54, 1  ;;  %v8134_v59 = vrot.slane %v21649_v53, %v17250_v26  ;;  %v8148_v62 = vrot.slane %v21650_v17, %v17250_v26  ;;  %v8023_v44 = vsel %vm6778_vm8, %v8022_v52, %v8021_v32 }
 0x3b5   : > { %v8033_v21 = vsel %vm6772_vm11, %v8032_v19, %v8031_v23  ;;  %v21651_v22 = vunpack.c.l.b16 %v18338_v39  ;;  %v21652_v6 = vunpack.c.l.b16 %v18345_v24  ;;  %v8025_v58 = vsel %vm6781_vm1, %v8024_v46, %v8023_v44 }
 0x3b6   : > { %v8035_v30 = vsel %vm6775_vm4, %v8034_v50, %v8033_v21  ;;  %v8141_v16 = vrot.slane %v8134_v59, %v17250_v26  ;;  %v8155_v63 = vrot.slane %v8148_v62, %v17250_v26  ;;  %v18902_v17 = vsel %vm6784_vm10, %v8026_v37, %v8025_v58 }
 0x3b7   : > { %v8248_v2 = vrot.slane %v21651_v22, 7  ;;  %v8250_v54 = vrot.slane %v21652_v6, 6  ;;  %21653 = vst [vmem:[#allocation48_spill] sm:$0xff] %v18902_v17  ;;  %v8037_v52 = vsel %vm6778_vm8, %v8036_v47, %v8035_v30  ;;  %v21654_v19 = vunpack.c.l.b16 %v18335_v40 }
 0x3b8   : > { %v21655_v24 = vunpack.c.l.b16 %v18361_v4  ;;  %v8039_v46 = vsel %vm6781_vm1, %v8038_v1, %v8037_v52  ;;  %v8240_v23 = vunpack.c.l.b16 %v8141_v16  ;;  %v8241_v50 = vunpack.c.l.b16 %v8155_v63 }
 0x3b9   : > { %v8249_v39 = vsel %vm6766_vm13, %v8248_v2, %v21654_v19  ;;  %v18913_v59 = vsel %vm6784_vm10, %v8040_v60, %v8039_v46  ;;  %v21657_v47 = vunpack.c.l.b16 %v18368_v14  ;;  %v21658_v40 = vunpack.c.l.b16 %v18371_v28 }
 0x3ba   : > { %v8252_v32 = vrot.slane %v21655_v24, 5  ;;  %v8251_v53 = vsel %vm6769_vm3, %v8250_v54, %v8249_v39  ;;  %21656 = vst [vmem:[#allocation41_spill] sm:$0xff] %v18913_v59  ;;  %v8045_v4 = vpack.c.b16 %v18913_v59, %v18902_v17  ;;  %v21659_v1 = vunpack.c.l.b16 %v18374_v11 }
 0x3bb   : > { %v8254_v62 = vrot.slane %v21657_v47, 4  ;;  %v8256_v44 = vrot.slane %v21658_v40, 3  ;;  %v8260_v22 = vrot.slane %v8240_v23, 1  ;;  %v21660_v2 = vunpack.c.l.b16 %v18388_v15 }
 0x3bc   : > { %v8253_v37 = vsel %vm6772_vm11, %v8252_v32, %v8251_v53  ;;  %v8258_v21 = vrot.slane %v21659_v1, 2  ;;  %v21661_v54 = vunpack.c.l.b16 %v18397_v31  ;;  %v21662_v14 = vunpack.c.l.b16 %v18400_v18  ;;  %14848 = vmatmul.mubr.msk.bf16.gmra.mrb[36].mxu1 %vm6888_vm15, %v8045_v4  ;;  %v21667_v32 = vld [vmem:[#allocation13_spill] sm:$0xff]  ;;  %v21668_v53 = vld [vmem:[#allocation15_spill] sm:$0xff] }
 0x3bd   : > { %v8262_v6 = vrot.slane %v21660_v2, 7  ;;  %v8255_v60 = vsel %vm6775_vm4, %v8254_v62, %v8253_v37  ;;  %v21663_v28 = vunpack.c.l.b16 %v18404_v12  ;;  %v21664_v63 = vunpack.c.l.b16 %v18381_v10 }
 0x3be   : > { %v8264_v58 = vrot.slane %v21661_v54, 6  ;;  %v8266_v30 = vrot.slane %v21662_v14, 5  ;;  %v8257_v11 = vsel %vm6778_vm8, %v8256_v44, %v8255_v60  ;;  %v21665_v52 = vunpack.c.l.b16 %v18407_v43 }
 0x3bf   : > { %v8268_v16 = vrot.slane %v21663_v28, 4  ;;  %v8263_v15 = vsel %vm6766_vm13, %v8262_v6, %v21664_v63  ;;  %v21666_v31 = vunpack.c.l.b16 %v18410_v33  ;;  %v8259_v18 = vsel %vm6781_vm1, %v8258_v21, %v8257_v11 }
 0x3c0   : > { %v8270_v19 = vrot.slane %v21665_v52, 3  ;;  %v8265_v24 = vsel %vm6769_vm3, %v8264_v58, %v8263_v15  ;;  %v8274_v12 = vrot.slane %v8241_v50, 1  ;;  %v8162_v46 = vrot.slane %v21667_v32, %v17250_v26 }
 0x3c1   : > { %v8272_v39 = vrot.slane %v21666_v31, 2  ;;  %v8261_v23 = vsel %vm6784_vm10, %v8260_v22, %v8259_v18  ;;  %v8267_v10 = vsel %vm6772_vm11, %v8266_v30, %v8265_v24  ;;  %v8176_v37 = vrot.slane %v21668_v53, %v17250_v26 }
 0x3c2   : > { %v21669_v43 = vunpack.c.l.b16 %v18476_v27  ;;  %v8269_v33 = vsel %vm6775_vm4, %v8268_v16, %v8267_v10  ;;  %v8169_v62 = vrot.slane %v8162_v46, %v17250_v26  ;;  %v21670_v40 = vunpack.c.l.b16 %v18481_v25 }
 0x3c3   : > { %v21671_v44 = vunpack.c.l.b16 %v18496_v56  ;;  %v8271_v1 = vsel %vm6778_vm8, %v8270_v19, %v8269_v33  ;;  %v8183_v21 = vrot.slane %v8176_v37, %v17250_v26  ;;  %v21672_v22 = vunpack.c.l.b16 %v18473_v45 }
 0x3c4   : > { %v8276_v47 = vrot.slane %v21669_v43, 7  ;;  %v8278_v50 = vrot.slane %v21670_v40, 6  ;;  %v21673_v27 = vunpack.c.l.b16 %v18504_v8  ;;  %v8273_v60 = vsel %vm6781_vm1, %v8272_v39, %v8271_v1 }
 0x3c5   : > { %v8280_v4 = vrot.slane %v21671_v44, 5  ;;  %v8242_v54 = vunpack.c.l.b16 %v8169_v62  ;;  %v21674_v58 = vunpack.c.l.b16 %v18507_v29  ;;  %v18970_v14 = vsel %vm6784_vm10, %v8274_v12, %v8273_v60  ;;  %v21692_v60 = vld [vmem:[#allocation28_spill] sm:$0xff] }
 0x3c6   : > { %v8277_v2 = vsel %vm6766_vm13, %v8276_v47, %v21672_v22  ;;  %v8282_v6 = vrot.slane %v21673_v27, 4  ;;  %21675 = vst [vmem:[#allocation45_spill] sm:$0xff] %v18970_v14  ;;  %v8243_v30 = vunpack.c.l.b16 %v8183_v21  ;;  %v21676_v45 = vunpack.c.l.b16 %v18510_v34 }
 0x3c7   : > { %v8279_v25 = vsel %vm6769_vm3, %v8278_v50, %v8277_v2  ;;  %v8284_v56 = vrot.slane %v21674_v58, 3  ;;  %v8360_v8 = vpack.c.b16 %v18970_v14, %v8261_v23  ;;  %v8288_v63 = vrot.slane %v8242_v54, 1  ;;  %v21694_v58 = vld [vmem:[#allocation26_spill] sm:$0xff] }
 0x3c8   : > { %v8281_v28 = vsel %vm6772_vm11, %v8280_v4, %v8279_v25  ;;  %v8286_v16 = vrot.slane %v21676_v45, 2  ;;  %v21677_v15 = vunpack.c.l.b16 %v18530_v49  ;;  %v21678_v19 = vunpack.c.l.b16 %v18533_v38 }
 0x3c9   : > { %v8283_v11 = vsel %vm6775_vm4, %v8282_v6, %v8281_v28  ;;  %v21679_v39 = vunpack.c.l.b16 %v18537_v42  ;;  %v21680_v24 = vunpack.c.l.b16 %v18540_v7  ;;  %14853 = vmatprep.mubr.msk.bf16.mxu1 %vm6888_vm15, %v8360_v8  ;;  %v21681_v32 = vunpack.c.l.b16 %v18514_v20  ;;  %v21685_v20 = vld [vmem:[#allocation33_spill] sm:$0xff] }
 0x3ca   : > { %v8290_v52 = vrot.slane %v21677_v15, 7  ;;  %v8285_v29 = vsel %vm6778_vm8, %v8284_v56, %v8283_v11  ;;  %v8292_v31 = vrot.slane %v21678_v19, 6  ;;  %v21682_v46 = vunpack.c.l.b16 %v18543_v5  ;;  %v21686_v5 = vld [vmem:[#allocation36_spill] sm:$0xff] }
 0x3cb   : > { %v8294_v18 = vrot.slane %v21679_v39, 5  ;;  %v8296_v34 = vrot.slane %v21680_v24, 4  ;;  %v8287_v12 = vsel %vm6781_vm1, %v8286_v16, %v8285_v29  ;;  %v21683_v38 = vunpack.c.l.b16 %v18546_v48 }
 0x3cc   : > { %v8291_v49 = vsel %vm6766_vm13, %v8290_v52, %v21681_v32  ;;  %v8298_v23 = vrot.slane %v21682_v46, 3  ;;  %v18996_v42 = vsel %vm6784_vm10, %v8288_v63, %v8287_v12  ;;  %v8302_v53 = vrot.slane %v8243_v30, 1  ;;  %v21696_v30 = vld [vmem:[#allocation17_spill] sm:$0xff] }
 0x3cd   : > { %v8300_v10 = vrot.slane %v21683_v38, 2  ;;  %21684 = vst [vmem:[#allocation46_spill] sm:$0xff] %v18996_v42  ;;  %v8293_v7 = vsel %vm6769_vm3, %v8292_v31, %v8291_v49  ;;  %v9943_v37 = vsel %vm6901_vm7, %v18661_v51, 0  ;;  %v8190_v47 = vrot.slane %v21685_v20, %v17250_v26  ;;  %v21690_v51 = vld [vmem:[#allocation22_spill] sm:$0xff]  ;;  %v21703_v49 = vld [vmem:[#allocation19_spill] sm:$0xff] }
 0x3ce   : > { %v8295_v43 = vsel %vm6772_vm11, %v8294_v18, %v8293_v7  ;;  %v8204_v33 = vrot.slane %v21686_v5, %v17250_v26  ;;  %v21687_v48 = vunpack.c.l.b16 %v18620_v61  ;;  %v21688_v50 = vunpack.c.l.b16 %v18624_v55  ;;  %v19046_v38 = vld [vmem:[%s21110_s7 + $0x10] sm:$0xf] }
 0x3cf   : > { %v8297_v40 = vsel %vm6775_vm4, %v8296_v34, %v8295_v43  ;;  %v21689_v4 = vunpack.c.l.b16 %v18642_v36  ;;  %v21691_v21 = vunpack.c.l.b16 %v21690_v51  ;;  %v8197_v27 = vrot.slane %v8190_v47, %v17250_v26  ;;  %v21701_v34 = vld [vmem:[#allocation10_spill] sm:$0xff]  ;;  %v21709_v47 = vld [vmem:[#allocation8_spill] sm:$0xff]  ;;  %v21713_v51 = vld [vmem:[#allocation55_spill] sm:$0xff] }
 0x3d0   : > { %v8304_v62 = vrot.slane %v21687_v48, 7  ;;  %v8306_v44 = vrot.slane %v21688_v50, 6  ;;  %v8299_v2 = vsel %vm6778_vm8, %v8298_v23, %v8297_v40  ;;  %v8211_v6 = vrot.slane %v8204_v33, %v17250_v26  ;;  %v21712_v50 = vld [vmem:[#allocation54_spill] sm:$0xff] }
 0x3d1   : > { %v8308_v1 = vrot.slane %v21689_v4, 5  ;;  %v8310_v22 = vrot.slane %v21691_v21, 4  ;;  %v21693_v61 = vunpack.c.l.b16 %v21692_v60  ;;  %v8301_v25 = vsel %vm6781_vm1, %v8300_v10, %v8299_v2  ;;  %v21716_v60 = vld [vmem:[#allocation35_spill] sm:$0xff] }
 0x3d2   : > { %v21695_v36 = vunpack.c.l.b16 %v21694_v58  ;;  %v21697_v28 = vunpack.c.l.b16 %v21696_v30  ;;  %v19028_v16 = vsel %vm6784_vm10, %v8302_v53, %v8301_v25  ;;  %v8244_v8 = vunpack.c.l.b16 %v8197_v27  ;;  %v21707_v53 = vld [vmem:[#allocation29_spill] sm:$0xff]  ;;  %v21718_v25 = vld [vmem:[#allocation32_spill] sm:$0xff]  ;;  %v21720_v30 = vld [vmem:[#allocation30_spill] sm:$0xff] }
 0x3d3   : > { %v8305_v54 = vsel %vm6766_vm13, %v8304_v62, %v21693_v61  ;;  %21698 = vst [vmem:[#allocation50_spill] sm:$0xff] %v19028_v16  ;;  %v8245_v11 = vunpack.c.l.b16 %v8211_v6  ;;  %v8361_v15 = vpack.c.b16 %v19028_v16, %v18996_v42  ;;  %v21699_v29 = vunpack.c.l.b16 %v18674_v3 }
 0x3d4   : > { %v8307_v55 = vsel %vm6769_vm3, %v8306_v44, %v8305_v54  ;;  %v8312_v56 = vrot.slane %v21695_v36, 3  ;;  %v8314_v45 = vrot.slane %v21697_v28, 2  ;;  %v21700_v31 = vunpack.c.l.b16 %v18682_v13  ;;  %v21705_v13 = vld [vmem:[#allocation27_spill] sm:$0xff] }
 0x3d5   : > { %v8309_v63 = vsel %vm6772_vm11, %v8308_v1, %v8307_v55  ;;  %v8318_v19 = vrot.slane %v21699_v29, 7  ;;  %v8316_v24 = vrot.slane %v8244_v8, 1  ;;  %v21702_v12 = vunpack.c.l.b16 %v21701_v34  ;;  %14854 = vmatmul.mubr.msk.bf16.vlgmr.msra.gmra.mrb[32].mxu1 %vm6888_vm15, %v8361_v15  ;;  %v21722_v8 = vld [vmem:[#allocation37_spill] sm:$0xff] }
 0x3d6   : > { %v8311_v52 = vsel %vm6775_vm4, %v8310_v22, %v8309_v63  ;;  %v8320_v39 = vrot.slane %v21700_v31, 6  ;;  %v21704_v46 = vunpack.c.l.b16 %v21703_v49  ;;  %v21706_v10 = vunpack.c.l.b16 %v21705_v13  ;;  %14862 = vmatpush3.bf16.msra.mxu1 %v9943_v37  ;;  %v21714_v22 = vld [vmem:[#allocation31_spill] sm:$0xff]  ;;  %v14116_v49 = vld.sshfl [vmem:[#allocation3 + $0xc] sm:$0x33 pattern:$0x75316420] }
 0x3d7   : > { %v8313_v18 = vsel %vm6778_vm8, %v8312_v56, %v8311_v52  ;;  %v8322_v32 = vrot.slane %v21702_v12, 5  ;;  %v21708_v43 = vunpack.c.l.b16 %v21707_v53  ;;  %v21710_v5 = vunpack.c.l.b16 %v21709_v47  ;;  %15291 = vmatprep.subr.msk.bf16.mxu1 %vm6901_vm7, %v19046_v38  ;;  %v21728_v13 = vld [vmem:[#allocation43_spill] sm:$0xff]  ;;  %v14117_v53 = vld.sshfl [vmem:[#allocation3 + $0x10] sm:$0x33 pattern:$0x75316420] }
 0x3d8   : > { %v8324_v23 = vrot.slane %v21704_v46, 4  ;;  %v8315_v3 = vsel %vm6781_vm1, %v8314_v45, %v8313_v18  ;;  %v8319_v7 = vsel %vm6766_vm13, %v8318_v19, %v21706_v10  ;;  %v8330_v40 = vrot.slane %v8245_v11, 1  ;;  %v21724_v19 = vld [vmem:[#allocation38_spill] sm:$0xff] }
 0x3d9   : > { %v8326_v20 = vrot.slane %v21708_v43, 3  ;;  %v8328_v33 = vrot.slane %v21710_v5, 2  ;;  %v19058_v48 = vsel %vm6784_vm10, %v8316_v24, %v8315_v3  ;;  %v8321_v62 = vsel %vm6769_vm3, %v8320_v39, %v8319_v7 }
 0x3da   : > { %21711 = vst [vmem:[#allocation49_spill] sm:$0xff] %v19058_v48  ;;  %v8218_v44 = vrot.slane %v21712_v50, %v17250_v26  ;;  %v8323_v4 = vsel %vm6772_vm11, %v8322_v32, %v8321_v62  ;;  %v8232_v21 = vrot.slane %v21713_v51, %v17250_v26  ;;  %v21715_v2 = vunpack.c.l.b16 %v21714_v22 }
 0x3db   : > { %v8325_v27 = vsel %vm6775_vm4, %v8324_v23, %v8323_v4  ;;  %v21717_v61 = vunpack.c.l.b16 %v21716_v60  ;;  %v21719_v55 = vunpack.c.l.b16 %v21718_v25  ;;  %v21721_v28 = vunpack.c.l.b16 %v21720_v30 }
 0x3dc   : > { %v8332_v37 = vrot.slane %v21715_v2, 7  ;;  %v8225_v6 = vrot.slane %v8218_v44, %v17250_v26  ;;  %v8327_v36 = vsel %vm6778_vm8, %v8326_v20, %v8325_v27  ;;  %v8239_v56 = vrot.slane %v8232_v21, %v17250_v26  ;;  %v21734_v44 = vld [vmem:[#allocation40_spill] sm:$0xff] }
 0x3dd   : > { %v8334_v54 = vrot.slane %v21717_v61, 6  ;;  %v8336_v58 = vrot.slane %v21719_v55, 5  ;;  %v21723_v11 = vunpack.c.l.b16 %v21722_v8  ;;  %v8329_v15 = vsel %vm6781_vm1, %v8328_v33, %v8327_v36  ;;  %v21732_v33 = vld [vmem:[#allocation44_spill] sm:$0xff] }
 0x3de   : > { %v8333_v45 = vsel %vm6766_vm13, %v8332_v37, %v21721_v28  ;;  %v8246_v52 = vunpack.c.l.b16 %v8225_v6  ;;  %v21725_v31 = vunpack.c.l.b16 %v21724_v19  ;;  %v19090_v18 = vsel %vm6784_vm10, %v8330_v40, %v8329_v15  ;;  %v14118_v37 = vld.sshfl [vmem:[#allocation3 + $0x24] sm:$0x33 pattern:$0x75316420] }
 0x3df   : > { %v8338_v63 = vrot.slane %v21723_v11, 4  ;;  %v8335_v29 = vsel %vm6769_vm3, %v8334_v54, %v8333_v45  ;;  %21726 = vst [vmem:[#allocation52_spill] sm:$0xff] %v19090_v18  ;;  %v8247_v24 = vunpack.c.l.b16 %v8239_v56  ;;  %v21727_v12 = vunpack.c.l.b16 %v18805_v35  ;;  %v14119_v55 = vld.sshfl [vmem:[#allocation3 + $0x28] sm:$0x33 pattern:$0x75316420] }
 0x3e0   : > { %v8340_v39 = vrot.slane %v21725_v31, 3  ;;  %v8337_v34 = vsel %vm6772_vm11, %v8336_v58, %v8335_v29  ;;  %v8362_v46 = vpack.c.b16 %v19090_v18, %v19058_v48  ;;  %v8344_v3 = vrot.slane %v8246_v52, 1 }
 0x3e1   : > { %v8342_v32 = vrot.slane %v21727_v12, 2  ;;  %v8339_v23 = vsel %vm6775_vm4, %v8338_v63, %v8337_v34  ;;  %v21729_v10 = vunpack.c.l.b16 %v21728_v13  ;;  %v21730_v20 = vunpack.c.l.b16 %v18823_v41 }
 0x3e2   : > { %v8341_v43 = vsel %vm6778_vm8, %v8340_v39, %v8339_v23  ;;  %v21731_v5 = vunpack.c.l.b16 %v18826_v9  ;;  %v21733_v62 = vunpack.c.l.b16 %v21732_v33  ;;  %14857 = vmatprep.mubr.msk.bf16.mxu1 %vm6888_vm15, %v8362_v46  ;;  %v21735_v4 = vunpack.c.l.b16 %v21734_v44 }
 0x3e3   : > { %v8346_v7 = vrot.slane %v21729_v10, 7  ;;  %v8348_v47 = vrot.slane %v21730_v20, 6  ;;  %v8343_v50 = vsel %vm6781_vm1, %v8342_v32, %v8341_v43  ;;  %v21736_v21 = vunpack.c.l.b16 %v18834_v0 }
 0x3e4   : > { %v8350_v35 = vrot.slane %v21731_v5, 5  ;;  %v8352_v40 = vrot.slane %v21733_v62, 4  ;;  %v21737_v41 = vunpack.c.l.b16 %v18839_v57  ;;  %v19117_v9 = vsel %vm6784_vm10, %v8344_v3, %v8343_v50 }
 0x3e5   : > { %v8347_v51 = vsel %vm6766_vm13, %v8346_v7, %v21735_v4  ;;  %v8354_v22 = vrot.slane %v21736_v21, 3  ;;  %21738 = vst [vmem:[#allocation53_spill] sm:$0xff] %v19117_v9  ;;  %v8358_v6 = vrot.slane %v8247_v24, 1  ;;  %v8475_v60 = vcombine.high %v14116_v49, %v14116_v49 }
 0x3e6   : > { %v8356_v2 = vrot.slane %v21737_v41, 2  ;;  %v8349_v27 = vsel %vm6769_vm3, %v8348_v47, %v8347_v51  ;;  %v19122_v54 = vrot.slane %v14116_v49, %v17250_v26  ;;  %v8499_v25 = vcombine.high %v14117_v53, %v14117_v53 }
 0x3e7   : > { %v8351_v61 = vsel %vm6772_vm11, %v8350_v35, %v8349_v27  ;;  %v19125_v0 = vrot.slane %v14117_v53, %v17250_v26  ;;  %v19129_v58 = vrot.slane %v8475_v60, %v17250_v26  ;;  %v8523_v36 = vcombine.high %v14118_v37, %v14118_v37 }
 0x3e8   : > { %v8353_v57 = vsel %vm6775_vm4, %v8352_v40, %v8351_v61  ;;  %v19132_v56 = vrot.slane %v14118_v37, %v17250_v26  ;;  %v19137_v28 = vcombine.high %v19122_v54, %v19122_v54  ;;  %v19140_v45 = vrot.slane %v8499_v25, %v17250_v26 }
 0x3e9   : > { %v8355_v30 = vsel %vm6778_vm8, %v8354_v22, %v8353_v57  ;;  %v19144_v8 = vcombine.high %v19125_v0, %v19125_v0  ;;  %v19149_v63 = vcombine.high %v19129_v58, %v19129_v58  ;;  %v19152_v15 = vrot.slane %v8523_v36, %v17250_v26 }
 0x3ea   : > { %v8357_v11 = vsel %vm6781_vm1, %v8356_v2, %v8355_v30  ;;  %v19156_v52 = vcombine.high %v19132_v56, %v19132_v56  ;;  %v19163_v19 = vcombine.high %v19140_v45, %v19140_v45  ;;  %v8547_v31 = vcombine.high %v14119_v55, %v14119_v55 }
 0x3eb   : > { %v19159_v29 = vsel %vm6784_vm10, %v8358_v6, %v8357_v11  ;;  %v19166_v39 = vrot.slane %v14119_v55, %v17250_v26  ;;  %v19172_v34 = vcombine.high %v19152_v15, %v19152_v15  ;;  %v8860_v12 = vrot.slane %v19122_v54, %v17250_v26 }
 0x3ec   : > { %21739 = vst [vmem:[#allocation58_spill] sm:$0xff] %v19159_v29  ;;  %v8363_v24 = vpack.c.b16 %v19159_v29, %v19117_v9  ;;  %v8874_v32 = vrot.slane %v19129_v58, %v17250_v26  ;;  %v19179_v49 = vrot.slane %v8547_v31, %v17250_v26  ;;  %v8888_v23 = vrot.slane %v19137_v28, %v17250_v26  ;;  %v14122_v9 = vld.sshfl [vmem:[#allocation3 + $0x54] sm:$0x33 pattern:$0x75316420] }
 0x3ed   : > { %v19183_v46 = vcombine.high %v19166_v39, %v19166_v39  ;;  %v8902_v3 = vrot.slane %v19149_v63, %v17250_v26  ;;  %v8867_v13 = vrot.slane %v8860_v12, %v17250_v26  ;;  %v8916_v7 = vrot.slane %v19125_v0, %v17250_v26 }
 0x3ee   : > { %14858 = vmatmul.mubr.msk.bf16.gmra.mrb[36].mxu1 %vm6888_vm15, %v8363_v24  ;;  %v19192_v10 = vrot.slane %v8874_v32, %v17250_v26  ;;  %v8930_v53 = vrot.slane %v19140_v45, %v17250_v26  ;;  %v19200_v43 = vcombine.high %v19179_v49, %v19179_v49  ;;  %v19203_v20 = vrot.slane %v8888_v23, %v17250_v26 }
 0x3ef   : > { %v19206_v47 = vrot.slane %v8902_v3, %v17250_v26  ;;  %v8944_v5 = vrot.slane %v19144_v8, %v17250_v26  ;;  %v19211_v35 = vrot.slane %v8916_v7, %v17250_v26  ;;  %v8958_v62 = vrot.slane %v19163_v19, %v17250_v26 }
 0x3f0   : > { %21740 = vst [vmem:[#allocation51_spill] sm:$0xff] %v19192_v10  ;;  %21741 = vst [vmem:[#allocation56_spill] sm:$0xff] %v19203_v20  ;;  %v19214_v33 = vrot.slane %v8930_v53, %v17250_v26  ;;  %v8972_v40 = vrot.slane %v19132_v56, %v17250_v26  ;;  %v8986_v44 = vrot.slane %v19152_v15, %v17250_v26  ;;  %v9750_v55 = vunpack.c.l.b16 %v8867_v13 }
 0x3f1   : > { %21742 = vst [vmem:[#allocation57_spill] sm:$0xff] %v19206_v47  ;;  %21743 = vst [vmem:[#allocation59_spill] sm:$0xff] %v19211_v35  ;;  %v19221_v50 = vrot.slane %v8944_v5, %v17250_v26  ;;  %v9000_v4 = vrot.slane %v19156_v52, %v17250_v26  ;;  %v9014_v51 = vrot.slane %v19172_v34, %v17250_v26  ;;  %v21261_v30 = vunpack.c.l.b16 %v19192_v10  ;;  %v14124_v10 = vld.sshfl [vmem:[#allocation3 + $0x6c] sm:$0x33 pattern:$0x75316420] }
 0x3f2   : > { %21744 = vst [vmem:[#allocation24_spill] sm:$0xff] %v19214_v33  ;;  %v19230_v21 = vrot.slane %v8958_v62, %v17250_v26  ;;  %v8979_v22 = vrot.slane %v8972_v40, %v17250_v26  ;;  %v9028_v41 = vrot.slane %v19166_v39, %v17250_v26  ;;  %v9042_v2 = vrot.slane %v19179_v49, %v17250_v26 }
 0x3f3   : > { %21745 = vst [vmem:[#allocation7_spill] sm:$0xff] %v19221_v50  ;;  %v19238_v37 = vrot.slane %v8986_v44, %v17250_v26  ;;  %v19241_v27 = vrot.slane %v9000_v4, %v17250_v26  ;;  %v19244_v6 = vrot.slane %v9014_v51, %v17250_v26  ;;  %v9056_v60 = vrot.slane %v19183_v46, %v17250_v26  ;;  %v14120_v4 = vld.sshfl [vmem:[#allocation3 + $0x3c] sm:$0x33 pattern:$0x75316420] }
 0x3f4   : > { %21746 = vst [vmem:[#allocation13_spill] sm:$0xff] %v19230_v21  ;;  %v19249_v61 = vrot.slane %v9028_v41, %v17250_v26  ;;  %v19252_v25 = vrot.slane %v9042_v2, %v17250_v26  ;;  %v9070_v57 = vrot.slane %v19200_v43, %v17250_v26  ;;  %v21262_v11 = vunpack.c.l.b16 %v19203_v20 }
 0x3f5   : > { %21747 = vst [vmem:[#allocation15_spill] sm:$0xff] %v19238_v37  ;;  %21748 = vst [vmem:[#allocation33_spill] sm:$0xff] %v19241_v27  ;;  %v19257_v36 = vrot.slane %v9056_v60, %v17250_v26  ;;  %v21263_v31 = vunpack.c.l.b16 %v19206_v47  ;;  %v21264_v12 = vunpack.c.l.b16 %v19211_v35  ;;  %v21265_v32 = vunpack.c.l.b16 %v19214_v33  ;;  %v14121_v60 = vld.sshfl [vmem:[#allocation3 + $0x40] sm:$0x33 pattern:$0x75316420] }
 0x3f6   : > { %21749 = vst [vmem:[#allocation36_spill] sm:$0xff] %v19244_v6  ;;  %21750 = vst [vmem:[#allocation22_spill] sm:$0xff] %v19249_v61  ;;  %v19263_v24 = vrot.slane %v9070_v57, %v17250_v26  ;;  %v21266_v23 = vunpack.c.l.b16 %v19221_v50  ;;  %v21268_v3 = vunpack.c.l.b16 %v19230_v21  ;;  %v9758_v13 = vunpack.c.l.b16 %v8979_v22  ;;  %v14125_v21 = vld.sshfl [vmem:[#allocation3 + $0x70] sm:$0x33 pattern:$0x75316420] }
 0x3f7   : > { %21751 = vst [vmem:[#allocation28_spill] sm:$0xff] %v19252_v25  ;;  %21752 = vst [vmem:[#allocation26_spill] sm:$0xff] %v19257_v36  ;;  %v21269_v7 = vunpack.c.l.b16 %v19238_v37  ;;  %v21270_v53 = vunpack.c.l.b16 %v19241_v27  ;;  %v21274_v5 = vunpack.c.l.b16 %v19244_v6  ;;  %v21275_v62 = vunpack.c.l.b16 %v19249_v61 }
 0x3f8   : > { %21753 = vst [vmem:[#allocation17_spill] sm:$0xff] %v19263_v24  ;;  %v9814_v41 = vrot.slane %v21261_v30, 7  ;;  %v9816_v22 = vrot.slane %v21262_v11, 6  ;;  %v9818_v2 = vrot.slane %v21263_v31, 5  ;;  %v9820_v57 = vrot.slane %v21264_v12, 4 }
 0x3f9   : > { %v9822_v1 = vrot.slane %v21265_v32, 3  ;;  %v9824_v44 = vrot.slane %v21266_v23, 2  ;;  %v9826_v51 = vrot.slane %v21268_v3, 1  ;;  %v9828_v11 = vrot.slane %v21269_v7, 7 }
 0x3fa   : > { %v9815_v30 = vsel %vm6766_vm13, %v9814_v41, %v9750_v55  ;;  %v9830_v31 = vrot.slane %v21270_v53, 6  ;;  %v9832_v12 = vrot.slane %v21274_v5, 5  ;;  %v9834_v32 = vrot.slane %v21275_v62, 4 }
 0x3fb   : > { %v9817_v40 = vsel %vm6769_vm3, %v9816_v22, %v9815_v30  ;;  %v21754_v23 = vunpack.c.l.b16 %v19252_v25  ;;  %v21755_v3 = vunpack.c.l.b16 %v19257_v36  ;;  %v9829_v7 = vsel %vm6766_vm13, %v9828_v11, %v9758_v13 }
 0x3fc   : > { %v9819_v41 = vsel %vm6772_vm11, %v9818_v2, %v9817_v40  ;;  %v21756_v53 = vunpack.c.l.b16 %v19263_v24  ;;  %v8571_v29 = vcombine.high %v14120_v4, %v14120_v4  ;;  %v9831_v30 = vsel %vm6769_vm3, %v9830_v31, %v9829_v7  ;;  %v14123_v31 = vld.sshfl [vmem:[#allocation3 + $0x58] sm:$0x33 pattern:$0x75316420] }
 0x3fd   : > { %v9836_v16 = vrot.slane %v21754_v23, 3  ;;  %v9838_v55 = vrot.slane %v21755_v3, 2  ;;  %v9821_v5 = vsel %vm6775_vm4, %v9820_v57, %v9819_v41  ;;  %v19311_v22 = vrot.slane %v14120_v4, %v17250_v26 }
 0x3fe   : > { %v9840_v48 = vrot.slane %v21756_v53, 1  ;;  %v8595_v62 = vcombine.high %v14121_v60, %v14121_v60  ;;  %v9823_v23 = vsel %vm6778_vm8, %v9822_v1, %v9821_v5  ;;  %v9833_v3 = vsel %vm6772_vm11, %v9832_v12, %v9831_v30 }
 0x3ff   : > { %v19316_v40 = vrot.slane %v8571_v29, %v17250_v26  ;;  %v19319_v11 = vrot.slane %v14121_v60, %v17250_v26  ;;  %v9825_v13 = vsel %vm6781_vm1, %v9824_v44, %v9823_v23  ;;  %v9835_v53 = vsel %vm6775_vm4, %v9834_v32, %v9833_v3 }
 0x400   : > { %v19325_v7 = vcombine.high %v19311_v22, %v19311_v22  ;;  %v19328_v1 = vrot.slane %v8595_v62, %v17250_v26  ;;  %v9827_v12 = vsel %vm6784_vm10, %v9826_v51, %v9825_v13  ;;  %v9837_v29 = vsel %vm6778_vm8, %v9836_v16, %v9835_v53 }
 0x401   : > { %v19334_v5 = vcombine.high %v19316_v40, %v19316_v40  ;;  %v19338_v44 = vcombine.high %v19319_v11, %v19319_v11  ;;  %v9839_v32 = vsel %vm6781_vm1, %v9838_v55, %v9837_v29  ;;  %v8619_v62 = vcombine.high %v14122_v9, %v14122_v9 }
 0x402   : > { %v19343_v4 = vcombine.high %v19328_v1, %v19328_v1  ;;  %v19346_v2 = vrot.slane %v14122_v9, %v17250_v26  ;;  %v9841_v16 = vsel %vm6784_vm10, %v9840_v48, %v9839_v32  ;;  %v8643_v51 = vcombine.high %v14123_v31, %v14123_v31 }
 0x403   : > { %v19350_v60 = vrot.slane %v14123_v31, %v17250_v26  ;;  %v9084_v57 = vrot.slane %v19311_v22, %v17250_v26  ;;  %v9926_v41 = vpack.c.b16 %v9841_v16, %v9827_v12  ;;  %v19355_v55 = vrot.slane %v8619_v62, %v17250_v26 }
 0x404   : > { %v19359_v30 = vcombine.high %v19346_v2, %v19346_v2  ;;  %v9098_v9 = vrot.slane %v19316_v40, %v17250_v26  ;;  %v19364_v48 = vrot.slane %v8643_v51, %v17250_v26  ;;  %v9112_v13 = vrot.slane %v19325_v7, %v17250_v26 }
 0x405   : > { %v19368_v23 = vcombine.high %v19350_v60, %v19350_v60  ;;  %v9091_v3 = vrot.slane %v9084_v57, %v17250_v26  ;;  %14863 = vmatprep.mubr.msk.bf16.mxu1 %vm6888_vm15, %v9926_v41  ;;  %v19376_v53 = vcombine.high %v19355_v55, %v19355_v55  ;;  %v9126_v12 = vrot.slane %v19334_v5, %v17250_v26 }
 0x406   : > { %v19379_v31 = vrot.slane %v9098_v9, %v17250_v26  ;;  %v9140_v29 = vrot.slane %v19319_v11, %v17250_v26  ;;  %v19387_v32 = vcombine.high %v19364_v48, %v19364_v48  ;;  %v19390_v62 = vrot.slane %v9112_v13, %v17250_v26 }
 0x407   : > { %v9154_v16 = vrot.slane %v19328_v1, %v17250_v26  ;;  %v9168_v51 = vrot.slane %v19338_v44, %v17250_v26  ;;  %v19397_v57 = vrot.slane %v9126_v12, %v17250_v26  ;;  %v9182_v9 = vrot.slane %v19343_v4, %v17250_v26 }
 0x408   : > { %21757 = vst [vmem:[#allocation10_spill] sm:$0xff] %v19379_v31  ;;  %21758 = vst [vmem:[#allocation19_spill] sm:$0xff] %v19387_v32  ;;  %v19400_v41 = vrot.slane %v9140_v29, %v17250_v26  ;;  %v9196_v18 = vrot.slane %v19346_v2, %v17250_v26  ;;  %v9210_v14 = vrot.slane %v19355_v55, %v17250_v26  ;;  %v21772_v50 = vunpack.c.l.b16 %v19379_v31 }
 0x409   : > { %21759 = vst [vmem:[#allocation27_spill] sm:$0xff] %v19390_v62  ;;  %21760 = vst [vmem:[#allocation29_spill] sm:$0xff] %v19397_v57  ;;  %v19407_v13 = vrot.slane %v9154_v16, %v17250_v26  ;;  %v19410_v42 = vrot.slane %v9168_v51, %v17250_v26  ;;  %v9224_v12 = vrot.slane %v19359_v30, %v17250_v26 }
 0x40a   : > { %21761 = vst [vmem:[#allocation8_spill] sm:$0xff] %v19400_v41  ;;  %v19417_v29 = vrot.slane %v9182_v9, %v17250_v26  ;;  %v9203_v59 = vrot.slane %v9196_v18, %v17250_v26  ;;  %v9238_v17 = vrot.slane %v19376_v53, %v17250_v26  ;;  %v9252_v16 = vrot.slane %v19350_v60, %v17250_v26 }
 0x40b   : > { %21762 = vst [vmem:[#allocation54_spill] sm:$0xff] %v19407_v13  ;;  %21763 = vst [vmem:[#allocation55_spill] sm:$0xff] %v19410_v42  ;;  %v19425_v51 = vrot.slane %v9210_v14, %v17250_v26  ;;  %v19428_v24 = vrot.slane %v9224_v12, %v17250_v26  ;;  %v9266_v36 = vrot.slane %v19364_v48, %v17250_v26  ;;  %v9766_v14 = vunpack.c.l.b16 %v9091_v3 }
 0x40c   : > { %21764 = vst [vmem:[#allocation31_spill] sm:$0xff] %v19417_v29  ;;  %v9280_v9 = vrot.slane %v19368_v23, %v17250_v26  ;;  %v19435_v18 = vrot.slane %v9238_v17, %v17250_v26  ;;  %v19438_v37 = vrot.slane %v9252_v16, %v17250_v26  ;;  %v9294_v25 = vrot.slane %v19387_v32, %v17250_v26 }
 0x40d   : > { %21765 = vst [vmem:[#allocation35_spill] sm:$0xff] %v19425_v51  ;;  %21766 = vst [vmem:[#allocation32_spill] sm:$0xff] %v19428_v24  ;;  %v19443_v61 = vrot.slane %v9266_v36, %v17250_v26  ;;  %v9774_v33 = vunpack.c.l.b16 %v9203_v59  ;;  %v9842_v3 = vrot.slane %v21772_v50, 7  ;;  %v21773_v36 = vunpack.c.l.b16 %v19390_v62 }
 0x40e   : > { %21767 = vst [vmem:[#allocation30_spill] sm:$0xff] %v19435_v18  ;;  %21768 = vst [vmem:[#allocation37_spill] sm:$0xff] %v19438_v37  ;;  %v19446_v12 = vrot.slane %v9280_v9, %v17250_v26  ;;  %v19451_v17 = vrot.slane %v9294_v25, %v17250_v26  ;;  %v21774_v9 = vunpack.c.l.b16 %v19397_v57  ;;  %v21775_v27 = vunpack.c.l.b16 %v19400_v41 }
 0x40f   : > { %21769 = vst [vmem:[#allocation38_spill] sm:$0xff] %v19443_v61  ;;  %v9844_v59 = vrot.slane %v21773_v36, 6  ;;  %v21776_v25 = vunpack.c.l.b16 %v19407_v13  ;;  %v21777_v16 = vunpack.c.l.b16 %v19410_v42  ;;  %v9843_v31 = vsel %vm6766_vm13, %v9842_v3, %v9766_v14 }
 0x410   : > { %21770 = vst [vmem:[#allocation43_spill] sm:$0xff] %v19446_v12  ;;  %21771 = vst [vmem:[#allocation44_spill] sm:$0xff] %v19451_v17  ;;  %v9846_v6 = vrot.slane %v21774_v9, 5  ;;  %v9848_v47 = vrot.slane %v21775_v27, 4  ;;  %v21778_v50 = vunpack.c.l.b16 %v19417_v29  ;;  %v21779_v36 = vunpack.c.l.b16 %v19425_v51 }
 0x411   : > { %v9850_v35 = vrot.slane %v21776_v25, 3  ;;  %v9852_v20 = vrot.slane %v21777_v16, 2  ;;  %v21780_v9 = vunpack.c.l.b16 %v19428_v24  ;;  %v9845_v27 = vsel %vm6769_vm3, %v9844_v59, %v9843_v31 }
 0x412   : > { %v9854_v62 = vrot.slane %v21778_v50, 1  ;;  %v9856_v32 = vrot.slane %v21779_v36, 7  ;;  %v21781_v13 = vunpack.c.l.b16 %v19435_v18  ;;  %v21782_v42 = vunpack.c.l.b16 %v19438_v37 }
 0x413   : > { %v9858_v57 = vrot.slane %v21780_v9, 6  ;;  %v21783_v41 = vunpack.c.l.b16 %v19443_v61  ;;  %v9847_v3 = vsel %vm6772_vm11, %v9846_v6, %v9845_v27  ;;  %v21784_v36 = vunpack.c.l.b16 %v19446_v12  ;;  %v14126_v27 = vld.sshfl [vmem:[#allocation3 + $0x84] sm:$0x33 pattern:$0x75316420] }
 0x414   : > { %v9860_v25 = vrot.slane %v21781_v13, 5  ;;  %v9862_v16 = vrot.slane %v21782_v42, 4  ;;  %v9857_v50 = vsel %vm6766_vm13, %v9856_v32, %v9774_v33  ;;  %v21785_v9 = vunpack.c.l.b16 %v19451_v17 }
 0x415   : > { %v9864_v14 = vrot.slane %v21783_v41, 3  ;;  %v9866_v51 = vrot.slane %v21784_v36, 2  ;;  %v9849_v31 = vsel %vm6775_vm4, %v9848_v47, %v9847_v3  ;;  %v9859_v13 = vsel %vm6769_vm3, %v9858_v57, %v9857_v50  ;;  %v14127_v47 = vld.sshfl [vmem:[#allocation3 + $0x88] sm:$0x33 pattern:$0x75316420] }
 0x416   : > { %v9868_v24 = vrot.slane %v21785_v9, 1  ;;  %v11749_v42 = vsel %vm6901_vm7, %v19046_v38, 0  ;;  %v8667_v59 = vcombine.high %v14124_v10, %v14124_v10  ;;  %v9851_v41 = vsel %vm6778_vm8, %v9850_v35, %v9849_v31 }
 0x417   : > { %v9861_v6 = vsel %vm6772_vm11, %v9860_v25, %v9859_v13  ;;  %v19504_v33 = vrot.slane %v14124_v10, %v17250_v26  ;;  %v8691_v32 = vcombine.high %v14125_v21, %v14125_v21  ;;  %v9853_v36 = vsel %vm6781_vm1, %v9852_v20, %v9851_v41 }
 0x418   : > { %v9863_v9 = vsel %vm6775_vm4, %v9862_v16, %v9861_v6  ;;  %v19509_v57 = vrot.slane %v8667_v59, %v17250_v26  ;;  %v19512_v38 = vrot.slane %v14125_v21, %v17250_v26  ;;  %v9855_v35 = vsel %vm6784_vm10, %v9854_v62, %v9853_v36 }
 0x419   : > { %21786 = vst [vmem:[#allocation40_spill] sm:$0xff] %v19504_v33  ;;  %v9865_v25 = vsel %vm6778_vm8, %v9864_v14, %v9863_v9  ;;  %v19518_v10 = vcombine.high %v19504_v33, %v19504_v33  ;;  %v19521_v3 = vrot.slane %v8691_v32, %v17250_v26  ;;  %v8715_v62 = vcombine.high %v14126_v27, %v14126_v27  ;;  %v19562_v9 = vld [vmem:[%s21110_s7 + $0x14] sm:$0xf] }
 0x41a   : > { %21787 = vst [vmem:[#allocation60_spill] sm:$0xff] %v19509_v57  ;;  %21788 = vst [vmem:[#allocation61_spill] sm:$0xff] %v19512_v38  ;;  %v9867_v20 = vsel %vm6781_vm1, %v9866_v51, %v9865_v25  ;;  %v19526_v16 = vcombine.high %v19509_v57, %v19509_v57  ;;  %v19530_v21 = vcombine.high %v19512_v38, %v19512_v38 }
 0x41b   : > { %21789 = vst [vmem:[#allocation62_spill] sm:$0xff] %v19518_v10  ;;  %21790 = vst [vmem:[#allocation63_spill] sm:$0xff] %v19521_v3  ;;  %v9869_v14 = vsel %vm6784_vm10, %v9868_v24, %v9867_v20  ;;  %v19535_v50 = vcombine.high %v19521_v3, %v19521_v3  ;;  %v19538_v31 = vrot.slane %v14126_v27, %v17250_v26 }
 0x41c   : > { %21791 = vst [vmem:[#allocation64_spill] sm:$0xff] %v19526_v16  ;;  %21792 = vst [vmem:[#allocation65_spill] sm:$0xff] %v19530_v21  ;;  %v8739_v13 = vcombine.high %v14127_v47, %v14127_v47  ;;  %v9927_v51 = vpack.c.b16 %v9869_v14, %v9855_v35  ;;  %v19541_v59 = vrot.slane %v8715_v62, %v17250_v26 }
 0x41d   : > { %21793 = vst [vmem:[#allocation66_spill] sm:$0xff] %v19535_v50  ;;  %21794 = vst [vmem:[#allocation67_spill] sm:$0xff] %v19538_v31  ;;  %v19544_v41 = vrot.slane %v14127_v47, %v17250_v26  ;;  %v9308_v6 = vrot.slane %v19504_v33, %v17250_v26  ;;  %v19550_v24 = vcombine.high %v19538_v31, %v19538_v31 }
 0x41e   : > { %21795 = vst [vmem:[#allocation68_spill] sm:$0xff] %v19541_v59  ;;  %v19553_v32 = vrot.slane %v8739_v13, %v17250_v26  ;;  %v9322_v27 = vrot.slane %v19509_v57, %v17250_v26  ;;  %v9336_v36 = vrot.slane %v19518_v10, %v17250_v26  ;;  %14864 = vmatmul.mubr.msk.bf16.vlgmr.msra.gmra.mrb[32].mxu1 %vm6888_vm15, %v9927_v51 }
 0x41f   : > { %21796 = vst [vmem:[#allocation69_spill] sm:$0xff] %v19544_v41  ;;  %21797 = vst [vmem:[#allocation70_spill] sm:$0xff] %v19550_v24  ;;  %v19567_v47 = vcombine.high %v19541_v59, %v19541_v59  ;;  %v19571_v35 = vcombine.high %v19544_v41, %v19544_v41  ;;  %v9315_v25 = vrot.slane %v9308_v6, %v17250_v26  ;;  %14872 = vmatpush3.bf16.msra.mxu1 %v11749_v42 }
 0x420   : > { %21798 = vst [vmem:[#allocation71_spill] sm:$0xff] %v19553_v32  ;;  %v9350_v20 = vrot.slane %v19526_v16, %v17250_v26  ;;  %v19578_v62 = vcombine.high %v19553_v32, %v19553_v32  ;;  %v19581_v14 = vrot.slane %v9322_v27, %v17250_v26  ;;  %v19584_v13 = vrot.slane %v9336_v36, %v17250_v26 }
 0x421   : > { %21799 = vst [vmem:[#allocation72_spill] sm:$0xff] %v19567_v47  ;;  %21800 = vst [vmem:[#allocation73_spill] sm:$0xff] %v19571_v35  ;;  %v9364_v51 = vrot.slane %v19512_v38, %v17250_v26  ;;  %v9378_v6 = vrot.slane %v19521_v3, %v17250_v26  ;;  %v9392_v42 = vrot.slane %v19530_v21, %v17250_v26  ;;  %15292 = vmatprep.subr.msk.bf16.mxu1 %vm6901_vm7, %v19562_v9 }
 0x422   : > { %21801 = vst [vmem:[#allocation74_spill] sm:$0xff] %v19578_v62  ;;  %21802 = vst [vmem:[#allocation75_spill] sm:$0xff] %v19581_v14  ;;  %v19589_v17 = vrot.slane %v9350_v20, %v17250_v26  ;;  %v9406_v12 = vrot.slane %v19535_v50, %v17250_v26  ;;  %v9420_v36 = vrot.slane %v19538_v31, %v17250_v26 }
 0x423   : > { %21803 = vst [vmem:[#allocation76_spill] sm:$0xff] %v19584_v13  ;;  %v19600_v27 = vrot.slane %v9364_v51, %v17250_v26  ;;  %v9434_v20 = vrot.slane %v19541_v59, %v17250_v26  ;;  %v9448_v61 = vrot.slane %v19550_v24, %v17250_v26  ;;  %v19609_v37 = vrot.slane %v9378_v6, %v17250_v26 }
 0x424   : > { %21804 = vst [vmem:[#allocation77_spill] sm:$0xff] %v19589_v17  ;;  %v19612_v18 = vrot.slane %v9392_v42, %v17250_v26  ;;  %v19615_v29 = vrot.slane %v9406_v12, %v17250_v26  ;;  %v9462_v51 = vrot.slane %v19567_v47, %v17250_v26  ;;  %v9427_v31 = vrot.slane %v9420_v36, %v17250_v26 }
 0x425   : > { %21805 = vst [vmem:[#allocation78_spill] sm:$0xff] %v19600_v27  ;;  %21806 = vst [vmem:[#allocation79_spill] sm:$0xff] %v19609_v37  ;;  %v19621_v50 = vrot.slane %v9434_v20, %v17250_v26  ;;  %v19624_v59 = vrot.slane %v9448_v61, %v17250_v26  ;;  %v9476_v6 = vrot.slane %v19544_v41, %v17250_v26  ;;  %v9782_v61 = vunpack.c.l.b16 %v9315_v25 }
 0x426   : > { %21807 = vst [vmem:[#allocation80_spill] sm:$0xff] %v19612_v18  ;;  %21808 = vst [vmem:[#allocation81_spill] sm:$0xff] %v19615_v29  ;;  %v19629_v42 = vrot.slane %v9462_v51, %v17250_v26  ;;  %v9490_v12 = vrot.slane %v19553_v32, %v17250_v26  ;;  %v9504_v47 = vrot.slane %v19571_v35, %v17250_v26  ;;  %v9790_v41 = vunpack.c.l.b16 %v9427_v31 }
 0x427   : > { %21809 = vst [vmem:[#allocation82_spill] sm:$0xff] %v19621_v50  ;;  %21810 = vst [vmem:[#allocation83_spill] sm:$0xff] %v19624_v59  ;;  %v9518_v36 = vrot.slane %v19578_v62, %v17250_v26  ;;  %v19638_v20 = vrot.slane %v9476_v6, %v17250_v26  ;;  %v14128_v6 = vld.sshfl [vmem:[#allocation3 + $0x9c] sm:$0x33 pattern:$0x75316420]  ;;  %v21816_v25 = vunpack.c.l.b16 %v19581_v14  ;;  %v21817_v31 = vunpack.c.l.b16 %v19584_v13 }
 0x428   : > { %21811 = vst [vmem:[#allocation84_spill] sm:$0xff] %v19629_v42  ;;  %v19643_v51 = vrot.slane %v9490_v12, %v17250_v26  ;;  %v19646_v21 = vrot.slane %v9504_v47, %v17250_v26  ;;  %v21818_v12 = vunpack.c.l.b16 %v19589_v17  ;;  %v21819_v47 = vunpack.c.l.b16 %v19600_v27 }
 0x429   : > { %21812 = vst [vmem:[#allocation85_spill] sm:$0xff] %v19638_v20  ;;  %v19649_v32 = vrot.slane %v9518_v36, %v17250_v26  ;;  %v9870_v16 = vrot.slane %v21816_v25, 7  ;;  %v9872_v24 = vrot.slane %v21817_v31, 6  ;;  %v21820_v38 = vunpack.c.l.b16 %v19609_v37 }
 0x42a   : > { %21813 = vst [vmem:[#allocation86_spill] sm:$0xff] %v19643_v51  ;;  %21814 = vst [vmem:[#allocation87_spill] sm:$0xff] %v19646_v21  ;;  %v9874_v3 = vrot.slane %v21818_v12, 5  ;;  %v9876_v10 = vrot.slane %v21819_v47, 4  ;;  %v21821_v35 = vunpack.c.l.b16 %v19612_v18  ;;  %v21822_v33 = vunpack.c.l.b16 %v19615_v29 }
 0x42b   : > { %21815 = vst [vmem:[#allocation88_spill] sm:$0xff] %v19649_v32  ;;  %v14129_v36 = vld.sshfl [vmem:[#allocation3 + $0xa0] sm:$0x33 pattern:$0x75316420]  ;;  %v9878_v57 = vrot.slane %v21820_v38, 3  ;;  %v21823_v25 = vunpack.c.l.b16 %v19621_v50  ;;  %v9871_v31 = vsel %vm6766_vm13, %v9870_v16, %v9782_v61  ;;  %v21824_v12 = vunpack.c.l.b16 %v19624_v59 }
 0x42c   : > { %v9880_v62 = vrot.slane %v21821_v35, 2  ;;  %v9882_v14 = vrot.slane %v21822_v33, 1  ;;  %v21825_v47 = vunpack.c.l.b16 %v19629_v42  ;;  %v21826_v37 = vunpack.c.l.b16 %v19638_v20 }
 0x42d   : > { %v9884_v13 = vrot.slane %v21823_v25, 7  ;;  %v9886_v17 = vrot.slane %v21824_v12, 6  ;;  %v9873_v18 = vsel %vm6769_vm3, %v9872_v24, %v9871_v31  ;;  %v21827_v33 = vunpack.c.l.b16 %v19643_v51 }
 0x42e   : > { %v9888_v27 = vrot.slane %v21825_v47, 5  ;;  %v9890_v38 = vrot.slane %v21826_v37, 4  ;;  %v21828_v25 = vunpack.c.l.b16 %v19646_v21  ;;  %v9875_v16 = vsel %vm6772_vm11, %v9874_v3, %v9873_v18 }
 0x42f   : > { %v9885_v35 = vsel %vm6766_vm13, %v9884_v13, %v9790_v41  ;;  %v9892_v29 = vrot.slane %v21827_v33, 3  ;;  %v21829_v12 = vunpack.c.l.b16 %v19649_v32  ;;  %v8763_v42 = vcombine.high %v14128_v6, %v14128_v6 }
 0x430   : > { %v9894_v50 = vrot.slane %v21828_v25, 2  ;;  %v9887_v61 = vsel %vm6769_vm3, %v9886_v17, %v9885_v35  ;;  %v9877_v37 = vsel %vm6775_vm4, %v9876_v10, %v9875_v16  ;;  %v19699_v41 = vrot.slane %v14128_v6, %v17250_v26  ;;  %v14130_v25 = vld.sshfl [vmem:[#allocation3 + $0xb4] sm:$0x33 pattern:$0x75316420] }
 0x431   : > { %v9896_v47 = vrot.slane %v21829_v12, 1  ;;  %v9889_v24 = vsel %vm6772_vm11, %v9888_v27, %v9887_v61  ;;  %v8787_v13 = vcombine.high %v14129_v36, %v14129_v36  ;;  %v9879_v31 = vsel %vm6778_vm8, %v9878_v57, %v9877_v37  ;;  %v14131_v27 = vld.sshfl [vmem:[#allocation3 + $0xb8] sm:$0x33 pattern:$0x75316420] }
 0x432   : > { %21830 = vst [vmem:[#allocation89_spill] sm:$0xff] %v19699_v41  ;;  %v9891_v33 = vsel %vm6775_vm4, %v9890_v38, %v9889_v24  ;;  %v19704_v18 = vrot.slane %v8763_v42, %v17250_v26  ;;  %v19707_v17 = vrot.slane %v14129_v36, %v17250_v26  ;;  %v9881_v3 = vsel %vm6781_vm1, %v9880_v62, %v9879_v31 }
 0x433   : > { %v9893_v10 = vsel %vm6778_vm8, %v9892_v29, %v9891_v33  ;;  %v19713_v6 = vcombine.high %v19699_v41, %v19699_v41  ;;  %v19716_v57 = vrot.slane %v8787_v13, %v17250_v26  ;;  %v9883_v38 = vsel %vm6784_vm10, %v9882_v14, %v9881_v3 }
 0x434   : > { %21831 = vst [vmem:[#allocation90_spill] sm:$0xff] %v19704_v18  ;;  %21832 = vst [vmem:[#allocation91_spill] sm:$0xff] %v19707_v17  ;;  %v9895_v42 = vsel %vm6781_vm1, %v9894_v50, %v9893_v10  ;;  %v19722_v36 = vcombine.high %v19704_v18, %v19704_v18  ;;  %v19726_v62 = vcombine.high %v19707_v17, %v19707_v17 }
 0x435   : > { %21833 = vst [vmem:[#allocation92_spill] sm:$0xff] %v19713_v6  ;;  %21834 = vst [vmem:[#allocation93_spill] sm:$0xff] %v19716_v57  ;;  %v9897_v29 = vsel %vm6784_vm10, %v9896_v47, %v9895_v42  ;;  %v19731_v35 = vcombine.high %v19716_v57, %v19716_v57  ;;  %v8811_v16 = vcombine.high %v14130_v25, %v14130_v25 }
 0x436   : > { %21835 = vst [vmem:[#allocation94_spill] sm:$0xff] %v19722_v36  ;;  %21836 = vst [vmem:[#allocation95_spill] sm:$0xff] %v19726_v62  ;;  %v19734_v61 = vrot.slane %v14130_v25, %v17250_v26  ;;  %v9928_v14 = vpack.c.b16 %v9897_v29, %v9883_v38  ;;  %v8835_v50 = vcombine.high %v14131_v27, %v14131_v27 }
 0x437   : > { %21837 = vst [vmem:[#allocation96_spill] sm:$0xff] %v19731_v35  ;;  %v19737_v12 = vrot.slane %v14131_v27, %v17250_v26  ;;  %v9532_v37 = vrot.slane %v19699_v41, %v17250_v26  ;;  %v19742_v24 = vrot.slane %v8811_v16, %v17250_v26  ;;  %v9546_v13 = vrot.slane %v19704_v18, %v17250_v26 }
 0x438   : > { %21838 = vst [vmem:[#allocation97_spill] sm:$0xff] %v19734_v61  ;;  %v19746_v47 = vcombine.high %v19734_v61, %v19734_v61  ;;  %v9560_v31 = vrot.slane %v19713_v6, %v17250_v26  ;;  %14867 = vmatprep.mubr.msk.bf16.mxu1 %vm6888_vm15, %v9928_v14  ;;  %v19754_v33 = vrot.slane %v8835_v50, %v17250_v26  ;;  %v14138_v6 = vld.sshfl [vmem:[#allocation3 + $0x2c] sm:$0x1 pattern:$0x75316420] }
 0x439   : > { %21839 = vst [vmem:[#allocation98_spill] sm:$0xff] %v19737_v12  ;;  %21840 = vst [vmem:[#allocation99_spill] sm:$0xff] %v19742_v24  ;;  %v19758_v25 = vcombine.high %v19737_v12, %v19737_v12  ;;  %v9539_v3 = vrot.slane %v9532_v37, %v17250_v26  ;;  %v9574_v10 = vrot.slane %v19722_v36, %v17250_v26 }
 0x43a   : > { %21841 = vst [vmem:[#allocation100_spill] sm:$0xff] %v19746_v47  ;;  %21842 = vst [vmem:[#allocation101_spill] sm:$0xff] %v19754_v33  ;;  %v19765_v27 = vcombine.high %v19742_v24, %v19742_v24  ;;  %v19768_v38 = vrot.slane %v9546_v13, %v17250_v26  ;;  %v19771_v42 = vrot.slane %v9560_v31, %v17250_v26 }
 0x43b   : > { %21843 = vst [vmem:[#allocation102_spill] sm:$0xff] %v19758_v25  ;;  %v9588_v29 = vrot.slane %v19707_v17, %v17250_v26  ;;  %v19777_v16 = vcombine.high %v19754_v33, %v19754_v33  ;;  %v19780_v14 = vrot.slane %v9574_v10, %v17250_v26  ;;  %v9602_v50 = vrot.slane %v19716_v57, %v17250_v26 }
 0x43c   : > { %21844 = vst [vmem:[#allocation103_spill] sm:$0xff] %v19765_v27  ;;  %21845 = vst [vmem:[#allocation104_spill] sm:$0xff] %v19768_v38  ;;  %v9616_v37 = vrot.slane %v19726_v62, %v17250_v26  ;;  %v9630_v31 = vrot.slane %v19731_v35, %v17250_v26  ;;  %v9644_v32 = vrot.slane %v19734_v61, %v17250_v26 }
 0x43d   : > { %21846 = vst [vmem:[#allocation105_spill] sm:$0xff] %v19771_v42  ;;  %21847 = vst [vmem:[#allocation106_spill] sm:$0xff] %v19777_v16  ;;  %v19787_v13 = vrot.slane %v9588_v29, %v17250_v26  ;;  %v9658_v21 = vrot.slane %v19742_v24, %v17250_v26  ;;  %v19796_v10 = vrot.slane %v9602_v50, %v17250_v26  ;;  %v21856_v57 = vunpack.c.l.b16 %v19780_v14 }
 0x43e   : > { %21848 = vst [vmem:[#allocation107_spill] sm:$0xff] %v19780_v14  ;;  %v19799_v51 = vrot.slane %v9616_v37, %v17250_v26  ;;  %v9672_v20 = vrot.slane %v19746_v47, %v17250_v26  ;;  %v9686_v29 = vrot.slane %v19765_v27, %v17250_v26  ;;  %v19806_v59 = vrot.slane %v9630_v31, %v17250_v26 }
 0x43f   : > { %21849 = vst [vmem:[#allocation108_spill] sm:$0xff] %v19787_v13  ;;  %21850 = vst [vmem:[#allocation109_spill] sm:$0xff] %v19796_v10  ;;  %v9651_v61 = vrot.slane %v9644_v32, %v17250_v26  ;;  %v19810_v35 = vrot.slane %v9658_v21, %v17250_v26  ;;  %v9700_v50 = vrot.slane %v19737_v12, %v17250_v26  ;;  %v9798_v47 = vunpack.c.l.b16 %v9539_v3 }
 0x440   : > { %21851 = vst [vmem:[#allocation110_spill] sm:$0xff] %v19799_v51  ;;  %21852 = vst [vmem:[#allocation111_spill] sm:$0xff] %v19806_v59  ;;  %v19815_v37 = vrot.slane %v9672_v20, %v17250_v26  ;;  %v19818_v24 = vrot.slane %v9686_v29, %v17250_v26  ;;  %v9714_v27 = vrot.slane %v19754_v33, %v17250_v26  ;;  %v21854_v3 = vunpack.c.l.b16 %v19768_v38 }
 0x441   : > { %21853 = vst [vmem:[#allocation112_spill] sm:$0xff] %v19810_v35  ;;  %v9728_v31 = vrot.slane %v19758_v25, %v17250_v26  ;;  %v19825_v32 = vrot.slane %v9700_v50, %v17250_v26  ;;  %v9742_v21 = vrot.slane %v19777_v16, %v17250_v26  ;;  %v14137_v50 = vld.sshfl [vmem:[#allocation3 + $0x14] sm:$0x1 pattern:$0x75316420]  ;;  %v21857_v33 = vunpack.c.l.b16 %v19787_v13 }
 0x442   : > { %v19831_v20 = vrot.slane %v9714_v27, %v17250_v26  ;;  %v9806_v27 = vunpack.c.l.b16 %v9651_v61  ;;  %v9898_v36 = vrot.slane %v21854_v3, 7  ;;  %v21855_v61 = vunpack.c.l.b16 %v19771_v42 }
 0x443   : > { %v19834_v29 = vrot.slane %v9728_v31, %v17250_v26  ;;  %v19839_v25 = vrot.slane %v9742_v21, %v17250_v26  ;;  %v9902_v31 = vrot.slane %v21856_v57, 5  ;;  %v9904_v62 = vrot.slane %v21857_v33, 4 }
 0x444   : > { %v9900_v12 = vrot.slane %v21855_v61, 6  ;;  %v21858_v21 = vunpack.c.l.b16 %v19796_v10  ;;  %v21859_v17 = vunpack.c.l.b16 %v19799_v51  ;;  %v21860_v16 = vunpack.c.l.b16 %v19806_v59 }
 0x445   : > { %v9899_v3 = vsel %vm6766_vm13, %v9898_v36, %v9798_v47  ;;  %v21861_v61 = vunpack.c.l.b16 %v19810_v35  ;;  %v21862_v57 = vunpack.c.l.b16 %v19815_v37  ;;  %v21863_v13 = vunpack.c.l.b16 %v19818_v24 }
 0x446   : > { %v9906_v18 = vrot.slane %v21858_v21, 3  ;;  %v9908_v41 = vrot.slane %v21859_v17, 2  ;;  %v9910_v38 = vrot.slane %v21860_v16, 1  ;;  %v9901_v10 = vsel %vm6769_vm3, %v9900_v12, %v9899_v3 }
 0x447   : > { %v9912_v42 = vrot.slane %v21861_v61, 7  ;;  %v9914_v14 = vrot.slane %v21862_v57, 6  ;;  %v9916_v33 = vrot.slane %v21863_v13, 5  ;;  %v21864_v21 = vunpack.c.l.b16 %v19825_v32 }
 0x448   : > { %v21865_v17 = vunpack.c.l.b16 %v19831_v20  ;;  %v21866_v16 = vunpack.c.l.b16 %v19834_v29  ;;  %v9903_v47 = vsel %vm6772_vm11, %v9902_v31, %v9901_v10  ;;  %v21867_v57 = vunpack.c.l.b16 %v19839_v25 }
 0x449   : > { %v9918_v51 = vrot.slane %v21864_v21, 4  ;;  %v9913_v61 = vsel %vm6766_vm13, %v9912_v42, %v9806_v27  ;;  %v19885_v13 = vrot.slane %v14137_v50, %v17250_v26  ;;  %v9905_v12 = vsel %vm6775_vm4, %v9904_v62, %v9903_v47 }
 0x44a   : > { %v9920_v59 = vrot.slane %v21865_v17, 3  ;;  %v9922_v36 = vrot.slane %v21866_v16, 2  ;;  %v9924_v35 = vrot.slane %v21867_v57, 1  ;;  %v9915_v3 = vsel %vm6769_vm3, %v9914_v14, %v9913_v61 }
 0x44b   : > { %v19890_v21 = vrot.slane %v14138_v6, %v17250_v26  ;;  %v10139_v17 = vshrl.u32 %v19122_v54, 16  ;;  %v9907_v16 = vsel %vm6778_vm8, %v9906_v18, %v9905_v12  ;;  %v9917_v10 = vsel %vm6772_vm11, %v9916_v33, %v9915_v3 }
 0x44c   : > { %v10144_v42 = vshll.u32 %v19129_v58, 16  ;;  %v10147_v27 = vshrl.u32 %v19129_v58, 16  ;;  %v9909_v50 = vsel %vm6781_vm1, %v9908_v41, %v9907_v16  ;;  %v9919_v31 = vsel %vm6775_vm4, %v9918_v51, %v9917_v10 }
 0x44d   : > { %v10152_v62 = vshll.u32 %v19137_v28, 16  ;;  %v10155_v14 = vshrl.u32 %v19137_v28, 16  ;;  %v9911_v6 = vsel %vm6784_vm10, %v9910_v38, %v9909_v50  ;;  %v9921_v54 = vsel %vm6778_vm8, %v9920_v59, %v9919_v31 }
 0x44e   : > { %v10146_v18 = vsel %vm17272_vm14, %v10139_v17, %v10144_v42  ;;  %v10160_v33 = vshll.u32 %v19149_v63, 16  ;;  %v9923_v61 = vsel %vm6781_vm1, %v9922_v36, %v9921_v54  ;;  %v10163_v51 = vshrl.u32 %v19149_v63, 16 }
 0x44f   : > { %v10154_v58 = vsel %vm17272_vm14, %v10147_v27, %v10152_v62  ;;  %v10168_v41 = vshll.u32 %v19125_v0, 16  ;;  %v9925_v28 = vsel %vm6784_vm10, %v9924_v35, %v9923_v61  ;;  %v10171_v59 = vshrl.u32 %v19125_v0, 16 }
 0x450   : > { %v10162_v38 = vsel %vm17272_vm14, %v10155_v14, %v10160_v33  ;;  %v10176_v57 = vshll.u32 %v19140_v45, 16  ;;  %v9929_v12 = vpack.c.b16 %v9925_v28, %v9911_v6  ;;  %v10179_v3 = vshrl.u32 %v19140_v45, 16 }
 0x451   : > { %v10170_v36 = vsel %vm17272_vm14, %v10163_v51, %v10168_v41  ;;  %v10184_v17 = vshll.u32 %v19144_v8, 16  ;;  %v10187_v35 = vshrl.u32 %v19144_v8, 16  ;;  %v10192_v16 = vshll.u32 %v19163_v19, 16 }
 0x452   : > { %v10178_v63 = vsel %vm17272_vm14, %v10171_v59, %v10176_v57  ;;  %v10195_v10 = vshrl.u32 %v19163_v19, 16  ;;  %14868 = vmatmul.mubr.msk.bf16.gmra.mrb[36].mxu1 %vm6888_vm15, %v9929_v12  ;;  %v10200_v42 = vshll.u32 %v19885_v13, 16  ;;  %v10204_v45 = vshrl.u32 %v19132_v56, 16 }
 0x453   : > { %v10186_v0 = vsel %vm17272_vm14, %v10179_v3, %v10184_v17  ;;  %v10209_v27 = vshll.u32 %v19152_v15, 16  ;;  %v10194_v50 = vsel %vm17272_vm14, %v10187_v35, %v10192_v16  ;;  %v10212_v8 = vshrl.u32 %v19152_v15, 16 }
 0x454   : > { %v10217_v31 = vshll.u32 %v19156_v52, 16  ;;  %v10220_v19 = vshrl.u32 %v19156_v52, 16  ;;  %v10202_v62 = vsel %vm17272_vm14, %v10195_v10, %v10200_v42  ;;  %v10225_v6 = vshll.u32 %v19172_v34, 16 }
 0x455   : > { %v10211_v14 = vsel %vm17272_vm14, %v10204_v45, %v10209_v27  ;;  %v10228_v56 = vshrl.u32 %v19172_v34, 16  ;;  %v10233_v33 = vshll.u32 %v19166_v39, 16  ;;  %v10236_v15 = vshrl.u32 %v19166_v39, 16 }
 0x456   : > { %v10219_v54 = vsel %vm17272_vm14, %v10212_v8, %v10217_v31  ;;  %v10241_v61 = vshll.u32 %v19179_v49, 16  ;;  %v10227_v52 = vsel %vm17272_vm14, %v10220_v19, %v10225_v6  ;;  %v10244_v51 = vshrl.u32 %v19179_v49, 16 }
 0x457   : > { %v10249_v41 = vshll.u32 %v19183_v46, 16  ;;  %v10252_v28 = vshrl.u32 %v19183_v46, 16  ;;  %v10235_v34 = vsel %vm17272_vm14, %v10228_v56, %v10233_v33  ;;  %v10257_v57 = vshll.u32 %v19200_v43, 16 }
 0x458   : > { %v10243_v59 = vsel %vm17272_vm14, %v10236_v15, %v10241_v61  ;;  %v10260_v39 = vshrl.u32 %v19200_v43, 16  ;;  %v10265_v3 = vshll.u32 %v19890_v21, 16  ;;  %v10666_v49 = vrot.slane %v10146_v18, %v17250_v26 }
 0x459   : > { %v10251_v12 = vsel %vm17272_vm14, %v10244_v51, %v10249_v41  ;;  %v10680_v17 = vrot.slane %v10154_v58, %v17250_v26  ;;  %v10259_v46 = vsel %vm17272_vm14, %v10252_v28, %v10257_v57  ;;  %v10694_v35 = vrot.slane %v10162_v38, %v17250_v26 }
 0x45a   : > { %v10708_v16 = vrot.slane %v10170_v36, %v17250_v26  ;;  %v10722_v10 = vrot.slane %v10178_v63, %v17250_v26  ;;  %v10267_v43 = vsel %vm17272_vm14, %v10260_v39, %v10265_v3  ;;  %v10673_v42 = vrot.slane %v10666_v49, %v17250_v26 }
 0x45b   : > { %v10687_v45 = vrot.slane %v10680_v17, %v17250_v26  ;;  %v10736_v18 = vrot.slane %v10186_v0, %v17250_v26  ;;  %v10701_v58 = vrot.slane %v10694_v35, %v17250_v26  ;;  %v10750_v38 = vrot.slane %v10194_v50, %v17250_v26 }
 0x45c   : > { %v10715_v27 = vrot.slane %v10708_v16, %v17250_v26  ;;  %v10729_v8 = vrot.slane %v10722_v10, %v17250_v26  ;;  %v10764_v63 = vrot.slane %v10202_v62, %v17250_v26  ;;  %v10778_v31 = vrot.slane %v10211_v14, %v17250_v26 }
 0x45d   : > { %v10743_v36 = vrot.slane %v10736_v18, %v17250_v26  ;;  %v10792_v19 = vrot.slane %v10219_v54, %v17250_v26  ;;  %v10757_v6 = vrot.slane %v10750_v38, %v17250_v26  ;;  %v10806_v0 = vrot.slane %v10227_v52, %v17250_v26 }
 0x45e   : > { %v10820_v56 = vrot.slane %v10235_v34, %v17250_v26  ;;  %v10834_v33 = vrot.slane %v10243_v59, %v17250_v26  ;;  %v10771_v15 = vrot.slane %v10764_v63, %v17250_v26  ;;  %v10785_v50 = vrot.slane %v10778_v31, %v17250_v26 }
 0x45f   : > { %v10799_v61 = vrot.slane %v10792_v19, %v17250_v26  ;;  %v10848_v62 = vrot.slane %v10251_v12, %v17250_v26  ;;  %v10813_v14 = vrot.slane %v10806_v0, %v17250_v26  ;;  %v10862_v52 = vrot.slane %v10259_v46, %v17250_v26 }
 0x460   : > { %v10827_v54 = vrot.slane %v10820_v56, %v17250_v26  ;;  %v10841_v51 = vrot.slane %v10834_v33, %v17250_v26  ;;  %v10876_v28 = vrot.slane %v10267_v43, %v17250_v26  ;;  %v11556_v34 = vunpack.c.l.b16 %v10673_v42  ;;  %v14139_v42 = vld.sshfl [vmem:[#allocation3 + $0x44] sm:$0x1 pattern:$0x75316420] }
 0x461   : > { %v10855_v41 = vrot.slane %v10848_v62, %v17250_v26  ;;  %v11557_v59 = vunpack.c.l.b16 %v10687_v45  ;;  %v10869_v57 = vrot.slane %v10862_v52, %v17250_v26  ;;  %v11558_v39 = vunpack.c.l.b16 %v10701_v58 }
 0x462   : > { %v11559_v3 = vunpack.c.l.b16 %v10715_v27  ;;  %v11560_v49 = vunpack.c.l.b16 %v10729_v8  ;;  %v10883_v12 = vrot.slane %v10876_v28, %v17250_v26  ;;  %v11561_v17 = vunpack.c.l.b16 %v10743_v36  ;;  %v14140_v27 = vld.sshfl [vmem:[#allocation3 + $0x5c] sm:$0x1 pattern:$0x75316420] }
 0x463   : > { %v11562_v35 = vunpack.c.l.b16 %v10757_v6  ;;  %v11563_v16 = vunpack.c.l.b16 %v10771_v15  ;;  %v11564_v10 = vunpack.c.l.b16 %v10785_v50  ;;  %v11565_v18 = vunpack.c.l.b16 %v10799_v61 }
 0x464   : > { %v11566_v38 = vunpack.c.l.b16 %v10813_v14  ;;  %v11567_v46 = vunpack.c.l.b16 %v10827_v54  ;;  %v11568_v63 = vunpack.c.l.b16 %v10841_v51  ;;  %v11569_v31 = vunpack.c.l.b16 %v10855_v41 }
 0x465   : > { %v11570_v19 = vunpack.c.l.b16 %v10869_v57  ;;  %v11571_v43 = vunpack.c.l.b16 %v10883_v12  ;;  %v11620_v45 = vrot.slane %v11557_v59, 7  ;;  %v11622_v0 = vrot.slane %v11558_v39, 6 }
 0x466   : > { %v11624_v56 = vrot.slane %v11559_v3, 5  ;;  %v11626_v58 = vrot.slane %v11560_v49, 4  ;;  %v11628_v8 = vrot.slane %v11561_v17, 3  ;;  %v11630_v33 = vrot.slane %v11562_v35, 2 }
 0x467   : > { %v11632_v62 = vrot.slane %v11563_v16, 1  ;;  %v11634_v36 = vrot.slane %v11565_v18, 7  ;;  %v11621_v6 = vsel %vm6766_vm13, %v11620_v45, %v11556_v34  ;;  %v11636_v15 = vrot.slane %v11566_v38, 6 }
 0x468   : > { %v11638_v50 = vrot.slane %v11567_v46, 5  ;;  %v11640_v61 = vrot.slane %v11568_v63, 4  ;;  %v11623_v14 = vsel %vm6769_vm3, %v11622_v0, %v11621_v6  ;;  %v11642_v51 = vrot.slane %v11569_v31, 3 }
 0x469   : > { %v11635_v54 = vsel %vm6766_vm13, %v11634_v36, %v11564_v10  ;;  %v11644_v52 = vrot.slane %v11570_v19, 2  ;;  %v11625_v41 = vsel %vm6772_vm11, %v11624_v56, %v11623_v14  ;;  %v11646_v59 = vrot.slane %v11571_v43, 1 }
 0x46a   : > { %v11637_v28 = vsel %vm6769_vm3, %v11636_v15, %v11635_v54  ;;  %v20003_v57 = vrot.slane %v14139_v42, %v17250_v26  ;;  %v11627_v39 = vsel %vm6775_vm4, %v11626_v58, %v11625_v41  ;;  %v20008_v3 = vrot.slane %v14140_v27, %v17250_v26 }
 0x46b   : > { %v11639_v34 = vsel %vm6772_vm11, %v11638_v50, %v11637_v28  ;;  %v10269_v49 = vshrl.u32 %v19311_v22, 16  ;;  %v11629_v12 = vsel %vm6778_vm8, %v11628_v8, %v11627_v39  ;;  %v10274_v35 = vshll.u32 %v19316_v40, 16 }
 0x46c   : > { %v11641_v17 = vsel %vm6775_vm4, %v11640_v61, %v11639_v34  ;;  %v10277_v16 = vshrl.u32 %v19316_v40, 16  ;;  %v11631_v10 = vsel %vm6781_vm1, %v11630_v33, %v11629_v12  ;;  %v10282_v38 = vshll.u32 %v19325_v7, 16 }
 0x46d   : > { %v11643_v18 = vsel %vm6778_vm8, %v11642_v51, %v11641_v17  ;;  %v10285_v46 = vshrl.u32 %v19325_v7, 16  ;;  %v11633_v63 = vsel %vm6784_vm10, %v11632_v62, %v11631_v10  ;;  %v10276_v31 = vsel %vm17272_vm14, %v10269_v49, %v10274_v35  ;;  %v21869_v17 = vld [vmem:[#allocation19_spill] sm:$0xff] }
 0x46e   : > { %v11645_v22 = vsel %vm6781_vm1, %v11644_v52, %v11643_v18  ;;  %v10290_v19 = vshll.u32 %v19334_v5, 16  ;;  %v10284_v40 = vsel %vm17272_vm14, %v10277_v16, %v10282_v38  ;;  %v10293_v42 = vshrl.u32 %v19334_v5, 16 }
 0x46f   : > { %v11647_v43 = vsel %vm6784_vm10, %v11646_v59, %v11645_v22  ;;  %v10298_v45 = vshll.u32 %v19319_v11, 16  ;;  %v10301_v56 = vshrl.u32 %v19319_v11, 16  ;;  %v10306_v58 = vshll.u32 %v19328_v1, 16 }
 0x470   : > { %v11732_v0 = vpack.c.b16 %v11647_v43, %v11633_v63  ;;  %v10292_v7 = vsel %vm17272_vm14, %v10285_v46, %v10290_v19  ;;  %v10309_v8 = vshrl.u32 %v19328_v1, 16  ;;  %v10314_v33 = vshll.u32 %v19338_v44, 16 }
 0x471   : > { %v10300_v27 = vsel %vm17272_vm14, %v10293_v42, %v10298_v45  ;;  %v10317_v62 = vshrl.u32 %v19338_v44, 16  ;;  %v10308_v5 = vsel %vm17272_vm14, %v10301_v56, %v10306_v58  ;;  %v10322_v36 = vshll.u32 %v19343_v4, 16 }
 0x472   : > { %14873 = vmatprep.mubr.msk.bf16.mxu1 %vm6888_vm15, %v11732_v0  ;;  %v10325_v11 = vshrl.u32 %v19343_v4, 16  ;;  %v10330_v6 = vshll.u32 %v20003_v57, 16  ;;  %v10316_v15 = vsel %vm17272_vm14, %v10309_v8, %v10314_v33  ;;  %v10334_v1 = vshrl.u32 %v19346_v2, 16 }
 0x473   : > { %v10339_v50 = vshll.u32 %v19355_v55, 16  ;;  %v10342_v44 = vshrl.u32 %v19355_v55, 16  ;;  %v10324_v61 = vsel %vm17272_vm14, %v10317_v62, %v10322_v36  ;;  %v10347_v54 = vshll.u32 %v19359_v30, 16 }
 0x474   : > { %v10332_v14 = vsel %vm17272_vm14, %v10325_v11, %v10330_v6  ;;  %v10350_v4 = vshrl.u32 %v19359_v30, 16  ;;  %v10355_v52 = vshll.u32 %v19376_v53, 16  ;;  %v10358_v2 = vshrl.u32 %v19376_v53, 16 }
 0x475   : > { %v10341_v51 = vsel %vm17272_vm14, %v10334_v1, %v10339_v50  ;;  %v10363_v41 = vshll.u32 %v19350_v60, 16  ;;  %v10349_v55 = vsel %vm17272_vm14, %v10342_v44, %v10347_v54  ;;  %v10366_v28 = vshrl.u32 %v19350_v60, 16 }
 0x476   : > { %v10371_v59 = vshll.u32 %v19364_v48, 16  ;;  %v10374_v39 = vshrl.u32 %v19364_v48, 16  ;;  %v10357_v30 = vsel %vm17272_vm14, %v10350_v4, %v10355_v52  ;;  %v10379_v49 = vshll.u32 %v19368_v23, 16 }
 0x477   : > { %v10365_v34 = vsel %vm17272_vm14, %v10358_v2, %v10363_v41  ;;  %v10382_v53 = vshrl.u32 %v19368_v23, 16  ;;  %v10387_v35 = vshll.u32 %v21869_v17, 16  ;;  %v10390_v60 = vshrl.u32 %v21869_v17, 16 }
 0x478   : > { %v10373_v12 = vsel %vm17272_vm14, %v10366_v28, %v10371_v59  ;;  %v10395_v16 = vshll.u32 %v20008_v3, 16  ;;  %v10381_v48 = vsel %vm17272_vm14, %v10374_v39, %v10379_v49  ;;  %v10890_v10 = vrot.slane %v10276_v31, %v17250_v26 }
 0x479   : > { %v10904_v18 = vrot.slane %v10284_v40, %v17250_v26  ;;  %v10918_v38 = vrot.slane %v10292_v7, %v17250_v26  ;;  %v10389_v23 = vsel %vm17272_vm14, %v10382_v53, %v10387_v35  ;;  %v10932_v63 = vrot.slane %v10300_v27, %v17250_v26 }
 0x47a   : > { %v10397_v46 = vsel %vm17272_vm14, %v10390_v60, %v10395_v16  ;;  %v10946_v22 = vrot.slane %v10308_v5, %v17250_v26  ;;  %v10897_v19 = vrot.slane %v10890_v10, %v17250_v26  ;;  %v10960_v40 = vrot.slane %v10316_v15, %v17250_v26 }
 0x47b   : > { %v10911_v43 = vrot.slane %v10904_v18, %v17250_v26  ;;  %v10925_v31 = vrot.slane %v10918_v38, %v17250_v26  ;;  %v10939_v42 = vrot.slane %v10932_v63, %v17250_v26  ;;  %v10974_v0 = vrot.slane %v10324_v61, %v17250_v26  ;;  %v14142_v63 = vld.sshfl [vmem:[#allocation3 + $0x8c] sm:$0x1 pattern:$0x75316420] }
 0x47c   : > { %v10953_v45 = vrot.slane %v10946_v22, %v17250_v26  ;;  %v10988_v7 = vrot.slane %v10332_v14, %v17250_v26  ;;  %v10967_v56 = vrot.slane %v10960_v40, %v17250_v26  ;;  %v11002_v58 = vrot.slane %v10341_v51, %v17250_v26 }
 0x47d   : > { %v11016_v27 = vrot.slane %v10349_v55, %v17250_v26  ;;  %v11030_v8 = vrot.slane %v10357_v30, %v17250_v26  ;;  %v10981_v33 = vrot.slane %v10974_v0, %v17250_v26  ;;  %v11044_v5 = vrot.slane %v10365_v34, %v17250_v26 }
 0x47e   : > { %v10995_v62 = vrot.slane %v10988_v7, %v17250_v26  ;;  %v11058_v36 = vrot.slane %v10373_v12, %v17250_v26  ;;  %v11009_v11 = vrot.slane %v11002_v58, %v17250_v26  ;;  %v11072_v1 = vrot.slane %v10381_v48, %v17250_v26 }
 0x47f   : > { %v11023_v6 = vrot.slane %v11016_v27, %v17250_v26  ;;  %v11037_v15 = vrot.slane %v11030_v8, %v17250_v26  ;;  %v11051_v50 = vrot.slane %v11044_v5, %v17250_v26  ;;  %v11086_v61 = vrot.slane %v10389_v23, %v17250_v26 }
 0x480   : > { %v11065_v44 = vrot.slane %v11058_v36, %v17250_v26  ;;  %v11100_v14 = vrot.slane %v10397_v46, %v17250_v26  ;;  %v11079_v54 = vrot.slane %v11072_v1, %v17250_v26  ;;  %v11572_v4 = vunpack.c.l.b16 %v10897_v19  ;;  %v14141_v46 = vld.sshfl [vmem:[#allocation3 + $0x74] sm:$0x1 pattern:$0x75316420] }
 0x481   : > { %v11573_v51 = vunpack.c.l.b16 %v10911_v43  ;;  %v11574_v52 = vunpack.c.l.b16 %v10925_v31  ;;  %v11093_v2 = vrot.slane %v11086_v61, %v17250_v26  ;;  %v11575_v55 = vunpack.c.l.b16 %v10939_v42 }
 0x482   : > { %v11107_v41 = vrot.slane %v11100_v14, %v17250_v26  ;;  %v11576_v28 = vunpack.c.l.b16 %v10953_v45  ;;  %v11577_v59 = vunpack.c.l.b16 %v10967_v56  ;;  %v11578_v39 = vunpack.c.l.b16 %v10981_v33  ;;  %v21871_v14 = vld [vmem:[#allocation60_spill] sm:$0xff] }
 0x483   : > { %v11579_v30 = vunpack.c.l.b16 %v10995_v62  ;;  %v11580_v34 = vunpack.c.l.b16 %v11009_v11  ;;  %v11581_v49 = vunpack.c.l.b16 %v11023_v6  ;;  %v11582_v53 = vunpack.c.l.b16 %v11037_v15 }
 0x484   : > { %v11583_v12 = vunpack.c.l.b16 %v11051_v50  ;;  %v11584_v17 = vunpack.c.l.b16 %v11065_v44  ;;  %v11585_v35 = vunpack.c.l.b16 %v11079_v54  ;;  %v11586_v60 = vunpack.c.l.b16 %v11093_v2  ;;  %v21870_v44 = vld [vmem:[#allocation40_spill] sm:$0xff] }
 0x485   : > { %v11587_v16 = vunpack.c.l.b16 %v11107_v41  ;;  %v11648_v48 = vrot.slane %v11573_v51, 7  ;;  %v11650_v10 = vrot.slane %v11574_v52, 6  ;;  %v11652_v18 = vrot.slane %v11575_v55, 5  ;;  %v21872_v52 = vld [vmem:[#allocation62_spill] sm:$0xff] }
 0x486   : > { %v11654_v38 = vrot.slane %v11576_v28, 4  ;;  %v11656_v23 = vrot.slane %v11577_v59, 3  ;;  %v11658_v19 = vrot.slane %v11578_v39, 2  ;;  %v11660_v43 = vrot.slane %v11579_v30, 1  ;;  %v21873_v59 = vld [vmem:[#allocation64_spill] sm:$0xff] }
 0x487   : > { %v11649_v22 = vsel %vm6766_vm13, %v11648_v48, %v11572_v4  ;;  %v11662_v31 = vrot.slane %v11581_v49, 7  ;;  %v11664_v42 = vrot.slane %v11582_v53, 6  ;;  %v11666_v45 = vrot.slane %v11583_v12, 5  ;;  %v21874_v53 = vld [vmem:[#allocation61_spill] sm:$0xff] }
 0x488   : > { %v11651_v40 = vsel %vm6769_vm3, %v11650_v10, %v11649_v22  ;;  %v11668_v0 = vrot.slane %v11584_v17, 4  ;;  %v11670_v58 = vrot.slane %v11585_v35, 3  ;;  %v11672_v27 = vrot.slane %v11586_v60, 2 }
 0x489   : > { %v11653_v7 = vsel %vm6772_vm11, %v11652_v18, %v11651_v40  ;;  %v11663_v56 = vsel %vm6766_vm13, %v11662_v31, %v11580_v34  ;;  %v11674_v62 = vrot.slane %v11587_v16, 1  ;;  %v12075_v5 = vsel %vm6901_vm7, %v19562_v9, 0  ;;  %v21875_v16 = vld [vmem:[#allocation63_spill] sm:$0xff] }
 0x48a   : > { %v11655_v8 = vsel %vm6775_vm4, %v11654_v38, %v11653_v7  ;;  %v11665_v33 = vsel %vm6769_vm3, %v11664_v42, %v11663_v56  ;;  %v20125_v6 = vrot.slane %v14141_v46, %v17250_v26  ;;  %v20128_v15 = vrot.slane %v14142_v63, %v17250_v26  ;;  %v21876_v38 = vld [vmem:[#allocation65_spill] sm:$0xff]  ;;  %v20160_v63 = vld [vmem:[%s21110_s7 + $0x18] sm:$0xf] }
 0x48b   : > { %v11657_v36 = vsel %vm6778_vm8, %v11656_v23, %v11655_v8  ;;  %v11667_v11 = vsel %vm6772_vm11, %v11666_v45, %v11665_v33  ;;  %v10399_v61 = vshrl.u32 %v21870_v44, 16  ;;  %v10404_v54 = vshll.u32 %v21871_v14, 16  ;;  %v21878_v45 = vld [vmem:[#allocation67_spill] sm:$0xff]  ;;  %v21879_v7 = vld [vmem:[#allocation68_spill] sm:$0xff]  ;;  %v21880_v33 = vld [vmem:[#allocation70_spill] sm:$0xff] }
 0x48c   : > { %v11659_v1 = vsel %vm6781_vm1, %v11658_v19, %v11657_v36  ;;  %v11669_v50 = vsel %vm6775_vm4, %v11668_v0, %v11667_v11  ;;  %v10407_v51 = vshrl.u32 %v21871_v14, 16  ;;  %v10412_v2 = vshll.u32 %v21872_v52, 16  ;;  %v21877_v19 = vld [vmem:[#allocation66_spill] sm:$0xff]  ;;  %v21881_v11 = vld [vmem:[#allocation72_spill] sm:$0xff]  ;;  %v21882_v44 = vld [vmem:[#allocation69_spill] sm:$0xff] }
 0x48d   : > { %v11661_v9 = vsel %vm6784_vm10, %v11660_v43, %v11659_v1  ;;  %v11671_v4 = vsel %vm6778_vm8, %v11670_v58, %v11669_v50  ;;  %v10406_v55 = vsel %vm17272_vm14, %v10399_v61, %v10404_v54  ;;  %v10415_v28 = vshrl.u32 %v21872_v52, 16 }
 0x48e   : > { %v11673_v41 = vsel %vm6781_vm1, %v11672_v27, %v11671_v4  ;;  %v10420_v39 = vshll.u32 %v21873_v59, 16  ;;  %v10414_v34 = vsel %vm17272_vm14, %v10407_v51, %v10412_v2  ;;  %v10423_v49 = vshrl.u32 %v21873_v59, 16 }
 0x48f   : > { %v11675_v30 = vsel %vm6784_vm10, %v11674_v62, %v11673_v41  ;;  %v10428_v12 = vshll.u32 %v21874_v53, 16  ;;  %v10431_v60 = vshrl.u32 %v21874_v53, 16  ;;  %v10436_v48 = vshll.u32 %v21875_v16, 16  ;;  %v21884_v41 = vld [vmem:[#allocation73_spill] sm:$0xff] }
 0x490   : > { %v11733_v17 = vpack.c.b16 %v11675_v30, %v11661_v9  ;;  %v10422_v35 = vsel %vm17272_vm14, %v10415_v28, %v10420_v39  ;;  %v10439_v18 = vshrl.u32 %v21875_v16, 16  ;;  %v10444_v23 = vshll.u32 %v21876_v38, 16  ;;  %v21883_v9 = vld [vmem:[#allocation71_spill] sm:$0xff]  ;;  %v21885_v30 = vld [vmem:[#allocation74_spill] sm:$0xff] }
 0x491   : > { %v10430_v10 = vsel %vm17272_vm14, %v10423_v49, %v10428_v12  ;;  %v10447_v46 = vshrl.u32 %v21876_v38, 16  ;;  %v10438_v22 = vsel %vm17272_vm14, %v10431_v60, %v10436_v48  ;;  %v10452_v43 = vshll.u32 %v21877_v19, 16 }
 0x492   : > { %14874 = vmatmul.mubr.msk.bf16.vlgmr.msra.gmra.mrb[32].mxu1 %vm6888_vm15, %v11733_v17  ;;  %v10455_v31 = vshrl.u32 %v21877_v19, 16  ;;  %v10460_v40 = vshll.u32 %v20125_v6, 16  ;;  %v10446_v42 = vsel %vm17272_vm14, %v10439_v18, %v10444_v23  ;;  %v10464_v0 = vshrl.u32 %v21878_v45, 16 }
 0x493   : > { %14882 = vmatpush3.bf16.msra.mxu1 %v12075_v5  ;;  %v10469_v56 = vshll.u32 %v21879_v7, 16  ;;  %v10472_v58 = vshrl.u32 %v21879_v7, 16  ;;  %v10454_v27 = vsel %vm17272_vm14, %v10447_v46, %v10452_v43  ;;  %v10477_v62 = vshll.u32 %v21880_v33, 16 }
 0x494   : > { %v10462_v8 = vsel %vm17272_vm14, %v10455_v31, %v10460_v40  ;;  %v10480_v36 = vshrl.u32 %v21880_v33, 16  ;;  %15293 = vmatprep.subr.msk.bf16.mxu1 %vm6901_vm7, %v20160_v63  ;;  %v10485_v1 = vshll.u32 %v21881_v11, 16  ;;  %v10488_v50 = vshrl.u32 %v21881_v11, 16 }
 0x495   : > { %v10471_v5 = vsel %vm17272_vm14, %v10464_v0, %v10469_v56  ;;  %v10493_v61 = vshll.u32 %v21882_v44, 16  ;;  %v10479_v14 = vsel %vm17272_vm14, %v10472_v58, %v10477_v62  ;;  %v10496_v54 = vshrl.u32 %v21882_v44, 16 }
 0x496   : > { %v10501_v4 = vshll.u32 %v21883_v9, 16  ;;  %v10504_v51 = vshrl.u32 %v21883_v9, 16  ;;  %v10487_v52 = vsel %vm17272_vm14, %v10480_v36, %v10485_v1  ;;  %v10509_v28 = vshll.u32 %v21884_v41, 16 }
 0x497   : > { %v10495_v2 = vsel %vm17272_vm14, %v10488_v50, %v10493_v61  ;;  %v10512_v59 = vshrl.u32 %v21884_v41, 16  ;;  %v10517_v49 = vshll.u32 %v21885_v30, 16  ;;  %v10520_v53 = vshrl.u32 %v21885_v30, 16 }
 0x498   : > { %v10503_v39 = vsel %vm17272_vm14, %v10496_v54, %v10501_v4  ;;  %v10525_v12 = vshll.u32 %v20128_v15, 16  ;;  %v10511_v17 = vsel %vm17272_vm14, %v10504_v51, %v10509_v28  ;;  %v11114_v60 = vrot.slane %v10406_v55, %v17250_v26 }
 0x499   : > { %v11128_v16 = vrot.slane %v10414_v34, %v17250_v26  ;;  %v11142_v48 = vrot.slane %v10422_v35, %v17250_v26  ;;  %v10519_v18 = vsel %vm17272_vm14, %v10512_v59, %v10517_v49  ;;  %v11156_v23 = vrot.slane %v10430_v10, %v17250_v26 }
 0x49a   : > { %v10527_v38 = vsel %vm17272_vm14, %v10520_v53, %v10525_v12  ;;  %v11170_v46 = vrot.slane %v10438_v22, %v17250_v26  ;;  %v11121_v19 = vrot.slane %v11114_v60, %v17250_v26  ;;  %v11184_v34 = vrot.slane %v10446_v42, %v17250_v26 }
 0x49b   : > { %v11135_v43 = vrot.slane %v11128_v16, %v17250_v26  ;;  %v11149_v55 = vrot.slane %v11142_v48, %v17250_v26  ;;  %v11163_v35 = vrot.slane %v11156_v23, %v17250_v26  ;;  %v11198_v40 = vrot.slane %v10454_v27, %v17250_v26  ;;  %v14143_v48 = vld.sshfl [vmem:[#allocation3 + $0xa4] sm:$0x1 pattern:$0x75316420] }
 0x49c   : > { %v11177_v31 = vrot.slane %v11170_v46, %v17250_v26  ;;  %v11212_v45 = vrot.slane %v10462_v8, %v17250_v26  ;;  %v11191_v10 = vrot.slane %v11184_v34, %v17250_v26  ;;  %v11226_v22 = vrot.slane %v10471_v5, %v17250_v26 }
 0x49d   : > { %v11240_v0 = vrot.slane %v10479_v14, %v17250_v26  ;;  %v11254_v7 = vrot.slane %v10487_v52, %v17250_v26  ;;  %v11205_v56 = vrot.slane %v11198_v40, %v17250_v26  ;;  %v11268_v58 = vrot.slane %v10495_v2, %v17250_v26 }
 0x49e   : > { %v11219_v42 = vrot.slane %v11212_v45, %v17250_v26  ;;  %v11282_v33 = vrot.slane %v10503_v39, %v17250_v26  ;;  %v11233_v27 = vrot.slane %v11226_v22, %v17250_v26  ;;  %v11296_v36 = vrot.slane %v10511_v17, %v17250_v26 }
 0x49f   : > { %v11247_v8 = vrot.slane %v11240_v0, %v17250_v26  ;;  %v11261_v62 = vrot.slane %v11254_v7, %v17250_v26  ;;  %v11275_v5 = vrot.slane %v11268_v58, %v17250_v26  ;;  %v11310_v1 = vrot.slane %v10519_v18, %v17250_v26 }
 0x4a0   : > { %v11289_v11 = vrot.slane %v11282_v33, %v17250_v26  ;;  %v11324_v50 = vrot.slane %v10527_v38, %v17250_v26  ;;  %v11303_v44 = vrot.slane %v11296_v36, %v17250_v26  ;;  %v11588_v61 = vunpack.c.l.b16 %v11121_v19  ;;  %v14144_v19 = vld.sshfl [vmem:[#allocation3 + $0xbc] sm:$0x1 pattern:$0x75316420] }
 0x4a1   : > { %v11589_v14 = vunpack.c.l.b16 %v11135_v43  ;;  %v11590_v54 = vunpack.c.l.b16 %v11149_v55  ;;  %v11317_v9 = vrot.slane %v11310_v1, %v17250_v26  ;;  %v11591_v51 = vunpack.c.l.b16 %v11163_v35 }
 0x4a2   : > { %v11331_v4 = vrot.slane %v11324_v50, %v17250_v26  ;;  %v11592_v52 = vunpack.c.l.b16 %v11177_v31  ;;  %v11593_v2 = vunpack.c.l.b16 %v11191_v10  ;;  %v11594_v41 = vunpack.c.l.b16 %v11205_v56 }
 0x4a3   : > { %v11595_v28 = vunpack.c.l.b16 %v11219_v42  ;;  %v11596_v59 = vunpack.c.l.b16 %v11233_v27  ;;  %v11597_v39 = vunpack.c.l.b16 %v11247_v8  ;;  %v11598_v30 = vunpack.c.l.b16 %v11261_v62 }
 0x4a4   : > { %v11599_v49 = vunpack.c.l.b16 %v11275_v5  ;;  %v11600_v53 = vunpack.c.l.b16 %v11289_v11  ;;  %v11601_v12 = vunpack.c.l.b16 %v11303_v44  ;;  %v11602_v17 = vunpack.c.l.b16 %v11317_v9  ;;  %v21886_v5 = vld [vmem:[#allocation89_spill] sm:$0xff]  ;;  %v21887_v44 = vld [vmem:[#allocation90_spill] sm:$0xff] }
 0x4a5   : > { %v11603_v60 = vunpack.c.l.b16 %v11331_v4  ;;  %v11676_v16 = vrot.slane %v11589_v14, 7  ;;  %v11678_v18 = vrot.slane %v11590_v54, 6  ;;  %v11680_v38 = vrot.slane %v11591_v51, 5  ;;  %v21888_v4 = vld [vmem:[#allocation92_spill] sm:$0xff] }
 0x4a6   : > { %v11682_v23 = vrot.slane %v11592_v52, 4  ;;  %v11684_v46 = vrot.slane %v11593_v2, 3  ;;  %v11686_v55 = vrot.slane %v11594_v41, 2  ;;  %v11688_v34 = vrot.slane %v11595_v28, 1  ;;  %v21889_v28 = vld [vmem:[#allocation94_spill] sm:$0xff] }
 0x4a7   : > { %v11677_v43 = vsel %vm6766_vm13, %v11676_v16, %v11588_v61  ;;  %v11690_v35 = vrot.slane %v11597_v39, 7  ;;  %v11692_v40 = vrot.slane %v11598_v30, 6  ;;  %v11694_v45 = vrot.slane %v11599_v49, 5 }
 0x4a8   : > { %v11679_v31 = vsel %vm6769_vm3, %v11678_v18, %v11677_v43  ;;  %v11696_v10 = vrot.slane %v11600_v53, 4  ;;  %v11698_v7 = vrot.slane %v11601_v12, 3  ;;  %v11700_v56 = vrot.slane %v11602_v17, 2  ;;  %v21890_v53 = vld [vmem:[#allocation91_spill] sm:$0xff] }
 0x4a9   : > { %v11681_v22 = vsel %vm6772_vm11, %v11680_v38, %v11679_v31  ;;  %v11691_v0 = vsel %vm6766_vm13, %v11690_v35, %v11596_v59  ;;  %v11702_v33 = vrot.slane %v11603_v60, 1  ;;  %v20247_v27 = vrot.slane %v14143_v48, %v17250_v26  ;;  %v21891_v48 = vld [vmem:[#allocation93_spill] sm:$0xff] }
 0x4aa   : > { %v11683_v42 = vsel %vm6775_vm4, %v11682_v23, %v11681_v22  ;;  %v11693_v58 = vsel %vm6769_vm3, %v11692_v40, %v11691_v0  ;;  %v20252_v36 = vrot.slane %v14144_v19, %v17250_v26  ;;  %v10529_v11 = vshrl.u32 %v21886_v5, 16  ;;  %v21897_v5 = vld [vmem:[#allocation103_spill] sm:$0xff] }
 0x4ab   : > { %v11685_v8 = vsel %vm6778_vm8, %v11684_v46, %v11683_v42  ;;  %v11695_v62 = vsel %vm6772_vm11, %v11694_v45, %v11693_v58  ;;  %v10534_v61 = vshll.u32 %v21887_v44, 16  ;;  %v10537_v14 = vshrl.u32 %v21887_v44, 16  ;;  %v21892_v46 = vld [vmem:[#allocation95_spill] sm:$0xff]  ;;  %v21894_v45 = vld [vmem:[#allocation97_spill] sm:$0xff]  ;;  %v21898_v44 = vld [vmem:[#allocation98_spill] sm:$0xff] }
 0x4ac   : > { %v11687_v1 = vsel %vm6781_vm1, %v11686_v55, %v11685_v8  ;;  %v11697_v50 = vsel %vm6775_vm4, %v11696_v10, %v11695_v62  ;;  %v10542_v51 = vshll.u32 %v21888_v4, 16  ;;  %v10545_v52 = vshrl.u32 %v21888_v4, 16  ;;  %v21893_v55 = vld [vmem:[#allocation96_spill] sm:$0xff]  ;;  %v21899_v4 = vld [vmem:[#allocation101_spill] sm:$0xff] }
 0x4ad   : > { %v11689_v54 = vsel %vm6784_vm10, %v11688_v34, %v11687_v1  ;;  %v11699_v9 = vsel %vm6778_vm8, %v11698_v7, %v11697_v50  ;;  %v10536_v41 = vsel %vm17272_vm14, %v10529_v11, %v10534_v61  ;;  %v10550_v59 = vshll.u32 %v21889_v28, 16  ;;  %v21895_v7 = vld [vmem:[#allocation99_spill] sm:$0xff] }
 0x4ae   : > { %v11701_v2 = vsel %vm6781_vm1, %v11700_v56, %v11699_v9  ;;  %v10553_v39 = vshrl.u32 %v21889_v28, 16  ;;  %v10544_v49 = vsel %vm17272_vm14, %v10537_v14, %v10542_v51  ;;  %v10558_v12 = vshll.u32 %v21890_v53, 16  ;;  %v21900_v28 = vld [vmem:[#allocation102_spill] sm:$0xff] }
 0x4af   : > { %v11703_v30 = vsel %vm6784_vm10, %v11702_v33, %v11701_v2  ;;  %v10561_v17 = vshrl.u32 %v21890_v53, 16  ;;  %v10552_v16 = vsel %vm17272_vm14, %v10545_v52, %v10550_v59  ;;  %v10566_v18 = vshll.u32 %v21891_v48, 16  ;;  %v21896_v33 = vld [vmem:[#allocation100_spill] sm:$0xff] }
 0x4b0   : > { %v11734_v60 = vpack.c.b16 %v11703_v30, %v11689_v54  ;;  %v10569_v38 = vshrl.u32 %v21891_v48, 16  ;;  %v10560_v23 = vsel %vm17272_vm14, %v10553_v39, %v10558_v12  ;;  %v10574_v19 = vshll.u32 %v21892_v46, 16  ;;  %v21901_v30 = vld [vmem:[#allocation106_spill] sm:$0xff] }
 0x4b1   : > { %v10577_v43 = vshrl.u32 %v21892_v46, 16  ;;  %v10582_v34 = vshll.u32 %v21893_v55, 16  ;;  %v10568_v35 = vsel %vm17272_vm14, %v10561_v17, %v10566_v18  ;;  %v10585_v31 = vshrl.u32 %v21893_v55, 16 }
 0x4b2   : > { %14877 = vmatprep.mubr.msk.bf16.mxu1 %vm6888_vm15, %v11734_v60  ;;  %v10590_v40 = vshll.u32 %v20247_v27, 16  ;;  %v10594_v10 = vshrl.u32 %v21894_v45, 16  ;;  %v10576_v22 = vsel %vm17272_vm14, %v10569_v38, %v10574_v19  ;;  %v10599_v56 = vshll.u32 %v21895_v7, 16 }
 0x4b3   : > { %v10584_v0 = vsel %vm17272_vm14, %v10577_v43, %v10582_v34  ;;  %v10602_v42 = vshrl.u32 %v21895_v7, 16  ;;  %v10607_v8 = vshll.u32 %v21896_v33, 16  ;;  %v10610_v62 = vshrl.u32 %v21896_v33, 16 }
 0x4b4   : > { %v10592_v58 = vsel %vm17272_vm14, %v10585_v31, %v10590_v40  ;;  %v10615_v11 = vshll.u32 %v21897_v5, 16  ;;  %v10601_v1 = vsel %vm17272_vm14, %v10594_v10, %v10599_v56  ;;  %v10618_v50 = vshrl.u32 %v21897_v5, 16 }
 0x4b5   : > { %v10623_v61 = vshll.u32 %v21898_v44, 16  ;;  %v10626_v14 = vshrl.u32 %v21898_v44, 16  ;;  %v10609_v54 = vsel %vm17272_vm14, %v10602_v42, %v10607_v8  ;;  %v10631_v51 = vshll.u32 %v21899_v4, 16 }
 0x4b6   : > { %v10617_v9 = vsel %vm17272_vm14, %v10610_v62, %v10615_v11  ;;  %v10634_v52 = vshrl.u32 %v21899_v4, 16  ;;  %v10639_v59 = vshll.u32 %v21900_v28, 16  ;;  %v10642_v39 = vshrl.u32 %v21900_v28, 16 }
 0x4b7   : > { %v10625_v2 = vsel %vm17272_vm14, %v10618_v50, %v10623_v61  ;;  %v10647_v53 = vshll.u32 %v21901_v30, 16  ;;  %v10633_v12 = vsel %vm17272_vm14, %v10626_v14, %v10631_v51  ;;  %v10650_v17 = vshrl.u32 %v21901_v30, 16 }
 0x4b8   : > { %v10655_v60 = vshll.u32 %v20252_v36, 16  ;;  %v11338_v48 = vrot.slane %v10536_v41, %v17250_v26  ;;  %v10641_v18 = vsel %vm17272_vm14, %v10634_v52, %v10639_v59  ;;  %v11352_v46 = vrot.slane %v10544_v49, %v17250_v26 }
 0x4b9   : > { %v10649_v38 = vsel %vm17272_vm14, %v10642_v39, %v10647_v53  ;;  %v11366_v19 = vrot.slane %v10552_v16, %v17250_v26  ;;  %v11380_v34 = vrot.slane %v10560_v23, %v17250_v26  ;;  %v11394_v31 = vrot.slane %v10568_v35, %v17250_v26 }
 0x4ba   : > { %v10657_v43 = vsel %vm17272_vm14, %v10650_v17, %v10655_v60  ;;  %v11345_v55 = vrot.slane %v11338_v48, %v17250_v26  ;;  %v11359_v41 = vrot.slane %v11352_v46, %v17250_v26  ;;  %v11408_v45 = vrot.slane %v10576_v22, %v17250_v26 }
 0x4bb   : > { %v11373_v40 = vrot.slane %v11366_v19, %v17250_v26  ;;  %v11422_v10 = vrot.slane %v10584_v0, %v17250_v26  ;;  %v11387_v49 = vrot.slane %v11380_v34, %v17250_v26  ;;  %v11401_v16 = vrot.slane %v11394_v31, %v17250_v26 }
 0x4bc   : > { %v11436_v7 = vrot.slane %v10592_v58, %v17250_v26  ;;  %v11450_v56 = vrot.slane %v10601_v1, %v17250_v26  ;;  %v11415_v23 = vrot.slane %v11408_v45, %v17250_v26  ;;  %v11464_v42 = vrot.slane %v10609_v54, %v17250_v26 }
 0x4bd   : > { %v11429_v35 = vrot.slane %v11422_v10, %v17250_v26  ;;  %v11478_v33 = vrot.slane %v10617_v9, %v17250_v26  ;;  %v11492_v8 = vrot.slane %v10625_v2, %v17250_v26  ;;  %v11506_v62 = vrot.slane %v10633_v12, %v17250_v26 }
 0x4be   : > { %v11443_v22 = vrot.slane %v11436_v7, %v17250_v26  ;;  %v11457_v0 = vrot.slane %v11450_v56, %v17250_v26  ;;  %v11471_v58 = vrot.slane %v11464_v42, %v17250_v26  ;;  %v11520_v11 = vrot.slane %v10641_v18, %v17250_v26 }
 0x4bf   : > { %v11485_v5 = vrot.slane %v11478_v33, %v17250_v26  ;;  %v11534_v1 = vrot.slane %v10649_v38, %v17250_v26  ;;  %v11499_v50 = vrot.slane %v11492_v8, %v17250_v26  ;;  %v11513_v44 = vrot.slane %v11506_v62, %v17250_v26 }
 0x4c0   : > { %v11548_v61 = vrot.slane %v10657_v43, %v17250_v26  ;;  %v11604_v14 = vunpack.c.l.b16 %v11345_v55  ;;  %v11527_v54 = vrot.slane %v11520_v11, %v17250_v26  ;;  %v11605_v4 = vunpack.c.l.b16 %v11359_v41 }
 0x4c1   : > { %v11541_v9 = vrot.slane %v11534_v1, %v17250_v26  ;;  %v11606_v51 = vunpack.c.l.b16 %v11373_v40  ;;  %v11607_v2 = vunpack.c.l.b16 %v11387_v49  ;;  %v11608_v28 = vunpack.c.l.b16 %v11401_v16  ;;  %v21902_v1 = vld [vmem:[#allocation56_spill] sm:$0xff] }
 0x4c2   : > { %v11555_v52 = vrot.slane %v11548_v61, %v17250_v26  ;;  %v11609_v59 = vunpack.c.l.b16 %v11415_v23  ;;  %v11610_v39 = vunpack.c.l.b16 %v11429_v35  ;;  %v11611_v30 = vunpack.c.l.b16 %v11443_v22  ;;  %v21904_v61 = vld [vmem:[#allocation57_spill] sm:$0xff] }
 0x4c3   : > { %v11612_v53 = vunpack.c.l.b16 %v11457_v0  ;;  %v11613_v12 = vunpack.c.l.b16 %v11471_v58  ;;  %v11614_v17 = vunpack.c.l.b16 %v11485_v5  ;;  %v11615_v60 = vunpack.c.l.b16 %v11499_v50 }
 0x4c4   : > { %v11616_v48 = vunpack.c.l.b16 %v11513_v44  ;;  %v11617_v18 = vunpack.c.l.b16 %v11527_v54  ;;  %v11618_v38 = vunpack.c.l.b16 %v11541_v9  ;;  %v11619_v46 = vunpack.c.l.b16 %v11555_v52 }
 0x4c5   : > { %v11704_v19 = vrot.slane %v11605_v4, 7  ;;  %v11706_v43 = vrot.slane %v11606_v51, 6  ;;  %v11708_v55 = vrot.slane %v11607_v2, 5  ;;  %v11710_v34 = vrot.slane %v11608_v28, 4  ;;  %v21906_v2 = vld [vmem:[#allocation51_spill] sm:$0xff] }
 0x4c6   : > { %v11712_v31 = vrot.slane %v11609_v59, 3  ;;  %v11714_v41 = vrot.slane %v11610_v39, 2  ;;  %v11716_v45 = vrot.slane %v11611_v30, 1  ;;  %v11718_v10 = vrot.slane %v11613_v12, 7  ;;  %v21908_v39 = vld [vmem:[#allocation59_spill] sm:$0xff] }
 0x4c7   : > { %v11705_v40 = vsel %vm6766_vm13, %v11704_v19, %v11604_v14  ;;  %v11720_v49 = vrot.slane %v11614_v17, 6  ;;  %v11722_v7 = vrot.slane %v11615_v60, 5  ;;  %v11724_v56 = vrot.slane %v11616_v48, 4 }
 0x4c8   : > { %v11707_v16 = vsel %vm6769_vm3, %v11706_v43, %v11705_v40  ;;  %v11726_v23 = vrot.slane %v11617_v18, 3  ;;  %v11719_v42 = vsel %vm6766_vm13, %v11718_v10, %v11612_v53  ;;  %v11728_v33 = vrot.slane %v11618_v38, 2  ;;  %v21914_v40 = vld [vmem:[#allocation13_spill] sm:$0xff] }
 0x4c9   : > { %v11709_v35 = vsel %vm6772_vm11, %v11708_v55, %v11707_v16  ;;  %v11730_v22 = vrot.slane %v11619_v46, 1  ;;  %v11721_v8 = vsel %vm6769_vm3, %v11720_v49, %v11719_v42  ;;  %v11832_v62 = vrot.slane %v19885_v13, %v17250_v26  ;;  %v21910_v46 = vld [vmem:[#allocation24_spill] sm:$0xff]  ;;  %v21912_v55 = vld [vmem:[#allocation7_spill] sm:$0xff]  ;;  %v21916_v16 = vld [vmem:[#allocation33_spill] sm:$0xff] }
 0x4ca   : > { %v11711_v0 = vsel %vm6775_vm4, %v11710_v34, %v11709_v35  ;;  %v11846_v58 = vrot.slane %v19890_v21, %v17250_v26  ;;  %v11723_v11 = vsel %vm6772_vm11, %v11722_v7, %v11721_v8  ;;  %v21903_v50 = vunpack.c.l.b16 %v21902_v1  ;;  %v21918_v35 = vld [vmem:[#allocation36_spill] sm:$0xff]  ;;  %v21924_v1 = vld [vmem:[#allocation15_spill] sm:$0xff] }
 0x4cb   : > { %v11713_v5 = vsel %vm6778_vm8, %v11712_v31, %v11711_v0  ;;  %v21905_v14 = vunpack.c.l.b16 %v21904_v61  ;;  %v11725_v4 = vsel %vm6775_vm4, %v11724_v56, %v11723_v11  ;;  %v11839_v51 = vrot.slane %v11832_v62, %v17250_v26  ;;  %v21922_v62 = vld [vmem:[#allocation28_spill] sm:$0xff]  ;;  %v21926_v61 = vld [vmem:[#allocation26_spill] sm:$0xff] }
 0x4cc   : > { %v11946_v44 = vrot.slane %v21903_v50, 7  ;;  %v11715_v9 = vsel %vm6781_vm1, %v11714_v41, %v11713_v5  ;;  %v11853_v13 = vrot.slane %v11846_v58, %v17250_v26  ;;  %v11727_v52 = vsel %vm6778_vm8, %v11726_v23, %v11725_v4 }
 0x4cd   : > { %v11948_v54 = vrot.slane %v21905_v14, 6  ;;  %v11717_v21 = vsel %vm6784_vm10, %v11716_v45, %v11715_v9  ;;  %v21907_v28 = vunpack.c.l.b16 %v21906_v2  ;;  %v21909_v30 = vunpack.c.l.b16 %v21908_v39  ;;  %v21928_v9 = vld [vmem:[#allocation17_spill] sm:$0xff] }
 0x4ce   : > { %v11729_v12 = vsel %vm6781_vm1, %v11728_v33, %v11727_v52  ;;  %v11938_v17 = vunpack.c.l.b16 %v11839_v51  ;;  %v11939_v60 = vunpack.c.l.b16 %v11853_v13  ;;  %v21911_v19 = vunpack.c.l.b16 %v21910_v46  ;;  %v21934_v46 = vld [vmem:[#allocation8_spill] sm:$0xff] }
 0x4cf   : > { %v11947_v59 = vsel %vm6766_vm13, %v11946_v44, %v21907_v28  ;;  %v11950_v53 = vrot.slane %v21909_v30, 5  ;;  %v11731_v18 = vsel %vm6784_vm10, %v11730_v22, %v11729_v12  ;;  %v21913_v34 = vunpack.c.l.b16 %v21912_v55  ;;  %v21920_v22 = vld [vmem:[#allocation22_spill] sm:$0xff]  ;;  %v21930_v30 = vld [vmem:[#allocation27_spill] sm:$0xff] }
 0x4d0   : > { %v11949_v48 = vsel %vm6769_vm3, %v11948_v54, %v11947_v59  ;;  %v11952_v43 = vrot.slane %v21911_v19, 4  ;;  %v11735_v41 = vpack.c.b16 %v11731_v18, %v11717_v21  ;;  %v21915_v45 = vunpack.c.l.b16 %v21914_v40  ;;  %v21932_v18 = vld [vmem:[#allocation29_spill] sm:$0xff] }
 0x4d1   : > { %v11951_v38 = vsel %vm6772_vm11, %v11950_v53, %v11949_v48  ;;  %v11954_v31 = vrot.slane %v21913_v34, 3  ;;  %v11958_v49 = vrot.slane %v11938_v17, 1  ;;  %v21917_v7 = vunpack.c.l.b16 %v21916_v16  ;;  %v21936_v34 = vld [vmem:[#allocation10_spill] sm:$0xff] }
 0x4d2   : > { %v11956_v10 = vrot.slane %v21915_v45, 2  ;;  %v11953_v23 = vsel %vm6775_vm4, %v11952_v43, %v11951_v38  ;;  %v21919_v42 = vunpack.c.l.b16 %v21918_v35  ;;  %v21921_v0 = vunpack.c.l.b16 %v21920_v22  ;;  %14878 = vmatmul.mubr.msk.bf16.gmra.mrb[36].mxu1 %vm6888_vm15, %v11735_v41  ;;  %v21938_v41 = vld [vmem:[#allocation54_spill] sm:$0xff]  ;;  %v21942_v22 = vld [vmem:[#allocation31_spill] sm:$0xff] }
 0x4d3   : > { %v11960_v56 = vrot.slane %v21917_v7, 7  ;;  %v21923_v58 = vunpack.c.l.b16 %v21922_v62  ;;  %v11955_v11 = vsel %vm6778_vm8, %v11954_v31, %v11953_v23  ;;  %v21925_v50 = vunpack.c.l.b16 %v21924_v1  ;;  %v21940_v7 = vld [vmem:[#allocation55_spill] sm:$0xff] }
 0x4d4   : > { %v11962_v33 = vrot.slane %v21919_v42, 6  ;;  %v11964_v8 = vrot.slane %v21921_v0, 5  ;;  %v21927_v14 = vunpack.c.l.b16 %v21926_v61  ;;  %v21929_v4 = vunpack.c.l.b16 %v21928_v9  ;;  %v21946_v61 = vld [vmem:[#allocation30_spill] sm:$0xff]  ;;  %v21948_v9 = vld [vmem:[#allocation37_spill] sm:$0xff] }
 0x4d5   : > { %v11966_v5 = vrot.slane %v21923_v58, 4  ;;  %v11961_v44 = vsel %vm6766_vm13, %v11960_v56, %v21925_v50  ;;  %v11957_v13 = vsel %vm6781_vm1, %v11956_v10, %v11955_v11  ;;  %v11972_v52 = vrot.slane %v11939_v60, 1  ;;  %v21944_v11 = vld [vmem:[#allocation32_spill] sm:$0xff] }
 0x4d6   : > { %v11968_v54 = vrot.slane %v21927_v14, 3  ;;  %v11970_v51 = vrot.slane %v21929_v4, 2  ;;  %v11963_v21 = vsel %vm6769_vm3, %v11962_v33, %v11961_v44  ;;  %v11860_v2 = vrot.slane %v20003_v57, %v17250_v26 }
 0x4d7   : > { %v11959_v28 = vsel %vm6784_vm10, %v11958_v49, %v11957_v13  ;;  %v11965_v59 = vsel %vm6772_vm11, %v11964_v8, %v11963_v21  ;;  %v11874_v39 = vrot.slane %v20008_v3, %v17250_v26  ;;  %v21931_v53 = vunpack.c.l.b16 %v21930_v30  ;;  %v21950_v13 = vld [vmem:[#allocation38_spill] sm:$0xff]  ;;  %v21954_v30 = vld [vmem:[#allocation43_spill] sm:$0xff] }
 0x4d8   : > { %v11967_v17 = vsel %vm6775_vm4, %v11966_v5, %v11965_v59  ;;  %v11867_v48 = vrot.slane %v11860_v2, %v17250_v26  ;;  %v21933_v38 = vunpack.c.l.b16 %v21932_v18  ;;  %v21935_v19 = vunpack.c.l.b16 %v21934_v46 }
 0x4d9   : > { %v11974_v12 = vrot.slane %v21931_v53, 7  ;;  %v11969_v43 = vsel %vm6778_vm8, %v11968_v54, %v11967_v17  ;;  %v11881_v55 = vrot.slane %v11874_v39, %v17250_v26  ;;  %v21937_v31 = vunpack.c.l.b16 %v21936_v34  ;;  %v21956_v17 = vld [vmem:[#allocation44_spill] sm:$0xff] }
 0x4da   : > { %v11976_v60 = vrot.slane %v21933_v38, 6  ;;  %v11978_v57 = vrot.slane %v21935_v19, 5  ;;  %v21939_v40 = vunpack.c.l.b16 %v21938_v41  ;;  %v11971_v10 = vsel %vm6781_vm1, %v11970_v51, %v11969_v43  ;;  %v21958_v34 = vld [vmem:[#allocation76_spill] sm:$0xff] }
 0x4db   : > { %v11975_v3 = vsel %vm6766_vm13, %v11974_v12, %v21937_v31  ;;  %v11940_v49 = vunpack.c.l.b16 %v11867_v48  ;;  %v21941_v56 = vunpack.c.l.b16 %v21940_v7  ;;  %v11973_v35 = vsel %vm6784_vm10, %v11972_v52, %v11971_v10 }
 0x4dc   : > { %v11980_v45 = vrot.slane %v21939_v40, 4  ;;  %v11977_v16 = vsel %vm6769_vm3, %v11976_v60, %v11975_v3  ;;  %v11941_v42 = vunpack.c.l.b16 %v11881_v55  ;;  %v21943_v0 = vunpack.c.l.b16 %v21942_v22  ;;  %v21960_v40 = vld [vmem:[#allocation77_spill] sm:$0xff] }
 0x4dd   : > { %v11982_v23 = vrot.slane %v21941_v56, 3  ;;  %v11979_v33 = vsel %vm6772_vm11, %v11978_v57, %v11977_v16  ;;  %v12058_v62 = vpack.c.b16 %v11973_v35, %v11959_v28  ;;  %v11986_v5 = vrot.slane %v11940_v49, 1  ;;  %v21952_v28 = vld [vmem:[#allocation35_spill] sm:$0xff]  ;;  %v21962_v49 = vld [vmem:[#allocation78_spill] sm:$0xff] }
 0x4de   : > { %v11984_v8 = vrot.slane %v21943_v0, 2  ;;  %v11981_v58 = vsel %vm6775_vm4, %v11980_v45, %v11979_v33  ;;  %v21945_v1 = vunpack.c.l.b16 %v21944_v11  ;;  %v21947_v14 = vunpack.c.l.b16 %v21946_v61  ;;  %v21970_v11 = vld [vmem:[#allocation81_spill] sm:$0xff] }
 0x4df   : > { %v11983_v44 = vsel %vm6778_vm8, %v11982_v23, %v11981_v58  ;;  %v21949_v4 = vunpack.c.l.b16 %v21948_v9  ;;  %v21951_v21 = vunpack.c.l.b16 %v21950_v13  ;;  %14883 = vmatprep.mubr.msk.bf16.mxu1 %vm6888_vm15, %v12058_v62  ;;  %v21953_v59 = vunpack.c.l.b16 %v21952_v28  ;;  %v21968_v62 = vld [vmem:[#allocation80_spill] sm:$0xff] }
 0x4e0   : > { %v11988_v50 = vrot.slane %v21945_v1, 7  ;;  %v11990_v54 = vrot.slane %v21947_v14, 6  ;;  %v11985_v2 = vsel %vm6781_vm1, %v11984_v8, %v11983_v44  ;;  %v21955_v53 = vunpack.c.l.b16 %v21954_v30  ;;  %v21976_v30 = vld [vmem:[#allocation85_spill] sm:$0xff] }
 0x4e1   : > { %v11992_v51 = vrot.slane %v21949_v4, 5  ;;  %v11994_v52 = vrot.slane %v21951_v21, 4  ;;  %v21957_v48 = vunpack.c.l.b16 %v21956_v17  ;;  %v11987_v38 = vsel %vm6784_vm10, %v11986_v5, %v11985_v2  ;;  %v21978_v17 = vld [vmem:[#allocation86_spill] sm:$0xff] }
 0x4e2   : > { %v11989_v39 = vsel %vm6766_vm13, %v11988_v50, %v21953_v59  ;;  %v11996_v12 = vrot.slane %v21955_v53, 3  ;;  %v12000_v46 = vrot.slane %v11941_v42, 1  ;;  %v12353_v19 = vsel %vm6901_vm7, %v20160_v63, 0  ;;  %v21964_v63 = vld [vmem:[#allocation79_spill] sm:$0xff] }
 0x4e3   : > { %v11998_v18 = vrot.slane %v21957_v48, 2  ;;  %v11991_v60 = vsel %vm6769_vm3, %v11990_v54, %v11989_v39  ;;  %v11888_v43 = vrot.slane %v20125_v6, %v17250_v26  ;;  %v11902_v55 = vrot.slane %v20128_v15, %v17250_v26  ;;  %v21966_v42 = vld [vmem:[#allocation75_spill] sm:$0xff] }
 0x4e4   : > { %v11993_v57 = vsel %vm6772_vm11, %v11992_v51, %v11991_v60  ;;  %v21959_v31 = vunpack.c.l.b16 %v21958_v34  ;;  %v21961_v45 = vunpack.c.l.b16 %v21960_v40  ;;  %v21963_v16 = vunpack.c.l.b16 %v21962_v49  ;;  %v21972_v51 = vld [vmem:[#allocation83_spill] sm:$0xff] }
 0x4e5   : > { %v11995_v41 = vsel %vm6775_vm4, %v11994_v52, %v11993_v57  ;;  %v21965_v56 = vunpack.c.l.b16 %v21964_v63  ;;  %v11895_v6 = vrot.slane %v11888_v43, %v17250_v26  ;;  %v11909_v15 = vrot.slane %v11902_v55, %v17250_v26  ;;  %v21974_v52 = vld [vmem:[#allocation84_spill] sm:$0xff]  ;;  %v21982_v55 = vld [vmem:[#allocation87_spill] sm:$0xff] }
 0x4e6   : > { %v12002_v3 = vrot.slane %v21959_v31, 7  ;;  %v12004_v10 = vrot.slane %v21961_v45, 6  ;;  %v12006_v7 = vrot.slane %v21963_v16, 5  ;;  %v11997_v35 = vsel %vm6778_vm8, %v11996_v12, %v11995_v41 }
 0x4e7   : > { %v12008_v23 = vrot.slane %v21965_v56, 4  ;;  %v21967_v33 = vunpack.c.l.b16 %v21966_v42  ;;  %v11999_v0 = vsel %vm6781_vm1, %v11998_v18, %v11997_v35  ;;  %v21969_v58 = vunpack.c.l.b16 %v21968_v62  ;;  %v21986_v56 = vld [vmem:[#allocation105_spill] sm:$0xff] }
 0x4e8   : > { %v21971_v1 = vunpack.c.l.b16 %v21970_v11  ;;  %v12001_v44 = vsel %vm6784_vm10, %v12000_v46, %v11999_v0  ;;  %v11942_v61 = vunpack.c.l.b16 %v11895_v6  ;;  %v11943_v14 = vunpack.c.l.b16 %v11909_v15  ;;  %v21980_v46 = vld [vmem:[#allocation82_spill] sm:$0xff]  ;;  %v21988_v6 = vld [vmem:[#allocation107_spill] sm:$0xff]  ;;  %v21994_v11 = vld [vmem:[#allocation104_spill] sm:$0xff] }
 0x4e9   : > { %v12003_v22 = vsel %vm6766_vm13, %v12002_v3, %v21967_v33  ;;  %v12010_v5 = vrot.slane %v21969_v58, 3  ;;  %v12059_v9 = vpack.c.b16 %v12001_v44, %v11987_v38  ;;  %v21973_v13 = vunpack.c.l.b16 %v21972_v51  ;;  %v14235_v38 = vld [vmem:[%s21110_s7 + $0x1c] sm:$0xf]  ;;  %v21996_v44 = vld [vmem:[#allocation110_spill] sm:$0xff]  ;;  %v21998_v51 = vld [vmem:[#allocation111_spill] sm:$0xff] }
 0x4ea   : > { %v12005_v8 = vsel %vm6769_vm3, %v12004_v10, %v12003_v22  ;;  %v12012_v50 = vrot.slane %v21971_v1, 2  ;;  %v21975_v2 = vunpack.c.l.b16 %v21974_v52  ;;  %v12014_v39 = vrot.slane %v11942_v61, 1  ;;  %v21984_v3 = vld [vmem:[#allocation88_spill] sm:$0xff] }
 0x4eb   : > { %v12007_v54 = vsel %vm6772_vm11, %v12006_v7, %v12005_v8  ;;  %v12016_v21 = vrot.slane %v21973_v13, 7  ;;  %v21977_v53 = vunpack.c.l.b16 %v21976_v30  ;;  %v21979_v48 = vunpack.c.l.b16 %v21978_v17  ;;  %14884 = vmatmul.mubr.msk.bf16.vlgmr.msra.gmra.mrb[32].mxu1 %vm6888_vm15, %v12059_v9  ;;  %v21990_v22 = vld [vmem:[#allocation108_spill] sm:$0xff]  ;;  %v21992_v8 = vld [vmem:[#allocation109_spill] sm:$0xff] }
 0x4ec   : > { %v12009_v4 = vsel %vm6775_vm4, %v12008_v23, %v12007_v54  ;;  %v12018_v28 = vrot.slane %v21975_v2, 6  ;;  %v21981_v57 = vunpack.c.l.b16 %v21980_v46  ;;  %v21983_v34 = vunpack.c.l.b16 %v21982_v55  ;;  %14892 = vmatpush3.bf16.msra.mxu1 %v12353_v19 }
 0x4ed   : > { %v12011_v59 = vsel %vm6778_vm8, %v12010_v5, %v12009_v4  ;;  %v12020_v12 = vrot.slane %v21977_v53, 5  ;;  %v12022_v18 = vrot.slane %v21979_v48, 4  ;;  %v21985_v41 = vunpack.c.l.b16 %v21984_v3  ;;  %15294 = vmatprep.subr.msk.bf16.mxu1 %vm6901_vm7, %v14235_v38 }
 0x4ee   : > { %v12013_v60 = vsel %vm6781_vm1, %v12012_v50, %v12011_v59  ;;  %v12017_v43 = vsel %vm6766_vm13, %v12016_v21, %v21981_v57  ;;  %v12024_v31 = vrot.slane %v21983_v34, 3  ;;  %v12028_v49 = vrot.slane %v11943_v14, 1 }
 0x4ef   : > { %v12026_v40 = vrot.slane %v21985_v41, 2  ;;  %v12015_v45 = vsel %vm6784_vm10, %v12014_v39, %v12013_v60  ;;  %v12019_v10 = vsel %vm6769_vm3, %v12018_v28, %v12017_v43  ;;  %v11916_v16 = vrot.slane %v20247_v27, %v17250_v26  ;;  %v22002_v60 = vld [vmem:[#allocation112_spill] sm:$0xff] }
 0x4f0   : > { %v12021_v7 = vsel %vm6772_vm11, %v12020_v12, %v12019_v10  ;;  %v11930_v63 = vrot.slane %v20252_v36, %v17250_v26  ;;  %v21987_v23 = vunpack.c.l.b16 %v21986_v56  ;;  %v21989_v15 = vunpack.c.l.b16 %v21988_v6  ;;  %v22011_v6 = vld [vmem:[#allocation48_spill] sm:$0xff] }
 0x4f1   : > { %v12023_v19 = vsel %vm6775_vm4, %v12022_v18, %v12021_v7  ;;  %v11923_v33 = vrot.slane %v11916_v16, %v17250_v26  ;;  %v21991_v0 = vunpack.c.l.b16 %v21990_v22  ;;  %v21993_v62 = vunpack.c.l.b16 %v21992_v8  ;;  %v22008_v7 = vld [vmem:[#allocation16_spill] sm:$0xff] }
 0x4f2   : > { %v12030_v35 = vrot.slane %v21987_v23, 7  ;;  %v12032_v42 = vrot.slane %v21989_v15, 6  ;;  %v12025_v36 = vsel %vm6778_vm8, %v12024_v31, %v12023_v19  ;;  %v11937_v5 = vrot.slane %v11930_v63, %v17250_v26  ;;  %v14219_v31 = vld.sshfl [vmem:[#allocation3 + $0xc0] sm:$0x33 pattern:$0x75316420] }
 0x4f3   : > { %v12034_v27 = vrot.slane %v21991_v0, 5  ;;  %v12036_v58 = vrot.slane %v21993_v62, 4  ;;  %v21995_v1 = vunpack.c.l.b16 %v21994_v11  ;;  %v21997_v61 = vunpack.c.l.b16 %v21996_v44  ;;  %v22009_v63 = vld [vmem:[#allocation18_spill] sm:$0xff]  ;;  %v20574_v23 = vld [vmem:[%s21110_s7 + $0x20] sm:$0xf]  ;;  %v22012_v62 = vld [vmem:[#allocation12_spill] sm:$0xff] }
 0x4f4   : > { %v12027_v54 = vsel %vm6781_vm1, %v12026_v40, %v12025_v36  ;;  %v11944_v9 = vunpack.c.l.b16 %v11923_v33  ;;  %v21999_v13 = vunpack.c.l.b16 %v21998_v51  ;;  %v11945_v2 = vunpack.c.l.b16 %v11937_v5 }
 0x4f5   : > { %v12031_v50 = vsel %vm6766_vm13, %v12030_v35, %v21995_v1  ;;  %v12038_v14 = vrot.slane %v21997_v61, 3  ;;  %v12029_v52 = vsel %vm6784_vm10, %v12028_v49, %v12027_v54  ;;  %v22000_v59 = vunpack.c.l.b16 %v19815_v37  ;;  %v14220_v49 = vld.sshfl [vmem:[#allocation3 + $0xc4] sm:$0x33 pattern:$0x75316420] }
 0x4f6   : > { %v12033_v4 = vsel %vm6769_vm3, %v12032_v42, %v12031_v50  ;;  %v12040_v21 = vrot.slane %v21999_v13, 2  ;;  %v12060_v30 = vpack.c.b16 %v12029_v52, %v12015_v45  ;;  %v12042_v12 = vrot.slane %v11944_v9, 1 }
 0x4f7   : > { %v12035_v28 = vsel %vm6772_vm11, %v12034_v27, %v12033_v4  ;;  %v12044_v39 = vrot.slane %v22000_v59, 7  ;;  %v22001_v17 = vunpack.c.l.b16 %v19818_v24  ;;  %v22003_v46 = vunpack.c.l.b16 %v22002_v60 }
 0x4f8   : > { %v12037_v53 = vsel %vm6775_vm4, %v12036_v58, %v12035_v28  ;;  %v22004_v43 = vunpack.c.l.b16 %v19825_v32  ;;  %v22005_v34 = vunpack.c.l.b16 %v19831_v20  ;;  %14887 = vmatprep.mubr.msk.bf16.mxu1 %vm6888_vm15, %v12060_v30  ;;  %v22006_v41 = vunpack.c.l.b16 %v19834_v29 }
 0x4f9   : > { %v12046_v48 = vrot.slane %v22001_v17, 6  ;;  %v12039_v18 = vsel %vm6778_vm8, %v12038_v14, %v12037_v53  ;;  %v12045_v57 = vsel %vm6766_vm13, %v12044_v39, %v22003_v46  ;;  %v22007_v45 = vunpack.c.l.b16 %v19839_v25  ;;  %v22010_v25 = vld [vmem:[#allocation39_spill] sm:$0xff] }
 0x4fa   : > { %v12048_v55 = vrot.slane %v22004_v43, 5  ;;  %v12050_v37 = vrot.slane %v22005_v34, 4  ;;  %v12041_v3 = vsel %vm6781_vm1, %v12040_v21, %v12039_v18  ;;  %v12052_v40 = vrot.slane %v22006_v41, 3 }
 0x4fb   : > { %v12047_v24 = vsel %vm6769_vm3, %v12046_v48, %v12045_v57  ;;  %v12054_v10 = vrot.slane %v22007_v45, 2  ;;  %v12043_v32 = vsel %vm6784_vm10, %v12042_v12, %v12041_v3  ;;  %v12056_v20 = vrot.slane %v11945_v2, 1  ;;  %v22014_v3 = vld [vmem:[#allocation47_spill] sm:$0xff] }
 0x4fc   : > { %v12049_v16 = vsel %vm6772_vm11, %v12048_v55, %v12047_v24  ;;  %v12336_v56 = vpack.c.b16 %v22009_v63, %v22008_v7  ;;  %v12661_v35 = vsel %vm6901_vm7, %v14235_v38, 0  ;;  %v12338_v15 = vpack.c.b16 %v22011_v6, %v22010_v25  ;;  %v22013_v38 = vld [vmem:[#allocation11_spill] sm:$0xff]  ;;  %v14226_v55 = vld.sshfl [vmem:[#allocation3 + $0xc8] sm:$0x1 pattern:$0x75316420] }
 0x4fd   : > { %v12051_v29 = vsel %vm6775_vm4, %v12050_v37, %v12049_v16  ;;  %v12159_v42 = vcombine.high %v14219_v31, %v14219_v31  ;;  %v20582_v33 = vrot.slane %v14219_v31, %v17250_v26  ;;  %v12183_v22 = vcombine.high %v14220_v49, %v14220_v49  ;;  %v22015_v24 = vld [vmem:[#allocation23_spill] sm:$0xff] }
 0x4fe   : > { %v12053_v19 = vsel %vm6778_vm8, %v12052_v40, %v12051_v29  ;;  %v20585_v0 = vrot.slane %v14220_v49, %v17250_v26  ;;  %v12644_v58 = vpack.c.b16 %v22013_v38, %v22012_v62  ;;  %v20595_v36 = vsel %vm6901_vm7, %v20574_v23, 0 }
 0x4ff   : > { %v12055_v27 = vsel %vm6781_vm1, %v12054_v10, %v12053_v19  ;;  %v20589_v8 = vrot.slane %v12159_v42, %v17250_v26  ;;  %v20600_v11 = vcombine.high %v20582_v33, %v20582_v33  ;;  %v20603_v1 = vrot.slane %v12183_v22, %v17250_v26  ;;  %v22016_v19 = vld [vmem:[#allocation34_spill] sm:$0xff]  ;;  %v22017_v22 = vld [vmem:[#allocation25_spill] sm:$0xff] }
 0x500   : > { %v12057_v5 = vsel %vm6784_vm10, %v12056_v20, %v12055_v27  ;;  %v20607_v50 = vcombine.high %v20585_v0, %v20585_v0  ;;  %v12208_v14 = vrot.slane %v20582_v33, %v17250_v26  ;;  %v12264_v51 = vrot.slane %v20585_v0, %v17250_v26 }
 0x501   : > { %v12061_v44 = vpack.c.b16 %v12057_v5, %v12043_v32  ;;  %v20611_v61 = vcombine.high %v20589_v8, %v20589_v8  ;;  %v12222_v54 = vrot.slane %v20589_v8, %v17250_v26  ;;  %v20619_v9 = vcombine.high %v20603_v1, %v20603_v1 }
 0x502   : > { %v12236_v4 = vrot.slane %v20600_v11, %v17250_v26  ;;  %v12278_v13 = vrot.slane %v20603_v1, %v17250_v26  ;;  %v12215_v21 = vrot.slane %v12208_v14, %v17250_v26  ;;  %v12292_v28 = vrot.slane %v20607_v50, %v17250_v26 }
 0x503   : > { %14888 = vmatmul.mubr.msk.bf16.gmra.mrb[36].mxu1 %vm6888_vm15, %v12061_v44  ;;  %v20630_v52 = vrot.slane %v12222_v54, %v17250_v26  ;;  %v12250_v2 = vrot.slane %v20611_v61, %v17250_v26  ;;  %v20641_v39 = vrot.slane %v12264_v51, %v17250_v26  ;;  %v12306_v53 = vrot.slane %v20619_v9, %v17250_v26 }
 0x504   : > { %14893 = vmatprep.mubr.msk.bf16.mxu1 %vm6888_vm15, %v12336_v56  ;;  %v20638_v59 = vrot.slane %v12236_v4, %v17250_v26  ;;  %v20644_v30 = vrot.slane %v12278_v13, %v17250_v26  ;;  %v20652_v17 = vrot.slane %v12292_v28, %v17250_v26  ;;  %v12314_v48 = vunpack.c.l.b16 %v12215_v21 }
 0x505   : > { %v20649_v12 = vrot.slane %v12250_v2, %v17250_v26  ;;  %v12315_v18 = vunpack.c.l.b16 %v20630_v52  ;;  %v20656_v60 = vrot.slane %v12306_v53, %v17250_v26  ;;  %v12318_v57 = vunpack.c.l.b16 %v20641_v39 }
 0x506   : > { %v12316_v46 = vunpack.c.l.b16 %v20638_v59  ;;  %v12319_v43 = vunpack.c.l.b16 %v20644_v30  ;;  %v12320_v37 = vunpack.c.l.b16 %v20652_v17  ;;  %v12646_v41 = vpack.c.b16 %v22015_v24, %v22014_v3  ;;  %v15388_v24 = vld [vmem:[%s15616_s24 + $0x8] sm:$0xff] }
 0x507   : > { %v12317_v34 = vunpack.c.l.b16 %v20649_v12  ;;  %v12322_v31 = vrot.slane %v12315_v18, 7  ;;  %v12321_v40 = vunpack.c.l.b16 %v20656_v60  ;;  %v12328_v10 = vrot.slane %v12318_v57, 4 }
 0x508   : > { %v12324_v45 = vrot.slane %v12316_v46, 6  ;;  %v12330_v49 = vrot.slane %v12319_v43, 3  ;;  %v12332_v20 = vrot.slane %v12320_v37, 2  ;;  %v20680_v7 = vrot.slane %v14226_v55, %v17250_v26 }
 0x509   : > { %v12323_v32 = vsel %vm6766_vm13, %v12322_v31, %v12314_v48  ;;  %v12326_v16 = vrot.slane %v12317_v34, 5  ;;  %v12334_v56 = vrot.slane %v12321_v40, 1  ;;  %v12444_v29 = vshrl.u32 %v20582_v33, 16  ;;  %v22019_v48 = vld [vmem:[#allocation41_spill] sm:$0xff] }
 0x50a   : > { %v12325_v63 = vsel %vm6769_vm3, %v12324_v45, %v12323_v32  ;;  %v12449_v42 = vshll.u32 %v20589_v8, 16  ;;  %v22018_v27 = vpack.c.b16 %v22016_v19, %v22017_v22  ;;  %v12452_v44 = vshrl.u32 %v20589_v8, 16 }
 0x50b   : > { %v12327_v5 = vsel %vm6772_vm11, %v12326_v16, %v12325_v63  ;;  %v12457_v14 = vshll.u32 %v20600_v11, 16  ;;  %v12460_v54 = vshrl.u32 %v20600_v11, 16  ;;  %v12465_v51 = vshll.u32 %v20611_v61, 16 }
 0x50c   : > { %14894 = vmatmul.mubr.msk.bf16.vlgmr.msra.gmra.mrb[32].mxu1 %vm6888_vm15, %v22018_v27  ;;  %v12329_v33 = vsel %vm6775_vm4, %v12328_v10, %v12327_v5  ;;  %v12451_v4 = vsel %vm17272_vm14, %v12444_v29, %v12449_v42  ;;  %v12468_v13 = vshrl.u32 %v20611_v61, 16  ;;  %v12473_v25 = vshll.u32 %v20585_v0, 16 }
 0x50d   : > { %14902 = vmatpush3.bf16.msra.mxu1 %v12661_v35  ;;  %14897 = vmatprep.mubr.msk.bf16.mxu1 %vm6888_vm15, %v12338_v15  ;;  %v12331_v8 = vsel %vm6778_vm8, %v12330_v49, %v12329_v33  ;;  %v12459_v35 = vsel %vm17272_vm14, %v12452_v44, %v12457_v14  ;;  %v12476_v6 = vshrl.u32 %v20585_v0, 16  ;;  %v12467_v11 = vsel %vm17272_vm14, %v12460_v54, %v12465_v51 }
 0x50e   : > { %15295 = vmatprep.subr.msk.bf16.mxu1 %vm6901_vm7, %v20574_v23  ;;  %v12333_v15 = vsel %vm6781_vm1, %v12332_v20, %v12331_v8  ;;  %v12481_v21 = vshll.u32 %v20603_v1, 16  ;;  %v12484_v61 = vshrl.u32 %v20603_v1, 16  ;;  %v12475_v23 = vsel %vm17272_vm14, %v12468_v13, %v12473_v25  ;;  %v22021_v25 = vld [vmem:[#allocation46_spill] sm:$0xff] }
 0x50f   : > { %v12335_v2 = vsel %vm6784_vm10, %v12334_v56, %v12333_v15  ;;  %v12489_v28 = vshll.u32 %v20607_v50, 16  ;;  %v12492_v53 = vshrl.u32 %v20607_v50, 16  ;;  %v12497_v31 = vshll.u32 %v20619_v9, 16 }
 0x510   : > { %v12339_v0 = vpack.c.b16 %v12335_v2, %v22019_v48  ;;  %v12483_v55 = vsel %vm17272_vm14, %v12476_v6, %v12481_v21  ;;  %v12500_v45 = vshrl.u32 %v20619_v9, 16  ;;  %v12505_v10 = vshll.u32 %v20680_v7, 16 }
 0x511   : > { %v12491_v1 = vsel %vm17272_vm14, %v12484_v61, %v12489_v28  ;;  %v12516_v49 = vrot.slane %v12451_v4, %v17250_v26  ;;  %v12530_v32 = vrot.slane %v12459_v35, %v17250_v26  ;;  %v12499_v50 = vsel %vm17272_vm14, %v12492_v53, %v12497_v31  ;;  %v22020_v35 = vld [vmem:[#allocation45_spill] sm:$0xff] }
 0x512   : > { %v12544_v16 = vrot.slane %v12467_v11, %v17250_v26  ;;  %v12558_v20 = vrot.slane %v12475_v23, %v17250_v26  ;;  %v12572_v63 = vrot.slane %v12483_v55, %v17250_v26  ;;  %v12507_v9 = vsel %vm17272_vm14, %v12500_v45, %v12505_v10  ;;  %v22022_v55 = vld [vmem:[#allocation52_spill] sm:$0xff]  ;;  %v22023_v31 = vld [vmem:[#allocation53_spill] sm:$0xff]  ;;  %v22024_v10 = vld [vmem:[#allocation42_spill] sm:$0xff] }
 0x513   : > { %v12523_v56 = vrot.slane %v12516_v49, %v17250_v26  ;;  %v12537_v29 = vrot.slane %v12530_v32, %v17250_v26  ;;  %v12586_v42 = vrot.slane %v12491_v1, %v17250_v26  ;;  %v12600_v47 = vrot.slane %v12499_v50, %v17250_v26  ;;  %v22025_v49 = vld [vmem:[#allocation9_spill] sm:$0xff] }
 0x514   : > { %14898 = vmatmul.mubr.msk.bf16.gmra.mrb[36].mxu1 %vm6888_vm15, %v12339_v0  ;;  %v12551_v19 = vrot.slane %v12544_v16, %v17250_v26  ;;  %v12565_v22 = vrot.slane %v12558_v20, %v17250_v26  ;;  %v12579_v27 = vrot.slane %v12572_v63, %v17250_v26  ;;  %v12614_v44 = vrot.slane %v12507_v9, %v17250_v26 }
 0x515   : > { %14903 = vmatprep.mubr.msk.bf16.mxu1 %vm6888_vm15, %v12644_v58  ;;  %v12593_v5 = vrot.slane %v12586_v42, %v17250_v26  ;;  %v12622_v14 = vunpack.c.l.b16 %v12523_v56  ;;  %v12623_v54 = vunpack.c.l.b16 %v12537_v29  ;;  %v12607_v33 = vrot.slane %v12600_v47, %v17250_v26  ;;  %v13290_v58 = vld [vmem:[%s21112_s9] sm:$0x3] }
 0x516   : > { %v12624_v4 = vunpack.c.l.b16 %v12551_v19  ;;  %v12625_v62 = vunpack.c.l.b16 %v12565_v22  ;;  %v12626_v38 = vunpack.c.l.b16 %v12579_v27  ;;  %v12621_v51 = vrot.slane %v12614_v44, %v17250_v26  ;;  %v15389_v19 = vld [vmem:[%s15616_s24 + $0x20] sm:$0xff]  ;;  %v15390_v27 = vld [vmem:[%s15616_s24 + $0x28] sm:$0xff] }
 0x517   : > { %v12627_v13 = vunpack.c.l.b16 %v12593_v5  ;;  %v12630_v8 = vrot.slane %v12623_v54, 7  ;;  %v12767_v6 = vpack.c.b16 %v22021_v25, %v22020_v35  ;;  %v12628_v15 = vunpack.c.l.b16 %v12607_v33  ;;  %v20809_v5 = vld [vmem:[%s15616_s24 + $0x40] sm:$0xff]  ;;  %v20815_v33 = vld [vmem:[%s15616_s24 + $0x48] sm:$0xff] }
 0x518   : > { %v12632_v11 = vrot.slane %v12624_v4, 6  ;;  %v12634_v21 = vrot.slane %v12625_v62, 5  ;;  %v12636_v61 = vrot.slane %v12626_v38, 4  ;;  %v12629_v2 = vunpack.c.l.b16 %v12621_v51  ;;  %v20820_v62 = vld [vmem:[%s15616_s24 + $0x60] sm:$0xff]  ;;  %v20829_v51 = vld [vmem:[%s15616_s24 + $0x68] sm:$0xff] }
 0x519   : > { %v12631_v23 = vsel %vm6766_vm13, %v12630_v8, %v12622_v14  ;;  %v12638_v28 = vrot.slane %v12627_v13, 3  ;;  %v20761_v53 = vsel %vm1844_vm0, %v13290_v58, 0  ;;  %v12640_v0 = vrot.slane %v12628_v15, 2  ;;  %v20834_v8 = vld [vmem:[%s15616_s24 + $0x80] sm:$0xff]  ;;  %v20868_v25 = vld [vmem:[%s15616_s24 + $0xc8] sm:$0xff] }
 0x51a   : > { %v12633_v48 = vsel %vm6769_vm3, %v12632_v11, %v12631_v23  ;;  %v12769_v45 = vpack.c.b16 %v22023_v31, %v22022_v55  ;;  %v12744_v1 = vrot.slane %v20680_v7, %v17250_v26  ;;  %v22026_v32 = vpack.c.b16 %v22024_v10, %v22025_v49  ;;  %v20839_v11 = vld [vmem:[%s15616_s24 + $0x88] sm:$0xff]  ;;  %v20863_v49 = vld [vmem:[%s15616_s24 + $0xc0] sm:$0xff] }
 0x51b   : > { %v12635_v50 = vsel %vm6772_vm11, %v12634_v21, %v12633_v48  ;;  %v12642_v16 = vrot.slane %v12629_v2, 1  ;;  %v12753_v20 = vrot.slane %v12316_v46, 7  ;;  %v12755_v63 = vrot.slane %v12317_v34, 6  ;;  %v22029_v23 = vld [vmem:[#allocation14_spill] sm:$0xff]  ;;  %v20853_v48 = vld [vmem:[%s15616_s24 + $0xa0] sm:$0xff] }
 0x51c   : > { %14904 = vmatmul.mubr.msk.bf16.vlgmr.msra.gmra.mrb[32].mxu1 %vm6888_vm15, %v22026_v32  ;;  %v12637_v7 = vsel %vm6775_vm4, %v12636_v61, %v12635_v50  ;;  %v12751_v9 = vrot.slane %v12744_v1, %v17250_v26  ;;  %v12757_v59 = vrot.slane %v12318_v57, 5  ;;  %v12759_v12 = vrot.slane %v12319_v43, 4  ;;  %v15387_v43 = vld [vmem:[%s15616_s24] sm:$0xff]  ;;  %v22028_v61 = vld [vmem:[#allocation58_spill] sm:$0xff] }
 0x51d   : > { %14912 = vmatpush3.bf16.msra.mxu1 %v20595_v36  ;;  %14907 = vmatprep.mubr.msk.bf16.mxu1 %vm6888_vm15, %v12646_v41  ;;  %v12639_v46 = vsel %vm6778_vm8, %v12638_v28, %v12637_v7  ;;  %v12754_v36 = vsel %vm6766_vm13, %v12753_v20, %v12315_v18  ;;  %v12761_v34 = vrot.slane %v12320_v37, 3  ;;  %v12763_v26 = vrot.slane %v12321_v40, 2  ;;  %v22027_v37 = vld [vmem:[#allocation21_spill] sm:$0xff]  ;;  %v20858_v1 = vld [vmem:[%s15616_s24 + $0xa8] sm:$0xff] }
 0x51e   : > { %15296 = vmatprep.subr.msk.bf16.mxu1 %vm1844_vm0, %v13290_v58  ;;  %v12641_v39 = vsel %vm6781_vm1, %v12640_v0, %v12639_v46  ;;  %v12752_v57 = vunpack.c.l.b16 %v12751_v9  ;;  %v12756_v30 = vsel %vm6769_vm3, %v12755_v63, %v12754_v36  ;;  %v12890_v3 = vcombine.high %v15387_v43, %v15387_v43  ;;  %v20873_v32 = vld [vmem:[%s15616_s24 + $0xe0] sm:$0xff] }
 0x51f   : > { %v12643_v52 = vsel %vm6784_vm10, %v12642_v16, %v12641_v39  ;;  %v12758_v18 = vsel %vm6772_vm11, %v12757_v59, %v12756_v30  ;;  %v12907_v17 = vcombine.high %v15388_v24, %v15388_v24  ;;  %v15469_v56 = vmov 1983009808   ;;  %v20878_v16 = vld [vmem:[%s15616_s24 + $0xe8] sm:$0xff]  ;;  %s377_s24 = sand.u32 1, %s15457_s18  }
 0x520   : > { %v12647_v60 = vpack.c.b16 %v12643_v52, %v22027_v37  ;;  %v12760_v41 = vsel %vm6775_vm4, %v12759_v12, %v12758_v18  ;;  %v12765_v40 = vrot.slane %v12752_v57, 1  ;;  %v12892_v29 = vunpack.c.l.s4 %v15469_v56  ;;  %s13718_s29 = sshll.u32 %s377_s24, 6  ;;  %s21062_s21 = scalar_lea.sflag [#allocation5], %s377_s24 }
 0x521   : > { %v12762_v42 = vsel %vm6778_vm8, %v12761_v34, %v12760_v41  ;;  %v12924_v22 = vcombine.high %v15389_v19, %v15389_v19  ;;  %v12941_v47 = vcombine.high %v15390_v27, %v15390_v27  ;;  %v12958_v44 = vcombine.high %v20809_v5, %v20809_v5  ;;  %v22030_v41 = vld [vmem:[#allocation49_spill] sm:$0xff]  ;;  %s379_s30 = scalar_lea.vmem [#allocation4], %s13718_s29  ;;  %s15407_s29 = sshll.u32 %s15470_s25, 4  ;;  %s15408_s29 = int_to_ptr.vmem [resolvable:$false] %s15407_s29 }
 0x522   : > { %v12764_v14 = vsel %vm6781_vm1, %v12763_v26, %v12762_v42  ;;  %v12893_v54 = vunpack.c.0.s8 %v12892_v29  ;;  %v12975_v4 = vcombine.high %v20815_v33, %v20815_v33  ;;  %v12992_v38 = vcombine.high %v20820_v62, %v20820_v62  ;;  %s13652_s13 = sshll.u32 %s379_s30, 4  ;;  %s15409_s12 = scalar_lea.vmem %s15408_s29, 2048  ;;  %s21055_s13 = int_to_ptr.vmem [resolvable:$true] %s13652_s13 }
 0x523   : > { %v20826_v58 = vsel %vm6784_vm10, %v12765_v40, %v12764_v14  ;;  %v13009_v13 = vcombine.high %v20829_v51, %v20829_v51  ;;  %v13026_v15 = vcombine.high %v20834_v8, %v20834_v8  ;;  %v13043_v21 = vcombine.high %v20839_v11, %v20839_v11  ;;  %v22031_v40 = vld [vmem:[#allocation50_spill] sm:$0xff]  ;;  %s15403_s22 = scalar_lea.vmem %s21055_s13, 1024  ;;  %p15410_p0 = scmp.lt.s32.totalorder %s21055_s13, %s15408_s29 }
 0x524   : > { %14908 = vmatmul.mubr.msk.bf16.gmra.mrb[36].mxu1 %vm6888_vm15, %v12647_v60  ;;  %v12770_v2 = vpack.c.b16 %v20826_v58, %v22028_v61  ;;  %v20850_v28 = vsub.s32 %v12893_v54, %v22029_v23  ;;  %v13060_v0 = vcombine.high %v20853_v48, %v20853_v48  ;;  %v13077_v10 = vcombine.high %v20858_v1, %v20858_v1  ;;  %p15404_p11 = scmp.ne.s32.totalorder %s21055_s13, %s15403_s22  ;;  %p15411_p1 = scmp.lt.s32.totalorder %s15409_s12, %s15403_s22 }
 0x525   : > { %14913 = vmatprep.mubr.msk.bf16.mxu1 %vm6888_vm15, %v12767_v6  ;;  %v13094_v35 = vcombine.high %v20863_v49, %v20863_v49  ;;  %v13111_v6 = vcombine.high %v20868_v25, %v20868_v25  ;;  %v13128_v50 = vcombine.high %v20873_v32, %v20873_v32  ;;  %v13145_v20 = vcombine.high %v20878_v16, %v20878_v16 }
 0x526   : > { %v12897_v63 = vrot.slane %v15387_v43, %v20850_v28  ;;  %v12904_v7 = vrot.slane %v12890_v3, %v20850_v28  ;;  %v12914_v9 = vrot.slane %v15388_v24, %v20850_v28  ;;  %v12921_v59 = vrot.slane %v12907_v17, %v20850_v28  ;;  %p15405_p12 = pnand %p15404_p11, %p15571_p5  ;;  %p15412_p2 = por %p15411_p1, %p15410_p0 }
 0x527   : > { %v12931_v12 = vrot.slane %v15389_v19, %v20850_v28  ;;  %v12938_v46 = vrot.slane %v12924_v22, %v20850_v28  ;;  %v12948_v36 = vrot.slane %v15390_v27, %v20850_v28  ;;  %v12955_v34 = vrot.slane %v12941_v47, %v20850_v28 }
 0x528   : > { %v12905_v26 = vcombine.high %v12897_v63, %v12897_v63  ;;  %v12906_v39 = vcombine.high %v12904_v7, %v12904_v7  ;;  %v12922_v57 = vcombine.high %v12914_v9, %v12914_v9  ;;  %v12923_v30 = vcombine.high %v12921_v59, %v12921_v59  ;;  %p15406_p13 = pneg %p15405_p12 }
 0x529   : > { %v12939_v52 = vcombine.high %v12931_v12, %v12931_v12  ;;  %v12940_v43 = vcombine.high %v12938_v46, %v12938_v46  ;;  %v12956_v18 = vcombine.high %v12948_v36, %v12948_v36  ;;  %v12957_v3 = vcombine.high %v12955_v34, %v12955_v34 }
 0x52a   : > { %v13226_v37 = vpack.c.bf16 %v12897_v63, %v12897_v63  ;;  %v13227_v24 = vpack.c.bf16 %v12905_v26, %v12905_v26  ;;  %v13228_v60 = vpack.c.bf16 %v12904_v7, %v12904_v7  ;;  %v13229_v17 = vpack.c.bf16 %v12906_v39, %v12906_v39  ;;  %p15413_p3 = pnand %p15412_p2, %p15406_p13 }
 0x52b   : > { %v22032_v56 = vpack.c.b16 %v22030_v41, %v22031_v40  ;;  %v13230_v29 = vpack.c.bf16 %v12914_v9, %v12914_v9  ;;  %v13231_v42 = vpack.c.bf16 %v12922_v57, %v12922_v57  ;;  %v13232_v19 = vpack.c.bf16 %v12921_v59, %v12921_v59 }
 0x52c   : > { %v13233_v22 = vpack.c.bf16 %v12923_v30, %v12923_v30  ;;  %v13234_v27 = vpack.c.bf16 %v12931_v12, %v12931_v12  ;;  %v13235_v47 = vpack.c.bf16 %v12939_v52, %v12939_v52  ;;  %v13236_v14 = vpack.c.bf16 %v12938_v46, %v12938_v46 }
 0x52d   : > { %14914 = vmatmul.mubr.msk.bf16.vlgmr.msra.gmra.mrb[32].mxu1 %vm6888_vm15, %v22032_v56  ;;  %v13362_v54 = vunpack.c.l.b16 %v13226_v37  ;;  %v13237_v23 = vpack.c.bf16 %v12940_v43, %v12940_v43  ;;  %v13238_v63 = vpack.c.bf16 %v12948_v36, %v12948_v36  ;;  %v13239_v7 = vpack.c.bf16 %v12956_v18, %v12956_v18 }
 0x52e   : > { %14922 = vmatpush3.bf16.msra.mxu1 %v20761_v53  ;;  %14917 = vmatprep.mubr.msk.bf16.mxu1 %vm6888_vm15, %v12769_v45  ;;  %v13240_v26 = vpack.c.bf16 %v12955_v34, %v12955_v34  ;;  %v13241_v39 = vpack.c.bf16 %v12957_v3, %v12957_v3  ;;  %v13363_v9 = vunpack.c.l.b16 %v13227_v24  ;;  %v13364_v57 = vunpack.c.l.b16 %v13228_v60 }
 0x52f   : > { %v13365_v59 = vunpack.c.l.b16 %v13229_v17  ;;  %v13366_v30 = vunpack.c.l.b16 %v13230_v29  ;;  %v13367_v41 = vunpack.c.l.b16 %v13231_v42  ;;  %v13368_v53 = vunpack.c.l.b16 %v13232_v19 }
 0x530   : > { %v13369_v40 = vunpack.c.l.b16 %v13233_v22  ;;  %v13370_v56 = vunpack.c.l.b16 %v13234_v27  ;;  %v13371_v55 = vunpack.c.l.b16 %v13235_v47  ;;  %v13372_v31 = vunpack.c.l.b16 %v13236_v14 }
 0x531   : > { %v13373_v45 = vunpack.c.l.b16 %v13237_v23  ;;  %v13374_v12 = vunpack.c.l.b16 %v13238_v63  ;;  %v13375_v52 = vunpack.c.l.b16 %v13239_v7  ;;  %v13376_v46 = vunpack.c.l.b16 %v13240_v26 }
 0x532   : > { %v13377_v37 = vunpack.c.l.b16 %v13241_v39  ;;  %v13426_v43 = vrot.slane %v13363_v9, 7  ;;  %v13428_v36 = vrot.slane %v13364_v57, 6  ;;  %v13430_v18 = vrot.slane %v13365_v59, 5 }
 0x533   : > { %v13432_v34 = vrot.slane %v13366_v30, 4  ;;  %v13434_v3 = vrot.slane %v13367_v41, 3  ;;  %v13436_v24 = vrot.slane %v13368_v53, 2  ;;  %v13438_v60 = vrot.slane %v13369_v40, 1 }
 0x534   : > { %v13440_v17 = vrot.slane %v13371_v55, 7  ;;  %v13427_v29 = vsel %vm6766_vm13, %v13426_v43, %v13362_v54  ;;  %v13442_v42 = vrot.slane %v13372_v31, 6  ;;  %v13444_v19 = vrot.slane %v13373_v45, 5 }
 0x535   : > { %14918 = vmatmul.mubr.msk.bf16.gmra.mrb[36].mxu1 %vm6888_vm15, %v12770_v2  ;;  %v13446_v22 = vrot.slane %v13374_v12, 4  ;;  %v13429_v27 = vsel %vm6769_vm3, %v13428_v36, %v13427_v29  ;;  %v13448_v14 = vrot.slane %v13375_v52, 3  ;;  %v13450_v23 = vrot.slane %v13376_v46, 2 }
 0x536   : > { %v13441_v47 = vsel %vm6766_vm13, %v13440_v17, %v13370_v56  ;;  %v13431_v63 = vsel %vm6772_vm11, %v13430_v18, %v13429_v27  ;;  %v13452_v61 = vrot.slane %v13377_v37, 1  ;;  %v12965_v2 = vrot.slane %v20809_v5, %v20850_v28 }
 0x537   : > { %v13443_v58 = vsel %vm6769_vm3, %v13442_v42, %v13441_v47  ;;  %v13433_v7 = vsel %vm6775_vm4, %v13432_v34, %v13431_v63  ;;  %v12972_v26 = vrot.slane %v12958_v44, %v20850_v28  ;;  %v12982_v39 = vrot.slane %v20815_v33, %v20850_v28 }
 0x538   : > { %v13445_v54 = vsel %vm6772_vm11, %v13444_v19, %v13443_v58  ;;  %v13435_v9 = vsel %vm6778_vm8, %v13434_v3, %v13433_v7  ;;  %v12973_v59 = vcombine.high %v12965_v2, %v12965_v2  ;;  %v12989_v30 = vrot.slane %v12975_v4, %v20850_v28 }
 0x539   : > { %v13447_v57 = vsel %vm6775_vm4, %v13446_v22, %v13445_v54  ;;  %v13437_v41 = vsel %vm6781_vm1, %v13436_v24, %v13435_v9  ;;  %v12974_v40 = vcombine.high %v12972_v26, %v12972_v26  ;;  %v12990_v5 = vcombine.high %v12982_v39, %v12982_v39 }
 0x53a   : > { %v13449_v53 = vsel %vm6778_vm8, %v13448_v14, %v13447_v57  ;;  %v13439_v44 = vsel %vm6784_vm10, %v13438_v60, %v13437_v41  ;;  %v12991_v55 = vcombine.high %v12989_v30, %v12989_v30  ;;  %v12999_v31 = vrot.slane %v20820_v62, %v20850_v28 }
 0x53b   : > { %v13451_v56 = vsel %vm6781_vm1, %v13450_v23, %v13449_v53  ;;  %v13006_v33 = vrot.slane %v12992_v38, %v20850_v28  ;;  %v13016_v4 = vrot.slane %v20829_v51, %v20850_v28  ;;  %v13023_v12 = vrot.slane %v13009_v13, %v20850_v28 }
 0x53c   : > { %v13453_v45 = vsel %vm6784_vm10, %v13452_v61, %v13451_v56  ;;  %v13007_v46 = vcombine.high %v12999_v31, %v12999_v31  ;;  %v13242_v37 = vpack.c.bf16 %v12965_v2, %v12965_v2  ;;  %v13243_v43 = vpack.c.bf16 %v12973_v59, %v12973_v59 }
 0x53d   : > { %v13538_v52 = vpack.c.b16 %v13453_v45, %v13439_v44  ;;  %v13008_v36 = vcombine.high %v13006_v33, %v13006_v33  ;;  %v13024_v18 = vcombine.high %v13016_v4, %v13016_v4  ;;  %v13025_v34 = vcombine.high %v13023_v12, %v13023_v12 }
 0x53e   : > { %v13244_v3 = vpack.c.bf16 %v12972_v26, %v12972_v26  ;;  %v13245_v62 = vpack.c.bf16 %v12974_v40, %v12974_v40  ;;  %v13246_v38 = vpack.c.bf16 %v12982_v39, %v12982_v39  ;;  %v13247_v24 = vpack.c.bf16 %v12990_v5, %v12990_v5 }
 0x53f   : > { %14923 = vmatprep.mubr.msk.bf16.mxu1 %vm1795_vm9, %v13538_v52  ;;  %v13248_v60 = vpack.c.bf16 %v12989_v30, %v12989_v30  ;;  %v13249_v17 = vpack.c.bf16 %v12991_v55, %v12991_v55  ;;  %v13250_v29 = vpack.c.bf16 %v12999_v31, %v12999_v31  ;;  %v13251_v42 = vpack.c.bf16 %v13007_v46, %v13007_v46 }
 0x540   : > { %v13252_v19 = vpack.c.bf16 %v13006_v33, %v13006_v33  ;;  %v13253_v51 = vpack.c.bf16 %v13008_v36, %v13008_v36  ;;  %v13254_v13 = vpack.c.bf16 %v13016_v4, %v13016_v4  ;;  %v13255_v22 = vpack.c.bf16 %v13024_v18, %v13024_v18 }
 0x541   : > { %v13256_v27 = vpack.c.bf16 %v13023_v12, %v13023_v12  ;;  %v13257_v47 = vpack.c.bf16 %v13025_v34, %v13025_v34  ;;  %v13378_v14 = vunpack.c.l.b16 %v13242_v37  ;;  %v13379_v23 = vunpack.c.l.b16 %v13243_v43 }
 0x542   : > { %v13380_v63 = vunpack.c.l.b16 %v13244_v3  ;;  %v13381_v58 = vunpack.c.l.b16 %v13245_v62  ;;  %v13382_v61 = vunpack.c.l.b16 %v13246_v38  ;;  %v13383_v2 = vunpack.c.l.b16 %v13247_v24 }
 0x543   : > { %v13384_v7 = vunpack.c.l.b16 %v13248_v60  ;;  %v13385_v54 = vunpack.c.l.b16 %v13249_v17  ;;  %v13386_v26 = vunpack.c.l.b16 %v13250_v29  ;;  %v13387_v39 = vunpack.c.l.b16 %v13251_v42 }
 0x544   : > { %v13388_v9 = vunpack.c.l.b16 %v13252_v19  ;;  %v13389_v57 = vunpack.c.l.b16 %v13253_v51  ;;  %v13390_v59 = vunpack.c.l.b16 %v13254_v13  ;;  %v13391_v30 = vunpack.c.l.b16 %v13255_v22 }
 0x545   : > { %v13392_v41 = vunpack.c.l.b16 %v13256_v27  ;;  %v13393_v53 = vunpack.c.l.b16 %v13257_v47  ;;  %v13454_v40 = vrot.slane %v13379_v23, 7  ;;  %v13456_v5 = vrot.slane %v13380_v63, 6 }
 0x546   : > { %v13458_v44 = vrot.slane %v13381_v58, 5  ;;  %v13460_v56 = vrot.slane %v13382_v61, 4  ;;  %v13462_v55 = vrot.slane %v13383_v2, 3  ;;  %v13464_v31 = vrot.slane %v13384_v7, 2 }
 0x547   : > { %v13466_v45 = vrot.slane %v13385_v54, 1  ;;  %v13455_v33 = vsel %vm6766_vm13, %v13454_v40, %v13378_v14  ;;  %v13468_v4 = vrot.slane %v13387_v39, 7  ;;  %v13470_v12 = vrot.slane %v13388_v9, 6 }
 0x548   : > { %v13472_v52 = vrot.slane %v13389_v57, 5  ;;  %v13457_v46 = vsel %vm6769_vm3, %v13456_v5, %v13455_v33  ;;  %v13474_v37 = vrot.slane %v13390_v59, 4  ;;  %v13476_v43 = vrot.slane %v13391_v30, 3 }
 0x549   : > { %v13478_v36 = vrot.slane %v13392_v41, 2  ;;  %v13459_v18 = vsel %vm6772_vm11, %v13458_v44, %v13457_v46  ;;  %v13469_v34 = vsel %vm6766_vm13, %v13468_v4, %v13386_v26  ;;  %v13480_v3 = vrot.slane %v13393_v53, 1 }
 0x54a   : > { %v13033_v62 = vrot.slane %v20834_v8, %v20850_v28  ;;  %v13461_v38 = vsel %vm6775_vm4, %v13460_v56, %v13459_v18  ;;  %v13471_v24 = vsel %vm6769_vm3, %v13470_v12, %v13469_v34  ;;  %v13040_v60 = vrot.slane %v13026_v15, %v20850_v28 }
 0x54b   : > { %v13050_v17 = vrot.slane %v20839_v11, %v20850_v28  ;;  %v13463_v29 = vsel %vm6778_vm8, %v13462_v55, %v13461_v38  ;;  %v13473_v42 = vsel %vm6772_vm11, %v13472_v52, %v13471_v24  ;;  %v13057_v51 = vrot.slane %v13043_v21, %v20850_v28 }
 0x54c   : > { %v13041_v19 = vcombine.high %v13033_v62, %v13033_v62  ;;  %v13465_v13 = vsel %vm6781_vm1, %v13464_v31, %v13463_v29  ;;  %v13475_v22 = vsel %vm6775_vm4, %v13474_v37, %v13473_v42  ;;  %v13042_v27 = vcombine.high %v13040_v60, %v13040_v60 }
 0x54d   : > { %v13058_v8 = vcombine.high %v13050_v17, %v13050_v17  ;;  %v13467_v15 = vsel %vm6784_vm10, %v13466_v45, %v13465_v13  ;;  %v13477_v47 = vsel %vm6778_vm8, %v13476_v43, %v13475_v22  ;;  %v13059_v14 = vcombine.high %v13057_v51, %v13057_v51 }
 0x54e   : > { %v13067_v23 = vrot.slane %v20853_v48, %v20850_v28  ;;  %v13479_v63 = vsel %vm6781_vm1, %v13478_v36, %v13477_v47  ;;  %v13074_v11 = vrot.slane %v13060_v0, %v20850_v28  ;;  %v13084_v21 = vrot.slane %v20858_v1, %v20850_v28 }
 0x54f   : > { %v13091_v58 = vrot.slane %v13077_v10, %v20850_v28  ;;  %v13481_v61 = vsel %vm6784_vm10, %v13480_v3, %v13479_v63  ;;  %v13258_v7 = vpack.c.bf16 %v13033_v62, %v13033_v62  ;;  %v13259_v54 = vpack.c.bf16 %v13041_v19, %v13041_v19 }
 0x550   : > { %v13075_v2 = vcombine.high %v13067_v23, %v13067_v23  ;;  %v13539_v26 = vpack.c.b16 %v13481_v61, %v13467_v15  ;;  %v13076_v39 = vcombine.high %v13074_v11, %v13074_v11  ;;  %v13092_v9 = vcombine.high %v13084_v21, %v13084_v21 }
 0x551   : > { %v13093_v57 = vcombine.high %v13091_v58, %v13091_v58  ;;  %v13260_v59 = vpack.c.bf16 %v13040_v60, %v13040_v60  ;;  %v13261_v48 = vpack.c.bf16 %v13042_v27, %v13042_v27  ;;  %v13262_v0 = vpack.c.bf16 %v13050_v17, %v13050_v17 }
 0x552   : > { %v13263_v30 = vpack.c.bf16 %v13058_v8, %v13058_v8  ;;  %14924 = vmatmul.mubr.msk.bf16.vlgmr.msra.gmra.mrb[32].mxu1 %vm1795_vm9, %v13539_v26  ;;  %v13264_v41 = vpack.c.bf16 %v13057_v51, %v13057_v51  ;;  %v13265_v53 = vpack.c.bf16 %v13059_v14, %v13059_v14  ;;  %v13266_v40 = vpack.c.bf16 %v13067_v23, %v13067_v23 }
 0x553   : > { %v13267_v1 = vpack.c.bf16 %v13075_v2, %v13075_v2  ;;  %v13268_v10 = vpack.c.bf16 %v13074_v11, %v13074_v11  ;;  %v13269_v5 = vpack.c.bf16 %v13076_v39, %v13076_v39  ;;  %v13270_v44 = vpack.c.bf16 %v13084_v21, %v13084_v21 }
 0x554   : > { %v13271_v56 = vpack.c.bf16 %v13092_v9, %v13092_v9  ;;  %v13272_v55 = vpack.c.bf16 %v13091_v58, %v13091_v58  ;;  %v13273_v31 = vpack.c.bf16 %v13093_v57, %v13093_v57  ;;  %v13394_v45 = vunpack.c.l.b16 %v13258_v7 }
 0x555   : > { %v13395_v33 = vunpack.c.l.b16 %v13259_v54  ;;  %v13396_v4 = vunpack.c.l.b16 %v13260_v59  ;;  %v13397_v12 = vunpack.c.l.b16 %v13261_v48  ;;  %v13398_v52 = vunpack.c.l.b16 %v13262_v0 }
 0x556   : > { %v13399_v46 = vunpack.c.l.b16 %v13263_v30  ;;  %v13400_v37 = vunpack.c.l.b16 %v13264_v41  ;;  %v13401_v43 = vunpack.c.l.b16 %v13265_v53  ;;  %v13402_v36 = vunpack.c.l.b16 %v13266_v40 }
 0x557   : > { %v13403_v18 = vunpack.c.l.b16 %v13267_v1  ;;  %v13404_v34 = vunpack.c.l.b16 %v13268_v10  ;;  %v13405_v3 = vunpack.c.l.b16 %v13269_v5  ;;  %v13406_v62 = vunpack.c.l.b16 %v13270_v44 }
 0x558   : > { %v13407_v38 = vunpack.c.l.b16 %v13271_v56  ;;  %v13408_v24 = vunpack.c.l.b16 %v13272_v55  ;;  %v13409_v60 = vunpack.c.l.b16 %v13273_v31  ;;  %v13482_v17 = vrot.slane %v13395_v33, 7 }
 0x559   : > { %v13484_v29 = vrot.slane %v13396_v4, 6  ;;  %v13486_v42 = vrot.slane %v13397_v12, 5  ;;  %v13488_v19 = vrot.slane %v13398_v52, 4  ;;  %v13490_v51 = vrot.slane %v13399_v46, 3 }
 0x55a   : > { %v13492_v13 = vrot.slane %v13400_v37, 2  ;;  %v13483_v22 = vsel %vm6766_vm13, %v13482_v17, %v13394_v45  ;;  %v13494_v27 = vrot.slane %v13401_v43, 1  ;;  %v13496_v8 = vrot.slane %v13403_v18, 7 }
 0x55b   : > { %v13498_v15 = vrot.slane %v13404_v34, 6  ;;  %v13485_v47 = vsel %vm6769_vm3, %v13484_v29, %v13483_v22  ;;  %v13500_v14 = vrot.slane %v13405_v3, 5  ;;  %v13502_v23 = vrot.slane %v13406_v62, 4 }
 0x55c   : > { %v13504_v63 = vrot.slane %v13407_v38, 3  ;;  %v13487_v11 = vsel %vm6772_vm11, %v13486_v42, %v13485_v47  ;;  %v13497_v21 = vsel %vm6766_vm13, %v13496_v8, %v13402_v36  ;;  %v13506_v58 = vrot.slane %v13408_v24, 2 }
 0x55d   : > { %v13508_v61 = vrot.slane %v13409_v60, 1  ;;  %v13489_v2 = vsel %vm6775_vm4, %v13488_v19, %v13487_v11  ;;  %v13499_v7 = vsel %vm6769_vm3, %v13498_v15, %v13497_v21  ;;  %v13101_v54 = vrot.slane %v20863_v49, %v20850_v28 }
 0x55e   : > { %v13108_v26 = vrot.slane %v13094_v35, %v20850_v28  ;;  %v13491_v39 = vsel %vm6778_vm8, %v13490_v51, %v13489_v2  ;;  %v13501_v9 = vsel %vm6772_vm11, %v13500_v14, %v13499_v7  ;;  %v13118_v57 = vrot.slane %v20868_v25, %v20850_v28 }
 0x55f   : > { %v13125_v59 = vrot.slane %v13111_v6, %v20850_v28  ;;  %v13493_v48 = vsel %vm6781_vm1, %v13492_v13, %v13491_v39  ;;  %v13503_v0 = vsel %vm6775_vm4, %v13502_v23, %v13501_v9  ;;  %v13109_v30 = vcombine.high %v13101_v54, %v13101_v54 }
 0x560   : > { %v13110_v41 = vcombine.high %v13108_v26, %v13108_v26  ;;  %v13495_v49 = vsel %vm6784_vm10, %v13494_v27, %v13493_v48  ;;  %v13505_v35 = vsel %vm6778_vm8, %v13504_v63, %v13503_v0  ;;  %v13126_v53 = vcombine.high %v13118_v57, %v13118_v57 }
 0x561   : > { %v13127_v40 = vcombine.high %v13125_v59, %v13125_v59  ;;  %v13507_v1 = vsel %vm6781_vm1, %v13506_v58, %v13505_v35  ;;  %v13135_v10 = vrot.slane %v20873_v32, %v20850_v28  ;;  %v13142_v25 = vrot.slane %v13128_v50, %v20850_v28 }
 0x562   : > { %v13152_v6 = vrot.slane %v20878_v16, %v20850_v28  ;;  %v13509_v5 = vsel %vm6784_vm10, %v13508_v61, %v13507_v1  ;;  %v13159_v44 = vrot.slane %v13145_v20, %v20850_v28  ;;  %v13275_v56 = vpack.c.bf16 %v13109_v30, %v13109_v30 }
 0x563   : > { %v13540_v55 = vpack.c.b16 %v13509_v5, %v13495_v49  ;;  %v13143_v31 = vcombine.high %v13135_v10, %v13135_v10  ;;  %v13144_v45 = vcombine.high %v13142_v25, %v13142_v25  ;;  %v13276_v12 = vpack.c.bf16 %v13108_v26, %v13108_v26 }
 0x564   : > { %v13160_v33 = vcombine.high %v13152_v6, %v13152_v6  ;;  %v13161_v4 = vcombine.high %v13159_v44, %v13159_v44  ;;  %v13277_v52 = vpack.c.bf16 %v13110_v41, %v13110_v41  ;;  %v13278_v32 = vpack.c.bf16 %v13118_v57, %v13118_v57 }
 0x565   : > { %14927 = vmatprep.mubr.msk.bf16.mxu1 %vm1795_vm9, %v13540_v55  ;;  %v13274_v50 = vpack.c.bf16 %v13101_v54, %v13101_v54  ;;  %v13279_v46 = vpack.c.bf16 %v13126_v53, %v13126_v53  ;;  %v13280_v37 = vpack.c.bf16 %v13125_v59, %v13125_v59  ;;  %v13281_v43 = vpack.c.bf16 %v13127_v40, %v13127_v40 }
 0x566   : > { %v13283_v36 = vpack.c.bf16 %v13143_v31, %v13143_v31  ;;  %v13284_v18 = vpack.c.bf16 %v13142_v25, %v13142_v25  ;;  %v13285_v34 = vpack.c.bf16 %v13144_v45, %v13144_v45  ;;  %v13286_v16 = vpack.c.bf16 %v13152_v6, %v13152_v6  ;;  %v14245_v31 = vld [vmem:[%s21111_s8] ss:$0 sm:$0xff] }
 0x567   : > { %v13282_v28 = vpack.c.bf16 %v13135_v10, %v13135_v10  ;;  %v13287_v20 = vpack.c.bf16 %v13160_v33, %v13160_v33  ;;  %v13288_v3 = vpack.c.bf16 %v13159_v44, %v13159_v44  ;;  %v13289_v62 = vpack.c.bf16 %v13161_v4, %v13161_v4  ;;  %v14246_v45 = vld [vmem:[%s21113_s10] ss:$0 sm:$0xff] }
 0x568   : > { %v13411_v38 = vunpack.c.l.b16 %v13275_v56  ;;  %v13412_v24 = vunpack.c.l.b16 %v13276_v12  ;;  %v13413_v60 = vunpack.c.l.b16 %v13277_v52  ;;  %v13414_v17 = vunpack.c.l.b16 %v13278_v32 }
 0x569   : > { %v13410_v29 = vunpack.c.l.b16 %v13274_v50  ;;  %v13415_v42 = vunpack.c.l.b16 %v13279_v46  ;;  %v13416_v19 = vunpack.c.l.b16 %v13280_v37  ;;  %v13417_v51 = vunpack.c.l.b16 %v13281_v43 }
 0x56a   : > { %v13419_v13 = vunpack.c.l.b16 %v13283_v36  ;;  %v13420_v22 = vunpack.c.l.b16 %v13284_v18  ;;  %v13421_v27 = vunpack.c.l.b16 %v13285_v34  ;;  %v13422_v8 = vunpack.c.l.b16 %v13286_v16 }
 0x56b   : > { %v13418_v15 = vunpack.c.l.b16 %v13282_v28  ;;  %v13423_v47 = vunpack.c.l.b16 %v13287_v20  ;;  %v13424_v14 = vunpack.c.l.b16 %v13288_v3  ;;  %v13510_v23 = vrot.slane %v13411_v38, 7 }
 0x56c   : > { %v13425_v63 = vunpack.c.l.b16 %v13289_v62  ;;  %v13512_v11 = vrot.slane %v13412_v24, 6  ;;  %v13514_v21 = vrot.slane %v13413_v60, 5  ;;  %v13516_v58 = vrot.slane %v13414_v17, 4 }
 0x56d   : > { %v13511_v61 = vsel %vm6766_vm13, %v13510_v23, %v13410_v29  ;;  %v13518_v2 = vrot.slane %v13415_v42, 3  ;;  %v13520_v7 = vrot.slane %v13416_v19, 2  ;;  %v13524_v54 = vrot.slane %v13419_v13, 7 }
 0x56e   : > { %v13513_v26 = vsel %vm6769_vm3, %v13512_v11, %v13511_v61  ;;  %v13526_v39 = vrot.slane %v13420_v22, 6  ;;  %v13528_v9 = vrot.slane %v13421_v27, 5  ;;  %v13530_v57 = vrot.slane %v13422_v8, 4 }
 0x56f   : > { %v13515_v59 = vsel %vm6772_vm11, %v13514_v21, %v13513_v26  ;;  %v13522_v48 = vrot.slane %v13417_v51, 1  ;;  %v13525_v0 = vsel %vm6766_vm13, %v13524_v54, %v13418_v15  ;;  %v13532_v30 = vrot.slane %v13423_v47, 3 }
 0x570   : > { %v13517_v41 = vsel %vm6775_vm4, %v13516_v58, %v13515_v59  ;;  %v13527_v49 = vsel %vm6769_vm3, %v13526_v39, %v13525_v0  ;;  %v13534_v35 = vrot.slane %v13424_v14, 2  ;;  %v13536_v1 = vrot.slane %v13425_v63, 1 }
 0x571   : > { %v13519_v53 = vsel %vm6778_vm8, %v13518_v2, %v13517_v41  ;;  %v13529_v40 = vsel %vm6772_vm11, %v13528_v9, %v13527_v49  ;;  %v14971_v33 = vadd.f32 %v14246_v45, %v14245_v31 }
 0x572   : > { %v13521_v10 = vsel %vm6781_vm1, %v13520_v7, %v13519_v53  ;;  %v13531_v25 = vsel %vm6775_vm4, %v13530_v57, %v13529_v40 }
 0x573   : > { %v13523_v6 = vsel %vm6784_vm10, %v13522_v48, %v13521_v10  ;;  %v13533_v5 = vsel %vm6778_vm8, %v13532_v30, %v13531_v25 }
 0x574   : > { %v13535_v44 = vsel %vm6781_vm1, %v13534_v35, %v13533_v5 }
 0x575   : > { %v13537_v56 = vsel %vm6784_vm10, %v13536_v1, %v13535_v44 }
 0x576   : > { %v13541_v55 = vpack.c.b16 %v13537_v56, %v13523_v6 }
 0x578   : > { %14928 = vmatmul.mubr.msk.bf16.gmra.mrb[36].mxu1 %vm1795_vm9, %v13541_v55 }
 0x625   : > { %v14925_v4 = vpop.f32.mrb[32].mxu1 }
 0x626   : > { %v14965_v12 = vadd.f32 %v14925_v4, %v14245_v31  ;;  %v13591_v52 = vpop.f32.mrb[33].mxu1 }
 0x627   : > { %v14967_v32 = vadd.f32 %v14245_v31, %v13591_v52  ;;  %v14926_v50 = vpop.f32.mrb[34].mxu1 }
 0x628   : > { %v14966_v46 = vadd.f32 %v14965_v12, %v14246_v45  ;;  %v14970_v37 = vadd.f32 %v14971_v33, %v14926_v50  ;;  %v13594_v43 = vpop.f32.mrb[35].mxu1 }
 0x629   : > { %v14968_v36 = vadd.f32 %v14967_v32, %v14246_v45  ;;  %v14972_v18 = vadd.f32 %v14971_v33, %v13594_v43 }
 0x62a   : > { %13632 = vst.msk [vmem:[%s379_s30 + $0x10] sm:$0xff] %vm6888_vm15, %v14966_v46  ;;  %13633 = vst.msk [vmem:[%s379_s30 + $0x18] sm:$0xff] %vm6888_vm15, %v14970_v37 }
 0x62b   : > { %13630 = vst.msk [vmem:[%s379_s30] sm:$0xff] %vm6888_vm15, %v14968_v36  ;;  %13631 = vst.msk [vmem:[%s379_s30 + $0x8] sm:$0xff] %vm6888_vm15, %v14972_v18 }
 0x64b   : > { %v14929_v34 = vpop.f32.mrb[36].mxu1 }
 0x64c   : > { %v14974_v16 = vadd.f32 %v14971_v33, %v14929_v34  ;;  %v13607_v28 = vpop.f32.mrb[37].mxu1 }
 0x64d   : > { %v14976_v20 = vadd.f32 %v14971_v33, %v13607_v28  ;;  %v14930_v3 = vpop.f32.mrb[38].mxu1 }
 0x64e   : > { %13636 = vst.msk [vmem:[%s379_s30 + $0x30] sm:$0xff] %vm6888_vm15, %v14974_v16  ;;  %v14978_v62 = vadd.f32 %v14971_v33, %v14930_v3  ;;  %v13610_v38 = vpop.f32.mrb[39].mxu1 }
 0x64f   : > { %13634 = vst.msk [vmem:[%s379_s30 + $0x20] sm:$0xff] %vm6888_vm15, %v14976_v20  ;;  %v14980_v24 = vadd.f32 %v14971_v33, %v13610_v38 }
 0x650   : > { %13637 = vst.msk [vmem:[%s379_s30 + $0x38] sm:$0xff] %vm6888_vm15, %v14978_v62 }
 0x651   : > { %13635 = vst.msk [vmem:[%s379_s30 + $0x28] sm:$0xff] %vm6888_vm15, %v14980_v24 }
 0x652   : > { %15416 = shalt.err (!%p15413_p3)
}
 0x653   : > { %s15417_s24 = scalar_lea.hbm %s21053_s16, 1024  ;;  %s15421_s15 = scalar_lea.hbm %s21114_s11, 2048 }
 0x654   : > { %p15418_p4 = scmp.ne.s32.totalorder %s21053_s16, %s15417_s24  ;;  %p15422_p9 = scmp.lt.u32.totalorder %s21053_s16, %s21114_s11 }
 0x655   : > { %p15423_p10 = scmp.lt.u32.totalorder %s15421_s15, %s15417_s24  ;;  %p15425_p12 = scmp.lt.u32.totalorder %s15417_s24, %s21053_s16 }
 0x656   : > { %p15419_p7 = pnand %p15418_p4, %p15571_p5 }
 0x657   : > { %p15424_p11 = por %p15423_p10, %p15422_p9 }
 0x658   : > { %p15420_p8 = pneg %p15419_p7 }
 0x659   : > { %p15426_p13 = por %p15425_p12, %p15424_p11 }
 0x65b   : > { %p15427_p0 = pnand %p15426_p13, %p15420_p8 }
 0x65d   : > { %15430 = shalt.err (!%p15427_p0)
}
 0x65e   : > { %s15471_s22 = smov 128   ;;  %s15472_s12 = smov 8  }
 0x65f   : > { %15297 = dma.vmem_to_hbm [thread:$0]  (%p15571_p5), %s21055_s13, 1024, %s21053_s16, %s21062_s21, %s15471_s22, %s15471_s22, %s15472_s12  }
 0x660 PF: > { %p15303_p1 = scmp.ge.s32.totalorder %s15465_s20, 2  ;;  %s13667_s30 = sand.u32 1, %s15453_s17  }
 0x661   : > { %s13668_s24 = scalar_lea.sflag [#allocation5], %s13667_s30 }
 0x662   : > { %p15300_p2 = pnand %p15303_p1, %p15575_p6 }
 0x664   : > { %15448 = dma.done.wait (!%p15300_p2), %s13668_s24, 1024  }
 0x665   : > { %15450 = vsyncadd (!%p15300_p2), %s13668_s24, 4294966272  ;;  %p21_p3 = scmp.ge.s32.totalorder %s15558_s23, 4   ;;  %s22033_s17 = smov %s15457_s18 }
 0x666   : > { %s22034_s18 = smov %s15461_s19  ;;  %s22035_s19 = smov %s15569_s26 }
 0x667   : > { %s22036_s20 = smov %s15558_s23  ;;  %23 = sbr.rel (!%p21_p3) target bundleno = 3 (0x3), region = 119 }
 0x66e   :  { %13673 = vsyncpa [#allocation5], 1 }
 0x66f   :  { %13675 = vsyncpa [#allocation5 + $0x1], 1 }

</bundles_post_ra>
